<compile_context>
chip_gen: v6e
topology: v6e:2x2x1
jax: 0.10.0
libtpu: 0.0.40
codegen_flags: <defaults>
</compile_context>

<pallas_src>
import functools

import jax
import jax.numpy as jnp
from jax import lax
from jax.experimental import pallas as pl
from jax.experimental.pallas import tpu as pltpu

EMB_DIM = 100     # embedding_dim
HID = 75          # GRU hidden_size (per direction)
ATT_HID = 64      # attention projection hidden
INTENT = 38       # intent_size

HP = 128          # hidden padded to a full 128-lane vreg per direction
H2 = 2 * HP       # stacked [fwd | bwd] hidden width (256)
KP = 256          # padded K for the hoisted input matmul (2*EMB_DIM -> 256)
AP = 128          # padded attention projection width (64 -> 128)
LP = 128          # slot logits padded lane width
IP = 128          # intent logits padded lane width


def _slot_intent_kernel(
    S,
    # inputs (all VMEM, padded / pre-blocked in the wrapper)
    xin_ref, wgi_ref, bgi_ref, whh_ref, bhn_ref,
    wp1_ref, bp1_ref, wp2_ref, bp2_ref,
    wfcW_ref, bfcW_ref, wfcv_ref, bfcv_ref,
    wfc_ref, bfc_ref, wint_ref, bint_ref,
    # outputs
    slot_ref, intent_ref,
    # scratch
    gi_scr, out_scr,
):
    # ---- 1) input->hidden gate pre-activations for BOTH directions, hoisted
    #         out of the recurrence as one (S, KP) x (KP, 3*H2) matmul.
    #         Column layout: [r: fwd|bwd, z: fwd|bwd, n: fwd|bwd], each
    #         direction padded to 128 lanes.  bgi already contains the folded
    #         r/z hidden biases (exact; they are purely additive).
    gi_scr[...] = (jnp.dot(xin_ref[...], wgi_ref[...],
                           preferred_element_type=jnp.float32) + bgi_ref[...])
    # TODO(synk): F.dropout(p=0.2) skipped (eval-mode semantics); a training
    # path would use pltpu.prng_seed + pltpu.prng_random_bits for a keep mask.

    Whh = whh_ref[...]          # (H2, 3*H2)  fused [Whr|Whz|Whn], block-diag
    Bhn = bhn_ref[...]          # (1, H2)     n-gate hidden bias (NOT foldable)

    # ---- 2) fused fwd+bwd GRU recurrence.  h = [h_fwd(128) | h_bwd(128)];
    #         one (1,H2)x(H2,3*H2) matmul per step, sliced into r/z/n.  Padded
    #         lanes stay exactly 0 (zero weights/biases/initial state).
    def step(t, h):
        gh = jnp.dot(h, Whh, preferred_element_type=jnp.float32)   # (1, 3*H2)
        gi = gi_scr[pl.ds(t, 1), :]                                # (1, 3*H2)
        r = jax.nn.sigmoid(gi[:, 0:H2] + gh[:, 0:H2])
        z = jax.nn.sigmoid(gi[:, H2:2 * H2] + gh[:, H2:2 * H2])
        n = jnp.tanh(gi[:, 2 * H2:3 * H2] + r * (gh[:, 2 * H2:3 * H2] + Bhn))
        h = (1.0 - z) * n + z * h
        out_scr[pl.ds(t, 1), 0:HP] = h[:, 0:HP]             # fwd -> row t
        out_scr[pl.ds(S - 1 - t, 1), HP:H2] = h[:, HP:H2]   # bwd -> row S-1-t
        return h

    h0 = jnp.zeros((1, H2), jnp.float32)
    if S <= 64:
        # Small static S: full unroll (static, lane-aligned loads/stores; LLO
        # schedules across iterations).
        h_fin = h0
        for t in range(S):
            h_fin = step(t, h_fin)
    else:
        # Long sequences: bounded code size, keep LLO visibility via unroll.
        h_fin = lax.fori_loop(0, S, step, h0, unroll=8)

    outputs = out_scr[...]                                  # (S, H2), pads == 0

    # ---- 3) attention: Linear -> ReLU -> Linear(->1 via VPU) -> softmax(seq)
    #         Projection padded to 128 lanes; zero columns contribute 0.
    hid1 = jnp.maximum(jnp.dot(outputs, wp1_ref[...],
                               preferred_element_type=jnp.float32)
                       + bp1_ref[...], 0.0)                 # (S, AP)
    energy = (jnp.sum(hid1 * wp2_ref[...], axis=-1, keepdims=True)
              + bp2_ref[...])                               # (S, 1)
    m = jnp.max(energy, axis=0, keepdims=True)
    p = jnp.exp(energy - m)
    inv_denom = pl.reciprocal(jnp.sum(p, axis=0, keepdims=True), approx=True)
    wts = p * inv_denom                                     # (S, 1)
    att = jnp.sum(outputs * wts, axis=0, keepdims=True)     # (1, H2)

    # ---- 4) gate = tanh(sum(fc_v(tanh(fc_W(att) + outputs)))) ----
    g1 = jnp.tanh(jnp.dot(att, wfcW_ref[...],
                          preferred_element_type=jnp.float32)
                  + bfcW_ref[...] + outputs)                # (S, H2)
    g2 = jnp.sum(g1 * wfcv_ref[...], axis=-1, keepdims=True) + bfcv_ref[...]
    gate = jnp.tanh(jnp.sum(g2, axis=(0, 1), keepdims=True))  # (1, 1)

    # ---- 5) slot head (lane-dense padded output) ----
    slot_ref[...] = (jnp.dot(outputs + outputs * gate, wfc_ref[...],
                             preferred_element_type=jnp.float32) + bfc_ref[...])

    # ---- 6) intent head: fc_intent(h_n.view(1,-1) + att) ----
    intent_ref[...] = (jnp.dot(h_fin + att, wint_ref[...],
                               preferred_element_type=jnp.float32)
                       + bint_ref[...])


def pack_params(params):
    """Repack torch-layout params into padded, lane-aligned kernel tensors.

    Call once per model (make_forward caches the result)."""
    (emb, wih_f, whh_f, bih_f, bhh_f, wih_b, whh_b, bih_b, bhh_b,
     wp1, bp1, wp2, bp2, wfc, bfc, wfcW, bfcW, wfcv, bfcv, wint, bint) = params
    del emb
    H, E = HID, EMB_DIM
    f32 = jnp.float32

    # Combined input->gates weight / bias:  (KP, 3*H2) / (1, 3*H2).
    # Gate order [r, z, n] (matches torch.nn.GRU); per gate: fwd | bwd lanes.
    wgi = jnp.zeros((KP, 3 * H2), f32)
    bgi = jnp.zeros((1, 3 * H2), f32)
    for g in range(3):
        wgi = wgi.at[0:E, g * H2:g * H2 + H].set(wih_f[:, g * H:(g + 1) * H])
        wgi = wgi.at[E:2 * E, g * H2 + HP:g * H2 + HP + H].set(
            wih_b[:, g * H:(g + 1) * H])
        bgi = bgi.at[:, g * H2:g * H2 + H].set(bih_f[:, g * H:(g + 1) * H])
        bgi = bgi.at[:, g * H2 + HP:g * H2 + HP + H].set(
            bih_b[:, g * H:(g + 1) * H])
    # Fold the r- and z-gate hidden biases into bgi (purely additive, exact).
    # bhn must stay separate: it is multiplied by r inside the n gate.
    for g in range(2):
        bgi = bgi.at[:, g * H2:g * H2 + H].add(bhh_f[:, g * H:(g + 1) * H])
        bgi = bgi.at[:, g * H2 + HP:g * H2 + HP + H].add(
            bhh_b[:, g * H:(g + 1) * H])

    # Fused hidden->hidden weight (H2, 3*H2): [Whr|Whz|Whn], each gate
    # block-diagonal across the fwd/bwd 128-lane halves.
    whh = jnp.zeros((H2, 3 * H2), f32)
    for g in range(3):
        whh = whh.at[0:H, g * H2:g * H2 + H].set(whh_f[:, g * H:(g + 1) * H])
        whh = whh.at[HP:HP + H, g * H2 + HP:g * H2 + HP + H].set(
            whh_b[:, g * H:(g + 1) * H])
    bhn = jnp.zeros((1, H2), f32)
    bhn = bhn.at[:, 0:H].set(bhh_f[:, 2 * H:3 * H])
    bhn = bhn.at[:, HP:HP + H].set(bhh_b[:, 2 * H:3 * H])

    def pad_rows(m):                       # (2H, C) -> (H2, C)
        out = jnp.zeros((H2, m.shape[1]), f32)
        return out.at[0:H, :].set(m[0:H]).at[HP:HP + H, :].set(m[H:2 * H])

    def pad_lanes(v):                      # (R, 2H) -> (R, H2)
        out = jnp.zeros((v.shape[0], H2), f32)
        return out.at[:, 0:H].set(v[:, 0:H]).at[:, HP:HP + H].set(v[:, H:2 * H])

    def pad_cols(m, cp):                   # (R, C) -> (R, cp)
        out = jnp.zeros((m.shape[0], cp), f32)
        return out.at[:, 0:m.shape[1]].set(m)

    wp1p = pad_cols(pad_rows(wp1), AP)     # (H2, AP)
    bp1p = pad_cols(bp1, AP)               # (1, AP)
    wp2r = pad_cols(wp2.T, AP)             # (1, AP)  -> VPU dot
    wfcWp = pad_lanes(pad_rows(wfcW))      # (H2, H2)
    bfcWp = pad_lanes(bfcW)                # (1, H2)
    wfcvr = pad_lanes(wfcv.T)              # (1, H2)  -> VPU dot
    wfcp = pad_cols(pad_rows(wfc), LP)     # (H2, LP)
    bfcp = pad_cols(bfc, LP)               # (1, LP)
    wintp = pad_cols(pad_rows(wint), IP)   # (H2, IP)
    bintp = pad_cols(bint, IP)             # (1, IP)

    return (wgi, bgi, whh, bhn,
            wp1p, bp1p, wp2r, bp2, wfcWp, bfcWp, wfcvr, bfcv,
            wfcp, bfcp, wintp, bintp)


def _forward_impl(X, emb, packed, label_size):
    S = X.shape[1]
    # Embedding gather done by XLA outside the kernel (keeps the vocab table
    # out of VMEM).  Row t of xin = [embed[t], embed[S-1-t], 0-pad] feeds both
    # GRU directions of the fused recurrence; K padded to 256 for a clean MXU K.
    e = jnp.take(emb, X[0], axis=0)                    # (S, E)
    xin = jnp.concatenate([e, e[::-1]], axis=-1)       # (S, 2E)
    xin = jnp.pad(xin, ((0, 0), (0, KP - 2 * EMB_DIM)))  # (S, KP)

    kernel = functools.partial(_slot_intent_kernel, S)
    slot_p, intent_p = pl.pallas_call(
        kernel,
        out_shape=(jax.ShapeDtypeStruct((S, LP), jnp.float32),
                   jax.ShapeDtypeStruct((1, IP), jnp.float32)),
        in_specs=[pl.BlockSpec(memory_space=pltpu.MemorySpace.VMEM)]
                 * (1 + len(packed)),
        out_specs=(pl.BlockSpec(memory_space=pltpu.MemorySpace.VMEM),
                   pl.BlockSpec(memory_space=pltpu.MemorySpace.VMEM)),
        scratch_shapes=[pltpu.VMEM((S, 3 * H2), jnp.float32),   # gi_scr
                        pltpu.VMEM((S, H2), jnp.float32)],      # out_scr
    )(xin, *packed)
    slot = slot_p[:, :label_size].reshape(1, S, label_size)
    intent = intent_p[:, :INTENT]
    return slot, intent


def make_forward(params, label_size):
    """Pack params ONCE and return a jitted forward: X -> (slot, intent)."""
    assert label_size <= LP, "label_size must be <= 128 (padded slot head)"
    assert INTENT <= IP, "intent_size must be <= 128 (padded intent head)"
    emb = params[0]
    packed = pack_params(params)

    @jax.jit
    def fwd(X):
        assert X.shape[0] == 1, "kernel assumes batch == 1 (PyTorch broadcast)"
        return _forward_impl(X, emb, packed, label_size)

    return fwd


def slot_intent_forward(X, params, label_size):
    # Convenience one-shot wrapper; prefer make_forward() to cache packing.
    return make_forward(params, label_size)(X)


def init_params(key, vocab_size, label_size):
    ks = iter(jax.random.split(key, 32))

    def w(shape, scale=0.08):
        return (scale * jax.random.normal(next(ks), shape)).astype(jnp.float32)

    emb = w((vocab_size, EMB_DIM), 0.3)
    wih_f = w((EMB_DIM, 3 * HID)); whh_f = w((HID, 3 * HID))
    bih_f = w((1, 3 * HID));       bhh_f = w((1, 3 * HID))
    wih_b = w((EMB_DIM, 3 * HID)); whh_b = w((HID, 3 * HID))
    bih_b = w((1, 3 * HID));       bhh_b = w((1, 3 * HID))
    wp1 = w((2 * HID, ATT_HID));   bp1 = w((1, ATT_HID))
    wp2 = w((ATT_HID, 1));         bp2 = w((1, 1))
    wfc = w((2 * HID, label_size)); bfc = w((1, label_size))
    wfcW = w((2 * HID, 2 * HID));  bfcW = w((1, 2 * HID))
    wfcv = w((2 * HID, 1));        bfcv = w((1, 1))
    wint = w((2 * HID, INTENT));   bint = w((1, INTENT))
    return (emb, wih_f, whh_f, bih_f, bhh_f, wih_b, whh_b, bih_b, bhh_b,
            wp1, bp1, wp2, bp2, wfc, bfc, wfcW, bfcW, wfcv, bfcv, wint, bint)


def reference_forward(X, params, label_size):
    """Pure-JAX reference mirroring the PyTorch forward (eval mode)."""
    (emb, wih_f, whh_f, bih_f, bhh_f, wih_b, whh_b, bih_b, bhh_b,
     wp1, bp1, wp2, bp2, wfc, bfc, wfcW, bfcW, wfcv, bfcv, wint, bint) = params
    S = X.shape[1]
    H = HID
    e = emb[X[0]]  # (S, E)

    def run_dir(wih, whh, bih, bhh, reverse):
        h = jnp.zeros((1, H), jnp.float32)
        outs = [None] * S
        order = range(S - 1, -1, -1) if reverse else range(S)
        for t in order:
            x = e[t:t + 1]
            gi = x @ wih + bih
            gh = h @ whh + bhh
            r = jax.nn.sigmoid(gi[:, :H] + gh[:, :H])
            z = jax.nn.sigmoid(gi[:, H:2 * H] + gh[:, H:2 * H])
            n = jnp.tanh(gi[:, 2 * H:] + r * gh[:, 2 * H:])
            h = (1.0 - z) * n + z * h
            outs[t] = h
        return jnp.concatenate(outs, axis=0), h

    of, hf = run_dir(wih_f, whh_f, bih_f, bhh_f, False)
    ob, hb = run_dir(wih_b, whh_b, bih_b, bhh_b, True)
    outputs = jnp.concatenate([of, ob], axis=-1)                    # (S, 2H)

    energy = jnp.maximum(outputs @ wp1 + bp1, 0.0) @ wp2 + bp2      # (S, 1)
    wts = jax.nn.softmax(energy[:, 0])
    att = (outputs * wts[:, None]).sum(axis=0, keepdims=True)       # (1, 2H)

    gate = jnp.tanh((jnp.tanh(att @ wfcW + bfcW + outputs) @ wfcv + bfcv).sum())
    slot = (outputs + outputs * gate) @ wfc + bfc                   # (S, L)
    intent = (jnp.concatenate([hf, hb], axis=-1) + att) @ wint + bint
    return slot.reshape(1, S, label_size), intent


if __name__ == "__main__":
    vocab_size, label_size, S = 50, 12, 8
    key = jax.random.PRNGKey(0)
    pkey, xkey = jax.random.split(key)
    params = init_params(pkey, vocab_size, label_size)
    X = jax.random.randint(xkey, (1, S), 0, vocab_size, dtype=jnp.int32)

    forward = make_forward(params, label_size)     # packs params ONCE, jitted
    slot, intent = forward(X)
    jax.block_until_ready((slot, intent))

    slot_ref, intent_ref = reference_forward(X, params, label_size)
    assert slot.shape == (1, S, label_size) and intent.shape == (1, INTENT)
    # Tolerance covers the approximate-reciprocal softmax normalization (EUP).
    assert jnp.allclose(slot, slot_ref, atol=1e-3, rtol=1e-3), "slot mismatch"
    assert jnp.allclose(intent, intent_ref, atol=1e-3, rtol=1e-3), "intent mismatch"
    print("KERNEL_OK")
</pallas_src>

<mosaic_0001>
module attributes {stable_mosaic.version = 11 : i64} {
  func.func @_slot_intent_kernel(%arg0: memref<8x256xf32, #tpu.memory_space<vmem>>, %arg1: memref<256x768xf32, #tpu.memory_space<vmem>>, %arg2: memref<1x768xf32, #tpu.memory_space<vmem>>, %arg3: memref<256x768xf32, #tpu.memory_space<vmem>>, %arg4: memref<1x256xf32, #tpu.memory_space<vmem>>, %arg5: memref<256x128xf32, #tpu.memory_space<vmem>>, %arg6: memref<1x128xf32, #tpu.memory_space<vmem>>, %arg7: memref<1x128xf32, #tpu.memory_space<vmem>>, %arg8: memref<1x1xf32, #tpu.memory_space<vmem>>, %arg9: memref<256x256xf32, #tpu.memory_space<vmem>>, %arg10: memref<1x256xf32, #tpu.memory_space<vmem>>, %arg11: memref<1x256xf32, #tpu.memory_space<vmem>>, %arg12: memref<1x1xf32, #tpu.memory_space<vmem>>, %arg13: memref<256x128xf32, #tpu.memory_space<vmem>>, %arg14: memref<1x128xf32, #tpu.memory_space<vmem>>, %arg15: memref<256x128xf32, #tpu.memory_space<vmem>>, %arg16: memref<1x128xf32, #tpu.memory_space<vmem>>, %arg17: memref<8x128xf32, #tpu.memory_space<vmem>>, %arg18: memref<1x128xf32, #tpu.memory_space<vmem>>, %arg19: memref<8x768xf32, #tpu.memory_space<vmem>>, %arg20: memref<8x256xf32, #tpu.memory_space<vmem>>) attributes {dimension_semantics = [], scalar_prefetch = 0 : i64, scratch_operands = 2 : i64, tpu.core_type = #tpu.core_type<tc>} {
    %c0 = arith.constant 0 : index
    %c0_0 = arith.constant 0 : index
    %0 = vector.load %arg0[%c0, %c0_0] : memref<8x256xf32, #tpu.memory_space<vmem>>, vector<8x256xf32>
    %c0_1 = arith.constant 0 : index
    %c0_2 = arith.constant 0 : index
    %1 = vector.load %arg1[%c0_1, %c0_2] : memref<256x768xf32, #tpu.memory_space<vmem>>, vector<256x768xf32>
    %cst = arith.constant dense<0.000000e+00> : vector<8x768xf32>
    %2 = tpu.matmul %0, %1, %cst {dimension_numbers = #tpu.dot_dimension_numbers<[1], [0], [0], [1], [0, 0, 1, 1], [], []>} : vector<8x256xf32>, vector<256x768xf32>, vector<8x768xf32> -> vector<8x768xf32>
    %c0_3 = arith.constant 0 : index
    %c0_4 = arith.constant 0 : index
    %3 = vector.load %arg2[%c0_3, %c0_4] : memref<1x768xf32, #tpu.memory_space<vmem>>, vector<1x768xf32>
    %4 = vector.broadcast %3 : vector<1x768xf32> to vector<8x768xf32>
    %5 = arith.addf %2, %4 : vector<8x768xf32>
    %c0_5 = arith.constant 0 : index
    %c0_6 = arith.constant 0 : index
    %6 = vector.load %arg19[%c0_5, %c0_6] : memref<8x768xf32, #tpu.memory_space<vmem>>, vector<8x768xf32>
    tpu.vector_store %arg19[%c0_5, %c0_6], %5 {strides = array<i32>} : memref<8x768xf32, #tpu.memory_space<vmem>>, vector<8x768xf32>,
    %c0_7 = arith.constant 0 : index
    %c0_8 = arith.constant 0 : index
    %7 = vector.load %arg3[%c0_7, %c0_8] : memref<256x768xf32, #tpu.memory_space<vmem>>, vector<256x768xf32>
    %c0_9 = arith.constant 0 : index
    %c0_10 = arith.constant 0 : index
    %8 = vector.load %arg4[%c0_9, %c0_10] : memref<1x256xf32, #tpu.memory_space<vmem>>, vector<1x256xf32>
    %cst_11 = arith.constant 0.000000e+00 : f32
    %9 = vector.broadcast %cst_11 : f32 to vector<1x256xf32>
    %cst_12 = arith.constant dense<0.000000e+00> : vector<1x768xf32>
    %10 = tpu.matmul %9, %7, %cst_12 {dimension_numbers = #tpu.dot_dimension_numbers<[1], [0], [0], [1], [0, 0, 1, 1], [], []>} : vector<1x256xf32>, vector<256x768xf32>, vector<1x768xf32> -> vector<1x768xf32>
    %c0_13 = arith.constant 0 : index
    %c0_14 = arith.constant 0 : index
    %11 = vector.load %arg19[%c0_13, %c0_14] : memref<8x768xf32, #tpu.memory_space<vmem>>, vector<1x768xf32>
    %12 = vector.extract_strided_slice %11 {offsets = [0, 0], sizes = [1, 256], strides = [1, 1]} : vector<1x768xf32> to vector<1x256xf32>
    %13 = vector.extract_strided_slice %10 {offsets = [0, 0], sizes = [1, 256], strides = [1, 1]} : vector<1x768xf32> to vector<1x256xf32>
    %14 = arith.addf %12, %13 : vector<1x256xf32>
    %15 = arith.negf %14 : vector<1x256xf32>
    %16 = math.exp %15 : vector<1x256xf32>
    %cst_15 = arith.constant 1.000000e+00 : f32
    %17 = vector.broadcast %cst_15 : f32 to vector<1x256xf32>
    %18 = arith.addf %17, %16 : vector<1x256xf32>
    %19 = arith.divf %17, %18 : vector<1x256xf32>
    %20 = vector.extract_strided_slice %11 {offsets = [0, 256], sizes = [1, 256], strides = [1, 1]} : vector<1x768xf32> to vector<1x256xf32>
    %21 = vector.extract_strided_slice %10 {offsets = [0, 256], sizes = [1, 256], strides = [1, 1]} : vector<1x768xf32> to vector<1x256xf32>
    %22 = arith.addf %20, %21 : vector<1x256xf32>
    %23 = arith.negf %22 : vector<1x256xf32>
    %24 = math.exp %23 : vector<1x256xf32>
    %cst_16 = arith.constant 1.000000e+00 : f32
    %25 = vector.broadcast %cst_16 : f32 to vector<1x256xf32>
    %26 = arith.addf %25, %24 : vector<1x256xf32>
    %27 = arith.divf %25, %26 : vector<1x256xf32>
    %28 = vector.extract_strided_slice %11 {offsets = [0, 512], sizes = [1, 256], strides = [1, 1]} : vector<1x768xf32> to vector<1x256xf32>
    %29 = vector.extract_strided_slice %10 {offsets = [0, 512], sizes = [1, 256], strides = [1, 1]} : vector<1x768xf32> to vector<1x256xf32>
    %30 = arith.addf %29, %8 : vector<1x256xf32>
    %31 = arith.mulf %19, %30 : vector<1x256xf32>
    %32 = arith.addf %28, %31 : vector<1x256xf32>
    %33 = math.tanh %32 : vector<1x256xf32>
    %cst_17 = arith.constant 1.000000e+00 : f32
    %34 = vector.broadcast %cst_17 : f32 to vector<1x256xf32>
    %35 = arith.subf %34, %27 : vector<1x256xf32>
    %36 = arith.mulf %35, %33 : vector<1x256xf32>
    %37 = arith.mulf %27, %9 : vector<1x256xf32>
    %38 = arith.addf %36, %37 : vector<1x256xf32>
    %39 = vector.extract_strided_slice %38 {offsets = [0, 0], sizes = [1, 128], strides = [1, 1]} : vector<1x256xf32> to vector<1x128xf32>
    %c0_18 = arith.constant 0 : index
    %c0_19 = arith.constant 0 : index
    %40 = vector.load %arg20[%c0_18, %c0_19] : memref<8x256xf32, #tpu.memory_space<vmem>>, vector<1x128xf32>
    tpu.vector_store %arg20[%c0_18, %c0_19], %39 {strides = array<i32>} : memref<8x256xf32, #tpu.memory_space<vmem>>, vector<1x128xf32>,
    %41 = vector.extract_strided_slice %38 {offsets = [0, 128], sizes = [1, 128], strides = [1, 1]} : vector<1x256xf32> to vector<1x128xf32>
    %c7 = arith.constant 7 : index
    %c128 = arith.constant 128 : index
    %42 = vector.load %arg20[%c7, %c128] : memref<8x256xf32, #tpu.memory_space<vmem>>, vector<1x128xf32>
    tpu.vector_store %arg20[%c7, %c128], %41 {strides = array<i32>} : memref<8x256xf32, #tpu.memory_space<vmem>>, vector<1x128xf32>,
    %cst_20 = arith.constant dense<0.000000e+00> : vector<1x768xf32>
    %43 = tpu.matmul %38, %7, %cst_20 {dimension_numbers = #tpu.dot_dimension_numbers<[1], [0], [0], [1], [0, 0, 1, 1], [], []>} : vector<1x256xf32>, vector<256x768xf32>, vector<1x768xf32> -> vector<1x768xf32>
    %c1 = arith.constant 1 : index
    %c0_21 = arith.constant 0 : index
    %44 = vector.load %arg19[%c1, %c0_21] : memref<8x768xf32, #tpu.memory_space<vmem>>, vector<1x768xf32>
    %45 = vector.extract_strided_slice %44 {offsets = [0, 0], sizes = [1, 256], strides = [1, 1]} : vector<1x768xf32> to vector<1x256xf32>
    %46 = vector.extract_strided_slice %43 {offsets = [0, 0], sizes = [1, 256], strides = [1, 1]} : vector<1x768xf32> to vector<1x256xf32>
    %47 = arith.addf %45, %46 : vector<1x256xf32>
    %48 = arith.negf %47 : vector<1x256xf32>
    %49 = math.exp %48 : vector<1x256xf32>
    %cst_22 = arith.constant 1.000000e+00 : f32
    %50 = vector.broadcast %cst_22 : f32 to vector<1x256xf32>
    %51 = arith.addf %50, %49 : vector<1x256xf32>
    %52 = arith.divf %50, %51 : vector<1x256xf32>
    %53 = vector.extract_strided_slice %44 {offsets = [0, 256], sizes = [1, 256], strides = [1, 1]} : vector<1x768xf32> to vector<1x256xf32>
    %54 = vector.extract_strided_slice %43 {offsets = [0, 256], sizes = [1, 256], strides = [1, 1]} : vector<1x768xf32> to vector<1x256xf32>
    %55 = arith.addf %53, %54 : vector<1x256xf32>
    %56 = arith.negf %55 : vector<1x256xf32>
    %57 = math.exp %56 : vector<1x256xf32>
    %cst_23 = arith.constant 1.000000e+00 : f32
    %58 = vector.broadcast %cst_23 : f32 to vector<1x256xf32>
    %59 = arith.addf %58, %57 : vector<1x256xf32>
    %60 = arith.divf %58, %59 : vector<1x256xf32>
    %61 = vector.extract_strided_slice %44 {offsets = [0, 512], sizes = [1, 256], strides = [1, 1]} : vector<1x768xf32> to vector<1x256xf32>
    %62 = vector.extract_strided_slice %43 {offsets = [0, 512], sizes = [1, 256], strides = [1, 1]} : vector<1x768xf32> to vector<1x256xf32>
    %63 = arith.addf %62, %8 : vector<1x256xf32>
    %64 = arith.mulf %52, %63 : vector<1x256xf32>
    %65 = arith.addf %61, %64 : vector<1x256xf32>
    %66 = math.tanh %65 : vector<1x256xf32>
    %cst_24 = arith.constant 1.000000e+00 : f32
    %67 = vector.broadcast %cst_24 : f32 to vector<1x256xf32>
    %68 = arith.subf %67, %60 : vector<1x256xf32>
    %69 = arith.mulf %68, %66 : vector<1x256xf32>
    %70 = arith.mulf %60, %38 : vector<1x256xf32>
    %71 = arith.addf %69, %70 : vector<1x256xf32>
    %72 = vector.extract_strided_slice %71 {offsets = [0, 0], sizes = [1, 128], strides = [1, 1]} : vector<1x256xf32> to vector<1x128xf32>
    %c1_25 = arith.constant 1 : index
    %c0_26 = arith.constant 0 : index
    %73 = vector.load %arg20[%c1_25, %c0_26] : memref<8x256xf32, #tpu.memory_space<vmem>>, vector<1x128xf32>
    tpu.vector_store %arg20[%c1_25, %c0_26], %72 {strides = array<i32>} : memref<8x256xf32, #tpu.memory_space<vmem>>, vector<1x128xf32>,
    %74 = vector.extract_strided_slice %71 {offsets = [0, 128], sizes = [1, 128], strides = [1, 1]} : vector<1x256xf32> to vector<1x128xf32>
    %c6 = arith.constant 6 : index
    %c128_27 = arith.constant 128 : index
    %75 = vector.load %arg20[%c6, %c128_27] : memref<8x256xf32, #tpu.memory_space<vmem>>, vector<1x128xf32>
    tpu.vector_store %arg20[%c6, %c128_27], %74 {strides = array<i32>} : memref<8x256xf32, #tpu.memory_space<vmem>>, vector<1x128xf32>,
    %cst_28 = arith.constant dense<0.000000e+00> : vector<1x768xf32>
    %76 = tpu.matmul %71, %7, %cst_28 {dimension_numbers = #tpu.dot_dimension_numbers<[1], [0], [0], [1], [0, 0, 1, 1], [], []>} : vector<1x256xf32>, vector<256x768xf32>, vector<1x768xf32> -> vector<1x768xf32>
    %c2 = arith.constant 2 : index
    %c0_29 = arith.constant 0 : index
    %77 = vector.load %arg19[%c2, %c0_29] : memref<8x768xf32, #tpu.memory_space<vmem>>, vector<1x768xf32>
    %78 = vector.extract_strided_slice %77 {offsets = [0, 0], sizes = [1, 256], strides = [1, 1]} : vector<1x768xf32> to vector<1x256xf32>
    %79 = vector.extract_strided_slice %76 {offsets = [0, 0], sizes = [1, 256], strides = [1, 1]} : vector<1x768xf32> to vector<1x256xf32>
    %80 = arith.addf %78, %79 : vector<1x256xf32>
    %81 = arith.negf %80 : vector<1x256xf32>
    %82 = math.exp %81 : vector<1x256xf32>
    %cst_30 = arith.constant 1.000000e+00 : f32
    %83 = vector.broadcast %cst_30 : f32 to vector<1x256xf32>
    %84 = arith.addf %83, %82 : vector<1x256xf32>
    %85 = arith.divf %83, %84 : vector<1x256xf32>
    %86 = vector.extract_strided_slice %77 {offsets = [0, 256], sizes = [1, 256], strides = [1, 1]} : vector<1x768xf32> to vector<1x256xf32>
    %87 = vector.extract_strided_slice %76 {offsets = [0, 256], sizes = [1, 256], strides = [1, 1]} : vector<1x768xf32> to vector<1x256xf32>
    %88 = arith.addf %86, %87 : vector<1x256xf32>
    %89 = arith.negf %88 : vector<1x256xf32>
    %90 = math.exp %89 : vector<1x256xf32>
    %cst_31 = arith.constant 1.000000e+00 : f32
    %91 = vector.broadcast %cst_31 : f32 to vector<1x256xf32>
    %92 = arith.addf %91, %90 : vector<1x256xf32>
    %93 = arith.divf %91, %92 : vector<1x256xf32>
    %94 = vector.extract_strided_slice %77 {offsets = [0, 512], sizes = [1, 256], strides = [1, 1]} : vector<1x768xf32> to vector<1x256xf32>
    %95 = vector.extract_strided_slice %76 {offsets = [0, 512], sizes = [1, 256], strides = [1, 1]} : vector<1x768xf32> to vector<1x256xf32>
    %96 = arith.addf %95, %8 : vector<1x256xf32>
    %97 = arith.mulf %85, %96 : vector<1x256xf32>
    %98 = arith.addf %94, %97 : vector<1x256xf32>
    %99 = math.tanh %98 : vector<1x256xf32>
    %cst_32 = arith.constant 1.000000e+00 : f32
    %100 = vector.broadcast %cst_32 : f32 to vector<1x256xf32>
    %101 = arith.subf %100, %93 : vector<1x256xf32>
    %102 = arith.mulf %101, %99 : vector<1x256xf32>
    %103 = arith.mulf %93, %71 : vector<1x256xf32>
    %104 = arith.addf %102, %103 : vector<1x256xf32>
    %105 = vector.extract_strided_slice %104 {offsets = [0, 0], sizes = [1, 128], strides = [1, 1]} : vector<1x256xf32> to vector<1x128xf32>
    %c2_33 = arith.constant 2 : index
    %c0_34 = arith.constant 0 : index
    %106 = vector.load %arg20[%c2_33, %c0_34] : memref<8x256xf32, #tpu.memory_space<vmem>>, vector<1x128xf32>
    tpu.vector_store %arg20[%c2_33, %c0_34], %105 {strides = array<i32>} : memref<8x256xf32, #tpu.memory_space<vmem>>, vector<1x128xf32>,
    %107 = vector.extract_strided_slice %104 {offsets = [0, 128], sizes = [1, 128], strides = [1, 1]} : vector<1x256xf32> to vector<1x128xf32>
    %c5 = arith.constant 5 : index
    %c128_35 = arith.constant 128 : index
    %108 = vector.load %arg20[%c5, %c128_35] : memref<8x256xf32, #tpu.memory_space<vmem>>, vector<1x128xf32>
    tpu.vector_store %arg20[%c5, %c128_35], %107 {strides = array<i32>} : memref<8x256xf32, #tpu.memory_space<vmem>>, vector<1x128xf32>,
    %cst_36 = arith.constant dense<0.000000e+00> : vector<1x768xf32>
    %109 = tpu.matmul %104, %7, %cst_36 {dimension_numbers = #tpu.dot_dimension_numbers<[1], [0], [0], [1], [0, 0, 1, 1], [], []>} : vector<1x256xf32>, vector<256x768xf32>, vector<1x768xf32> -> vector<1x768xf32>
    %c3 = arith.constant 3 : index
    %c0_37 = arith.constant 0 : index
    %110 = vector.load %arg19[%c3, %c0_37] : memref<8x768xf32, #tpu.memory_space<vmem>>, vector<1x768xf32>
    %111 = vector.extract_strided_slice %110 {offsets = [0, 0], sizes = [1, 256], strides = [1, 1]} : vector<1x768xf32> to vector<1x256xf32>
    %112 = vector.extract_strided_slice %109 {offsets = [0, 0], sizes = [1, 256], strides = [1, 1]} : vector<1x768xf32> to vector<1x256xf32>
    %113 = arith.addf %111, %112 : vector<1x256xf32>
    %114 = arith.negf %113 : vector<1x256xf32>
    %115 = math.exp %114 : vector<1x256xf32>
    %cst_38 = arith.constant 1.000000e+00 : f32
    %116 = vector.broadcast %cst_38 : f32 to vector<1x256xf32>
    %117 = arith.addf %116, %115 : vector<1x256xf32>
    %118 = arith.divf %116, %117 : vector<1x256xf32>
    %119 = vector.extract_strided_slice %110 {offsets = [0, 256], sizes = [1, 256], strides = [1, 1]} : vector<1x768xf32> to vector<1x256xf32>
    %120 = vector.extract_strided_slice %109 {offsets = [0, 256], sizes = [1, 256], strides = [1, 1]} : vector<1x768xf32> to vector<1x256xf32>
    %121 = arith.addf %119, %120 : vector<1x256xf32>
    %122 = arith.negf %121 : vector<1x256xf32>
    %123 = math.exp %122 : vector<1x256xf32>
    %cst_39 = arith.constant 1.000000e+00 : f32
    %124 = vector.broadcast %cst_39 : f32 to vector<1x256xf32>
    %125 = arith.addf %124, %123 : vector<1x256xf32>
    %126 = arith.divf %124, %125 : vector<1x256xf32>
    %127 = vector.extract_strided_slice %110 {offsets = [0, 512], sizes = [1, 256], strides = [1, 1]} : vector<1x768xf32> to vector<1x256xf32>
    %128 = vector.extract_strided_slice %109 {offsets = [0, 512], sizes = [1, 256], strides = [1, 1]} : vector<1x768xf32> to vector<1x256xf32>
    %129 = arith.addf %128, %8 : vector<1x256xf32>
    %130 = arith.mulf %118, %129 : vector<1x256xf32>
    %131 = arith.addf %127, %130 : vector<1x256xf32>
    %132 = math.tanh %131 : vector<1x256xf32>
    %cst_40 = arith.constant 1.000000e+00 : f32
    %133 = vector.broadcast %cst_40 : f32 to vector<1x256xf32>
    %134 = arith.subf %133, %126 : vector<1x256xf32>
    %135 = arith.mulf %134, %132 : vector<1x256xf32>
    %136 = arith.mulf %126, %104 : vector<1x256xf32>
    %137 = arith.addf %135, %136 : vector<1x256xf32>
    %138 = vector.extract_strided_slice %137 {offsets = [0, 0], sizes = [1, 128], strides = [1, 1]} : vector<1x256xf32> to vector<1x128xf32>
    %c3_41 = arith.constant 3 : index
    %c0_42 = arith.constant 0 : index
    %139 = vector.load %arg20[%c3_41, %c0_42] : memref<8x256xf32, #tpu.memory_space<vmem>>, vector<1x128xf32>
    tpu.vector_store %arg20[%c3_41, %c0_42], %138 {strides = array<i32>} : memref<8x256xf32, #tpu.memory_space<vmem>>, vector<1x128xf32>,
    %140 = vector.extract_strided_slice %137 {offsets = [0, 128], sizes = [1, 128], strides = [1, 1]} : vector<1x256xf32> to vector<1x128xf32>
    %c4 = arith.constant 4 : index
    %c128_43 = arith.constant 128 : index
    %141 = vector.load %arg20[%c4, %c128_43] : memref<8x256xf32, #tpu.memory_space<vmem>>, vector<1x128xf32>
    tpu.vector_store %arg20[%c4, %c128_43], %140 {strides = array<i32>} : memref<8x256xf32, #tpu.memory_space<vmem>>, vector<1x128xf32>,
    %cst_44 = arith.constant dense<0.000000e+00> : vector<1x768xf32>
    %142 = tpu.matmul %137, %7, %cst_44 {dimension_numbers = #tpu.dot_dimension_numbers<[1], [0], [0], [1], [0, 0, 1, 1], [], []>} : vector<1x256xf32>, vector<256x768xf32>, vector<1x768xf32> -> vector<1x768xf32>
    %c4_45 = arith.constant 4 : index
    %c0_46 = arith.constant 0 : index
    %143 = vector.load %arg19[%c4_45, %c0_46] : memref<8x768xf32, #tpu.memory_space<vmem>>, vector<1x768xf32>
    %144 = vector.extract_strided_slice %143 {offsets = [0, 0], sizes = [1, 256], strides = [1, 1]} : vector<1x768xf32> to vector<1x256xf32>
    %145 = vector.extract_strided_slice %142 {offsets = [0, 0], sizes = [1, 256], strides = [1, 1]} : vector<1x768xf32> to vector<1x256xf32>
    %146 = arith.addf %144, %145 : vector<1x256xf32>
    %147 = arith.negf %146 : vector<1x256xf32>
    %148 = math.exp %147 : vector<1x256xf32>
    %cst_47 = arith.constant 1.000000e+00 : f32
    %149 = vector.broadcast %cst_47 : f32 to vector<1x256xf32>
    %150 = arith.addf %149, %148 : vector<1x256xf32>
    %151 = arith.divf %149, %150 : vector<1x256xf32>
    %152 = vector.extract_strided_slice %143 {offsets = [0, 256], sizes = [1, 256], strides = [1, 1]} : vector<1x768xf32> to vector<1x256xf32>
    %153 = vector.extract_strided_slice %142 {offsets = [0, 256], sizes = [1, 256], strides = [1, 1]} : vector<1x768xf32> to vector<1x256xf32>
    %154 = arith.addf %152, %153 : vector<1x256xf32>
    %155 = arith.negf %154 : vector<1x256xf32>
    %156 = math.exp %155 : vector<1x256xf32>
    %cst_48 = arith.constant 1.000000e+00 : f32
    %157 = vector.broadcast %cst_48 : f32 to vector<1x256xf32>
    %158 = arith.addf %157, %156 : vector<1x256xf32>
    %159 = arith.divf %157, %158 : vector<1x256xf32>
    %160 = vector.extract_strided_slice %143 {offsets = [0, 512], sizes = [1, 256], strides = [1, 1]} : vector<1x768xf32> to vector<1x256xf32>
    %161 = vector.extract_strided_slice %142 {offsets = [0, 512], sizes = [1, 256], strides = [1, 1]} : vector<1x768xf32> to vector<1x256xf32>
    %162 = arith.addf %161, %8 : vector<1x256xf32>
    %163 = arith.mulf %151, %162 : vector<1x256xf32>
    %164 = arith.addf %160, %163 : vector<1x256xf32>
    %165 = math.tanh %164 : vector<1x256xf32>
    %cst_49 = arith.constant 1.000000e+00 : f32
    %166 = vector.broadcast %cst_49 : f32 to vector<1x256xf32>
    %167 = arith.subf %166, %159 : vector<1x256xf32>
    %168 = arith.mulf %167, %165 : vector<1x256xf32>
    %169 = arith.mulf %159, %137 : vector<1x256xf32>
    %170 = arith.addf %168, %169 : vector<1x256xf32>
    %171 = vector.extract_strided_slice %170 {offsets = [0, 0], sizes = [1, 128], strides = [1, 1]} : vector<1x256xf32> to vector<1x128xf32>
    %c4_50 = arith.constant 4 : index
    %c0_51 = arith.constant 0 : index
    %172 = vector.load %arg20[%c4_50, %c0_51] : memref<8x256xf32, #tpu.memory_space<vmem>>, vector<1x128xf32>
    tpu.vector_store %arg20[%c4_50, %c0_51], %171 {strides = array<i32>} : memref<8x256xf32, #tpu.memory_space<vmem>>, vector<1x128xf32>,
    %173 = vector.extract_strided_slice %170 {offsets = [0, 128], sizes = [1, 128], strides = [1, 1]} : vector<1x256xf32> to vector<1x128xf32>
    %c3_52 = arith.constant 3 : index
    %c128_53 = arith.constant 128 : index
    %174 = vector.load %arg20[%c3_52, %c128_53] : memref<8x256xf32, #tpu.memory_space<vmem>>, vector<1x128xf32>
    tpu.vector_store %arg20[%c3_52, %c128_53], %173 {strides = array<i32>} : memref<8x256xf32, #tpu.memory_space<vmem>>, vector<1x128xf32>,
    %cst_54 = arith.constant dense<0.000000e+00> : vector<1x768xf32>
    %175 = tpu.matmul %170, %7, %cst_54 {dimension_numbers = #tpu.dot_dimension_numbers<[1], [0], [0], [1], [0, 0, 1, 1], [], []>} : vector<1x256xf32>, vector<256x768xf32>, vector<1x768xf32> -> vector<1x768xf32>
    %c5_55 = arith.constant 5 : index
    %c0_56 = arith.constant 0 : index
    %176 = vector.load %arg19[%c5_55, %c0_56] : memref<8x768xf32, #tpu.memory_space<vmem>>, vector<1x768xf32>
    %177 = vector.extract_strided_slice %176 {offsets = [0, 0], sizes = [1, 256], strides = [1, 1]} : vector<1x768xf32> to vector<1x256xf32>
    %178 = vector.extract_strided_slice %175 {offsets = [0, 0], sizes = [1, 256], strides = [1, 1]} : vector<1x768xf32> to vector<1x256xf32>
    %179 = arith.addf %177, %178 : vector<1x256xf32>
    %180 = arith.negf %179 : vector<1x256xf32>
    %181 = math.exp %180 : vector<1x256xf32>
    %cst_57 = arith.constant 1.000000e+00 : f32
    %182 = vector.broadcast %cst_57 : f32 to vector<1x256xf32>
    %183 = arith.addf %182, %181 : vector<1x256xf32>
    %184 = arith.divf %182, %183 : vector<1x256xf32>
    %185 = vector.extract_strided_slice %176 {offsets = [0, 256], sizes = [1, 256], strides = [1, 1]} : vector<1x768xf32> to vector<1x256xf32>
    %186 = vector.extract_strided_slice %175 {offsets = [0, 256], sizes = [1, 256], strides = [1, 1]} : vector<1x768xf32> to vector<1x256xf32>
    %187 = arith.addf %185, %186 : vector<1x256xf32>
    %188 = arith.negf %187 : vector<1x256xf32>
    %189 = math.exp %188 : vector<1x256xf32>
    %cst_58 = arith.constant 1.000000e+00 : f32
    %190 = vector.broadcast %cst_58 : f32 to vector<1x256xf32>
    %191 = arith.addf %190, %189 : vector<1x256xf32>
    %192 = arith.divf %190, %191 : vector<1x256xf32>
    %193 = vector.extract_strided_slice %176 {offsets = [0, 512], sizes = [1, 256], strides = [1, 1]} : vector<1x768xf32> to vector<1x256xf32>
    %194 = vector.extract_strided_slice %175 {offsets = [0, 512], sizes = [1, 256], strides = [1, 1]} : vector<1x768xf32> to vector<1x256xf32>
    %195 = arith.addf %194, %8 : vector<1x256xf32>
    %196 = arith.mulf %184, %195 : vector<1x256xf32>
    %197 = arith.addf %193, %196 : vector<1x256xf32>
    %198 = math.tanh %197 : vector<1x256xf32>
    %cst_59 = arith.constant 1.000000e+00 : f32
    %199 = vector.broadcast %cst_59 : f32 to vector<1x256xf32>
    %200 = arith.subf %199, %192 : vector<1x256xf32>
    %201 = arith.mulf %200, %198 : vector<1x256xf32>
    %202 = arith.mulf %192, %170 : vector<1x256xf32>
    %203 = arith.addf %201, %202 : vector<1x256xf32>
    %204 = vector.extract_strided_slice %203 {offsets = [0, 0], sizes = [1, 128], strides = [1, 1]} : vector<1x256xf32> to vector<1x128xf32>
    %c5_60 = arith.constant 5 : index
    %c0_61 = arith.constant 0 : index
    %205 = vector.load %arg20[%c5_60, %c0_61] : memref<8x256xf32, #tpu.memory_space<vmem>>, vector<1x128xf32>
    tpu.vector_store %arg20[%c5_60, %c0_61], %204 {strides = array<i32>} : memref<8x256xf32, #tpu.memory_space<vmem>>, vector<1x128xf32>,
    %206 = vector.extract_strided_slice %203 {offsets = [0, 128], sizes = [1, 128], strides = [1, 1]} : vector<1x256xf32> to vector<1x128xf32>
    %c2_62 = arith.constant 2 : index
    %c128_63 = arith.constant 128 : index
    %207 = vector.load %arg20[%c2_62, %c128_63] : memref<8x256xf32, #tpu.memory_space<vmem>>, vector<1x128xf32>
    tpu.vector_store %arg20[%c2_62, %c128_63], %206 {strides = array<i32>} : memref<8x256xf32, #tpu.memory_space<vmem>>, vector<1x128xf32>,
    %cst_64 = arith.constant dense<0.000000e+00> : vector<1x768xf32>
    %208 = tpu.matmul %203, %7, %cst_64 {dimension_numbers = #tpu.dot_dimension_numbers<[1], [0], [0], [1], [0, 0, 1, 1], [], []>} : vector<1x256xf32>, vector<256x768xf32>, vector<1x768xf32> -> vector<1x768xf32>
    %c6_65 = arith.constant 6 : index
    %c0_66 = arith.constant 0 : index
    %209 = vector.load %arg19[%c6_65, %c0_66] : memref<8x768xf32, #tpu.memory_space<vmem>>, vector<1x768xf32>
    %210 = vector.extract_strided_slice %209 {offsets = [0, 0], sizes = [1, 256], strides = [1, 1]} : vector<1x768xf32> to vector<1x256xf32>
    %211 = vector.extract_strided_slice %208 {offsets = [0, 0], sizes = [1, 256], strides = [1, 1]} : vector<1x768xf32> to vector<1x256xf32>
    %212 = arith.addf %210, %211 : vector<1x256xf32>
    %213 = arith.negf %212 : vector<1x256xf32>
    %214 = math.exp %213 : vector<1x256xf32>
    %cst_67 = arith.constant 1.000000e+00 : f32
    %215 = vector.broadcast %cst_67 : f32 to vector<1x256xf32>
    %216 = arith.addf %215, %214 : vector<1x256xf32>
    %217 = arith.divf %215, %216 : vector<1x256xf32>
    %218 = vector.extract_strided_slice %209 {offsets = [0, 256], sizes = [1, 256], strides = [1, 1]} : vector<1x768xf32> to vector<1x256xf32>
    %219 = vector.extract_strided_slice %208 {offsets = [0, 256], sizes = [1, 256], strides = [1, 1]} : vector<1x768xf32> to vector<1x256xf32>
    %220 = arith.addf %218, %219 : vector<1x256xf32>
    %221 = arith.negf %220 : vector<1x256xf32>
    %222 = math.exp %221 : vector<1x256xf32>
    %cst_68 = arith.constant 1.000000e+00 : f32
    %223 = vector.broadcast %cst_68 : f32 to vector<1x256xf32>
    %224 = arith.addf %223, %222 : vector<1x256xf32>
    %225 = arith.divf %223, %224 : vector<1x256xf32>
    %226 = vector.extract_strided_slice %209 {offsets = [0, 512], sizes = [1, 256], strides = [1, 1]} : vector<1x768xf32> to vector<1x256xf32>
    %227 = vector.extract_strided_slice %208 {offsets = [0, 512], sizes = [1, 256], strides = [1, 1]} : vector<1x768xf32> to vector<1x256xf32>
    %228 = arith.addf %227, %8 : vector<1x256xf32>
    %229 = arith.mulf %217, %228 : vector<1x256xf32>
    %230 = arith.addf %226, %229 : vector<1x256xf32>
    %231 = math.tanh %230 : vector<1x256xf32>
    %cst_69 = arith.constant 1.000000e+00 : f32
    %232 = vector.broadcast %cst_69 : f32 to vector<1x256xf32>
    %233 = arith.subf %232, %225 : vector<1x256xf32>
    %234 = arith.mulf %233, %231 : vector<1x256xf32>
    %235 = arith.mulf %225, %203 : vector<1x256xf32>
    %236 = arith.addf %234, %235 : vector<1x256xf32>
    %237 = vector.extract_strided_slice %236 {offsets = [0, 0], sizes = [1, 128], strides = [1, 1]} : vector<1x256xf32> to vector<1x128xf32>
    %c6_70 = arith.constant 6 : index
    %c0_71 = arith.constant 0 : index
    %238 = vector.load %arg20[%c6_70, %c0_71] : memref<8x256xf32, #tpu.memory_space<vmem>>, vector<1x128xf32>
    tpu.vector_store %arg20[%c6_70, %c0_71], %237 {strides = array<i32>} : memref<8x256xf32, #tpu.memory_space<vmem>>, vector<1x128xf32>,
    %239 = vector.extract_strided_slice %236 {offsets = [0, 128], sizes = [1, 128], strides = [1, 1]} : vector<1x256xf32> to vector<1x128xf32>
    %c1_72 = arith.constant 1 : index
    %c128_73 = arith.constant 128 : index
    %240 = vector.load %arg20[%c1_72, %c128_73] : memref<8x256xf32, #tpu.memory_space<vmem>>, vector<1x128xf32>
    tpu.vector_store %arg20[%c1_72, %c128_73], %239 {strides = array<i32>} : memref<8x256xf32, #tpu.memory_space<vmem>>, vector<1x128xf32>,
    %cst_74 = arith.constant dense<0.000000e+00> : vector<1x768xf32>
    %241 = tpu.matmul %236, %7, %cst_74 {dimension_numbers = #tpu.dot_dimension_numbers<[1], [0], [0], [1], [0, 0, 1, 1], [], []>} : vector<1x256xf32>, vector<256x768xf32>, vector<1x768xf32> -> vector<1x768xf32>
    %c7_75 = arith.constant 7 : index
    %c0_76 = arith.constant 0 : index
    %242 = vector.load %arg19[%c7_75, %c0_76] : memref<8x768xf32, #tpu.memory_space<vmem>>, vector<1x768xf32>
    %243 = vector.extract_strided_slice %242 {offsets = [0, 0], sizes = [1, 256], strides = [1, 1]} : vector<1x768xf32> to vector<1x256xf32>
    %244 = vector.extract_strided_slice %241 {offsets = [0, 0], sizes = [1, 256], strides = [1, 1]} : vector<1x768xf32> to vector<1x256xf32>
    %245 = arith.addf %243, %244 : vector<1x256xf32>
    %246 = arith.negf %245 : vector<1x256xf32>
    %247 = math.exp %246 : vector<1x256xf32>
    %cst_77 = arith.constant 1.000000e+00 : f32
    %248 = vector.broadcast %cst_77 : f32 to vector<1x256xf32>
    %249 = arith.addf %248, %247 : vector<1x256xf32>
    %250 = arith.divf %248, %249 : vector<1x256xf32>
    %251 = vector.extract_strided_slice %242 {offsets = [0, 256], sizes = [1, 256], strides = [1, 1]} : vector<1x768xf32> to vector<1x256xf32>
    %252 = vector.extract_strided_slice %241 {offsets = [0, 256], sizes = [1, 256], strides = [1, 1]} : vector<1x768xf32> to vector<1x256xf32>
    %253 = arith.addf %251, %252 : vector<1x256xf32>
    %254 = arith.negf %253 : vector<1x256xf32>
    %255 = math.exp %254 : vector<1x256xf32>
    %cst_78 = arith.constant 1.000000e+00 : f32
    %256 = vector.broadcast %cst_78 : f32 to vector<1x256xf32>
    %257 = arith.addf %256, %255 : vector<1x256xf32>
    %258 = arith.divf %256, %257 : vector<1x256xf32>
    %259 = vector.extract_strided_slice %242 {offsets = [0, 512], sizes = [1, 256], strides = [1, 1]} : vector<1x768xf32> to vector<1x256xf32>
    %260 = vector.extract_strided_slice %241 {offsets = [0, 512], sizes = [1, 256], strides = [1, 1]} : vector<1x768xf32> to vector<1x256xf32>
    %261 = arith.addf %260, %8 : vector<1x256xf32>
    %262 = arith.mulf %250, %261 : vector<1x256xf32>
    %263 = arith.addf %259, %262 : vector<1x256xf32>
    %264 = math.tanh %263 : vector<1x256xf32>
    %cst_79 = arith.constant 1.000000e+00 : f32
    %265 = vector.broadcast %cst_79 : f32 to vector<1x256xf32>
    %266 = arith.subf %265, %258 : vector<1x256xf32>
    %267 = arith.mulf %266, %264 : vector<1x256xf32>
    %268 = arith.mulf %258, %236 : vector<1x256xf32>
    %269 = arith.addf %267, %268 : vector<1x256xf32>
    %270 = vector.extract_strided_slice %269 {offsets = [0, 0], sizes = [1, 128], strides = [1, 1]} : vector<1x256xf32> to vector<1x128xf32>
    %c7_80 = arith.constant 7 : index
    %c0_81 = arith.constant 0 : index
    %271 = vector.load %arg20[%c7_80, %c0_81] : memref<8x256xf32, #tpu.memory_space<vmem>>, vector<1x128xf32>
    tpu.vector_store %arg20[%c7_80, %c0_81], %270 {strides = array<i32>} : memref<8x256xf32, #tpu.memory_space<vmem>>, vector<1x128xf32>,
    %272 = vector.extract_strided_slice %269 {offsets = [0, 128], sizes = [1, 128], strides = [1, 1]} : vector<1x256xf32> to vector<1x128xf32>
    %c0_82 = arith.constant 0 : index
    %c128_83 = arith.constant 128 : index
    %273 = vector.load %arg20[%c0_82, %c128_83] : memref<8x256xf32, #tpu.memory_space<vmem>>, vector<1x128xf32>
    tpu.vector_store %arg20[%c0_82, %c128_83], %272 {strides = array<i32>} : memref<8x256xf32, #tpu.memory_space<vmem>>, vector<1x128xf32>,
    %c0_84 = arith.constant 0 : index
    %c0_85 = arith.constant 0 : index
    %274 = vector.load %arg20[%c0_84, %c0_85] : memref<8x256xf32, #tpu.memory_space<vmem>>, vector<8x256xf32>
    %c0_86 = arith.constant 0 : index
    %c0_87 = arith.constant 0 : index
    %275 = vector.load %arg5[%c0_86, %c0_87] : memref<256x128xf32, #tpu.memory_space<vmem>>, vector<256x128xf32>
    %cst_88 = arith.constant dense<0.000000e+00> : vector<8x128xf32>
    %276 = tpu.matmul %274, %275, %cst_88 {dimension_numbers = #tpu.dot_dimension_numbers<[1], [0], [0], [1], [0, 0, 1, 1], [], []>} : vector<8x256xf32>, vector<256x128xf32>, vector<8x128xf32> -> vector<8x128xf32>
    %c0_89 = arith.constant 0 : index
    %c0_90 = arith.constant 0 : index
    %277 = vector.load %arg6[%c0_89, %c0_90] : memref<1x128xf32, #tpu.memory_space<vmem>>, vector<1x128xf32>
    %278 = vector.broadcast %277 : vector<1x128xf32> to vector<8x128xf32>
    %279 = arith.addf %276, %278 : vector<8x128xf32>
    %cst_91 = arith.constant 0.000000e+00 : f32
    %280 = vector.broadcast %cst_91 : f32 to vector<8x128xf32>
    %281 = arith.maximumf %279, %280 : vector<8x128xf32>
    %c0_92 = arith.constant 0 : index
    %c0_93 = arith.constant 0 : index
    %282 = vector.load %arg7[%c0_92, %c0_93] : memref<1x128xf32, #tpu.memory_space<vmem>>, vector<1x128xf32>
    %283 = vector.broadcast %282 : vector<1x128xf32> to vector<8x128xf32>
    %284 = arith.mulf %281, %283 : vector<8x128xf32>
    %cst_94 = arith.constant dense<0.000000e+00> : vector<8xf32>
    %285 = vector.multi_reduction <add>, %284, %cst_94 [1] : vector<8x128xf32> to vector<8xf32>
    %286 = vector.shape_cast %285 : vector<8xf32> to vector<8x1xf32>
    %c0_95 = arith.constant 0 : index
    %c0_96 = arith.constant 0 : index
    %287 = vector.load %arg8[%c0_95, %c0_96] : memref<1x1xf32, #tpu.memory_space<vmem>>, vector<1x1xf32>
    %288 = vector.broadcast %287 : vector<1x1xf32> to vector<8x1xf32>
    %289 = arith.addf %286, %288 : vector<8x1xf32>
    %cst_97 = arith.constant dense<0xFF800000> : vector<1xf32>
    %290 = vector.multi_reduction <maximumf>, %289, %cst_97 [0] : vector<8x1xf32> to vector<1xf32>
    %291 = vector.shape_cast %290 : vector<1xf32> to vector<1x1xf32>
    %292 = vector.broadcast %291 : vector<1x1xf32> to vector<8x1xf32>
    %293 = arith.subf %289, %292 : vector<8x1xf32>
    %294 = math.exp %293 : vector<8x1xf32>
    %cst_98 = arith.constant dense<0.000000e+00> : vector<1xf32>
    %295 = vector.multi_reduction <add>, %294, %cst_98 [0] : vector<8x1xf32> to vector<1xf32>
    %296 = vector.shape_cast %295 : vector<1xf32> to vector<1x1xf32>
    %297 = tpu.reciprocal %296 {approx = true} : vector<1x1xf32> -> vector<1x1xf32>
    %298 = vector.broadcast %297 : vector<1x1xf32> to vector<8x1xf32>
    %299 = arith.mulf %294, %298 : vector<8x1xf32>
    %300 = vector.broadcast %299 : vector<8x1xf32> to vector<8x256xf32>
    %301 = arith.mulf %274, %300 : vector<8x256xf32>
    %cst_99 = arith.constant dense<0.000000e+00> : vector<256xf32>
    %302 = vector.multi_reduction <add>, %301, %cst_99 [0] : vector<8x256xf32> to vector<256xf32>
    %303 = vector.shape_cast %302 : vector<256xf32> to vector<1x256xf32>
    %c0_100 = arith.constant 0 : index
    %c0_101 = arith.constant 0 : index
    %304 = vector.load %arg9[%c0_100, %c0_101] : memref<256x256xf32, #tpu.memory_space<vmem>>, vector<256x256xf32>
    %cst_102 = arith.constant dense<0.000000e+00> : vector<1x256xf32>
    %305 = tpu.matmul %303, %304, %cst_102 {dimension_numbers = #tpu.dot_dimension_numbers<[1], [0], [0], [1], [0, 0, 1, 1], [], []>} : vector<1x256xf32>, vector<256x256xf32>, vector<1x256xf32> -> vector<1x256xf32>
    %c0_103 = arith.constant 0 : index
    %c0_104 = arith.constant 0 : index
    %306 = vector.load %arg10[%c0_103, %c0_104] : memref<1x256xf32, #tpu.memory_space<vmem>>, vector<1x256xf32>
    %307 = arith.addf %305, %306 : vector<1x256xf32>
    %308 = vector.broadcast %307 : vector<1x256xf32> to vector<8x256xf32>
    %309 = arith.addf %308, %274 : vector<8x256xf32>
    %310 = math.tanh %309 : vector<8x256xf32>
    %c0_105 = arith.constant 0 : index
    %c0_106 = arith.constant 0 : index
    %311 = vector.load %arg11[%c0_105, %c0_106] : memref<1x256xf32, #tpu.memory_space<vmem>>, vector<1x256xf32>
    %312 = vector.broadcast %311 : vector<1x256xf32> to vector<8x256xf32>
    %313 = arith.mulf %310, %312 : vector<8x256xf32>
    %cst_107 = arith.constant dense<0.000000e+00> : vector<8xf32>
    %314 = vector.multi_reduction <add>, %313, %cst_107 [1] : vector<8x256xf32> to vector<8xf32>
    %315 = vector.shape_cast %314 : vector<8xf32> to vector<8x1xf32>
    %c0_108 = arith.constant 0 : index
    %c0_109 = arith.constant 0 : index
    %316 = vector.load %arg12[%c0_108, %c0_109] : memref<1x1xf32, #tpu.memory_space<vmem>>, vector<1x1xf32>
    %317 = vector.broadcast %316 : vector<1x1xf32> to vector<8x1xf32>
    %318 = arith.addf %315, %317 : vector<8x1xf32>
    %319 = vector.shape_cast %318 : vector<8x1xf32> to vector<1x8x1xf32>
    %cst_110 = arith.constant dense<0.000000e+00> : vector<1xf32>
    %320 = vector.multi_reduction <add>, %319, %cst_110 [1, 2] : vector<1x8x1xf32> to vector<1xf32>
    %321 = vector.shape_cast %320 : vector<1xf32> to vector<1x1x1xf32>
    %322 = vector.extract %321[0, 0, 0] : f32 from vector<1x1x1xf32>
    %323 = vector.broadcast %322 : f32 to vector<1x1xf32>
    %324 = math.tanh %323 : vector<1x1xf32>
    %325 = vector.broadcast %324 : vector<1x1xf32> to vector<8x256xf32>
    %326 = arith.mulf %274, %325 : vector<8x256xf32>
    %327 = arith.addf %274, %326 : vector<8x256xf32>
    %c0_111 = arith.constant 0 : index
    %c0_112 = arith.constant 0 : index
    %328 = vector.load %arg13[%c0_111, %c0_112] : memref<256x128xf32, #tpu.memory_space<vmem>>, vector<256x128xf32>
    %cst_113 = arith.constant dense<0.000000e+00> : vector<8x128xf32>
    %329 = tpu.matmul %327, %328, %cst_113 {dimension_numbers = #tpu.dot_dimension_numbers<[1], [0], [0], [1], [0, 0, 1, 1], [], []>} : vector<8x256xf32>, vector<256x128xf32>, vector<8x128xf32> -> vector<8x128xf32>
    %c0_114 = arith.constant 0 : index
    %c0_115 = arith.constant 0 : index
    %330 = vector.load %arg14[%c0_114, %c0_115] : memref<1x128xf32, #tpu.memory_space<vmem>>, vector<1x128xf32>
    %331 = vector.broadcast %330 : vector<1x128xf32> to vector<8x128xf32>
    %332 = arith.addf %329, %331 : vector<8x128xf32>
    %c0_116 = arith.constant 0 : index
    %c0_117 = arith.constant 0 : index
    %333 = vector.load %arg17[%c0_116, %c0_117] : memref<8x128xf32, #tpu.memory_space<vmem>>, vector<8x128xf32>
    tpu.vector_store %arg17[%c0_116, %c0_117], %332 {strides = array<i32>} : memref<8x128xf32, #tpu.memory_space<vmem>>, vector<8x128xf32>,
    %334 = arith.addf %269, %303 : vector<1x256xf32>
    %c0_118 = arith.constant 0 : index
    %c0_119 = arith.constant 0 : index
    %335 = vector.load %arg15[%c0_118, %c0_119] : memref<256x128xf32, #tpu.memory_space<vmem>>, vector<256x128xf32>
    %cst_120 = arith.constant dense<0.000000e+00> : vector<1x128xf32>
    %336 = tpu.matmul %334, %335, %cst_120 {dimension_numbers = #tpu.dot_dimension_numbers<[1], [0], [0], [1], [0, 0, 1, 1], [], []>} : vector<1x256xf32>, vector<256x128xf32>, vector<1x128xf32> -> vector<1x128xf32>
    %c0_121 = arith.constant 0 : index
    %c0_122 = arith.constant 0 : index
    %337 = vector.load %arg16[%c0_121, %c0_122] : memref<1x128xf32, #tpu.memory_space<vmem>>, vector<1x128xf32>
    %338 = arith.addf %336, %337 : vector<1x128xf32>
    %c0_123 = arith.constant 0 : index
    %c0_124 = arith.constant 0 : index
    %339 = vector.load %arg18[%c0_123, %c0_124] : memref<1x128xf32, #tpu.memory_space<vmem>>, vector<1x128xf32>
    tpu.vector_store %arg18[%c0_123, %c0_124], %338 {strides = array<i32>} : memref<1x128xf32, #tpu.memory_space<vmem>>, vector<1x128xf32>,
    return
  }
}

</mosaic_0001>

<bundles_post_ra>
// kernel: fwd.1
= control target key start
LH: loop header
LB: loop body
LE: loop exit
PB: predicated region body
PF: predicated region fallthrough
CT: control target
= control target key end

     0   :  { %s7768_s0 = inlined_call_operand.vmem [shape: f32[8,256], index: 0, kind: input, shape index: {}]   ;;  %s7769_s1 = inlined_call_operand.hbm [shape: f32[256,768], index: 1, kind: input, shape index: {}]   ;;  %s7770_s2 = inlined_call_operand.vmem [shape: f32[1,768], index: 2, kind: input, shape index: {}]   ;;  %s7771_s3 = inlined_call_operand.hbm [shape: f32[256,768], index: 3, kind: input, shape index: {}]   ;;  %s7772_s4 = inlined_call_operand.vmem [shape: f32[1,256], index: 4, kind: input, shape index: {}]   ;;  %s7773_s5 = inlined_call_operand.hbm [shape: f32[256,128], index: 5, kind: input, shape index: {}]   ;;  %s7774_s6 = inlined_call_operand.vmem [shape: f32[1,128], index: 6, kind: input, shape index: {}]   ;;  %s7775_s7 = inlined_call_operand.vmem [shape: f32[1,128], index: 7, kind: input, shape index: {}]   ;;  %s7776_s8 = inlined_call_operand.<no memory space> [shape: f32[1,1], index: 8, kind: input, shape index: {}]   ;;  %s7777_s9 = inlined_call_operand.hbm [shape: f32[256,256], index: 9, kind: input, shape index: {}]   ;;  %s7778_s10 = inlined_call_operand.vmem [shape: f32[1,256], index: 10, kind: input, shape index: {}]   ;;  %s7779_s11 = inlined_call_operand.vmem [shape: f32[1,256], index: 11, kind: input, shape index: {}]   ;;  %s7780_s13 = inlined_call_operand.hbm [shape: f32[256,128], index: 13, kind: input, shape index: {}]   ;;  %s7781_s14 = inlined_call_operand.vmem [shape: f32[1,128], index: 14, kind: input, shape index: {}]   ;;  %s7782_s15 = inlined_call_operand.hbm [shape: f32[256,128], index: 15, kind: input, shape index: {}]   ;;  %s7783_s16 = inlined_call_operand.vmem [shape: f32[1,128], index: 16, kind: input, shape index: {}]   ;;  %s7784_s17 = inlined_call_operand.vmem [shape: f32[8,128], index: 17, kind: output, shape index: {0}]   ;;  %s7785_s18 = inlined_call_operand.hbm [shape: f32[1,128], index: 18, kind: output, shape index: {1}]   ;;  %s7786_s12 = inlined_call_operand.<no memory space> [shape: f32[1,1], index: 12, kind: input, shape index: {}]  }
   0x1   :  { %8476 = sst [smem:[#allocation169_spill]] %s7768_s0  ;;  %v24_v0 = vstv %s7776_s8  ;;  %v26_v1 = vstv %s7786_s12 }
   0x2   :  { %8477 = sst [smem:[#allocation170_spill]] %s7769_s1  ;;  %25 = vst [vmem:[#allocation4] sm:$0x1] %v24_v0  ;;  %27 = vst [vmem:[#allocation5] sm:$0x1] %v26_v1 }
   0x3   :  { %8478 = sst [smem:[#allocation171_spill]] %s7770_s2 }
   0x4   :  { %28 = vsyncpa [#allocation7], 0 }
   0x5   :  { %29 = vsyncpa [#allocation10], 0 }
   0x6   :  { %30 = vsyncpa [#allocation13], 0 }
   0x7   :  { %31 = vsyncpa [#allocation16], 0 }
   0x8   :  { %32 = vsyncpa [#allocation8], 0  ;;  %s4695_s0 = smov [#allocation9]   ;;  %s4696_s1 = smov [#allocation12]  }
   0x9   :  { %s54_s19 = sshll.u32 %s4695_s0, 4  ;;  %s86_s20 = sshll.u32 %s4696_s1, 4  ;;  %s55_s19 = int_to_ptr.vmem [resolvable:$true] %s54_s19  ;;  %s87_s20 = int_to_ptr.vmem [resolvable:$true] %s86_s20 }
   0xa   :  { %s4553_s21 = scalar_lea.vmem %s55_s19, 24576  ;;  %p4558_p1 = scmp.lt.s32.totalorder %s55_s19, %s55_s19 }
   0xb   :  { %p4554_p0 = scmp.ne.s32.totalorder %s55_s19, %s4553_s21  ;;  %p4559_p2 = scmp.lt.s32.totalorder %s4553_s21, %s4553_s21 }
   0xd   :  { %p4560_p3 = por %p4559_p2, %p4558_p1 }
   0xf   :  { %p4561_p4 = pnand %p4560_p3, %p4554_p0 }
  0x11   :  { %4564 = shalt.err (!%p4561_p4)
}
  0x12   :  { %s4697_s8 = smov 768   ;;  %s4698_s12 = smov 48  }
  0x13   :  { %60 = dma.hbm_to_vmem [thread:$0]  %s7771_s3, 24576, %s55_s19, [#allocation10], %s4697_s8, %s4697_s8, %s4698_s12  }
  0x14   :  { %s4573_s23 = scalar_lea.vmem %s87_s20, 8192  ;;  %p4578_p6 = scmp.lt.s32.totalorder %s87_s20, %s87_s20 }
  0x15   :  { %p4574_p5 = scmp.ne.s32.totalorder %s87_s20, %s4573_s23  ;;  %p4579_p7 = scmp.lt.s32.totalorder %s4573_s23, %s4573_s23 }
  0x17   :  { %p4580_p8 = por %p4579_p7, %p4578_p6 }
  0x19   :  { %p4581_p9 = pnand %p4580_p8, %p4574_p5 }
  0x1b   :  { %4584 = shalt.err (!%p4581_p9)
}
  0x1c   :  { %s4699_s24 = smov 256   ;;  %s4700_s25 = smov 16  }
  0x1d   :  { %92 = dma.hbm_to_vmem [thread:$0]  %s7777_s9, 8192, %s87_s20, [#allocation13], %s4699_s24, %s4699_s24, %s4700_s25  }
  0x1e   :  { %s4701_s28 = smov [#allocation6]   ;;  %s4702_s30 = smov [#allocation11]  }
  0x1f   :  { %s40_s29 = sshll.u32 %s4701_s28, 4  ;;  %s68_s0 = sshll.u32 %s4702_s30, 4  ;;  %s41_s29 = int_to_ptr.vmem [resolvable:$true] %s40_s29  ;;  %s69_s0 = int_to_ptr.vmem [resolvable:$true] %s68_s0 }
  0x20   :  { %s4593_s3 = scalar_lea.vmem %s41_s29, 24576  ;;  %p4598_p11 = scmp.lt.s32.totalorder %s41_s29, %s41_s29 }
  0x21   :  { %p4594_p10 = scmp.ne.s32.totalorder %s41_s29, %s4593_s3  ;;  %p4599_p12 = scmp.lt.s32.totalorder %s4593_s3, %s4593_s3 }
  0x23   :  { %p4600_p13 = por %p4599_p12, %p4598_p11 }
  0x25   :  { %p4601_p0 = pnand %p4600_p13, %p4594_p10 }
  0x27   :  { %4604 = shalt.err (!%p4601_p0)
}
  0x28   :  { %s8479_s21 = sld [smem:[#allocation170_spill]]  ;;  %s4613_s22 = scalar_lea.vmem %s69_s0, 4096 }
  0x29   :  { %p4614_p1 = scmp.ne.s32.totalorder %s69_s0, %s4613_s22  ;;  %p4618_p2 = scmp.lt.s32.totalorder %s69_s0, %s69_s0 }
  0x2a   :  { %p4619_p3 = scmp.lt.s32.totalorder %s4613_s22, %s4613_s22 }
  0x2c   :  { %p4620_p4 = por %p4619_p3, %p4618_p2 }
  0x2e   :  { %46 = dma.hbm_to_vmem [thread:$0]  %s8479_s21, 24576, %s41_s29, [#allocation7], %s4697_s8, %s4697_s8, %s4698_s12  }
  0x2f   :  { %p4621_p5 = pnand %p4620_p4, %p4614_p1 }
  0x31   :  { %4624 = shalt.err (!%p4621_p5)
}
  0x32   :  { %s4703_s9 = smov 128   ;;  %s4704_s20 = smov 8  }
  0x33   :  { %74 = dma.hbm_to_vmem [thread:$0]  %s7773_s5, 4096, %s69_s0, [#allocation10], %s4703_s9, %s4703_s9, %s4704_s20  }
  0x34   :  { %s4705_s24 = smov [#allocation14]   ;;  %s4706_s26 = smov [#allocation15]  }
  0x35   :  { %s104_s25 = sshll.u32 %s4705_s24, 4  ;;  %s118_s27 = sshll.u32 %s4706_s26, 4  ;;  %s105_s25 = int_to_ptr.vmem [resolvable:$true] %s104_s25  ;;  %s119_s27 = int_to_ptr.vmem [resolvable:$true] %s118_s27 }
  0x36   :  { %s4633_s8 = scalar_lea.vmem %s105_s25, 4096  ;;  %p4638_p7 = scmp.lt.s32.totalorder %s105_s25, %s105_s25 }
  0x37   :  { %p4634_p6 = scmp.ne.s32.totalorder %s105_s25, %s4633_s8  ;;  %p4639_p8 = scmp.lt.s32.totalorder %s4633_s8, %s4633_s8 }
  0x39   :  { %p4640_p9 = por %p4639_p8, %p4638_p7 }
  0x3b   :  { %p4641_p10 = pnand %p4640_p9, %p4634_p6 }
  0x3d   :  { %4644 = shalt.err (!%p4641_p10)
}
  0x3e   :  { %110 = dma.hbm_to_vmem [thread:$0]  %s7780_s13, 4096, %s105_s25, [#allocation13], %s4703_s9, %s4703_s9, %s4704_s20  }
  0x3f   :  { %s4653_s29 = scalar_lea.vmem %s119_s27, 4096  ;;  %p4658_p12 = scmp.lt.s32.totalorder %s119_s27, %s119_s27 }
  0x40   :  { %p4654_p11 = scmp.ne.s32.totalorder %s119_s27, %s4653_s29  ;;  %p4659_p13 = scmp.lt.s32.totalorder %s4653_s29, %s4653_s29 }
  0x42   :  { %p4660_p0 = por %p4659_p13, %p4658_p12 }
  0x44   :  { %p4661_p1 = pnand %p4660_p0, %p4654_p11 }
  0x46   :  { %4664 = shalt.err (!%p4661_p1)
}
  0x47   :  { %124 = dma.hbm_to_vmem [thread:$0]  %s7782_s15, 4096, %s119_s27, [#allocation16], %s4703_s9, %s4703_s9, %s4704_s20  }
  0x48   :  { %4685 = dma.done.wait [#allocation7], 24576  }
  0x49   :  { %4686 = vsyncadd [#allocation7], 4294942720 }
  0x4a   :  { %4687 = dma.done.wait [#allocation10], 28672  }
  0x4b   :  { %4688 = vsyncadd [#allocation10], 4294938624 }
  0x4c   :  { %4689 = dma.done.wait [#allocation13], 12288  }
  0x4d   :  { %4690 = vsyncadd [#allocation13], 4294955008 }
  0x4e   :  { %4691 = dma.done.wait [#allocation16], 4096  }
  0x4f   :  { %4692 = vsyncadd [#allocation16], 4294963200  ;;  %v238_v2 = vld [vmem:[#allocation6 + $0x2d8] sm:$0xff]  ;;  %v240_v3 = vld [vmem:[#allocation6 + $0x2e8] sm:$0xff]  ;;  %s8480_s0 = sld [smem:[#allocation169_spill]]  ;;  %vm3414_vm0 = vcmask 7168  }
  0x50   :  { %v237_v4 = vld [vmem:[#allocation6 + $0x2d0] sm:$0xff]  ;;  %371 = vmatprep.subr.mxu0 %v238_v2  ;;  %442 = vmatprep.subr.mxu1 %v240_v3  ;;  %v239_v5 = vld [vmem:[#allocation6 + $0x2e0] sm:$0xff]  ;;  %v232_v6 = vld [vmem:[#allocation6 + $0x2a8] sm:$0xff]  ;;  %s8654_s22 = sld [smem:[#allocation171_spill]]  ;;  %s4710_s5 = smov [#allocation17]  }
  0x51   :  { %v234_v7 = vld [vmem:[#allocation6 + $0x2b8] sm:$0xff]  ;;  %372 = vmatpush1.msra.mxu0 %v237_v4  ;;  %443 = vmatpush1.msra.mxu1 %v239_v5  ;;  %v231_v8 = vld [vmem:[#allocation6 + $0x2a0] sm:$0xff]  ;;  %v233_v9 = vld [vmem:[#allocation6 + $0x2b0] sm:$0xff]  ;;  %s3905_s30 = sshll.u32 %s4710_s5, 4  ;;  %s3906_s30 = int_to_ptr.vmem [resolvable:$true] %s3905_s30 }
  0x52   :  { %v226_v10 = vld [vmem:[#allocation6 + $0x278] sm:$0xff]  ;;  %373 = vmatprep.subr.mxu0 %v232_v6  ;;  %444 = vmatprep.subr.mxu1 %v234_v7  ;;  %v228_v11 = vld [vmem:[#allocation6 + $0x288] sm:$0xff]  ;;  %v225_v12 = vld [vmem:[#allocation6 + $0x270] sm:$0xff]  ;;  %s4669_s13 = scalar_lea.vmem %s3906_s30, 32  ;;  %p4670_p3 = scmp.lt.s32.totalorder %s3906_s30, %s3906_s30 }
  0x53   :  { %v227_v13 = vld [vmem:[#allocation6 + $0x280] sm:$0xff]  ;;  %374 = vmatpush1.msra.mxu0 %v231_v8  ;;  %445 = vmatpush1.msra.mxu1 %v233_v9  ;;  %v220_v14 = vld [vmem:[#allocation6 + $0x248] sm:$0xff]  ;;  %v222_v15 = vld [vmem:[#allocation6 + $0x258] sm:$0xff] }
  0x54   :  { %375 = vmatprep.subr.mxu0 %v226_v10  ;;  %446 = vmatprep.subr.mxu1 %v228_v11  ;;  %v219_v16 = vld [vmem:[#allocation6 + $0x240] sm:$0xff]  ;;  %v221_v17 = vld [vmem:[#allocation6 + $0x250] sm:$0xff]  ;;  %v214_v18 = vld [vmem:[#allocation6 + $0x218] sm:$0xff] }
  0x55   :  { %376 = vmatpush1.msra.mxu0 %v225_v12  ;;  %447 = vmatpush1.msra.mxu1 %v227_v13  ;;  %v216_v19 = vld [vmem:[#allocation6 + $0x228] sm:$0xff]  ;;  %v213_v20 = vld [vmem:[#allocation6 + $0x210] sm:$0xff]  ;;  %v215_v21 = vld [vmem:[#allocation6 + $0x220] sm:$0xff] }
  0x56   :  { %377 = vmatprep.subr.mxu0 %v220_v14  ;;  %448 = vmatprep.subr.mxu1 %v222_v15  ;;  %v208_v22 = vld [vmem:[#allocation6 + $0x1e8] sm:$0xff]  ;;  %v210_v23 = vld [vmem:[#allocation6 + $0x1f8] sm:$0xff]  ;;  %v207_v24 = vld [vmem:[#allocation6 + $0x1e0] sm:$0xff] }
  0x57   :  { %378 = vmatpush1.msra.mxu0 %v219_v16  ;;  %449 = vmatpush1.msra.mxu1 %v221_v17  ;;  %v209_v25 = vld [vmem:[#allocation6 + $0x1f0] sm:$0xff]  ;;  %v202_v26 = vld [vmem:[#allocation6 + $0x1b8] sm:$0xff]  ;;  %v204_v27 = vld [vmem:[#allocation6 + $0x1c8] sm:$0xff] }
  0x58   :  { %379 = vmatprep.subr.mxu0 %v214_v18  ;;  %450 = vmatprep.subr.mxu1 %v216_v19  ;;  %v201_v28 = vld [vmem:[#allocation6 + $0x1b0] sm:$0xff]  ;;  %v203_v29 = vld [vmem:[#allocation6 + $0x1c0] sm:$0xff]  ;;  %v196_v30 = vld [vmem:[#allocation6 + $0x188] sm:$0xff] }
  0x59   :  { %380 = vmatpush1.msra.mxu0 %v213_v20  ;;  %451 = vmatpush1.msra.mxu1 %v215_v21  ;;  %v198_v31 = vld [vmem:[#allocation6 + $0x198] sm:$0xff]  ;;  %v195_v32 = vld [vmem:[#allocation6 + $0x180] sm:$0xff]  ;;  %v197_v33 = vld [vmem:[#allocation6 + $0x190] sm:$0xff] }
  0x5a   :  { %381 = vmatprep.subr.mxu0 %v208_v22  ;;  %452 = vmatprep.subr.mxu1 %v210_v23  ;;  %v190_v34 = vld [vmem:[#allocation6 + $0x158] sm:$0xff]  ;;  %v192_v35 = vld [vmem:[#allocation6 + $0x168] sm:$0xff]  ;;  %v189_v36 = vld [vmem:[#allocation6 + $0x150] sm:$0xff] }
  0x5b   :  { %382 = vmatpush1.msra.mxu0 %v207_v24  ;;  %453 = vmatpush1.msra.mxu1 %v209_v25  ;;  %v191_v37 = vld [vmem:[#allocation6 + $0x160] sm:$0xff]  ;;  %v184_v38 = vld [vmem:[#allocation6 + $0x128] sm:$0xff]  ;;  %v186_v39 = vld [vmem:[#allocation6 + $0x138] sm:$0xff] }
  0x5c   :  { %383 = vmatprep.subr.mxu0 %v202_v26  ;;  %454 = vmatprep.subr.mxu1 %v204_v27  ;;  %v183_v40 = vld [vmem:[#allocation6 + $0x120] sm:$0xff]  ;;  %v185_v41 = vld [vmem:[#allocation6 + $0x130] sm:$0xff]  ;;  %v178_v42 = vld [vmem:[#allocation6 + $0xf8] sm:$0xff] }
  0x5d   :  { %384 = vmatpush1.msra.mxu0 %v201_v28  ;;  %455 = vmatpush1.msra.mxu1 %v203_v29  ;;  %v180_v43 = vld [vmem:[#allocation6 + $0x108] sm:$0xff]  ;;  %v177_v44 = vld [vmem:[#allocation6 + $0xf0] sm:$0xff]  ;;  %v179_v45 = vld [vmem:[#allocation6 + $0x100] sm:$0xff] }
  0x5e   :  { %385 = vmatprep.subr.mxu0 %v196_v30  ;;  %456 = vmatprep.subr.mxu1 %v198_v31  ;;  %v172_v46 = vld [vmem:[#allocation6 + $0xc8] sm:$0xff]  ;;  %v174_v47 = vld [vmem:[#allocation6 + $0xd8] sm:$0xff]  ;;  %v171_v48 = vld [vmem:[#allocation6 + $0xc0] sm:$0xff] }
  0x5f   :  { %386 = vmatpush1.msra.mxu0 %v195_v32  ;;  %457 = vmatpush1.msra.mxu1 %v197_v33  ;;  %v173_v49 = vld [vmem:[#allocation6 + $0xd0] sm:$0xff]  ;;  %v166_v50 = vld [vmem:[#allocation6 + $0x98] sm:$0xff]  ;;  %v168_v51 = vld [vmem:[#allocation6 + $0xa8] sm:$0xff] }
  0x60   :  { %387 = vmatprep.subr.mxu0 %v190_v34  ;;  %458 = vmatprep.subr.mxu1 %v192_v35  ;;  %v165_v52 = vld [vmem:[#allocation6 + $0x90] sm:$0xff]  ;;  %v167_v53 = vld [vmem:[#allocation6 + $0xa0] sm:$0xff]  ;;  %v160_v54 = vld [vmem:[#allocation6 + $0x68] sm:$0xff] }
  0x61   :  { %388 = vmatpush1.msra.mxu0 %v189_v36  ;;  %459 = vmatpush1.msra.mxu1 %v191_v37  ;;  %v162_v55 = vld [vmem:[#allocation6 + $0x78] sm:$0xff]  ;;  %v159_v56 = vld [vmem:[#allocation6 + $0x60] sm:$0xff]  ;;  %v161_v57 = vld [vmem:[#allocation6 + $0x70] sm:$0xff] }
  0x62   :  { %389 = vmatprep.subr.mxu0 %v184_v38  ;;  %460 = vmatprep.subr.mxu1 %v186_v39  ;;  %v154_v58 = vld [vmem:[#allocation6 + $0x38] sm:$0xff]  ;;  %v156_v59 = vld [vmem:[#allocation6 + $0x48] sm:$0xff]  ;;  %v153_v60 = vld [vmem:[#allocation6 + $0x30] sm:$0xff] }
  0x63   :  { %390 = vmatpush1.msra.mxu0 %v183_v40  ;;  %461 = vmatpush1.msra.mxu1 %v185_v41  ;;  %v155_v61 = vld [vmem:[#allocation6 + $0x40] sm:$0xff]  ;;  %v148_v62 = vld [vmem:[#allocation6 + $0x8] sm:$0xff]  ;;  %v150_v63 = vld [vmem:[#allocation6 + $0x18] sm:$0xff] }
  0x64   :  { %391 = vmatprep.subr.mxu0 %v178_v42  ;;  %462 = vmatprep.subr.mxu1 %v180_v43  ;;  %v147_v0 = vld [vmem:[#allocation6] sm:$0xff]  ;;  %v149_v1 = vld [vmem:[#allocation6 + $0x10] sm:$0xff]  ;;  %v334_v2 = vld [vmem:[#allocation6 + $0x5d8] sm:$0xff] }
  0x65   :  { %392 = vmatpush1.msra.mxu0 %v177_v44  ;;  %463 = vmatpush1.msra.mxu1 %v179_v45  ;;  %v336_v3 = vld [vmem:[#allocation6 + $0x5e8] sm:$0xff]  ;;  %v333_v4 = vld [vmem:[#allocation6 + $0x5d0] sm:$0xff]  ;;  %v335_v5 = vld [vmem:[#allocation6 + $0x5e0] sm:$0xff] }
  0x66   :  { %393 = vmatprep.subr.mxu0 %v172_v46  ;;  %464 = vmatprep.subr.mxu1 %v174_v47  ;;  %v328_v6 = vld [vmem:[#allocation6 + $0x5a8] sm:$0xff]  ;;  %v330_v7 = vld [vmem:[#allocation6 + $0x5b8] sm:$0xff]  ;;  %v327_v8 = vld [vmem:[#allocation6 + $0x5a0] sm:$0xff] }
  0x67   :  { %394 = vmatpush1.msra.mxu0 %v171_v48  ;;  %465 = vmatpush1.msra.mxu1 %v173_v49  ;;  %v329_v9 = vld [vmem:[#allocation6 + $0x5b0] sm:$0xff]  ;;  %v322_v10 = vld [vmem:[#allocation6 + $0x578] sm:$0xff]  ;;  %v324_v11 = vld [vmem:[#allocation6 + $0x588] sm:$0xff] }
  0x68   :  { %395 = vmatprep.subr.mxu0 %v166_v50  ;;  %466 = vmatprep.subr.mxu1 %v168_v51  ;;  %v321_v12 = vld [vmem:[#allocation6 + $0x570] sm:$0xff]  ;;  %v323_v13 = vld [vmem:[#allocation6 + $0x580] sm:$0xff]  ;;  %v316_v14 = vld [vmem:[#allocation6 + $0x548] sm:$0xff] }
  0x69   :  { %396 = vmatpush1.msra.mxu0 %v165_v52  ;;  %467 = vmatpush1.msra.mxu1 %v167_v53  ;;  %v318_v15 = vld [vmem:[#allocation6 + $0x558] sm:$0xff]  ;;  %v315_v16 = vld [vmem:[#allocation6 + $0x540] sm:$0xff]  ;;  %v317_v17 = vld [vmem:[#allocation6 + $0x550] sm:$0xff] }
  0x6a   :  { %397 = vmatprep.subr.mxu0 %v160_v54  ;;  %468 = vmatprep.subr.mxu1 %v162_v55  ;;  %v310_v18 = vld [vmem:[#allocation6 + $0x518] sm:$0xff]  ;;  %v312_v19 = vld [vmem:[#allocation6 + $0x528] sm:$0xff]  ;;  %v309_v20 = vld [vmem:[#allocation6 + $0x510] sm:$0xff] }
  0x6b   :  { %398 = vmatpush1.msra.mxu0 %v159_v56  ;;  %469 = vmatpush1.msra.mxu1 %v161_v57  ;;  %v311_v21 = vld [vmem:[#allocation6 + $0x520] sm:$0xff]  ;;  %v304_v22 = vld [vmem:[#allocation6 + $0x4e8] sm:$0xff]  ;;  %v306_v23 = vld [vmem:[#allocation6 + $0x4f8] sm:$0xff] }
  0x6c   :  { %399 = vmatprep.subr.mxu0 %v154_v58  ;;  %470 = vmatprep.subr.mxu1 %v156_v59  ;;  %v303_v24 = vld [vmem:[#allocation6 + $0x4e0] sm:$0xff]  ;;  %v305_v25 = vld [vmem:[#allocation6 + $0x4f0] sm:$0xff]  ;;  %v298_v26 = vld [vmem:[#allocation6 + $0x4b8] sm:$0xff] }
  0x6d   :  { %400 = vmatpush1.msra.mxu0 %v153_v60  ;;  %471 = vmatpush1.msra.mxu1 %v155_v61  ;;  %v300_v27 = vld [vmem:[#allocation6 + $0x4c8] sm:$0xff]  ;;  %v297_v28 = vld [vmem:[#allocation6 + $0x4b0] sm:$0xff]  ;;  %v299_v29 = vld [vmem:[#allocation6 + $0x4c0] sm:$0xff] }
  0x6e   :  { %401 = vmatprep.subr.mxu0 %v148_v62  ;;  %472 = vmatprep.subr.mxu1 %v150_v63  ;;  %v292_v30 = vld [vmem:[#allocation6 + $0x488] sm:$0xff]  ;;  %v294_v31 = vld [vmem:[#allocation6 + $0x498] sm:$0xff]  ;;  %v291_v32 = vld [vmem:[#allocation6 + $0x480] sm:$0xff] }
  0x6f   :  { %402 = vmatpush1.msra.mxu0 %v147_v0  ;;  %473 = vmatpush1.msra.mxu1 %v149_v1  ;;  %v293_v33 = vld [vmem:[#allocation6 + $0x490] sm:$0xff]  ;;  %v286_v34 = vld [vmem:[#allocation6 + $0x458] sm:$0xff]  ;;  %v288_v35 = vld [vmem:[#allocation6 + $0x468] sm:$0xff] }
  0x70   :  { %403 = vmatprep.subr.mxu0 %v334_v2  ;;  %474 = vmatprep.subr.mxu1 %v336_v3  ;;  %v285_v36 = vld [vmem:[#allocation6 + $0x450] sm:$0xff]  ;;  %v287_v37 = vld [vmem:[#allocation6 + $0x460] sm:$0xff]  ;;  %v280_v38 = vld [vmem:[#allocation6 + $0x428] sm:$0xff] }
  0x71   :  { %404 = vmatpush2.msra.mxu0 %v333_v4  ;;  %475 = vmatpush2.msra.mxu1 %v335_v5  ;;  %v282_v39 = vld [vmem:[#allocation6 + $0x438] sm:$0xff]  ;;  %v279_v40 = vld [vmem:[#allocation6 + $0x420] sm:$0xff]  ;;  %v281_v41 = vld [vmem:[#allocation6 + $0x430] sm:$0xff] }
  0x72   :  { %405 = vmatprep.subr.mxu0 %v328_v6  ;;  %476 = vmatprep.subr.mxu1 %v330_v7  ;;  %v274_v42 = vld [vmem:[#allocation6 + $0x3f8] sm:$0xff]  ;;  %v276_v43 = vld [vmem:[#allocation6 + $0x408] sm:$0xff]  ;;  %v273_v44 = vld [vmem:[#allocation6 + $0x3f0] sm:$0xff] }
  0x73   :  { %406 = vmatpush2.msra.mxu0 %v327_v8  ;;  %477 = vmatpush2.msra.mxu1 %v329_v9  ;;  %v275_v45 = vld [vmem:[#allocation6 + $0x400] sm:$0xff]  ;;  %v268_v46 = vld [vmem:[#allocation6 + $0x3c8] sm:$0xff]  ;;  %v270_v47 = vld [vmem:[#allocation6 + $0x3d8] sm:$0xff] }
  0x74   :  { %407 = vmatprep.subr.mxu0 %v322_v10  ;;  %478 = vmatprep.subr.mxu1 %v324_v11  ;;  %v267_v48 = vld [vmem:[#allocation6 + $0x3c0] sm:$0xff]  ;;  %v269_v49 = vld [vmem:[#allocation6 + $0x3d0] sm:$0xff]  ;;  %v262_v50 = vld [vmem:[#allocation6 + $0x398] sm:$0xff] }
  0x75   :  { %408 = vmatpush2.msra.mxu0 %v321_v12  ;;  %479 = vmatpush2.msra.mxu1 %v323_v13  ;;  %v264_v51 = vld [vmem:[#allocation6 + $0x3a8] sm:$0xff]  ;;  %v261_v52 = vld [vmem:[#allocation6 + $0x390] sm:$0xff]  ;;  %v263_v53 = vld [vmem:[#allocation6 + $0x3a0] sm:$0xff] }
  0x76   :  { %409 = vmatprep.subr.mxu0 %v316_v14  ;;  %480 = vmatprep.subr.mxu1 %v318_v15  ;;  %v256_v54 = vld [vmem:[#allocation6 + $0x368] sm:$0xff]  ;;  %v258_v55 = vld [vmem:[#allocation6 + $0x378] sm:$0xff]  ;;  %v255_v56 = vld [vmem:[#allocation6 + $0x360] sm:$0xff] }
  0x77   :  { %410 = vmatpush2.msra.mxu0 %v315_v16  ;;  %481 = vmatpush2.msra.mxu1 %v317_v17  ;;  %v257_v57 = vld [vmem:[#allocation6 + $0x370] sm:$0xff]  ;;  %v250_v58 = vld [vmem:[#allocation6 + $0x338] sm:$0xff]  ;;  %v252_v59 = vld [vmem:[#allocation6 + $0x348] sm:$0xff] }
  0x78   :  { %411 = vmatprep.subr.mxu0 %v310_v18  ;;  %482 = vmatprep.subr.mxu1 %v312_v19  ;;  %v249_v60 = vld [vmem:[#allocation6 + $0x330] sm:$0xff]  ;;  %v251_v61 = vld [vmem:[#allocation6 + $0x340] sm:$0xff]  ;;  %v244_v62 = vld [vmem:[#allocation6 + $0x308] sm:$0xff] }
  0x79   :  { %412 = vmatpush2.msra.mxu0 %v309_v20  ;;  %483 = vmatpush2.msra.mxu1 %v311_v21  ;;  %v246_v63 = vld [vmem:[#allocation6 + $0x318] sm:$0xff]  ;;  %v243_v0 = vld [vmem:[#allocation6 + $0x300] sm:$0xff]  ;;  %v245_v2 = vld [vmem:[#allocation6 + $0x310] sm:$0xff] }
  0x7a   :  { %413 = vmatprep.subr.mxu0 %v304_v22  ;;  %484 = vmatprep.subr.mxu1 %v306_v23  ;;  %v4833_v1 = vld [vmem:[%s8480_s0 + $0x8] sm:$0xff]  ;;  %v4838_v3 = vld [vmem:[%s8480_s0] sm:$0xff]  ;;  %v241_v6 = vld [vmem:[#allocation6 + $0x2f0] sm:$0xff] }
  0x7b   :  { %414 = vmatpush2.msra.mxu0 %v303_v24  ;;  %485 = vmatpush2.msra.mxu1 %v305_v25  ;;  %v242_v4 = vld [vmem:[#allocation6 + $0x2f8] sm:$0xff]  ;;  %v680_v7 = vld [vmem:[#allocation9 + $0x2d0] sm:$0xff]  ;;  %v236_v8 = vld [vmem:[#allocation6 + $0x2c8] sm:$0xff] }
  0x7c   :  { %415 = vmatprep.subr.mxu0 %v298_v26  ;;  %486 = vmatprep.subr.mxu1 %v300_v27  ;;  %v681_v5 = vld [vmem:[#allocation9 + $0x2d8] sm:$0xff]  ;;  %v675_v9 = vld [vmem:[#allocation9 + $0x2a8] sm:$0xff]  ;;  %v235_v10 = vld [vmem:[#allocation6 + $0x2c0] sm:$0xff] }
  0x7d   :  { %416 = vmatpush2.msra.mxu0 %v297_v28  ;;  %487 = vmatpush2.msra.mxu1 %v299_v29  ;;  %v674_v11 = vld [vmem:[#allocation9 + $0x2a0] sm:$0xff]  ;;  %v230_v12 = vld [vmem:[#allocation6 + $0x298] sm:$0xff]  ;;  %v229_v14 = vld [vmem:[#allocation6 + $0x290] sm:$0xff] }
  0x7e   :  { %417 = vmatprep.subr.mxu0 %v292_v30  ;;  %488 = vmatprep.subr.mxu1 %v294_v31  ;;  %v669_v13 = vld [vmem:[#allocation9 + $0x278] sm:$0xff]  ;;  %v668_v15 = vld [vmem:[#allocation9 + $0x270] sm:$0xff]  ;;  %v224_v16 = vld [vmem:[#allocation6 + $0x268] sm:$0xff] }
  0x7f   :  { %418 = vmatpush2.msra.mxu0 %v291_v32  ;;  %489 = vmatpush2.msra.mxu1 %v293_v33  ;;  %v663_v17 = vld [vmem:[#allocation9 + $0x248] sm:$0xff]  ;;  %v223_v18 = vld [vmem:[#allocation6 + $0x260] sm:$0xff]  ;;  %v218_v20 = vld [vmem:[#allocation6 + $0x238] sm:$0xff] }
  0x80   :  { %419 = vmatprep.subr.mxu0 %v286_v34  ;;  %490 = vmatprep.subr.mxu1 %v288_v35  ;;  %v4844_v19 = vld [vmem:[#allocation9 + $0x240] sm:$0xff]  ;;  %v4846_v21 = vld [vmem:[#allocation9 + $0x218] sm:$0xff]  ;;  %v217_v22 = vld [vmem:[#allocation6 + $0x230] sm:$0xff] }
  0x81   :  { %420 = vmatpush2.msra.mxu0 %v285_v36  ;;  %491 = vmatpush2.msra.mxu1 %v287_v37  ;;  %v4848_v23 = vld [vmem:[#allocation9 + $0x210] sm:$0xff]  ;;  %v212_v24 = vld [vmem:[#allocation6 + $0x208] sm:$0xff]  ;;  %v211_v26 = vld [vmem:[#allocation6 + $0x200] sm:$0xff] }
  0x82   :  { %421 = vmatprep.subr.mxu0 %v280_v38  ;;  %492 = vmatprep.subr.mxu1 %v282_v39  ;;  %v4851_v25 = vld [vmem:[#allocation9 + $0x1e8] sm:$0xff]  ;;  %v4854_v27 = vld [vmem:[#allocation9 + $0x1e0] sm:$0xff]  ;;  %v206_v28 = vld [vmem:[#allocation6 + $0x1d8] sm:$0xff] }
  0x83   :  { %422 = vmatpush2.msra.mxu0 %v279_v40  ;;  %493 = vmatpush2.msra.mxu1 %v281_v41  ;;  %v4857_v29 = vld [vmem:[#allocation9 + $0x1b8] sm:$0xff]  ;;  %v205_v30 = vld [vmem:[#allocation6 + $0x1d0] sm:$0xff]  ;;  %v200_v32 = vld [vmem:[#allocation6 + $0x1a8] sm:$0xff] }
  0x84   :  { %423 = vmatprep.subr.mxu0 %v274_v42  ;;  %494 = vmatprep.subr.mxu1 %v276_v43  ;;  %v4860_v31 = vld [vmem:[#allocation9 + $0x1b0] sm:$0xff]  ;;  %v4863_v33 = vld [vmem:[#allocation9 + $0x188] sm:$0xff]  ;;  %v199_v34 = vld [vmem:[#allocation6 + $0x1a0] sm:$0xff] }
  0x85   :  { %424 = vmatpush2.msra.mxu0 %v273_v44  ;;  %495 = vmatpush2.msra.mxu1 %v275_v45  ;;  %v4866_v35 = vld [vmem:[#allocation9 + $0x180] sm:$0xff]  ;;  %v194_v36 = vld [vmem:[#allocation6 + $0x178] sm:$0xff]  ;;  %v193_v38 = vld [vmem:[#allocation6 + $0x170] sm:$0xff] }
  0x86   :  { %425 = vmatprep.subr.mxu0 %v268_v46  ;;  %496 = vmatprep.subr.mxu1 %v270_v47  ;;  %v4869_v37 = vld [vmem:[#allocation9 + $0x158] sm:$0xff]  ;;  %v4872_v39 = vld [vmem:[#allocation9 + $0x150] sm:$0xff]  ;;  %v188_v40 = vld [vmem:[#allocation6 + $0x148] sm:$0xff] }
  0x87   :  { %426 = vmatpush2.msra.mxu0 %v267_v48  ;;  %497 = vmatpush2.msra.mxu1 %v269_v49  ;;  %v4875_v41 = vld [vmem:[#allocation9 + $0x128] sm:$0xff]  ;;  %v187_v42 = vld [vmem:[#allocation6 + $0x140] sm:$0xff]  ;;  %v182_v44 = vld [vmem:[#allocation6 + $0x118] sm:$0xff] }
  0x88   :  { %427 = vmatprep.subr.mxu0 %v262_v50  ;;  %498 = vmatprep.subr.mxu1 %v264_v51  ;;  %v4878_v43 = vld [vmem:[#allocation9 + $0x120] sm:$0xff]  ;;  %v4881_v45 = vld [vmem:[#allocation9 + $0xf8] sm:$0xff]  ;;  %v181_v46 = vld [vmem:[#allocation6 + $0x110] sm:$0xff] }
  0x89   :  { %428 = vmatpush2.msra.mxu0 %v261_v52  ;;  %499 = vmatpush2.msra.mxu1 %v263_v53  ;;  %v4884_v47 = vld [vmem:[#allocation9 + $0xf0] sm:$0xff]  ;;  %v176_v48 = vld [vmem:[#allocation6 + $0xe8] sm:$0xff]  ;;  %v175_v50 = vld [vmem:[#allocation6 + $0xe0] sm:$0xff] }
  0x8a   :  { %429 = vmatprep.subr.mxu0 %v256_v54  ;;  %500 = vmatprep.subr.mxu1 %v258_v55  ;;  %v4887_v49 = vld [vmem:[#allocation9 + $0xc8] sm:$0xff]  ;;  %v4890_v51 = vld [vmem:[#allocation9 + $0xc0] sm:$0xff]  ;;  %v170_v52 = vld [vmem:[#allocation6 + $0xb8] sm:$0xff] }
  0x8b   :  { %430 = vmatpush2.msra.mxu0 %v255_v56  ;;  %501 = vmatpush2.msra.mxu1 %v257_v57  ;;  %v4893_v53 = vld [vmem:[#allocation9 + $0x98] sm:$0xff]  ;;  %v169_v54 = vld [vmem:[#allocation6 + $0xb0] sm:$0xff]  ;;  %v164_v56 = vld [vmem:[#allocation6 + $0x88] sm:$0xff] }
  0x8c   :  { %431 = vmatprep.subr.mxu0 %v250_v58  ;;  %502 = vmatprep.subr.mxu1 %v252_v59  ;;  %v4896_v55 = vld [vmem:[#allocation9 + $0x90] sm:$0xff]  ;;  %v4899_v57 = vld [vmem:[#allocation9 + $0x68] sm:$0xff]  ;;  %v163_v58 = vld [vmem:[#allocation6 + $0x80] sm:$0xff] }
  0x8d   :  { %432 = vmatpush2.msra.mxu0 %v249_v60  ;;  %503 = vmatpush2.msra.mxu1 %v251_v61  ;;  %v4902_v59 = vld [vmem:[#allocation9 + $0x60] sm:$0xff]  ;;  %v158_v60 = vld [vmem:[#allocation6 + $0x58] sm:$0xff] }
  0x8e   :  { %433 = vmatprep.subr.mxu0 %v244_v62  ;;  %504 = vmatprep.subr.mxu1 %v246_v63  ;;  %v4905_v61 = vld [vmem:[#allocation9 + $0x38] sm:$0xff]  ;;  %v157_v62 = vld [vmem:[#allocation6 + $0x50] sm:$0xff] }
  0x8f   :  { %434 = vmatpush2.msra.mxu0 %v243_v0  ;;  %435 = vmatprep.mubr.f32.mxu0 %v4833_v1  ;;  %v4908_v63 = vld [vmem:[#allocation9 + $0x30] sm:$0xff]  ;;  %v152_v0 = vld [vmem:[#allocation6 + $0x28] sm:$0xff] }
  0x90   :  { %505 = vmatpush2.msra.mxu1 %v245_v2  ;;  %506 = vmatprep.mubr.f32.mxu1 %v4833_v1  ;;  %v4911_v2 = vld [vmem:[#allocation9 + $0x8] sm:$0xff] }
  0x91   :  { %436 = vmatmul.mubr.f32.vlgmr.msra.gmra.mxu0 %v4838_v3  ;;  %507 = vmatmul.mubr.f32.vlgmr.msra.gmra.mxu1 %v4838_v3  ;;  %8481 = vst [vmem:[#allocation23_spill] sm:$0xff] %v4911_v2 }
  0x92   :  { %513 = vmatprep.subr.mxu0 %v242_v4  ;;  %783 = vmatprep.subr.mxu1 %v681_v5  ;;  %v151_v4 = vld [vmem:[#allocation6 + $0x20] sm:$0xff] }
  0x93   :  { %514 = vmatpush1.msra.mxu0 %v241_v6  ;;  %784 = vmatpush1.msra.mxu1 %v680_v7  ;;  %v4914_v5 = vld [vmem:[#allocation9] sm:$0xff]  ;;  %v338_v6 = vld [vmem:[#allocation6 + $0x5f8] sm:$0xff] }
  0x94   :  { %515 = vmatprep.subr.mxu0 %v236_v8  ;;  %785 = vmatprep.subr.mxu1 %v675_v9  ;;  %8482 = vst [vmem:[#allocation24_spill] sm:$0xff] %v4914_v5  ;;  %v4917_v7 = vld [vmem:[#allocation9 + $0x5d8] sm:$0xff]  ;;  %v337_v8 = vld [vmem:[#allocation6 + $0x5f0] sm:$0xff] }
  0x95   :  { %516 = vmatpush1.msra.mxu0 %v235_v10  ;;  %786 = vmatpush1.msra.mxu1 %v674_v11  ;;  %8483 = vst [vmem:[#allocation25_spill] sm:$0xff] %v4917_v7  ;;  %v4920_v9 = vld [vmem:[#allocation9 + $0x5d0] sm:$0xff]  ;;  %v332_v10 = vld [vmem:[#allocation6 + $0x5c8] sm:$0xff] }
  0x96   :  { %517 = vmatprep.subr.mxu0 %v230_v12  ;;  %787 = vmatprep.subr.mxu1 %v669_v13  ;;  %8484 = vst [vmem:[#allocation26_spill] sm:$0xff] %v4920_v9  ;;  %v4923_v11 = vld [vmem:[#allocation9 + $0x5a8] sm:$0xff]  ;;  %v331_v12 = vld [vmem:[#allocation6 + $0x5c0] sm:$0xff] }
  0x97   :  { %518 = vmatpush1.msra.mxu0 %v229_v14  ;;  %788 = vmatpush1.msra.mxu1 %v668_v15  ;;  %8485 = vst [vmem:[#allocation27_spill] sm:$0xff] %v4923_v11  ;;  %v4926_v13 = vld [vmem:[#allocation9 + $0x5a0] sm:$0xff]  ;;  %v326_v14 = vld [vmem:[#allocation6 + $0x598] sm:$0xff] }
  0x98   :  { %519 = vmatprep.subr.mxu0 %v224_v16  ;;  %789 = vmatprep.subr.mxu1 %v663_v17  ;;  %8486 = vst [vmem:[#allocation28_spill] sm:$0xff] %v4926_v13  ;;  %v4929_v15 = vld [vmem:[#allocation9 + $0x578] sm:$0xff]  ;;  %v325_v16 = vld [vmem:[#allocation6 + $0x590] sm:$0xff] }
  0x99   :  { %520 = vmatpush1.msra.mxu0 %v223_v18  ;;  %790 = vmatpush1.msra.mxu1 %v4844_v19  ;;  %8487 = vst [vmem:[#allocation29_spill] sm:$0xff] %v4929_v15  ;;  %v4932_v17 = vld [vmem:[#allocation9 + $0x570] sm:$0xff]  ;;  %v320_v18 = vld [vmem:[#allocation6 + $0x568] sm:$0xff] }
  0x9a   :  { %521 = vmatprep.subr.mxu0 %v218_v20  ;;  %791 = vmatprep.subr.mxu1 %v4846_v21  ;;  %8488 = vst [vmem:[#allocation30_spill] sm:$0xff] %v4932_v17  ;;  %v4935_v20 = vld [vmem:[#allocation9 + $0x548] sm:$0xff] }
  0x9b   :  { %522 = vmatpush1.msra.mxu0 %v217_v22  ;;  %792 = vmatpush1.msra.mxu1 %v4848_v23  ;;  %8489 = vst [vmem:[#allocation31_spill] sm:$0xff] %v4935_v20  ;;  %v319_v22 = vld [vmem:[#allocation6 + $0x560] sm:$0xff] }
  0x9c   :  { %523 = vmatprep.subr.mxu0 %v212_v24  ;;  %793 = vmatprep.subr.mxu1 %v4851_v25  ;;  %v4938_v24 = vld [vmem:[#allocation9 + $0x540] sm:$0xff] }
  0x9d   :  { %524 = vmatpush1.msra.mxu0 %v211_v26  ;;  %794 = vmatpush1.msra.mxu1 %v4854_v27  ;;  %8490 = vst [vmem:[#allocation32_spill] sm:$0xff] %v4938_v24  ;;  %v314_v26 = vld [vmem:[#allocation6 + $0x538] sm:$0xff] }
  0x9e   :  { %525 = vmatprep.subr.mxu0 %v206_v28  ;;  %795 = vmatprep.subr.mxu1 %v4857_v29  ;;  %v4941_v28 = vld [vmem:[#allocation9 + $0x518] sm:$0xff] }
  0x9f   :  { %526 = vmatpush1.msra.mxu0 %v205_v30  ;;  %796 = vmatpush1.msra.mxu1 %v4860_v31  ;;  %8491 = vst [vmem:[#allocation33_spill] sm:$0xff] %v4941_v28  ;;  %v313_v30 = vld [vmem:[#allocation6 + $0x530] sm:$0xff] }
  0xa0   :  { %527 = vmatprep.subr.mxu0 %v200_v32  ;;  %797 = vmatprep.subr.mxu1 %v4863_v33  ;;  %v4944_v32 = vld [vmem:[#allocation9 + $0x510] sm:$0xff] }
  0xa1   :  { %528 = vmatpush1.msra.mxu0 %v199_v34  ;;  %798 = vmatpush1.msra.mxu1 %v4866_v35  ;;  %8492 = vst [vmem:[#allocation34_spill] sm:$0xff] %v4944_v32  ;;  %v308_v34 = vld [vmem:[#allocation6 + $0x508] sm:$0xff] }
  0xa2   :  { %529 = vmatprep.subr.mxu0 %v194_v36  ;;  %799 = vmatprep.subr.mxu1 %v4869_v37  ;;  %v4947_v36 = vld [vmem:[#allocation9 + $0x4e8] sm:$0xff] }
  0xa3   :  { %530 = vmatpush1.msra.mxu0 %v193_v38  ;;  %800 = vmatpush1.msra.mxu1 %v4872_v39  ;;  %8493 = vst [vmem:[#allocation35_spill] sm:$0xff] %v4947_v36  ;;  %v307_v38 = vld [vmem:[#allocation6 + $0x500] sm:$0xff] }
  0xa4   :  { %531 = vmatprep.subr.mxu0 %v188_v40  ;;  %801 = vmatprep.subr.mxu1 %v4875_v41  ;;  %v4950_v40 = vld [vmem:[#allocation9 + $0x4e0] sm:$0xff] }
  0xa5   :  { %532 = vmatpush1.msra.mxu0 %v187_v42  ;;  %802 = vmatpush1.msra.mxu1 %v4878_v43  ;;  %8494 = vst [vmem:[#allocation36_spill] sm:$0xff] %v4950_v40  ;;  %v302_v42 = vld [vmem:[#allocation6 + $0x4d8] sm:$0xff] }
  0xa6   :  { %533 = vmatprep.subr.mxu0 %v182_v44  ;;  %803 = vmatprep.subr.mxu1 %v4881_v45  ;;  %v4953_v44 = vld [vmem:[#allocation9 + $0x4b8] sm:$0xff] }
  0xa7   :  { %534 = vmatpush1.msra.mxu0 %v181_v46  ;;  %804 = vmatpush1.msra.mxu1 %v4884_v47  ;;  %8495 = vst [vmem:[#allocation37_spill] sm:$0xff] %v4953_v44  ;;  %v301_v46 = vld [vmem:[#allocation6 + $0x4d0] sm:$0xff] }
  0xa8   :  { %535 = vmatprep.subr.mxu0 %v176_v48  ;;  %805 = vmatprep.subr.mxu1 %v4887_v49  ;;  %v4956_v48 = vld [vmem:[#allocation9 + $0x4b0] sm:$0xff] }
  0xa9   :  { %536 = vmatpush1.msra.mxu0 %v175_v50  ;;  %806 = vmatpush1.msra.mxu1 %v4890_v51  ;;  %8496 = vst [vmem:[#allocation38_spill] sm:$0xff] %v4956_v48  ;;  %v296_v50 = vld [vmem:[#allocation6 + $0x4a8] sm:$0xff] }
  0xaa   :  { %537 = vmatprep.subr.mxu0 %v170_v52  ;;  %807 = vmatprep.subr.mxu1 %v4893_v53  ;;  %v4959_v52 = vld [vmem:[#allocation9 + $0x488] sm:$0xff] }
  0xab   :  { %538 = vmatpush1.msra.mxu0 %v169_v54  ;;  %808 = vmatpush1.msra.mxu1 %v4896_v55  ;;  %8497 = vst [vmem:[#allocation39_spill] sm:$0xff] %v4959_v52  ;;  %v295_v54 = vld [vmem:[#allocation6 + $0x4a0] sm:$0xff] }
  0xac   :  { %539 = vmatprep.subr.mxu0 %v164_v56  ;;  %809 = vmatprep.subr.mxu1 %v4899_v57  ;;  %v4962_v56 = vld [vmem:[#allocation9 + $0x480] sm:$0xff] }
  0xad   :  { %540 = vmatpush1.msra.mxu0 %v163_v58  ;;  %810 = vmatpush1.msra.mxu1 %v4902_v59  ;;  %8498 = vst [vmem:[#allocation40_spill] sm:$0xff] %v4962_v56  ;;  %v290_v58 = vld [vmem:[#allocation6 + $0x478] sm:$0xff] }
  0xae   :  { %541 = vmatprep.subr.mxu0 %v158_v60  ;;  %811 = vmatprep.subr.mxu1 %v4905_v61  ;;  %v4965_v60 = vld [vmem:[#allocation9 + $0x458] sm:$0xff] }
  0xaf   :  { %542 = vmatpush1.msra.mxu0 %v157_v62  ;;  %812 = vmatpush1.msra.mxu1 %v4908_v63  ;;  %8499 = vst [vmem:[#allocation41_spill] sm:$0xff] %v4965_v60  ;;  %v289_v62 = vld [vmem:[#allocation6 + $0x470] sm:$0xff] }
  0xb0   :  { %543 = vmatprep.subr.mxu0 %v152_v0  ;;  %813 = vmatprep.subr.mxu1 %v4911_v2  ;;  %v4968_v0 = vld [vmem:[#allocation9 + $0x450] sm:$0xff]  ;;  %v5221_v2 = vld [vmem:[#allocation9 + $0x5c8] sm:$0xff] }
  0xb1   :  { %544 = vmatpush1.msra.mxu0 %v151_v4  ;;  %814 = vmatpush1.msra.mxu1 %v4914_v5  ;;  %8500 = vst [vmem:[#allocation42_spill] sm:$0xff] %v4968_v0  ;;  %v284_v4 = vld [vmem:[#allocation6 + $0x448] sm:$0xff]  ;;  %v5215_v5 = vld [vmem:[#allocation9 + $0x5f0] sm:$0xff]  ;;  %8554 = vst [vmem:[#allocation96_spill] sm:$0xff] %v5221_v2 }
  0xb2   :  { %545 = vmatprep.subr.mxu0 %v338_v6  ;;  %815 = vmatprep.subr.mxu1 %v4917_v7  ;;  %v4971_v6 = vld [vmem:[#allocation9 + $0x428] sm:$0xff]  ;;  %v5209_v7 = vld [vmem:[#allocation9 + $0x5f8] sm:$0xff]  ;;  %8552 = vst [vmem:[#allocation94_spill] sm:$0xff] %v5215_v5 }
  0xb3   :  { %546 = vmatpush2.msra.mxu0 %v337_v8  ;;  %816 = vmatpush2.msra.mxu1 %v4920_v9  ;;  %8501 = vst [vmem:[#allocation43_spill] sm:$0xff] %v4971_v6  ;;  %v283_v8 = vld [vmem:[#allocation6 + $0x440] sm:$0xff]  ;;  %8550 = vst [vmem:[#allocation92_spill] sm:$0xff] %v5209_v7 }
  0xb4   :  { %547 = vmatprep.subr.mxu0 %v332_v10  ;;  %817 = vmatprep.subr.mxu1 %v4923_v11  ;;  %v4974_v10 = vld [vmem:[#allocation9 + $0x420] sm:$0xff]  ;;  %v5197_v11 = vld [vmem:[#allocation9 + $0x28] sm:$0xff] }
  0xb5   :  { %548 = vmatpush2.msra.mxu0 %v331_v12  ;;  %818 = vmatpush2.msra.mxu1 %v4926_v13  ;;  %8502 = vst [vmem:[#allocation44_spill] sm:$0xff] %v4974_v10  ;;  %v278_v12 = vld [vmem:[#allocation6 + $0x418] sm:$0xff]  ;;  %v5191_v13 = vld [vmem:[#allocation9 + $0x50] sm:$0xff]  ;;  %8546 = vst [vmem:[#allocation88_spill] sm:$0xff] %v5197_v11 }
  0xb6   :  { %549 = vmatprep.subr.mxu0 %v326_v14  ;;  %819 = vmatprep.subr.mxu1 %v4929_v15  ;;  %v4977_v14 = vld [vmem:[#allocation9 + $0x3f8] sm:$0xff]  ;;  %8544 = vst [vmem:[#allocation86_spill] sm:$0xff] %v5191_v13  ;;  %v5203_v9 = vld [vmem:[#allocation9 + $0x20] sm:$0xff] }
  0xb7   :  { %550 = vmatpush2.msra.mxu0 %v325_v16  ;;  %820 = vmatpush2.msra.mxu1 %v4932_v17  ;;  %8503 = vst [vmem:[#allocation45_spill] sm:$0xff] %v4977_v14  ;;  %v277_v16 = vld [vmem:[#allocation6 + $0x410] sm:$0xff]  ;;  %v5179_v17 = vld [vmem:[#allocation9 + $0x80] sm:$0xff]  ;;  %v5185_v15 = vld [vmem:[#allocation9 + $0x58] sm:$0xff] }
  0xb8   :  { %551 = vmatprep.subr.mxu0 %v320_v18  ;;  %821 = vmatprep.subr.mxu1 %v4935_v20  ;;  %v4980_v18 = vld [vmem:[#allocation9 + $0x3f0] sm:$0xff]  ;;  %v5173_v20 = vld [vmem:[#allocation9 + $0x88] sm:$0xff]  ;;  %8542 = vst [vmem:[#allocation84_spill] sm:$0xff] %v5179_v17  ;;  %8543 = vst [vmem:[#allocation85_spill] sm:$0xff] %v5185_v15 }
  0xb9   :  { %552 = vmatpush2.msra.mxu0 %v319_v22  ;;  %822 = vmatpush2.msra.mxu1 %v4938_v24  ;;  %8504 = vst [vmem:[#allocation46_spill] sm:$0xff] %v4980_v18  ;;  %v272_v22 = vld [vmem:[#allocation6 + $0x3e8] sm:$0xff]  ;;  %v5167_v24 = vld [vmem:[#allocation9 + $0xb0] sm:$0xff]  ;;  %8541 = vst [vmem:[#allocation83_spill] sm:$0xff] %v5173_v20 }
  0xba   :  { %553 = vmatprep.subr.mxu0 %v314_v26  ;;  %823 = vmatprep.subr.mxu1 %v4941_v28  ;;  %v4983_v26 = vld [vmem:[#allocation9 + $0x3c8] sm:$0xff]  ;;  %v5161_v28 = vld [vmem:[#allocation9 + $0xb8] sm:$0xff]  ;;  %8540 = vst [vmem:[#allocation82_spill] sm:$0xff] %v5167_v24  ;;  %8548 = vst [vmem:[#allocation90_spill] sm:$0xff] %v5203_v9 }
  0xbb   :  { %554 = vmatpush2.msra.mxu0 %v313_v30  ;;  %824 = vmatpush2.msra.mxu1 %v4944_v32  ;;  %8505 = vst [vmem:[#allocation47_spill] sm:$0xff] %v4983_v26  ;;  %v271_v30 = vld [vmem:[#allocation6 + $0x3e0] sm:$0xff]  ;;  %8539 = vst [vmem:[#allocation81_spill] sm:$0xff] %v5161_v28 }
  0xbc   :  { %555 = vmatprep.subr.mxu0 %v308_v34  ;;  %825 = vmatprep.subr.mxu1 %v4947_v36  ;;  %v4986_v34 = vld [vmem:[#allocation9 + $0x3c0] sm:$0xff]  ;;  %v5149_v36 = vld [vmem:[#allocation9 + $0xe8] sm:$0xff] }
  0xbd   :  { %556 = vmatpush2.msra.mxu0 %v307_v38  ;;  %826 = vmatpush2.msra.mxu1 %v4950_v40  ;;  %8506 = vst [vmem:[#allocation48_spill] sm:$0xff] %v4986_v34  ;;  %v266_v38 = vld [vmem:[#allocation6 + $0x3b8] sm:$0xff]  ;;  %v5143_v40 = vld [vmem:[#allocation9 + $0x110] sm:$0xff]  ;;  %8537 = vst [vmem:[#allocation79_spill] sm:$0xff] %v5149_v36 }
  0xbe   :  { %557 = vmatprep.subr.mxu0 %v302_v42  ;;  %827 = vmatprep.subr.mxu1 %v4953_v44  ;;  %v4989_v42 = vld [vmem:[#allocation9 + $0x398] sm:$0xff]  ;;  %8536 = vst [vmem:[#allocation78_spill] sm:$0xff] %v5143_v40  ;;  %v5155_v32 = vld [vmem:[#allocation9 + $0xe0] sm:$0xff] }
  0xbf   :  { %558 = vmatpush2.msra.mxu0 %v301_v46  ;;  %828 = vmatpush2.msra.mxu1 %v4956_v48  ;;  %8507 = vst [vmem:[#allocation49_spill] sm:$0xff] %v4989_v42  ;;  %v265_v46 = vld [vmem:[#allocation6 + $0x3b0] sm:$0xff]  ;;  %v5131_v48 = vld [vmem:[#allocation9 + $0x140] sm:$0xff]  ;;  %v5137_v44 = vld [vmem:[#allocation9 + $0x118] sm:$0xff] }
  0xc0   :  { %559 = vmatprep.subr.mxu0 %v296_v50  ;;  %829 = vmatprep.subr.mxu1 %v4959_v52  ;;  %v4992_v50 = vld [vmem:[#allocation9 + $0x390] sm:$0xff]  ;;  %v5125_v52 = vld [vmem:[#allocation9 + $0x148] sm:$0xff]  ;;  %8534 = vst [vmem:[#allocation76_spill] sm:$0xff] %v5131_v48  ;;  %8535 = vst [vmem:[#allocation77_spill] sm:$0xff] %v5137_v44 }
  0xc1   :  { %560 = vmatpush2.msra.mxu0 %v295_v54  ;;  %830 = vmatpush2.msra.mxu1 %v4962_v56  ;;  %8508 = vst [vmem:[#allocation50_spill] sm:$0xff] %v4992_v50  ;;  %v260_v54 = vld [vmem:[#allocation6 + $0x388] sm:$0xff]  ;;  %v5119_v56 = vld [vmem:[#allocation9 + $0x170] sm:$0xff]  ;;  %8533 = vst [vmem:[#allocation75_spill] sm:$0xff] %v5125_v52 }
  0xc2   :  { %561 = vmatprep.subr.mxu0 %v290_v58  ;;  %831 = vmatprep.subr.mxu1 %v4965_v60  ;;  %v4995_v58 = vld [vmem:[#allocation9 + $0x368] sm:$0xff]  ;;  %v5113_v60 = vld [vmem:[#allocation9 + $0x178] sm:$0xff]  ;;  %8532 = vst [vmem:[#allocation74_spill] sm:$0xff] %v5119_v56  ;;  %8538 = vst [vmem:[#allocation80_spill] sm:$0xff] %v5155_v32 }
  0xc3   :  { %562 = vmatpush2.msra.mxu0 %v289_v62  ;;  %832 = vmatpush2.msra.mxu1 %v4968_v0  ;;  %8509 = vst [vmem:[#allocation51_spill] sm:$0xff] %v4995_v58  ;;  %v259_v62 = vld [vmem:[#allocation6 + $0x380] sm:$0xff]  ;;  %8531 = vst [vmem:[#allocation73_spill] sm:$0xff] %v5113_v60 }
  0xc4   :  { %563 = vmatprep.subr.mxu0 %v284_v4  ;;  %833 = vmatprep.subr.mxu1 %v4971_v6  ;;  %v4998_v4 = vld [vmem:[#allocation9 + $0x360] sm:$0xff]  ;;  %v5101_v6 = vld [vmem:[#allocation9 + $0x1a8] sm:$0xff] }
  0xc5   :  { %564 = vmatpush2.msra.mxu0 %v283_v8  ;;  %834 = vmatpush2.msra.mxu1 %v4974_v10  ;;  %8510 = vst [vmem:[#allocation52_spill] sm:$0xff] %v4998_v4  ;;  %v254_v8 = vld [vmem:[#allocation6 + $0x358] sm:$0xff]  ;;  %v5095_v10 = vld [vmem:[#allocation9 + $0x1d0] sm:$0xff]  ;;  %8529 = vst [vmem:[#allocation71_spill] sm:$0xff] %v5101_v6 }
  0xc6   :  { %565 = vmatprep.subr.mxu0 %v278_v12  ;;  %835 = vmatprep.subr.mxu1 %v4977_v14  ;;  %v5001_v12 = vld [vmem:[#allocation9 + $0x338] sm:$0xff]  ;;  %8528 = vst [vmem:[#allocation70_spill] sm:$0xff] %v5095_v10  ;;  %v5107_v0 = vld [vmem:[#allocation9 + $0x1a0] sm:$0xff] }
  0xc7   :  { %566 = vmatpush2.msra.mxu0 %v277_v16  ;;  %836 = vmatpush2.msra.mxu1 %v4980_v18  ;;  %8511 = vst [vmem:[#allocation53_spill] sm:$0xff] %v5001_v12  ;;  %v253_v16 = vld [vmem:[#allocation6 + $0x350] sm:$0xff]  ;;  %v5083_v18 = vld [vmem:[#allocation9 + $0x200] sm:$0xff]  ;;  %v5089_v14 = vld [vmem:[#allocation9 + $0x1d8] sm:$0xff] }
  0xc8   :  { %567 = vmatprep.subr.mxu0 %v272_v22  ;;  %837 = vmatprep.subr.mxu1 %v4983_v26  ;;  %v5004_v22 = vld [vmem:[#allocation9 + $0x330] sm:$0xff]  ;;  %v5077_v26 = vld [vmem:[#allocation9 + $0x208] sm:$0xff]  ;;  %8526 = vst [vmem:[#allocation68_spill] sm:$0xff] %v5083_v18  ;;  %8527 = vst [vmem:[#allocation69_spill] sm:$0xff] %v5089_v14 }
  0xc9   :  { %568 = vmatpush2.msra.mxu0 %v271_v30  ;;  %838 = vmatpush2.msra.mxu1 %v4986_v34  ;;  %8512 = vst [vmem:[#allocation54_spill] sm:$0xff] %v5004_v22  ;;  %v248_v30 = vld [vmem:[#allocation6 + $0x328] sm:$0xff]  ;;  %v5071_v34 = vld [vmem:[#allocation9 + $0x230] sm:$0xff]  ;;  %8525 = vst [vmem:[#allocation67_spill] sm:$0xff] %v5077_v26 }
  0xca   :  { %569 = vmatprep.subr.mxu0 %v266_v38  ;;  %839 = vmatprep.subr.mxu1 %v4989_v42  ;;  %v5007_v38 = vld [vmem:[#allocation9 + $0x308] sm:$0xff]  ;;  %v5065_v42 = vld [vmem:[#allocation9 + $0x238] sm:$0xff]  ;;  %8524 = vst [vmem:[#allocation66_spill] sm:$0xff] %v5071_v34  ;;  %8530 = vst [vmem:[#allocation72_spill] sm:$0xff] %v5107_v0 }
  0xcb   :  { %570 = vmatpush2.msra.mxu0 %v265_v46  ;;  %840 = vmatpush2.msra.mxu1 %v4992_v50  ;;  %8513 = vst [vmem:[#allocation55_spill] sm:$0xff] %v5007_v38  ;;  %v247_v46 = vld [vmem:[#allocation6 + $0x320] sm:$0xff]  ;;  %8523 = vst [vmem:[#allocation65_spill] sm:$0xff] %v5065_v42 }
  0xcc   :  { %571 = vmatprep.subr.mxu0 %v260_v54  ;;  %841 = vmatprep.subr.mxu1 %v4995_v58  ;;  %v5011_v50 = vld [vmem:[#allocation9 + $0x300] sm:$0xff]  ;;  %v5014_v54 = vld [vmem:[#allocation9 + $0x2e8] sm:$0xff] }
  0xcd   :  { %572 = vmatpush2.msra.mxu0 %v259_v62  ;;  %842 = vmatpush2.msra.mxu1 %v4998_v4  ;;  %8514 = vst [vmem:[#allocation56_spill] sm:$0xff] %v5011_v50  ;;  %v5017_v62 = vld [vmem:[#allocation9 + $0x2f8] sm:$0xff]  ;;  %v5053_v4 = vld [vmem:[#allocation9 + $0x268] sm:$0xff]  ;;  %v5059_v58 = vld [vmem:[#allocation9 + $0x260] sm:$0xff] }
  0xce   :  { %573 = vmatprep.subr.mxu0 %v254_v8  ;;  %843 = vmatprep.subr.mxu1 %v5001_v12  ;;  %8515 = vst [vmem:[#allocation57_spill] sm:$0xff] %v5017_v62  ;;  %v5021_v8 = vld [vmem:[#allocation9 + $0x2e0] sm:$0xff]  ;;  %8521 = vst [vmem:[#allocation63_spill] sm:$0xff] %v5053_v4 }
  0xcf   :  { %574 = vmatpush2.msra.mxu0 %v253_v16  ;;  %844 = vmatpush2.msra.mxu1 %v5004_v22  ;;  %v5023_v16 = vld [vmem:[#allocation9 + $0x2f0] sm:$0xff]  ;;  %v7794_v22 = vmov 0.0   ;;  %v5045_v12 = vld [vmem:[#allocation9 + $0x280] sm:$0xff]  ;;  %8522 = vst [vmem:[#allocation64_spill] sm:$0xff] %v5059_v58 }
  0xd0   :  { %575 = vmatprep.subr.mxu0 %v248_v30  ;;  %845 = vmatprep.subr.mxu1 %v5007_v38  ;;  %8516 = vst [vmem:[#allocation58_spill] sm:$0xff] %v5023_v16  ;;  %v5027_v30 = vld [vmem:[#allocation9 + $0x2b8] sm:$0xff] }
  0xd1   :  { %576 = vmatpush2.msra.mxu0 %v247_v46  ;;  %577 = vmatprep.mubr.f32.mxu0 %v4833_v1  ;;  %v5029_v46 = vld [vmem:[#allocation9 + $0x2c8] sm:$0xff]  ;;  %v5033_v1 = vld [vmem:[#allocation9 + $0x2b0] sm:$0xff]  ;;  %v5041_v38 = vld [vmem:[#allocation9 + $0x298] sm:$0xff] }
  0xd2   :  { %846 = vmatpush2.msra.mxu1 %v5011_v50  ;;  %578 = vmatmul.mubr.f32.vlgmr.msra.gmra.mxu0 %v4838_v3  ;;  %8517 = vst [vmem:[#allocation59_spill] sm:$0xff] %v5029_v46  ;;  %v5035_v3 = vld [vmem:[#allocation9 + $0x2c0] sm:$0xff]  ;;  %v5039_v50 = vld [vmem:[#allocation9 + $0x288] sm:$0xff]  ;;  %8519 = vst [vmem:[#allocation61_spill] sm:$0xff] %v5041_v38 }
  0xd3   :  { %847 = vmatprep.mubr.f32.mxu1 %v7794_v22  ;;  %854 = vmatprep.subr.mxu0 %v5014_v54  ;;  %8518 = vst [vmem:[#allocation60_spill] sm:$0xff] %v5035_v3 }
  0xd4   :  { %925 = vmatprep.subr.mxu1 %v5017_v62  ;;  %848 = vmatmul.mubr.f32.vlgmr.msra.gmra.mxu1 %v7794_v22  ;;  %v5047_v62 = vld [vmem:[#allocation9 + $0x290] sm:$0xff]  ;;  %v5051_v22 = vld [vmem:[#allocation9 + $0x258] sm:$0xff] }
  0xd5   :  { %855 = vmatpush1.msra.mxu0 %v5021_v8  ;;  %926 = vmatpush1.msra.mxu1 %v5023_v16  ;;  %8520 = vst [vmem:[#allocation62_spill] sm:$0xff] %v5047_v62  ;;  %v5057_v16 = vld [vmem:[#allocation9 + $0x250] sm:$0xff] }
  0xd6   :  { %856 = vmatprep.subr.mxu0 %v5027_v30  ;;  %927 = vmatprep.subr.mxu1 %v5029_v46  ;;  %v5063_v46 = vld [vmem:[#allocation9 + $0x228] sm:$0xff] }
  0xd7   :  { %857 = vmatpush1.msra.mxu0 %v5033_v1  ;;  %928 = vmatpush1.msra.mxu1 %v5035_v3  ;;  %v5069_v3 = vld [vmem:[#allocation9 + $0x220] sm:$0xff] }
  0xd8   :  { %858 = vmatprep.subr.mxu0 %v5039_v50  ;;  %929 = vmatprep.subr.mxu1 %v5041_v38  ;;  %v5075_v38 = vld [vmem:[#allocation9 + $0x1f8] sm:$0xff] }
  0xd9   :  { %859 = vmatpush1.msra.mxu0 %v5045_v12  ;;  %930 = vmatpush1.msra.mxu1 %v5047_v62  ;;  %v5081_v62 = vld [vmem:[#allocation9 + $0x1f0] sm:$0xff] }
  0xda   :  { %860 = vmatprep.subr.mxu0 %v5051_v22  ;;  %931 = vmatprep.subr.mxu1 %v5053_v4  ;;  %v5087_v4 = vld [vmem:[#allocation9 + $0x1c8] sm:$0xff] }
  0xdb   :  { %861 = vmatpush1.msra.mxu0 %v5057_v16  ;;  %932 = vmatpush1.msra.mxu1 %v5059_v58  ;;  %v5093_v58 = vld [vmem:[#allocation9 + $0x1c0] sm:$0xff] }
  0xdc   :  { %862 = vmatprep.subr.mxu0 %v5063_v46  ;;  %933 = vmatprep.subr.mxu1 %v5065_v42  ;;  %v5099_v42 = vld [vmem:[#allocation9 + $0x198] sm:$0xff] }
  0xdd   :  { %863 = vmatpush1.msra.mxu0 %v5069_v3  ;;  %934 = vmatpush1.msra.mxu1 %v5071_v34  ;;  %v5105_v34 = vld [vmem:[#allocation9 + $0x190] sm:$0xff] }
  0xde   :  { %864 = vmatprep.subr.mxu0 %v5075_v38  ;;  %935 = vmatprep.subr.mxu1 %v5077_v26  ;;  %v5111_v26 = vld [vmem:[#allocation9 + $0x168] sm:$0xff] }
  0xdf   :  { %865 = vmatpush1.msra.mxu0 %v5081_v62  ;;  %936 = vmatpush1.msra.mxu1 %v5083_v18  ;;  %v5117_v18 = vld [vmem:[#allocation9 + $0x160] sm:$0xff] }
  0xe0   :  { %866 = vmatprep.subr.mxu0 %v5087_v4  ;;  %937 = vmatprep.subr.mxu1 %v5089_v14  ;;  %v5123_v14 = vld [vmem:[#allocation9 + $0x138] sm:$0xff] }
  0xe1   :  { %867 = vmatpush1.msra.mxu0 %v5093_v58  ;;  %938 = vmatpush1.msra.mxu1 %v5095_v10  ;;  %v5129_v10 = vld [vmem:[#allocation9 + $0x130] sm:$0xff] }
  0xe2   :  { %868 = vmatprep.subr.mxu0 %v5099_v42  ;;  %939 = vmatprep.subr.mxu1 %v5101_v6  ;;  %v5135_v6 = vld [vmem:[#allocation9 + $0x108] sm:$0xff] }
  0xe3   :  { %869 = vmatpush1.msra.mxu0 %v5105_v34  ;;  %940 = vmatpush1.msra.mxu1 %v5107_v0  ;;  %v5141_v0 = vld [vmem:[#allocation9 + $0x100] sm:$0xff] }
  0xe4   :  { %870 = vmatprep.subr.mxu0 %v5111_v26  ;;  %941 = vmatprep.subr.mxu1 %v5113_v60  ;;  %v5147_v60 = vld [vmem:[#allocation9 + $0xd8] sm:$0xff] }
  0xe5   :  { %871 = vmatpush1.msra.mxu0 %v5117_v18  ;;  %942 = vmatpush1.msra.mxu1 %v5119_v56  ;;  %v5153_v56 = vld [vmem:[#allocation9 + $0xd0] sm:$0xff] }
  0xe6   :  { %872 = vmatprep.subr.mxu0 %v5123_v14  ;;  %943 = vmatprep.subr.mxu1 %v5125_v52  ;;  %v5159_v52 = vld [vmem:[#allocation9 + $0xa8] sm:$0xff] }
  0xe7   :  { %873 = vmatpush1.msra.mxu0 %v5129_v10  ;;  %944 = vmatpush1.msra.mxu1 %v5131_v48  ;;  %v5165_v48 = vld [vmem:[#allocation9 + $0xa0] sm:$0xff] }
  0xe8   :  { %874 = vmatprep.subr.mxu0 %v5135_v6  ;;  %945 = vmatprep.subr.mxu1 %v5137_v44  ;;  %v5171_v44 = vld [vmem:[#allocation9 + $0x78] sm:$0xff] }
  0xe9   :  { %875 = vmatpush1.msra.mxu0 %v5141_v0  ;;  %946 = vmatpush1.msra.mxu1 %v5143_v40  ;;  %v5177_v40 = vld [vmem:[#allocation9 + $0x70] sm:$0xff] }
  0xea   :  { %876 = vmatprep.subr.mxu0 %v5147_v60  ;;  %947 = vmatprep.subr.mxu1 %v5149_v36  ;;  %v5183_v36 = vld [vmem:[#allocation9 + $0x48] sm:$0xff] }
  0xeb   :  { %877 = vmatpush1.msra.mxu0 %v5153_v56  ;;  %948 = vmatpush1.msra.mxu1 %v5155_v32  ;;  %v5189_v32 = vld [vmem:[#allocation9 + $0x40] sm:$0xff] }
  0xec   :  { %878 = vmatprep.subr.mxu0 %v5159_v52  ;;  %949 = vmatprep.subr.mxu1 %v5161_v28  ;;  %v5195_v28 = vld [vmem:[#allocation9 + $0x18] sm:$0xff] }
  0xed   :  { %879 = vmatpush1.msra.mxu0 %v5165_v48  ;;  %950 = vmatpush1.msra.mxu1 %v5167_v24  ;;  %8545 = vst [vmem:[#allocation87_spill] sm:$0xff] %v5195_v28  ;;  %v5201_v24 = vld [vmem:[#allocation9 + $0x10] sm:$0xff] }
  0xee   :  { %880 = vmatprep.subr.mxu0 %v5171_v44  ;;  %951 = vmatprep.subr.mxu1 %v5173_v20  ;;  %8547 = vst [vmem:[#allocation89_spill] sm:$0xff] %v5201_v24  ;;  %v5207_v20 = vld [vmem:[#allocation9 + $0x5e8] sm:$0xff] }
  0xef   :  { %881 = vmatpush1.msra.mxu0 %v5177_v40  ;;  %952 = vmatpush1.msra.mxu1 %v5179_v17  ;;  %8549 = vst [vmem:[#allocation91_spill] sm:$0xff] %v5207_v20  ;;  %v5213_v17 = vld [vmem:[#allocation9 + $0x5e0] sm:$0xff] }
  0xf0   :  { %882 = vmatprep.subr.mxu0 %v5183_v36  ;;  %953 = vmatprep.subr.mxu1 %v5185_v15  ;;  %8551 = vst [vmem:[#allocation93_spill] sm:$0xff] %v5213_v17  ;;  %v5219_v15 = vld [vmem:[#allocation9 + $0x5b8] sm:$0xff] }
  0xf1   :  { %883 = vmatpush1.msra.mxu0 %v5189_v32  ;;  %954 = vmatpush1.msra.mxu1 %v5191_v13  ;;  %8553 = vst [vmem:[#allocation95_spill] sm:$0xff] %v5219_v15  ;;  %v5225_v13 = vld [vmem:[#allocation9 + $0x5b0] sm:$0xff] }
  0xf2   :  { %884 = vmatprep.subr.mxu0 %v5195_v28  ;;  %955 = vmatprep.subr.mxu1 %v5197_v11  ;;  %8555 = vst [vmem:[#allocation97_spill] sm:$0xff] %v5225_v13  ;;  %v5227_v28 = vld [vmem:[#allocation9 + $0x5c0] sm:$0xff]  ;;  %v5231_v11 = vld [vmem:[#allocation9 + $0x588] sm:$0xff] }
  0xf3   :  { %885 = vmatpush1.msra.mxu0 %v5201_v24  ;;  %956 = vmatpush1.msra.mxu1 %v5203_v9  ;;  %8556 = vst [vmem:[#allocation98_spill] sm:$0xff] %v5227_v28  ;;  %8557 = vst [vmem:[#allocation99_spill] sm:$0xff] %v5231_v11  ;;  %v5233_v24 = vld [vmem:[#allocation9 + $0x598] sm:$0xff]  ;;  %v5237_v9 = vld [vmem:[#allocation9 + $0x580] sm:$0xff] }
  0xf4   :  { %886 = vmatprep.subr.mxu0 %v5207_v20  ;;  %957 = vmatprep.subr.mxu1 %v5209_v7  ;;  %8558 = vst [vmem:[#allocation100_spill] sm:$0xff] %v5233_v24  ;;  %8559 = vst [vmem:[#allocation101_spill] sm:$0xff] %v5237_v9  ;;  %v5239_v20 = vld [vmem:[#allocation9 + $0x590] sm:$0xff]  ;;  %v5243_v7 = vld [vmem:[#allocation9 + $0x558] sm:$0xff] }
  0xf5   :  { %887 = vmatpush2.msra.mxu0 %v5213_v17  ;;  %958 = vmatpush2.msra.mxu1 %v5215_v5  ;;  %8560 = vst [vmem:[#allocation102_spill] sm:$0xff] %v5239_v20  ;;  %8561 = vst [vmem:[#allocation103_spill] sm:$0xff] %v5243_v7  ;;  %v5245_v17 = vld [vmem:[#allocation9 + $0x568] sm:$0xff]  ;;  %v5249_v5 = vld [vmem:[#allocation9 + $0x550] sm:$0xff] }
  0xf6   :  { %888 = vmatprep.subr.mxu0 %v5219_v15  ;;  %959 = vmatprep.subr.mxu1 %v5221_v2  ;;  %8562 = vst [vmem:[#allocation104_spill] sm:$0xff] %v5245_v17  ;;  %8563 = vst [vmem:[#allocation105_spill] sm:$0xff] %v5249_v5  ;;  %v5251_v15 = vld [vmem:[#allocation9 + $0x560] sm:$0xff]  ;;  %v5255_v2 = vld [vmem:[#allocation9 + $0x528] sm:$0xff] }
  0xf7   :  { %889 = vmatpush2.msra.mxu0 %v5225_v13  ;;  %960 = vmatpush2.msra.mxu1 %v5227_v28  ;;  %8564 = vst [vmem:[#allocation106_spill] sm:$0xff] %v5251_v15  ;;  %8565 = vst [vmem:[#allocation107_spill] sm:$0xff] %v5255_v2  ;;  %v5257_v13 = vld [vmem:[#allocation9 + $0x538] sm:$0xff]  ;;  %v5261_v28 = vld [vmem:[#allocation9 + $0x520] sm:$0xff] }
  0xf8   :  { %890 = vmatprep.subr.mxu0 %v5231_v11  ;;  %961 = vmatprep.subr.mxu1 %v5233_v24  ;;  %8566 = vst [vmem:[#allocation108_spill] sm:$0xff] %v5257_v13  ;;  %8567 = vst [vmem:[#allocation109_spill] sm:$0xff] %v5261_v28  ;;  %v5263_v11 = vld [vmem:[#allocation9 + $0x530] sm:$0xff]  ;;  %v5267_v24 = vld [vmem:[#allocation9 + $0x4f8] sm:$0xff] }
  0xf9   :  { %891 = vmatpush2.msra.mxu0 %v5237_v9  ;;  %962 = vmatpush2.msra.mxu1 %v5239_v20  ;;  %8568 = vst [vmem:[#allocation110_spill] sm:$0xff] %v5263_v11  ;;  %8569 = vst [vmem:[#allocation111_spill] sm:$0xff] %v5267_v24  ;;  %v5269_v9 = vld [vmem:[#allocation9 + $0x508] sm:$0xff]  ;;  %v5273_v20 = vld [vmem:[#allocation9 + $0x4f0] sm:$0xff] }
  0xfa   :  { %892 = vmatprep.subr.mxu0 %v5243_v7  ;;  %963 = vmatprep.subr.mxu1 %v5245_v17  ;;  %8570 = vst [vmem:[#allocation112_spill] sm:$0xff] %v5269_v9  ;;  %8571 = vst [vmem:[#allocation113_spill] sm:$0xff] %v5273_v20  ;;  %v5275_v7 = vld [vmem:[#allocation9 + $0x500] sm:$0xff]  ;;  %v5279_v17 = vld [vmem:[#allocation9 + $0x4c8] sm:$0xff] }
  0xfb   :  { %893 = vmatpush2.msra.mxu0 %v5249_v5  ;;  %964 = vmatpush2.msra.mxu1 %v5251_v15  ;;  %8572 = vst [vmem:[#allocation114_spill] sm:$0xff] %v5275_v7  ;;  %8573 = vst [vmem:[#allocation115_spill] sm:$0xff] %v5279_v17  ;;  %v5281_v5 = vld [vmem:[#allocation9 + $0x4d8] sm:$0xff]  ;;  %v5285_v15 = vld [vmem:[#allocation9 + $0x4c0] sm:$0xff] }
  0xfc   :  { %894 = vmatprep.subr.mxu0 %v5255_v2  ;;  %965 = vmatprep.subr.mxu1 %v5257_v13  ;;  %8574 = vst [vmem:[#allocation116_spill] sm:$0xff] %v5281_v5  ;;  %8575 = vst [vmem:[#allocation117_spill] sm:$0xff] %v5285_v15  ;;  %v5287_v2 = vld [vmem:[#allocation9 + $0x4d0] sm:$0xff]  ;;  %v5291_v13 = vld [vmem:[#allocation9 + $0x498] sm:$0xff] }
  0xfd   :  { %895 = vmatpush2.msra.mxu0 %v5261_v28  ;;  %966 = vmatpush2.msra.mxu1 %v5263_v11  ;;  %8576 = vst [vmem:[#allocation118_spill] sm:$0xff] %v5287_v2  ;;  %8577 = vst [vmem:[#allocation119_spill] sm:$0xff] %v5291_v13  ;;  %v5293_v28 = vld [vmem:[#allocation9 + $0x4a8] sm:$0xff]  ;;  %v5297_v11 = vld [vmem:[#allocation9 + $0x490] sm:$0xff] }
  0xfe   :  { %896 = vmatprep.subr.mxu0 %v5267_v24  ;;  %967 = vmatprep.subr.mxu1 %v5269_v9  ;;  %8578 = vst [vmem:[#allocation120_spill] sm:$0xff] %v5293_v28  ;;  %8579 = vst [vmem:[#allocation121_spill] sm:$0xff] %v5297_v11  ;;  %v5299_v24 = vld [vmem:[#allocation9 + $0x4a0] sm:$0xff]  ;;  %v5303_v9 = vld [vmem:[#allocation9 + $0x468] sm:$0xff] }
  0xff   :  { %897 = vmatpush2.msra.mxu0 %v5273_v20  ;;  %968 = vmatpush2.msra.mxu1 %v5275_v7  ;;  %8580 = vst [vmem:[#allocation122_spill] sm:$0xff] %v5299_v24  ;;  %8581 = vst [vmem:[#allocation123_spill] sm:$0xff] %v5303_v9  ;;  %v5305_v20 = vld [vmem:[#allocation9 + $0x478] sm:$0xff]  ;;  %v5309_v7 = vld [vmem:[#allocation9 + $0x460] sm:$0xff] }
 0x100   :  { %898 = vmatprep.subr.mxu0 %v5279_v17  ;;  %969 = vmatprep.subr.mxu1 %v5281_v5  ;;  %8582 = vst [vmem:[#allocation124_spill] sm:$0xff] %v5305_v20  ;;  %8583 = vst [vmem:[#allocation125_spill] sm:$0xff] %v5309_v7  ;;  %v5311_v17 = vld [vmem:[#allocation9 + $0x470] sm:$0xff]  ;;  %v5315_v5 = vld [vmem:[#allocation9 + $0x438] sm:$0xff] }
 0x101   :  { %899 = vmatpush2.msra.mxu0 %v5285_v15  ;;  %970 = vmatpush2.msra.mxu1 %v5287_v2  ;;  %8584 = vst [vmem:[#allocation126_spill] sm:$0xff] %v5311_v17  ;;  %8585 = vst [vmem:[#allocation127_spill] sm:$0xff] %v5315_v5  ;;  %v5317_v15 = vld [vmem:[#allocation9 + $0x448] sm:$0xff]  ;;  %v5321_v2 = vld [vmem:[#allocation9 + $0x430] sm:$0xff] }
 0x102   :  { %900 = vmatprep.subr.mxu0 %v5291_v13  ;;  %971 = vmatprep.subr.mxu1 %v5293_v28  ;;  %8586 = vst [vmem:[#allocation128_spill] sm:$0xff] %v5317_v15  ;;  %8587 = vst [vmem:[#allocation129_spill] sm:$0xff] %v5321_v2  ;;  %v5323_v13 = vld [vmem:[#allocation9 + $0x440] sm:$0xff]  ;;  %v5327_v28 = vld [vmem:[#allocation9 + $0x408] sm:$0xff] }
 0x103   :  { %901 = vmatpush2.msra.mxu0 %v5297_v11  ;;  %972 = vmatpush2.msra.mxu1 %v5299_v24  ;;  %8588 = vst [vmem:[#allocation130_spill] sm:$0xff] %v5323_v13  ;;  %8589 = vst [vmem:[#allocation131_spill] sm:$0xff] %v5327_v28  ;;  %v5329_v11 = vld [vmem:[#allocation9 + $0x418] sm:$0xff]  ;;  %v5333_v24 = vld [vmem:[#allocation9 + $0x400] sm:$0xff] }
 0x104   :  { %902 = vmatprep.subr.mxu0 %v5303_v9  ;;  %973 = vmatprep.subr.mxu1 %v5305_v20  ;;  %8590 = vst [vmem:[#allocation132_spill] sm:$0xff] %v5329_v11  ;;  %8591 = vst [vmem:[#allocation133_spill] sm:$0xff] %v5333_v24  ;;  %v5335_v9 = vld [vmem:[#allocation9 + $0x410] sm:$0xff]  ;;  %v5339_v20 = vld [vmem:[#allocation9 + $0x3d8] sm:$0xff] }
 0x105   :  { %903 = vmatpush2.msra.mxu0 %v5309_v7  ;;  %974 = vmatpush2.msra.mxu1 %v5311_v17  ;;  %8592 = vst [vmem:[#allocation134_spill] sm:$0xff] %v5335_v9  ;;  %8593 = vst [vmem:[#allocation135_spill] sm:$0xff] %v5339_v20  ;;  %v5341_v7 = vld [vmem:[#allocation9 + $0x3e8] sm:$0xff]  ;;  %v5345_v17 = vld [vmem:[#allocation9 + $0x3d0] sm:$0xff] }
 0x106   :  { %904 = vmatprep.subr.mxu0 %v5315_v5  ;;  %975 = vmatprep.subr.mxu1 %v5317_v15  ;;  %8594 = vst [vmem:[#allocation136_spill] sm:$0xff] %v5341_v7  ;;  %8595 = vst [vmem:[#allocation137_spill] sm:$0xff] %v5345_v17  ;;  %v5347_v5 = vld [vmem:[#allocation9 + $0x3e0] sm:$0xff]  ;;  %v5351_v15 = vld [vmem:[#allocation9 + $0x3a8] sm:$0xff] }
 0x107   :  { %905 = vmatpush2.msra.mxu0 %v5321_v2  ;;  %976 = vmatpush2.msra.mxu1 %v5323_v13  ;;  %8596 = vst [vmem:[#allocation138_spill] sm:$0xff] %v5347_v5  ;;  %8597 = vst [vmem:[#allocation139_spill] sm:$0xff] %v5351_v15  ;;  %v5353_v2 = vld [vmem:[#allocation9 + $0x3b8] sm:$0xff]  ;;  %v5357_v13 = vld [vmem:[#allocation9 + $0x3a0] sm:$0xff] }
 0x108   :  { %906 = vmatprep.subr.mxu0 %v5327_v28  ;;  %977 = vmatprep.subr.mxu1 %v5329_v11  ;;  %8598 = vst [vmem:[#allocation140_spill] sm:$0xff] %v5353_v2  ;;  %8599 = vst [vmem:[#allocation141_spill] sm:$0xff] %v5357_v13  ;;  %v5359_v28 = vld [vmem:[#allocation9 + $0x3b0] sm:$0xff]  ;;  %v5363_v11 = vld [vmem:[#allocation9 + $0x378] sm:$0xff] }
 0x109   :  { %907 = vmatpush2.msra.mxu0 %v5333_v24  ;;  %978 = vmatpush2.msra.mxu1 %v5335_v9  ;;  %8600 = vst [vmem:[#allocation142_spill] sm:$0xff] %v5359_v28  ;;  %v5365_v24 = vld [vmem:[#allocation9 + $0x388] sm:$0xff]  ;;  %v5369_v9 = vld [vmem:[#allocation9 + $0x370] sm:$0xff] }
 0x10a   :  { %908 = vmatprep.subr.mxu0 %v5339_v20  ;;  %979 = vmatprep.subr.mxu1 %v5341_v7  ;;  %8601 = vst [vmem:[#allocation143_spill] sm:$0xff] %v5365_v24  ;;  %v5371_v20 = vld [vmem:[#allocation9 + $0x380] sm:$0xff]  ;;  %v5375_v7 = vld [vmem:[#allocation9 + $0x348] sm:$0xff] }
 0x10b   :  { %909 = vmatpush2.msra.mxu0 %v5345_v17  ;;  %980 = vmatpush2.msra.mxu1 %v5347_v5  ;;  %8602 = vst [vmem:[#allocation144_spill] sm:$0xff] %v5371_v20  ;;  %v5377_v17 = vld [vmem:[#allocation9 + $0x358] sm:$0xff]  ;;  %v5381_v5 = vld [vmem:[#allocation9 + $0x340] sm:$0xff] }
 0x10c   :  { %910 = vmatprep.subr.mxu0 %v5351_v15  ;;  %981 = vmatprep.subr.mxu1 %v5353_v2  ;;  %8603 = vst [vmem:[#allocation145_spill] sm:$0xff] %v5377_v17  ;;  %v5383_v15 = vld [vmem:[#allocation9 + $0x350] sm:$0xff]  ;;  %v5387_v2 = vld [vmem:[#allocation9 + $0x318] sm:$0xff] }
 0x10d   :  { %911 = vmatpush2.msra.mxu0 %v5357_v13  ;;  %982 = vmatpush2.msra.mxu1 %v5359_v28  ;;  %8604 = vst [vmem:[#allocation146_spill] sm:$0xff] %v5383_v15  ;;  %v5389_v13 = vld [vmem:[#allocation9 + $0x328] sm:$0xff]  ;;  %v5393_v28 = vld [vmem:[#allocation9 + $0x310] sm:$0xff] }
 0x10e   :  { %912 = vmatprep.subr.mxu0 %v5363_v11  ;;  %983 = vmatprep.subr.mxu1 %v5365_v24  ;;  %8605 = vst [vmem:[#allocation147_spill] sm:$0xff] %v5389_v13  ;;  %v5397_v24 = vld [vmem:[#allocation9 + $0x320] sm:$0xff] }
 0x10f   :  { %913 = vmatpush2.msra.mxu0 %v5369_v9  ;;  %984 = vmatpush2.msra.mxu1 %v5371_v20  ;;  %8606 = vst [vmem:[#allocation148_spill] sm:$0xff] %v5397_v24  ;;  %v8607_v20 = vmov 0.0  }
 0x110   :  { %914 = vmatprep.subr.mxu0 %v5375_v7  ;;  %985 = vmatprep.subr.mxu1 %v5377_v17  ;;  %v5407_v17 = vld [vmem:[#allocation9 + $0x2d8] sm:$0xff] }
 0x111   :  { %915 = vmatpush2.msra.mxu0 %v5381_v5  ;;  %986 = vmatpush2.msra.mxu1 %v5383_v15  ;;  %v5411_v15 = vld [vmem:[#allocation9 + $0x2d0] sm:$0xff] }
 0x112   :  { %916 = vmatprep.subr.mxu0 %v5387_v2  ;;  %987 = vmatprep.subr.mxu1 %v5389_v13  ;;  %v5415_v13 = vld [vmem:[#allocation9 + $0x2a8] sm:$0xff] }
 0x113   :  { %917 = vmatpush2.msra.mxu0 %v5393_v28  ;;  %918 = vmatprep.mubr.f32.mxu0 %v8607_v20 }
 0x114   :  { %988 = vmatpush2.msra.mxu1 %v5397_v24  ;;  %989 = vmatprep.mubr.f32.mxu1 %v8607_v20  ;;  %v5419_v24 = vld [vmem:[#allocation9 + $0x2a0] sm:$0xff] }
 0x115   :  { %919 = vmatmul.mubr.f32.vlgmr.msra.gmra.mxu0 %v8607_v20  ;;  %990 = vmatmul.mubr.f32.vlgmr.msra.gmra.mxu1 %v8607_v20  ;;  %v5423_v20 = vld [vmem:[#allocation9 + $0x278] sm:$0xff] }
 0x116   :  { %1105 = vmatprep.subr.mxu0 %v5407_v17  ;;  %1176 = vmatprep.subr.mxu1 %v5014_v54  ;;  %v5427_v54 = vld [vmem:[#allocation9 + $0x270] sm:$0xff] }
 0x117   :  { %1106 = vmatpush1.msra.mxu0 %v5411_v15  ;;  %1177 = vmatpush1.msra.mxu1 %v5021_v8  ;;  %v5431_v8 = vld [vmem:[#allocation9 + $0x248] sm:$0xff] }
 0x118   :  { %1107 = vmatprep.subr.mxu0 %v5415_v13  ;;  %1178 = vmatprep.subr.mxu1 %v5027_v30 }
 0x119   :  { %1108 = vmatpush1.msra.mxu0 %v5419_v24  ;;  %1179 = vmatpush1.msra.mxu1 %v5033_v1  ;;  %v8653_v1 = vld [vmem:[#allocation131_spill] sm:$0xff] }
 0x11a   :  { %1109 = vmatprep.subr.mxu0 %v5423_v20  ;;  %1180 = vmatprep.subr.mxu1 %v5039_v50  ;;  %v8645_v50 = vld [vmem:[#allocation123_spill] sm:$0xff] }
 0x11b   :  { %1110 = vmatpush1.msra.mxu0 %v5427_v54  ;;  %1181 = vmatpush1.msra.mxu1 %v5045_v12  ;;  %v8648_v12 = vld [vmem:[#allocation43_spill] sm:$0xff] }
 0x11c   :  { %1111 = vmatprep.subr.mxu0 %v5431_v8  ;;  %1182 = vmatprep.subr.mxu1 %v5051_v22  ;;  %v8649_v22 = vld [vmem:[#allocation127_spill] sm:$0xff] }
 0x11d   :  { %1112 = vmatpush1.msra.mxu0 %v4844_v19  ;;  %1183 = vmatpush1.msra.mxu1 %v5057_v16  ;;  %v8608_v19 = vld [vmem:[#allocation23_spill] sm:$0xff] }
 0x11e   :  { %1113 = vmatprep.subr.mxu0 %v4846_v21  ;;  %1184 = vmatprep.subr.mxu1 %v5063_v46  ;;  %v8609_v21 = vld [vmem:[#allocation87_spill] sm:$0xff]  ;;  %v8652_v46 = vld [vmem:[#allocation45_spill] sm:$0xff] }
 0x11f   :  { %1114 = vmatpush1.msra.mxu0 %v4848_v23  ;;  %1185 = vmatpush1.msra.mxu1 %v5069_v3  ;;  %v8610_v23 = vld [vmem:[#allocation24_spill] sm:$0xff]  ;;  %v339_v3 = vld [vmem:[%s8654_s22] sm:$0x3f] }
 0x120   :  { %1115 = vmatprep.subr.mxu0 %v4851_v25  ;;  %1186 = vmatprep.subr.mxu1 %v5075_v38  ;;  %v8611_v25 = vld [vmem:[#allocation89_spill] sm:$0xff]  ;;  %v8650_v38 = vld [vmem:[#allocation44_spill] sm:$0xff] }
 0x121   :  { %1116 = vmatpush1.msra.mxu0 %v4854_v27  ;;  %1187 = vmatpush1.msra.mxu1 %v5081_v62  ;;  %v8612_v27 = vld [vmem:[#allocation25_spill] sm:$0xff] }
 0x122   :  { %1117 = vmatprep.subr.mxu0 %v4857_v29  ;;  %1188 = vmatprep.subr.mxu1 %v5087_v4  ;;  %v8613_v29 = vld [vmem:[#allocation91_spill] sm:$0xff]  ;;  %v8647_v4 = vld [vmem:[#allocation125_spill] sm:$0xff] }
 0x123   :  { %1118 = vmatpush1.msra.mxu0 %v4860_v31  ;;  %1189 = vmatpush1.msra.mxu1 %v5093_v58  ;;  %v8614_v31 = vld [vmem:[#allocation26_spill] sm:$0xff]  ;;  %v8651_v62 = vld [vmem:[#allocation129_spill] sm:$0xff] }
 0x124   :  { %1119 = vmatprep.subr.mxu0 %v4863_v33  ;;  %1190 = vmatprep.subr.mxu1 %v5099_v42  ;;  %v8615_v33 = vld [vmem:[#allocation93_spill] sm:$0xff]  ;;  %v8646_v58 = vld [vmem:[#allocation42_spill] sm:$0xff] }
 0x125   :  { %1120 = vmatpush1.msra.mxu0 %v4866_v35  ;;  %1191 = vmatpush1.msra.mxu1 %v5105_v34  ;;  %v8616_v35 = vld [vmem:[#allocation27_spill] sm:$0xff]  ;;  %v8644_v42 = vld [vmem:[#allocation41_spill] sm:$0xff] }
 0x126   :  { %1121 = vmatprep.subr.mxu0 %v4869_v37  ;;  %1192 = vmatprep.subr.mxu1 %v5111_v26  ;;  %v8617_v37 = vld [vmem:[#allocation95_spill] sm:$0xff]  ;;  %v8643_v26 = vld [vmem:[#allocation121_spill] sm:$0xff] }
 0x127   :  { %1122 = vmatpush1.msra.mxu0 %v4872_v39  ;;  %1193 = vmatpush1.msra.mxu1 %v5117_v18  ;;  %v8618_v39 = vld [vmem:[#allocation28_spill] sm:$0xff] }
 0x128   :  { %1123 = vmatprep.subr.mxu0 %v4875_v41  ;;  %1194 = vmatprep.subr.mxu1 %v5123_v14  ;;  %v8619_v41 = vld [vmem:[#allocation97_spill] sm:$0xff]  ;;  %v8641_v14 = vld [vmem:[#allocation119_spill] sm:$0xff]  ;;  %v8642_v18 = vld [vmem:[#allocation40_spill] sm:$0xff] }
 0x129   :  { %1124 = vmatpush1.msra.mxu0 %v4878_v43  ;;  %1195 = vmatpush1.msra.mxu1 %v5129_v10  ;;  %v8620_v43 = vld [vmem:[#allocation29_spill] sm:$0xff]  ;;  %v8640_v10 = vld [vmem:[#allocation39_spill] sm:$0xff] }
 0x12a   :  { %1125 = vmatprep.subr.mxu0 %v4881_v45  ;;  %1196 = vmatprep.subr.mxu1 %v5135_v6  ;;  %v8621_v45 = vld [vmem:[#allocation99_spill] sm:$0xff]  ;;  %v8639_v6 = vld [vmem:[#allocation117_spill] sm:$0xff] }
 0x12b   :  { %1126 = vmatpush1.msra.mxu0 %v4884_v47  ;;  %1197 = vmatpush1.msra.mxu1 %v5141_v0  ;;  %v8622_v47 = vld [vmem:[#allocation30_spill] sm:$0xff] }
 0x12c   :  { %1127 = vmatprep.subr.mxu0 %v4887_v49  ;;  %1198 = vmatprep.subr.mxu1 %v5147_v60  ;;  %v8623_v49 = vld [vmem:[#allocation101_spill] sm:$0xff]  ;;  %v8637_v60 = vld [vmem:[#allocation115_spill] sm:$0xff]  ;;  %v8638_v0 = vld [vmem:[#allocation38_spill] sm:$0xff] }
 0x12d   :  { %1128 = vmatpush1.msra.mxu0 %v4890_v51  ;;  %1199 = vmatpush1.msra.mxu1 %v5153_v56  ;;  %v8624_v51 = vld [vmem:[#allocation31_spill] sm:$0xff]  ;;  %v8636_v56 = vld [vmem:[#allocation37_spill] sm:$0xff] }
 0x12e   :  { %1129 = vmatprep.subr.mxu0 %v4893_v53  ;;  %1200 = vmatprep.subr.mxu1 %v5159_v52  ;;  %v8625_v53 = vld [vmem:[#allocation103_spill] sm:$0xff]  ;;  %v341_v52 = vlaneseq }
 0x12f   :  { %1130 = vmatpush1.msra.mxu0 %v4896_v55  ;;  %1201 = vmatpush1.msra.mxu1 %v5165_v48  ;;  %v8626_v55 = vld [vmem:[#allocation32_spill] sm:$0xff]  ;;  %v8635_v48 = vld [vmem:[#allocation113_spill] sm:$0xff] }
 0x130   :  { %1131 = vmatprep.subr.mxu0 %v4899_v57  ;;  %1202 = vmatprep.subr.mxu1 %v5171_v44  ;;  %v8627_v57 = vld [vmem:[#allocation105_spill] sm:$0xff]  ;;  %v8634_v44 = vld [vmem:[#allocation36_spill] sm:$0xff]  ;;  %v5517_v34 = vshrl.u32 %v341_v52, 7 }
 0x131   :  { %1132 = vmatpush1.msra.mxu0 %v4902_v59  ;;  %1203 = vmatpush1.msra.mxu1 %v5177_v40  ;;  %v8628_v59 = vld [vmem:[#allocation33_spill] sm:$0xff]  ;;  %v8633_v40 = vld [vmem:[#allocation111_spill] sm:$0xff]  ;;  %v8666_v52 = vld [vmem:[#allocation52_spill] sm:$0xff] }
 0x132   :  { %1133 = vmatprep.subr.mxu0 %v4905_v61  ;;  %1204 = vmatprep.subr.mxu1 %v5183_v36  ;;  %v8629_v61 = vld [vmem:[#allocation107_spill] sm:$0xff]  ;;  %v5528_v16 = vsub.s32 0, %v5517_v34  ;;  %v351_v30 = vsub.s32 2, %v5517_v34 }
 0x133   :  { %1134 = vmatpush1.msra.mxu0 %v4908_v63  ;;  %1205 = vmatpush1.msra.mxu1 %v5189_v32  ;;  %v8630_v63 = vld [vmem:[#allocation34_spill] sm:$0xff]  ;;  %v8631_v32 = vld [vmem:[#allocation109_spill] sm:$0xff]  ;;  %v8632_v36 = vld [vmem:[#allocation35_spill] sm:$0xff] }
 0x134   :  { %1135 = vmatprep.subr.mxu0 %v8608_v19  ;;  %1206 = vmatprep.subr.mxu1 %v8609_v21  ;;  %v8655_v19 = vld [vmem:[#allocation46_spill] sm:$0xff]  ;;  %v8656_v21 = vld [vmem:[#allocation133_spill] sm:$0xff] }
 0x135   :  { %1136 = vmatpush1.msra.mxu0 %v8610_v23  ;;  %1207 = vmatpush1.msra.mxu1 %v8611_v25  ;;  %v5539_v23 = vsub.s32 1, %v5517_v34  ;;  %v355_v25 = vsub.s32 3, %v5517_v34 }
 0x136   :  { %1137 = vmatprep.subr.mxu0 %v8612_v27  ;;  %1208 = vmatprep.subr.mxu1 %v8613_v29  ;;  %v8657_v27 = vld [vmem:[#allocation47_spill] sm:$0xff] }
 0x137   :  { %1138 = vmatpush2.msra.mxu0 %v8614_v31  ;;  %1209 = vmatpush2.msra.mxu1 %v8615_v33  ;;  %v8658_v29 = vld [vmem:[#allocation135_spill] sm:$0xff]  ;;  %v8659_v31 = vld [vmem:[#allocation48_spill] sm:$0xff]  ;;  %v8660_v33 = vld [vmem:[#allocation137_spill] sm:$0xff] }
 0x138   :  { %1139 = vmatprep.subr.mxu0 %v8616_v35  ;;  %1210 = vmatprep.subr.mxu1 %v8617_v37  ;;  %v344_v35 = vrot.slane %v339_v3, %v5528_v16  ;;  %v352_v37 = vrot.slane %v339_v3, %v351_v30  ;;  %v8669_v30 = vld [vmem:[#allocation55_spill] sm:$0xff] }
 0x139   :  { %1140 = vmatpush2.msra.mxu0 %v8618_v39  ;;  %1211 = vmatpush2.msra.mxu1 %v8619_v41  ;;  %v8661_v39 = vld [vmem:[#allocation49_spill] sm:$0xff] }
 0x13a   :  { %1141 = vmatprep.subr.mxu0 %v8620_v43  ;;  %1212 = vmatprep.subr.mxu1 %v8621_v45  ;;  %v8662_v43 = vld [vmem:[#allocation139_spill] sm:$0xff] }
 0x13b   :  { %1142 = vmatpush2.msra.mxu0 %v8622_v47  ;;  %1213 = vmatpush2.msra.mxu1 %v8623_v49  ;;  %v8663_v47 = vld [vmem:[#allocation50_spill] sm:$0xff] }
 0x13c   :  { %1143 = vmatprep.subr.mxu0 %v8624_v51  ;;  %1214 = vmatprep.subr.mxu1 %v8625_v53  ;;  %v8664_v51 = vld [vmem:[#allocation141_spill] sm:$0xff] }
 0x13d   :  { %1144 = vmatpush2.msra.mxu0 %v8626_v55  ;;  %1215 = vmatpush2.msra.mxu1 %v8627_v57  ;;  %v348_v55 = vrot.slane %v339_v3, %v5539_v23 }
 0x13e   :  { %1145 = vmatprep.subr.mxu0 %v8628_v59  ;;  %1216 = vmatprep.subr.mxu1 %v8629_v61  ;;  %v356_v59 = vrot.slane %v339_v3, %v355_v25  ;;  %v359_v25 = vsub.s32 4, %v5517_v34 }
 0x13f   :  { %1146 = vmatpush2.msra.mxu0 %v8630_v63  ;;  %1217 = vmatpush2.msra.mxu1 %v8631_v32  ;;  %v8665_v63 = vld [vmem:[#allocation51_spill] sm:$0xff] }
 0x140   :  { %1147 = vmatprep.subr.mxu0 %v8632_v36  ;;  %1218 = vmatprep.subr.mxu1 %v8633_v40 }
 0x141   :  { %1148 = vmatpush2.msra.mxu0 %v8634_v44  ;;  %1219 = vmatpush2.msra.mxu1 %v8635_v48 }
 0x142   :  { %1149 = vmatprep.subr.mxu0 %v8636_v56  ;;  %1220 = vmatprep.subr.mxu1 %v8637_v60 }
 0x143   :  { %1150 = vmatpush2.msra.mxu0 %v8638_v0  ;;  %1221 = vmatpush2.msra.mxu1 %v8639_v6 }
 0x144   :  { %1151 = vmatprep.subr.mxu0 %v8640_v10  ;;  %1222 = vmatprep.subr.mxu1 %v8641_v14  ;;  %v8667_v10 = vld [vmem:[#allocation53_spill] sm:$0xff] }
 0x145   :  { %1152 = vmatpush2.msra.mxu0 %v8642_v18  ;;  %1223 = vmatpush2.msra.mxu1 %v8643_v26 }
 0x146   :  { %1153 = vmatprep.subr.mxu0 %v8644_v42  ;;  %1224 = vmatprep.subr.mxu1 %v8645_v50 }
 0x147   :  { %1154 = vmatpush2.msra.mxu0 %v8646_v58  ;;  %1225 = vmatpush2.msra.mxu1 %v8647_v4  ;;  %v8668_v58 = vld [vmem:[#allocation54_spill] sm:$0xff] }
 0x148   :  { %1155 = vmatprep.subr.mxu0 %v8648_v12  ;;  %1226 = vmatprep.subr.mxu1 %v8649_v22 }
 0x149   :  { %1156 = vmatpush2.msra.mxu0 %v8650_v38  ;;  %1227 = vmatpush2.msra.mxu1 %v8651_v62 }
 0x14a   :  { %1157 = vmatprep.subr.mxu0 %v8652_v46  ;;  %1228 = vmatprep.subr.mxu1 %v8653_v1  ;;  %v8670_v46 = vld [vmem:[#allocation56_spill] sm:$0xff] }
 0x14b   :  { %1158 = vmatpush2.msra.mxu0 %v8655_v19  ;;  %1229 = vmatpush2.msra.mxu1 %v8656_v21  ;;  %v8671_v19 = vld [vmem:[#allocation57_spill] sm:$0xff] }
 0x14c   :  { %1159 = vmatprep.subr.mxu0 %v8657_v27  ;;  %1230 = vmatprep.subr.mxu1 %v8658_v29  ;;  %v363_v27 = vsub.s32 5, %v5517_v34 }
 0x14d   :  { %1160 = vmatpush2.msra.mxu0 %v8659_v31  ;;  %1231 = vmatpush2.msra.mxu1 %v8660_v33  ;;  %v360_v31 = vrot.slane %v339_v3, %v359_v25 }
 0x14e   :  { %1161 = vmatprep.subr.mxu0 %v8661_v39  ;;  %1232 = vmatprep.subr.mxu1 %v8662_v43 }
 0x14f   :  { %1162 = vmatpush2.msra.mxu0 %v8663_v47  ;;  %1233 = vmatpush2.msra.mxu1 %v8664_v51 }
 0x150   :  { %1163 = vmatprep.subr.mxu0 %v8665_v63  ;;  %1234 = vmatprep.subr.mxu1 %v5363_v11 }
 0x151   :  { %v437_v36 = vpop.f32.mrf.mxu0  ;;  %v508_v44 = vpop.f32.mrf.mxu1  ;;  %1164 = vmatpush2.msra.mxu0 %v8666_v52  ;;  %1235 = vmatpush2.msra.mxu1 %v5369_v9 }
 0x152   :  { %v438_v56 = vadd.f32 %v437_v36, %v344_v35  ;;  %v509_v0 = vadd.f32 %v508_v44, %v352_v37  ;;  %1165 = vmatprep.subr.mxu0 %v8667_v10  ;;  %1236 = vmatprep.subr.mxu1 %v5375_v7  ;;  %v364_v35 = vrot.slane %v339_v3, %v363_v27 }
 0x153   :  { %v439_v18 = vpop.f32.mrf.mxu0  ;;  %v510_v42 = vpop.f32.mrf.mxu1  ;;  %1166 = vmatpush2.msra.mxu0 %v8668_v58  ;;  %1237 = vmatpush2.msra.mxu1 %v5381_v5 }
 0x154   :  { %584 = vst [vmem:[#allocation2] sm:$0xff] %v438_v56  ;;  %586 = vst [vmem:[#allocation2 + $0x10] sm:$0xff] %v509_v0  ;;  %v440_v12 = vadd.f32 %v439_v18, %v348_v55  ;;  %v511_v38 = vadd.f32 %v510_v42, %v356_v59  ;;  %1167 = vmatprep.subr.mxu0 %v8669_v30  ;;  %1238 = vmatprep.subr.mxu1 %v5387_v2  ;;  %v4708_v59 = vmov 1966171168  }
 0x155   :  { %1168 = vmatpush2.msra.mxu0 %v8670_v46  ;;  %1239 = vmatpush2.msra.mxu1 %v5393_v28  ;;  %v1003_v63 = vunpack.c.l.s4 %v4708_v59  ;;  %v782_v46 = vld [vmem:[%s7772_s4] sm:$0x3] }
 0x156   :  { %585 = vst [vmem:[#allocation2 + $0x8] sm:$0xff] %v440_v12  ;;  %587 = vst [vmem:[#allocation2 + $0x18] sm:$0xff] %v511_v38  ;;  %1247 = vmatprep.subr.mxu0 %v8671_v19  ;;  %1417 = vmatprep.subr.mxu1 %v5407_v17  ;;  %v5577_v27 = vrot.slane %v782_v46, %v5528_v16 }
 0x157   :  { %v1004_v44 = vunpack.c.0.s8 %v1003_v63 }
 0x159   :  { %v5569_v56 = vsub.s32 %v1004_v44, %v5517_v34 }
 0x15d   :  { %v996_v42 = vld [vmem:[#allocation2] ss:$8 sm:$0xf] }
 0x192   :  { %v579_v37 = vpop.f32.mrf.mxu0 }
 0x193   :  { %v580_v39 = vadd.f32 %v579_v37, %v360_v31 }
 0x194   :  { %v581_v47 = vpop.f32.mrf.mxu0  ;;  %v849_v36 = vpop.f32.mrf.mxu1 }
 0x195   :  { %588 = vst [vmem:[#allocation2 + $0x20] sm:$0xff] %v580_v39  ;;  %v582_v55 = vadd.f32 %v581_v47, %v364_v35  ;;  %v5580_v35 = vrot.slane %v782_v46, %v5539_v23 }
 0x196   :  { %v851_v52 = vpop.f32.mrf.mxu1 }
 0x197   :  { %589 = vst [vmem:[#allocation2 + $0x28] sm:$0xff] %v582_v55  ;;  %v1001_v0 = vcombine.low %v849_v36, %v851_v52 }
 0x199   :  { %v1008_v10 = vrot.slane %v1001_v0, %v5569_v56 }
 0x19b   :  { %v1015_v58 = vrot.slane %v1008_v10, %v5569_v56 }
 0x19e   :  { %v997_v18 = vld [vmem:[#allocation2] ss:$8 sm:$0x30] }
 0x19f   :  { %v998_v3 = vor.u32 %v997_v18, %v996_v42 }
 0x1a1   :  { %v1017_v12 = vadd.f32 %v1015_v58, %v998_v3  ;;  %v1025_v59 = vrot.slane %v998_v3, 2 }
 0x1a3   :  { %v3919_v38 = vmul.f32 -1.442695, %v1017_v12  ;;  %v1084_v12 = vrot.slane %v998_v3, 4 }
 0x1a5   :  { %4064 = vpow2.f32 %v3919_v38 }
 0x1b2   :  { %v4065_v25 = vpop.eup %4064 }
 0x1b3   :  { %v1021_v39 = vadd.f32 1.0, %v4065_v25 }
 0x1b5   :  { %4066 = vrcp.f32 %v1021_v39 }
 0x1c2   :  { %v4067_v42 = vpop.eup %4066 }
 0x1d5   :  { %v920_v30 = vpop.f32.mrf.mxu0  ;;  %v991_v19 = vpop.f32.mrf.mxu1 }
 0x1d6   :  { %v1063_v55 = vadd.f32 %v5577_v27, %v991_v19 }
 0x1d7   :  { %v922_v34 = vpop.f32.mrf.mxu0  ;;  %v993_v37 = vpop.f32.mrf.mxu1 }
 0x1d8   :  { %v1029_v31 = vcombine.low %v920_v30, %v922_v34  ;;  %v1064_v36 = vadd.f32 %v5580_v35, %v993_v37 }
 0x1da   :  { %v1036_v47 = vrot.slane %v1029_v31, %v5569_v56  ;;  %v1067_v0 = vcombine.low %v1063_v55, %v1064_v36  ;;  %v8672_v55 = vld [vmem:[#allocation58_spill] sm:$0xff]  ;;  %v8675_v36 = vld [vmem:[#allocation61_spill] sm:$0xff] }
 0x1dc   :  { %v1043_v63 = vrot.slane %v1036_v47, %v5569_v56  ;;  %v1074_v10 = vrot.slane %v1067_v0, %v5569_v56  ;;  %v8678_v0 = vld [vmem:[#allocation64_spill] sm:$0xff] }
 0x1de   :  { %v1045_v44 = vadd.f32 %v1043_v63, %v1025_v59  ;;  %v1081_v18 = vrot.slane %v1074_v10, %v5569_v56  ;;  %v8673_v59 = vld [vmem:[#allocation59_spill] sm:$0xff]  ;;  %v8674_v63 = vld [vmem:[#allocation60_spill] sm:$0xff]  ;;  %v8679_v10 = vld [vmem:[#allocation65_spill] sm:$0xff] }
 0x1e0   :  { %v3920_v52 = vmul.f32 -1.442695, %v1045_v44  ;;  %v1083_v58 = vmul.f32 %v4067_v42, %v1081_v18  ;;  %v8676_v44 = vld [vmem:[#allocation62_spill] sm:$0xff] }
 0x1e1   :  { %v5613_v18 = vld [vmem:[#allocation9 + $0x240] sm:$0xff] }
 0x1e2   :  { %4068 = vpow2.f32 %v3920_v52  ;;  %v1086_v46 = vadd.f32 %v1084_v12, %v1083_v58  ;;  %v8677_v52 = vld [vmem:[#allocation63_spill] sm:$0xff]  ;;  %v8680_v42 = vld [vmem:[#allocation66_spill] sm:$0xff] }
 0x1e3   :  { %v5617_v58 = vld [vmem:[#allocation9 + $0x218] sm:$0xff]  ;;  %v8681_v12 = vld [vmem:[#allocation67_spill] sm:$0xff] }
 0x1ef   :  { %v4069_v38 = vpop.eup %4068 }
 0x1f0   :  { %v1049_v30 = vadd.f32 1.0, %v4069_v38  ;;  %v5621_v38 = vld [vmem:[#allocation9 + $0x210] sm:$0xff] }
 0x1f2   :  { %4070 = vrcp.f32 %v1049_v30  ;;  %v8682_v30 = vld [vmem:[#allocation68_spill] sm:$0xff] }
 0x1f3   :  { %4072 = vtanh.f32 %v1086_v46  ;;  %v5625_v46 = vld [vmem:[#allocation9 + $0x1e8] sm:$0xff] }
 0x1ff   :  { %v4071_v19 = vpop.eup %4070 }
 0x200   :  { %v1088_v25 = vsub.f32 1.0, %v4071_v19  ;;  %v4073_v34 = vpop.eup %4072  ;;  %v1090_v37 = vmul.f32 0.0, %v4071_v19  ;;  %v8683_v19 = vld [vmem:[#allocation69_spill] sm:$0xff] }
 0x202   :  { %v1089_v31 = vmul.f32 %v4073_v34, %v1088_v25  ;;  %v5629_v25 = vld [vmem:[#allocation9 + $0x1e0] sm:$0xff] }
 0x203   :  { %v8684_v34 = vld [vmem:[#allocation70_spill] sm:$0xff] }
 0x204   :  { %v5588_v39 = vadd.f32 %v1090_v37, %v1089_v31  ;;  %v5633_v31 = vld [vmem:[#allocation9 + $0x1b8] sm:$0xff]  ;;  %v8685_v37 = vld [vmem:[#allocation71_spill] sm:$0xff] }
 0x206   :  { %1092 = vst [vmem:[#allocation3] sm:$0x1] %v5588_v39  ;;  %v1097_v47 = vrot.slane %v5588_v39, %v5539_v23  ;;  %v5595_v3 = vrot.slane %v5588_v39, %v5528_v16 }
 0x208   :  { %1099 = vst [vmem:[#allocation3 + $0xf] sm:$0x1] %v1097_v47  ;;  %1169 = vmatprep.mubr.f32.mxu0 %v1097_v47  ;;  %1240 = vmatprep.mubr.f32.mxu1 %v1097_v47 }
 0x209   :  { %1170 = vmatmul.mubr.f32.vlgmr.msra.gmra.mxu0 %v5595_v3  ;;  %1241 = vmatmul.mubr.f32.vlgmr.msra.gmra.mxu1 %v5595_v3 }
 0x20a   :  { %1248 = vmatpush1.msra.mxu0 %v8672_v55  ;;  %1311 = vmatprep.mubr.f32.mxu0 %v1097_v47  ;;  %v5637_v47 = vld [vmem:[#allocation9 + $0x1b0] sm:$0xff] }
 0x20b   :  { %1249 = vmatprep.subr.mxu0 %v8673_v59  ;;  %1418 = vmatpush1.msra.mxu1 %v5411_v15  ;;  %v8686_v55 = vld [vmem:[#allocation72_spill] sm:$0xff] }
 0x20c   :  { %1250 = vmatpush1.msra.mxu0 %v8674_v63  ;;  %1419 = vmatprep.subr.mxu1 %v5415_v13  ;;  %v5641_v59 = vld [vmem:[#allocation9 + $0x188] sm:$0xff]  ;;  %v8687_v63 = vld [vmem:[#allocation73_spill] sm:$0xff] }
 0x20d   :  { %1251 = vmatprep.subr.mxu0 %v8675_v36  ;;  %1420 = vmatpush1.msra.mxu1 %v5419_v24  ;;  %v5645_v36 = vld [vmem:[#allocation9 + $0x180] sm:$0xff] }
 0x20e   :  { %1252 = vmatpush1.msra.mxu0 %v8676_v44  ;;  %1421 = vmatprep.subr.mxu1 %v5423_v20  ;;  %v8688_v44 = vld [vmem:[#allocation74_spill] sm:$0xff] }
 0x20f   :  { %1253 = vmatprep.subr.mxu0 %v8677_v52  ;;  %1422 = vmatpush1.msra.mxu1 %v5427_v54  ;;  %v5649_v52 = vld [vmem:[#allocation9 + $0x158] sm:$0xff] }
 0x210   :  { %1254 = vmatpush1.msra.mxu0 %v8678_v0  ;;  %1423 = vmatprep.subr.mxu1 %v5431_v8  ;;  %v8689_v0 = vld [vmem:[#allocation75_spill] sm:$0xff] }
 0x211   :  { %1255 = vmatprep.subr.mxu0 %v8679_v10  ;;  %1424 = vmatpush1.msra.mxu1 %v5613_v18  ;;  %v5653_v10 = vld [vmem:[#allocation9 + $0x150] sm:$0xff] }
 0x212   :  { %1256 = vmatpush1.msra.mxu0 %v8680_v42  ;;  %1425 = vmatprep.subr.mxu1 %v5617_v58  ;;  %v8690_v42 = vld [vmem:[#allocation76_spill] sm:$0xff] }
 0x213   :  { %1257 = vmatprep.subr.mxu0 %v8681_v12  ;;  %1426 = vmatpush1.msra.mxu1 %v5621_v38  ;;  %v5657_v12 = vld [vmem:[#allocation9 + $0x128] sm:$0xff] }
 0x214   :  { %1258 = vmatpush1.msra.mxu0 %v8682_v30  ;;  %1427 = vmatprep.subr.mxu1 %v5625_v46  ;;  %v8691_v30 = vld [vmem:[#allocation77_spill] sm:$0xff] }
 0x215   :  { %1259 = vmatprep.subr.mxu0 %v8683_v19  ;;  %1428 = vmatpush1.msra.mxu1 %v5629_v25  ;;  %v5661_v19 = vld [vmem:[#allocation9 + $0x120] sm:$0xff] }
 0x216   :  { %1260 = vmatpush1.msra.mxu0 %v8684_v34  ;;  %1429 = vmatprep.subr.mxu1 %v5633_v31  ;;  %v8692_v34 = vld [vmem:[#allocation78_spill] sm:$0xff] }
 0x217   :  { %1261 = vmatprep.subr.mxu0 %v8685_v37  ;;  %1430 = vmatpush1.msra.mxu1 %v5637_v47  ;;  %v5665_v37 = vld [vmem:[#allocation9 + $0xf8] sm:$0xff] }
 0x218   :  { %1262 = vmatpush1.msra.mxu0 %v8686_v55  ;;  %1431 = vmatprep.subr.mxu1 %v5641_v59  ;;  %8693 = vst [vmem:[#allocation23_spill] sm:$0xff] %v5665_v37  ;;  %v8694_v55 = vld [vmem:[#allocation79_spill] sm:$0xff] }
 0x219   :  { %1263 = vmatprep.subr.mxu0 %v8687_v63  ;;  %1432 = vmatpush1.msra.mxu1 %v5645_v36  ;;  %v5669_v63 = vld [vmem:[#allocation9 + $0xf0] sm:$0xff] }
 0x21a   :  { %1264 = vmatpush1.msra.mxu0 %v8688_v44  ;;  %1433 = vmatprep.subr.mxu1 %v5649_v52  ;;  %8695 = vst [vmem:[#allocation87_spill] sm:$0xff] %v5669_v63  ;;  %v8696_v44 = vld [vmem:[#allocation80_spill] sm:$0xff] }
 0x21b   :  { %1265 = vmatprep.subr.mxu0 %v8689_v0  ;;  %1434 = vmatpush1.msra.mxu1 %v5653_v10  ;;  %v5673_v0 = vld [vmem:[#allocation9 + $0xc8] sm:$0xff] }
 0x21c   :  { %1266 = vmatpush1.msra.mxu0 %v8690_v42  ;;  %1435 = vmatprep.subr.mxu1 %v5657_v12  ;;  %8697 = vst [vmem:[#allocation24_spill] sm:$0xff] %v5673_v0  ;;  %v8698_v42 = vld [vmem:[#allocation81_spill] sm:$0xff] }
 0x21d   :  { %1267 = vmatprep.subr.mxu0 %v8691_v30  ;;  %1436 = vmatpush1.msra.mxu1 %v5661_v19  ;;  %v5677_v30 = vld [vmem:[#allocation9 + $0xc0] sm:$0xff] }
 0x21e   :  { %1268 = vmatpush1.msra.mxu0 %v8692_v34  ;;  %1437 = vmatprep.subr.mxu1 %v5665_v37  ;;  %8699 = vst [vmem:[#allocation89_spill] sm:$0xff] %v5677_v30  ;;  %v8700_v34 = vld [vmem:[#allocation82_spill] sm:$0xff] }
 0x21f   :  { %1269 = vmatprep.subr.mxu0 %v8694_v55  ;;  %1438 = vmatpush1.msra.mxu1 %v5669_v63  ;;  %v5681_v37 = vld [vmem:[#allocation9 + $0x98] sm:$0xff]  ;;  %v8702_v55 = vld [vmem:[#allocation83_spill] sm:$0xff]  ;;  %v5685_v63 = vld [vmem:[#allocation9 + $0x90] sm:$0xff] }
 0x220   :  { %1270 = vmatpush1.msra.mxu0 %v8696_v44  ;;  %1439 = vmatprep.subr.mxu1 %v5673_v0  ;;  %8701 = vst [vmem:[#allocation25_spill] sm:$0xff] %v5681_v37  ;;  %8703 = vst [vmem:[#allocation91_spill] sm:$0xff] %v5685_v63  ;;  %v8704_v44 = vld [vmem:[#allocation84_spill] sm:$0xff] }
 0x221   :  { %1271 = vmatprep.subr.mxu0 %v8698_v42  ;;  %1440 = vmatpush1.msra.mxu1 %v5677_v30  ;;  %v5689_v0 = vld [vmem:[#allocation9 + $0x68] sm:$0xff]  ;;  %v8706_v42 = vld [vmem:[#allocation85_spill] sm:$0xff]  ;;  %v5693_v30 = vld [vmem:[#allocation9 + $0x60] sm:$0xff] }
 0x222   :  { %1272 = vmatpush1.msra.mxu0 %v8700_v34  ;;  %1441 = vmatprep.subr.mxu1 %v5681_v37  ;;  %8705 = vst [vmem:[#allocation26_spill] sm:$0xff] %v5689_v0  ;;  %8707 = vst [vmem:[#allocation93_spill] sm:$0xff] %v5693_v30  ;;  %v8708_v34 = vld [vmem:[#allocation86_spill] sm:$0xff] }
 0x223   :  { %1273 = vmatprep.subr.mxu0 %v8702_v55  ;;  %1442 = vmatpush1.msra.mxu1 %v5685_v63  ;;  %v5697_v37 = vld [vmem:[#allocation9 + $0x38] sm:$0xff]  ;;  %v8710_v55 = vld [vmem:[#allocation88_spill] sm:$0xff] }
 0x224   :  { %1274 = vmatpush1.msra.mxu0 %v8704_v44  ;;  %1443 = vmatprep.subr.mxu1 %v5689_v0  ;;  %8709 = vst [vmem:[#allocation27_spill] sm:$0xff] %v5697_v37  ;;  %v5701_v63 = vld [vmem:[#allocation9 + $0x30] sm:$0xff]  ;;  %v8712_v44 = vld [vmem:[#allocation90_spill] sm:$0xff]  ;;  %v5705_v0 = vld [vmem:[#allocation9 + $0x8] sm:$0xff] }
 0x225   :  { %1275 = vmatprep.subr.mxu0 %v8706_v42  ;;  %1444 = vmatpush1.msra.mxu1 %v5693_v30  ;;  %8711 = vst [vmem:[#allocation95_spill] sm:$0xff] %v5701_v63  ;;  %8713 = vst [vmem:[#allocation28_spill] sm:$0xff] %v5705_v0  ;;  %v8714_v42 = vld [vmem:[#allocation92_spill] sm:$0xff]  ;;  %v5709_v30 = vld [vmem:[#allocation9] sm:$0xff] }
 0x226   :  { %1276 = vmatpush1.msra.mxu0 %v8708_v34  ;;  %1445 = vmatprep.subr.mxu1 %v5697_v37  ;;  %8715 = vst [vmem:[#allocation97_spill] sm:$0xff] %v5709_v30  ;;  %v8716_v34 = vld [vmem:[#allocation94_spill] sm:$0xff] }
 0x227   :  { %1277 = vmatprep.subr.mxu0 %v8710_v55  ;;  %1446 = vmatpush1.msra.mxu1 %v5701_v63  ;;  %v5713_v37 = vld [vmem:[#allocation9 + $0x5d8] sm:$0xff]  ;;  %v8718_v55 = vld [vmem:[#allocation96_spill] sm:$0xff] }
 0x228   :  { %1278 = vmatpush1.msra.mxu0 %v8712_v44  ;;  %1447 = vmatprep.subr.mxu1 %v5705_v0  ;;  %8717 = vst [vmem:[#allocation29_spill] sm:$0xff] %v5713_v37  ;;  %v5717_v63 = vld [vmem:[#allocation9 + $0x5d0] sm:$0xff]  ;;  %v8720_v44 = vld [vmem:[#allocation98_spill] sm:$0xff]  ;;  %v5721_v0 = vld [vmem:[#allocation9 + $0x5a8] sm:$0xff] }
 0x229   :  { %1279 = vmatprep.subr.mxu0 %v8714_v42  ;;  %1448 = vmatpush1.msra.mxu1 %v5709_v30  ;;  %8719 = vst [vmem:[#allocation99_spill] sm:$0xff] %v5717_v63  ;;  %8721 = vst [vmem:[#allocation30_spill] sm:$0xff] %v5721_v0  ;;  %v8722_v42 = vld [vmem:[#allocation100_spill] sm:$0xff]  ;;  %v5725_v30 = vld [vmem:[#allocation9 + $0x5a0] sm:$0xff] }
 0x22a   :  { %1280 = vmatpush2.msra.mxu0 %v8716_v34  ;;  %1449 = vmatprep.subr.mxu1 %v5713_v37  ;;  %8723 = vst [vmem:[#allocation101_spill] sm:$0xff] %v5725_v30  ;;  %v8724_v34 = vld [vmem:[#allocation102_spill] sm:$0xff] }
 0x22b   :  { %1281 = vmatprep.subr.mxu0 %v8718_v55  ;;  %1450 = vmatpush2.msra.mxu1 %v5717_v63  ;;  %v5729_v37 = vld [vmem:[#allocation9 + $0x578] sm:$0xff]  ;;  %v8726_v55 = vld [vmem:[#allocation104_spill] sm:$0xff] }
 0x22c   :  { %1282 = vmatpush2.msra.mxu0 %v8720_v44  ;;  %1451 = vmatprep.subr.mxu1 %v5721_v0  ;;  %8725 = vst [vmem:[#allocation31_spill] sm:$0xff] %v5729_v37  ;;  %v5733_v63 = vld [vmem:[#allocation9 + $0x570] sm:$0xff]  ;;  %v8728_v44 = vld [vmem:[#allocation106_spill] sm:$0xff]  ;;  %v5737_v0 = vld [vmem:[#allocation9 + $0x548] sm:$0xff] }
 0x22d   :  { %1283 = vmatprep.subr.mxu0 %v8722_v42  ;;  %1452 = vmatpush2.msra.mxu1 %v5725_v30  ;;  %8727 = vst [vmem:[#allocation103_spill] sm:$0xff] %v5733_v63  ;;  %8729 = vst [vmem:[#allocation32_spill] sm:$0xff] %v5737_v0  ;;  %v8730_v42 = vld [vmem:[#allocation108_spill] sm:$0xff]  ;;  %v5741_v30 = vld [vmem:[#allocation9 + $0x540] sm:$0xff] }
 0x22e   :  { %1284 = vmatpush2.msra.mxu0 %v8724_v34  ;;  %1453 = vmatprep.subr.mxu1 %v5729_v37  ;;  %8731 = vst [vmem:[#allocation105_spill] sm:$0xff] %v5741_v30  ;;  %v8732_v34 = vld [vmem:[#allocation110_spill] sm:$0xff] }
 0x22f   :  { %1285 = vmatprep.subr.mxu0 %v8726_v55  ;;  %1454 = vmatpush2.msra.mxu1 %v5733_v63  ;;  %v5745_v37 = vld [vmem:[#allocation9 + $0x518] sm:$0xff]  ;;  %v8734_v55 = vld [vmem:[#allocation112_spill] sm:$0xff] }
 0x230   :  { %1286 = vmatpush2.msra.mxu0 %v8728_v44  ;;  %1455 = vmatprep.subr.mxu1 %v5737_v0  ;;  %8733 = vst [vmem:[#allocation33_spill] sm:$0xff] %v5745_v37  ;;  %v5749_v63 = vld [vmem:[#allocation9 + $0x510] sm:$0xff]  ;;  %v8736_v44 = vld [vmem:[#allocation114_spill] sm:$0xff]  ;;  %v5753_v0 = vld [vmem:[#allocation9 + $0x4e8] sm:$0xff] }
 0x231   :  { %1287 = vmatprep.subr.mxu0 %v8730_v42  ;;  %1456 = vmatpush2.msra.mxu1 %v5741_v30  ;;  %8735 = vst [vmem:[#allocation107_spill] sm:$0xff] %v5749_v63  ;;  %8737 = vst [vmem:[#allocation34_spill] sm:$0xff] %v5753_v0  ;;  %v8738_v42 = vld [vmem:[#allocation116_spill] sm:$0xff]  ;;  %v5757_v30 = vld [vmem:[#allocation9 + $0x4e0] sm:$0xff] }
 0x232   :  { %1288 = vmatpush2.msra.mxu0 %v8732_v34  ;;  %1457 = vmatprep.subr.mxu1 %v5745_v37  ;;  %8739 = vst [vmem:[#allocation109_spill] sm:$0xff] %v5757_v30  ;;  %v8740_v34 = vld [vmem:[#allocation118_spill] sm:$0xff] }
 0x233   :  { %1289 = vmatprep.subr.mxu0 %v8734_v55  ;;  %1458 = vmatpush2.msra.mxu1 %v5749_v63  ;;  %v5761_v37 = vld [vmem:[#allocation9 + $0x4b8] sm:$0xff]  ;;  %v8742_v55 = vld [vmem:[#allocation120_spill] sm:$0xff] }
 0x234   :  { %1290 = vmatpush2.msra.mxu0 %v8736_v44  ;;  %1459 = vmatprep.subr.mxu1 %v5753_v0  ;;  %8741 = vst [vmem:[#allocation35_spill] sm:$0xff] %v5761_v37  ;;  %v5765_v63 = vld [vmem:[#allocation9 + $0x4b0] sm:$0xff]  ;;  %v8744_v44 = vld [vmem:[#allocation122_spill] sm:$0xff]  ;;  %v5769_v0 = vld [vmem:[#allocation9 + $0x488] sm:$0xff] }
 0x235   :  { %1291 = vmatprep.subr.mxu0 %v8738_v42  ;;  %1460 = vmatpush2.msra.mxu1 %v5757_v30  ;;  %8743 = vst [vmem:[#allocation111_spill] sm:$0xff] %v5765_v63  ;;  %8745 = vst [vmem:[#allocation36_spill] sm:$0xff] %v5769_v0  ;;  %v8746_v42 = vld [vmem:[#allocation124_spill] sm:$0xff]  ;;  %v5773_v30 = vld [vmem:[#allocation9 + $0x480] sm:$0xff] }
 0x236   :  { %1292 = vmatpush2.msra.mxu0 %v8740_v34  ;;  %1461 = vmatprep.subr.mxu1 %v5761_v37  ;;  %8747 = vst [vmem:[#allocation113_spill] sm:$0xff] %v5773_v30  ;;  %v8748_v34 = vld [vmem:[#allocation126_spill] sm:$0xff] }
 0x237   :  { %1293 = vmatprep.subr.mxu0 %v8742_v55  ;;  %1462 = vmatpush2.msra.mxu1 %v5765_v63  ;;  %v5777_v37 = vld [vmem:[#allocation9 + $0x458] sm:$0xff]  ;;  %v8750_v55 = vld [vmem:[#allocation128_spill] sm:$0xff] }
 0x238   :  { %1294 = vmatpush2.msra.mxu0 %v8744_v44  ;;  %1463 = vmatprep.subr.mxu1 %v5769_v0  ;;  %8749 = vst [vmem:[#allocation37_spill] sm:$0xff] %v5777_v37  ;;  %v5781_v63 = vld [vmem:[#allocation9 + $0x450] sm:$0xff]  ;;  %v8752_v44 = vld [vmem:[#allocation130_spill] sm:$0xff]  ;;  %v5785_v0 = vld [vmem:[#allocation9 + $0x428] sm:$0xff] }
 0x239   :  { %1295 = vmatprep.subr.mxu0 %v8746_v42  ;;  %1464 = vmatpush2.msra.mxu1 %v5773_v30  ;;  %8751 = vst [vmem:[#allocation115_spill] sm:$0xff] %v5781_v63  ;;  %8753 = vst [vmem:[#allocation38_spill] sm:$0xff] %v5785_v0  ;;  %v8754_v42 = vld [vmem:[#allocation132_spill] sm:$0xff]  ;;  %v5789_v30 = vld [vmem:[#allocation9 + $0x420] sm:$0xff] }
 0x23a   :  { %1296 = vmatpush2.msra.mxu0 %v8748_v34  ;;  %1465 = vmatprep.subr.mxu1 %v5777_v37  ;;  %8755 = vst [vmem:[#allocation117_spill] sm:$0xff] %v5789_v30  ;;  %v8756_v34 = vld [vmem:[#allocation134_spill] sm:$0xff] }
 0x23b   :  { %1297 = vmatprep.subr.mxu0 %v8750_v55  ;;  %1466 = vmatpush2.msra.mxu1 %v5781_v63  ;;  %v5793_v37 = vld [vmem:[#allocation9 + $0x3f8] sm:$0xff]  ;;  %v8758_v55 = vld [vmem:[#allocation136_spill] sm:$0xff] }
 0x23c   :  { %1298 = vmatpush2.msra.mxu0 %v8752_v44  ;;  %1467 = vmatprep.subr.mxu1 %v5785_v0  ;;  %8757 = vst [vmem:[#allocation39_spill] sm:$0xff] %v5793_v37  ;;  %v5797_v63 = vld [vmem:[#allocation9 + $0x3f0] sm:$0xff]  ;;  %v8760_v44 = vld [vmem:[#allocation138_spill] sm:$0xff]  ;;  %v5801_v0 = vld [vmem:[#allocation9 + $0x3c8] sm:$0xff] }
 0x23d   :  { %1299 = vmatprep.subr.mxu0 %v8754_v42  ;;  %1468 = vmatpush2.msra.mxu1 %v5789_v30  ;;  %8759 = vst [vmem:[#allocation119_spill] sm:$0xff] %v5797_v63  ;;  %8761 = vst [vmem:[#allocation40_spill] sm:$0xff] %v5801_v0  ;;  %v8762_v42 = vld [vmem:[#allocation140_spill] sm:$0xff]  ;;  %v5805_v30 = vld [vmem:[#allocation9 + $0x3c0] sm:$0xff] }
 0x23e   :  { %1300 = vmatpush2.msra.mxu0 %v8756_v34  ;;  %1469 = vmatprep.subr.mxu1 %v5793_v37  ;;  %8763 = vst [vmem:[#allocation121_spill] sm:$0xff] %v5805_v30  ;;  %v8764_v34 = vld [vmem:[#allocation142_spill] sm:$0xff] }
 0x23f   :  { %1301 = vmatprep.subr.mxu0 %v8758_v55  ;;  %1470 = vmatpush2.msra.mxu1 %v5797_v63  ;;  %v5809_v37 = vld [vmem:[#allocation9 + $0x398] sm:$0xff]  ;;  %v8766_v55 = vld [vmem:[#allocation143_spill] sm:$0xff]  ;;  %v5813_v63 = vld [vmem:[#allocation9 + $0x390] sm:$0xff] }
 0x240   :  { %1302 = vmatpush2.msra.mxu0 %v8760_v44  ;;  %1471 = vmatprep.subr.mxu1 %v5801_v0  ;;  %8765 = vst [vmem:[#allocation41_spill] sm:$0xff] %v5809_v37  ;;  %8767 = vst [vmem:[#allocation123_spill] sm:$0xff] %v5813_v63  ;;  %v8768_v44 = vld [vmem:[#allocation144_spill] sm:$0xff] }
 0x241   :  { %1303 = vmatprep.subr.mxu0 %v8762_v42  ;;  %1472 = vmatpush2.msra.mxu1 %v5805_v30  ;;  %v5817_v0 = vld [vmem:[#allocation9 + $0x368] sm:$0xff]  ;;  %v8770_v42 = vld [vmem:[#allocation145_spill] sm:$0xff]  ;;  %v5821_v30 = vld [vmem:[#allocation9 + $0x360] sm:$0xff] }
 0x242   :  { %1304 = vmatpush2.msra.mxu0 %v8764_v34  ;;  %1473 = vmatprep.subr.mxu1 %v5809_v37  ;;  %8769 = vst [vmem:[#allocation42_spill] sm:$0xff] %v5817_v0  ;;  %8771 = vst [vmem:[#allocation125_spill] sm:$0xff] %v5821_v30  ;;  %v8772_v34 = vld [vmem:[#allocation146_spill] sm:$0xff] }
 0x243   :  { %1305 = vmatprep.subr.mxu0 %v8766_v55  ;;  %1474 = vmatpush2.msra.mxu1 %v5813_v63  ;;  %v5825_v37 = vld [vmem:[#allocation9 + $0x338] sm:$0xff]  ;;  %v8774_v55 = vld [vmem:[#allocation147_spill] sm:$0xff]  ;;  %v5829_v63 = vld [vmem:[#allocation9 + $0x330] sm:$0xff] }
 0x244   :  { %1306 = vmatpush2.msra.mxu0 %v8768_v44  ;;  %1475 = vmatprep.subr.mxu1 %v5817_v0  ;;  %8773 = vst [vmem:[#allocation43_spill] sm:$0xff] %v5825_v37  ;;  %8775 = vst [vmem:[#allocation127_spill] sm:$0xff] %v5829_v63  ;;  %v8776_v44 = vld [vmem:[#allocation148_spill] sm:$0xff] }
 0x245   :  { %1307 = vmatprep.subr.mxu0 %v8770_v42  ;;  %1476 = vmatpush2.msra.mxu1 %v5821_v30  ;;  %v5833_v0 = vld [vmem:[#allocation9 + $0x308] sm:$0xff] }
 0x246   :  { %1308 = vmatpush2.msra.mxu0 %v8772_v34  ;;  %1477 = vmatprep.subr.mxu1 %v5825_v37  ;;  %8777 = vst [vmem:[#allocation44_spill] sm:$0xff] %v5833_v0  ;;  %v5837_v42 = vld [vmem:[#allocation9 + $0x2e8] sm:$0xff]  ;;  %v5840_v34 = vld [vmem:[#allocation9 + $0x2e0] sm:$0xff] }
 0x247   :  { %1309 = vmatprep.subr.mxu0 %v8774_v55  ;;  %1478 = vmatpush2.msra.mxu1 %v5829_v63  ;;  %8778 = vst [vmem:[#allocation129_spill] sm:$0xff] %v5837_v42  ;;  %8779 = vst [vmem:[#allocation45_spill] sm:$0xff] %v5840_v34  ;;  %v5843_v55 = vld [vmem:[#allocation9 + $0x300] sm:$0xff]  ;;  %v5846_v63 = vld [vmem:[#allocation9 + $0x2b8] sm:$0xff] }
 0x248   :  { %1310 = vmatpush2.msra.mxu0 %v8776_v44  ;;  %1479 = vmatprep.subr.mxu1 %v5833_v0  ;;  %8780 = vst [vmem:[#allocation131_spill] sm:$0xff] %v5843_v55  ;;  %8781 = vst [vmem:[#allocation46_spill] sm:$0xff] %v5846_v63  ;;  %v5849_v44 = vld [vmem:[#allocation9 + $0x2f8] sm:$0xff] }
 0x249   :  { %1312 = vmatmul.mubr.f32.vlgmr.msra.gmra.mxu0 %v5595_v3  ;;  %1488 = vmatprep.subr.mxu0 %v5837_v42  ;;  %8782 = vst [vmem:[#allocation133_spill] sm:$0xff] %v5849_v44  ;;  %v5852_v3 = vld [vmem:[#allocation9 + $0x2b0] sm:$0xff]  ;;  %v5855_v42 = vld [vmem:[#allocation9 + $0x288] sm:$0xff] }
 0x24a   :  { %1489 = vmatpush1.msra.mxu0 %v5840_v34  ;;  %1480 = vmatpush2.msra.mxu1 %v5843_v55  ;;  %8783 = vst [vmem:[#allocation47_spill] sm:$0xff] %v5852_v3  ;;  %8784 = vst [vmem:[#allocation135_spill] sm:$0xff] %v5855_v42  ;;  %v5858_v34 = vld [vmem:[#allocation9 + $0x280] sm:$0xff]  ;;  %v5861_v55 = vld [vmem:[#allocation9 + $0x258] sm:$0xff] }
 0x24b   :  { %1490 = vmatprep.subr.mxu0 %v5846_v63  ;;  %1559 = vmatprep.subr.mxu1 %v5849_v44  ;;  %8785 = vst [vmem:[#allocation48_spill] sm:$0xff] %v5858_v34  ;;  %8786 = vst [vmem:[#allocation137_spill] sm:$0xff] %v5861_v55  ;;  %v5864_v63 = vld [vmem:[#allocation9 + $0x250] sm:$0xff]  ;;  %v5867_v44 = vld [vmem:[#allocation9 + $0x228] sm:$0xff] }
 0x24c   :  { %1491 = vmatpush1.msra.mxu0 %v5852_v3  ;;  %8787 = vst [vmem:[#allocation49_spill] sm:$0xff] %v5864_v63  ;;  %8788 = vst [vmem:[#allocation139_spill] sm:$0xff] %v5867_v44  ;;  %v5870_v3 = vld [vmem:[#allocation9 + $0x220] sm:$0xff] }
 0x24d   :  { %1492 = vmatprep.subr.mxu0 %v5855_v42  ;;  %8789 = vst [vmem:[#allocation50_spill] sm:$0xff] %v5870_v3  ;;  %v5873_v42 = vld [vmem:[#allocation9 + $0x1f8] sm:$0xff] }
 0x24e   :  { %1493 = vmatpush1.msra.mxu0 %v5858_v34  ;;  %8790 = vst [vmem:[#allocation141_spill] sm:$0xff] %v5873_v42  ;;  %v5876_v34 = vld [vmem:[#allocation9 + $0x1f0] sm:$0xff] }
 0x24f   :  { %1494 = vmatprep.subr.mxu0 %v5861_v55  ;;  %8791 = vst [vmem:[#allocation51_spill] sm:$0xff] %v5876_v34  ;;  %v5879_v55 = vld [vmem:[#allocation9 + $0x1c8] sm:$0xff] }
 0x250   :  { %1495 = vmatpush1.msra.mxu0 %v5864_v63  ;;  %8792 = vst [vmem:[#allocation52_spill] sm:$0xff] %v5879_v55  ;;  %v5882_v63 = vld [vmem:[#allocation9 + $0x1c0] sm:$0xff] }
 0x251   :  { %1496 = vmatprep.subr.mxu0 %v5867_v44  ;;  %8793 = vst [vmem:[#allocation53_spill] sm:$0xff] %v5882_v63  ;;  %v5885_v44 = vld [vmem:[#allocation9 + $0x198] sm:$0xff] }
 0x252   :  { %1497 = vmatpush1.msra.mxu0 %v5870_v3  ;;  %8794 = vst [vmem:[#allocation54_spill] sm:$0xff] %v5885_v44  ;;  %v5888_v3 = vld [vmem:[#allocation9 + $0x190] sm:$0xff] }
 0x253   :  { %1498 = vmatprep.subr.mxu0 %v5873_v42  ;;  %8795 = vst [vmem:[#allocation55_spill] sm:$0xff] %v5888_v3  ;;  %v5891_v42 = vld [vmem:[#allocation9 + $0x168] sm:$0xff] }
 0x254   :  { %1499 = vmatpush1.msra.mxu0 %v5876_v34  ;;  %8796 = vst [vmem:[#allocation56_spill] sm:$0xff] %v5891_v42  ;;  %v5894_v34 = vld [vmem:[#allocation9 + $0x160] sm:$0xff] }
 0x255   :  { %1500 = vmatprep.subr.mxu0 %v5879_v55  ;;  %8797 = vst [vmem:[#allocation57_spill] sm:$0xff] %v5894_v34  ;;  %v5897_v55 = vld [vmem:[#allocation9 + $0x138] sm:$0xff] }
 0x256   :  { %1501 = vmatpush1.msra.mxu0 %v5882_v63  ;;  %8798 = vst [vmem:[#allocation58_spill] sm:$0xff] %v5897_v55  ;;  %v5900_v63 = vld [vmem:[#allocation9 + $0x130] sm:$0xff] }
 0x257   :  { %1502 = vmatprep.subr.mxu0 %v5885_v44  ;;  %8799 = vst [vmem:[#allocation59_spill] sm:$0xff] %v5900_v63  ;;  %v5903_v44 = vld [vmem:[#allocation9 + $0x108] sm:$0xff] }
 0x258   :  { %1503 = vmatpush1.msra.mxu0 %v5888_v3  ;;  %8800 = vst [vmem:[#allocation60_spill] sm:$0xff] %v5903_v44  ;;  %v5906_v3 = vld [vmem:[#allocation9 + $0x100] sm:$0xff] }
 0x259   :  { %1504 = vmatprep.subr.mxu0 %v5891_v42  ;;  %8801 = vst [vmem:[#allocation61_spill] sm:$0xff] %v5906_v3  ;;  %v5909_v42 = vld [vmem:[#allocation9 + $0xd8] sm:$0xff] }
 0x25a   :  { %1505 = vmatpush1.msra.mxu0 %v5894_v34  ;;  %8802 = vst [vmem:[#allocation62_spill] sm:$0xff] %v5909_v42  ;;  %v5912_v34 = vld [vmem:[#allocation9 + $0xd0] sm:$0xff] }
 0x25b   :  { %1506 = vmatprep.subr.mxu0 %v5897_v55  ;;  %8803 = vst [vmem:[#allocation63_spill] sm:$0xff] %v5912_v34  ;;  %v5915_v55 = vld [vmem:[#allocation9 + $0xa8] sm:$0xff] }
 0x25c   :  { %1507 = vmatpush1.msra.mxu0 %v5900_v63  ;;  %8804 = vst [vmem:[#allocation64_spill] sm:$0xff] %v5915_v55  ;;  %v5918_v63 = vld [vmem:[#allocation9 + $0xa0] sm:$0xff] }
 0x25d   :  { %1508 = vmatprep.subr.mxu0 %v5903_v44  ;;  %8805 = vst [vmem:[#allocation65_spill] sm:$0xff] %v5918_v63  ;;  %v5921_v44 = vld [vmem:[#allocation9 + $0x78] sm:$0xff] }
 0x25e   :  { %1509 = vmatpush1.msra.mxu0 %v5906_v3  ;;  %8806 = vst [vmem:[#allocation66_spill] sm:$0xff] %v5921_v44  ;;  %v5924_v3 = vld [vmem:[#allocation9 + $0x70] sm:$0xff] }
 0x25f   :  { %1510 = vmatprep.subr.mxu0 %v5909_v42  ;;  %8807 = vst [vmem:[#allocation67_spill] sm:$0xff] %v5924_v3  ;;  %v5927_v42 = vld [vmem:[#allocation9 + $0x48] sm:$0xff] }
 0x260   :  { %1511 = vmatpush1.msra.mxu0 %v5912_v34  ;;  %8808 = vst [vmem:[#allocation68_spill] sm:$0xff] %v5927_v42  ;;  %v5930_v34 = vld [vmem:[#allocation9 + $0x40] sm:$0xff] }
 0x261   :  { %1512 = vmatprep.subr.mxu0 %v5915_v55  ;;  %8809 = vst [vmem:[#allocation69_spill] sm:$0xff] %v5930_v34  ;;  %v5933_v55 = vld [vmem:[#allocation9 + $0x18] sm:$0xff] }
 0x262   :  { %1513 = vmatpush1.msra.mxu0 %v5918_v63  ;;  %8810 = vst [vmem:[#allocation70_spill] sm:$0xff] %v5933_v55  ;;  %v5936_v63 = vld [vmem:[#allocation9 + $0x10] sm:$0xff] }
 0x263   :  { %1514 = vmatprep.subr.mxu0 %v5921_v44  ;;  %8811 = vst [vmem:[#allocation71_spill] sm:$0xff] %v5936_v63  ;;  %v5939_v44 = vld [vmem:[#allocation9 + $0x5e8] sm:$0xff] }
 0x264   :  { %1515 = vmatpush1.msra.mxu0 %v5924_v3  ;;  %8812 = vst [vmem:[#allocation72_spill] sm:$0xff] %v5939_v44  ;;  %v5942_v3 = vld [vmem:[#allocation9 + $0x5e0] sm:$0xff] }
 0x265   :  { %1516 = vmatprep.subr.mxu0 %v5927_v42  ;;  %8813 = vst [vmem:[#allocation73_spill] sm:$0xff] %v5942_v3  ;;  %v5945_v42 = vld [vmem:[#allocation9 + $0x5b8] sm:$0xff] }
 0x266   :  { %1517 = vmatpush1.msra.mxu0 %v5930_v34  ;;  %8814 = vst [vmem:[#allocation74_spill] sm:$0xff] %v5945_v42 }
 0x267   :  { %1518 = vmatprep.subr.mxu0 %v5933_v55 }
 0x268   :  { %1519 = vmatpush1.msra.mxu0 %v5936_v63 }
 0x269   :  { %1520 = vmatprep.subr.mxu0 %v5939_v44 }
 0x26a   :  { %1521 = vmatpush2.msra.mxu0 %v5942_v3 }
 0x26b   :  { %1522 = vmatprep.subr.mxu0 %v5945_v42 }
 0x26c   :  { %1523 = vmatpush2.msra.mxu0 %v8619_v41 }
 0x26d   :  { %1524 = vmatprep.subr.mxu0 %v8621_v45 }
 0x26e   :  { %1525 = vmatpush2.msra.mxu0 %v8623_v49 }
 0x26f   :  { %1526 = vmatprep.subr.mxu0 %v8625_v53 }
 0x270   :  { %1527 = vmatpush2.msra.mxu0 %v8627_v57 }
 0x271   :  { %1528 = vmatprep.subr.mxu0 %v8629_v61  ;;  %v1320_v61 = vld [vmem:[#allocation2 + $0x1] ss:$8 sm:$0x30] }
 0x272   :  { %1529 = vmatpush2.msra.mxu0 %v8631_v32 }
 0x273   :  { %1530 = vmatprep.subr.mxu0 %v8633_v40 }
 0x274   :  { %1531 = vmatpush2.msra.mxu0 %v8635_v48 }
 0x275   :  { %1532 = vmatprep.subr.mxu0 %v8637_v60 }
 0x276   :  { %1533 = vmatpush2.msra.mxu0 %v8639_v6 }
 0x277   :  { %1534 = vmatprep.subr.mxu0 %v8641_v14 }
 0x278   :  { %1535 = vmatpush2.msra.mxu0 %v8643_v26 }
 0x279   :  { %1536 = vmatprep.subr.mxu0 %v8645_v50 }
 0x27a   :  { %1537 = vmatpush2.msra.mxu0 %v8647_v4 }
 0x27b   :  { %1538 = vmatprep.subr.mxu0 %v8649_v22 }
 0x27c   :  { %1539 = vmatpush2.msra.mxu0 %v8651_v62 }
 0x27d   :  { %1540 = vmatprep.subr.mxu0 %v8653_v1 }
 0x27e   :  { %1541 = vmatpush2.msra.mxu0 %v8656_v21 }
 0x27f   :  { %1542 = vmatprep.subr.mxu0 %v8658_v29 }
 0x280   :  { %1543 = vmatpush2.msra.mxu0 %v8660_v33 }
 0x281   :  { %1544 = vmatprep.subr.mxu0 %v8662_v43 }
 0x282   :  { %1545 = vmatpush2.msra.mxu0 %v8664_v51 }
 0x283   :  { %1546 = vmatprep.subr.mxu0 %v5363_v11 }
 0x284   :  { %1547 = vmatpush2.msra.mxu0 %v5369_v9  ;;  %v1319_v9 = vld [vmem:[#allocation2 + $0x1] ss:$8 sm:$0xf] }
 0x285   :  { %1548 = vmatprep.subr.mxu0 %v5375_v7  ;;  %v1321_v32 = vor.u32 %v1320_v61, %v1319_v9 }
 0x286   :  { %1549 = vmatpush2.msra.mxu0 %v5381_v5 }
 0x287   :  { %1550 = vmatprep.subr.mxu0 %v5387_v2 }
 0x288   :  { %1551 = vmatpush2.msra.mxu0 %v5393_v28  ;;  %v1348_v28 = vrot.slane %v1321_v32, 2 }
 0x289   :  { %1729 = vmatprep.subr.mxu0 %v5407_v17 }
 0x2c9   :  { %v1171_v41 = vpop.f32.mrf.mxu0  ;;  %v1242_v57 = vpop.f32.mrf.mxu1 }
 0x2cb   :  { %v1173_v45 = vpop.f32.mrf.mxu0  ;;  %v1244_v7 = vpop.f32.mrf.mxu1 }
 0x2cc   :  { %v1324_v49 = vcombine.low %v1171_v41, %v1173_v45  ;;  %v1352_v5 = vcombine.low %v1242_v57, %v1244_v7  ;;  %v1396_v45 = vrot.slane %v1321_v32, 4 }
 0x2ce   :  { %v1331_v53 = vrot.slane %v1324_v49, %v5569_v56  ;;  %v1359_v2 = vrot.slane %v1352_v5, %v5569_v56 }
 0x2d0   :  { %v1338_v11 = vrot.slane %v1331_v53, %v5569_v56  ;;  %v1366_v17 = vrot.slane %v1359_v2, %v5569_v56  ;;  %v6009_v2 = vld [vmem:[#allocation9 + $0x298] sm:$0xff] }
 0x2d2   :  { %v1340_v40 = vadd.f32 %v1338_v11, %v1321_v32  ;;  %v1368_v60 = vadd.f32 %v1366_v17, %v1348_v28  ;;  %v5998_v32 = vld [vmem:[#allocation9 + $0x2f0] sm:$0xff]  ;;  %v6017_v28 = vld [vmem:[#allocation9 + $0x268] sm:$0xff] }
 0x2d3   :  { %v6013_v17 = vld [vmem:[#allocation9 + $0x290] sm:$0xff] }
 0x2d4   :  { %v3921_v48 = vmul.f32 -1.442695, %v1340_v40  ;;  %v3922_v6 = vmul.f32 -1.442695, %v1368_v60  ;;  %v6045_v60 = vld [vmem:[#allocation9 + $0x1d0] sm:$0xff] }
 0x2d6   :  { %4074 = vpow2.f32 %v3921_v48  ;;  %v6005_v48 = vld [vmem:[#allocation9 + $0x2c0] sm:$0xff] }
 0x2d7   :  { %4076 = vpow2.f32 %v3922_v6  ;;  %v6049_v6 = vld [vmem:[#allocation9 + $0x1a8] sm:$0xff] }
 0x2e3   :  { %v4075_v14 = vpop.eup %4074 }
 0x2e4   :  { %v1344_v26 = vadd.f32 1.0, %v4075_v14  ;;  %v4077_v1 = vpop.eup %4076  ;;  %v6053_v14 = vld [vmem:[#allocation9 + $0x1a0] sm:$0xff] }
 0x2e5   :  { %v1372_v29 = vadd.f32 1.0, %v4077_v1  ;;  %v6077_v1 = vld [vmem:[#allocation9 + $0x110] sm:$0xff] }
 0x2e6   :  { %4078 = vrcp.f32 %v1344_v26  ;;  %v6057_v26 = vld [vmem:[#allocation9 + $0x178] sm:$0xff] }
 0x2e7   :  { %4080 = vrcp.f32 %v1372_v29  ;;  %v6081_v29 = vld [vmem:[#allocation9 + $0xe8] sm:$0xff] }
 0x2f3   :  { %v4079_v51 = vpop.eup %4078 }
 0x2f4   :  { %v4081_v53 = vpop.eup %4080 }
 0x2f5   :  { %v1400_v57 = vsub.f32 1.0, %v4081_v53  ;;  %v1402_v9 = vmul.f32 %v4081_v53, %v5588_v39  ;;  %v6001_v39 = vld [vmem:[#allocation9 + $0x2c8] sm:$0xff]  ;;  %v8820_v53 = vld [vmem:[#allocation25_spill] sm:$0xff] }
 0x309   :  { %v1313_v50 = vpop.f32.mrf.mxu0 }
 0x30a   :  { %v1375_v22 = vadd.f32 %v1313_v50, %v5577_v27  ;;  %v6061_v50 = vld [vmem:[#allocation9 + $0x170] sm:$0xff] }
 0x30b   :  { %v1315_v4 = vpop.f32.mrf.mxu0 }
 0x30c   :  { %v1376_v62 = vadd.f32 %v1315_v4, %v5580_v35  ;;  %v6065_v4 = vld [vmem:[#allocation9 + $0x148] sm:$0xff] }
 0x30e   :  { %v1379_v21 = vcombine.low %v1375_v22, %v1376_v62  ;;  %v6069_v22 = vld [vmem:[#allocation9 + $0x140] sm:$0xff]  ;;  %v6073_v62 = vld [vmem:[#allocation9 + $0x118] sm:$0xff] }
 0x310   :  { %v1386_v33 = vrot.slane %v1379_v21, %v5569_v56  ;;  %v8815_v21 = vld [vmem:[#allocation23_spill] sm:$0xff] }
 0x312   :  { %v1393_v43 = vrot.slane %v1386_v33, %v5569_v56  ;;  %v8816_v33 = vld [vmem:[#allocation87_spill] sm:$0xff] }
 0x314   :  { %v1395_v41 = vmul.f32 %v4079_v51, %v1393_v43  ;;  %v6085_v43 = vld [vmem:[#allocation9 + $0xe0] sm:$0xff]  ;;  %v8817_v51 = vld [vmem:[#allocation24_spill] sm:$0xff] }
 0x316   :  { %v1398_v49 = vadd.f32 %v1396_v45, %v1395_v41  ;;  %v6089_v41 = vld [vmem:[#allocation9 + $0xb8] sm:$0xff] }
 0x317   :  { %v8818_v45 = vld [vmem:[#allocation89_spill] sm:$0xff] }
 0x318   :  { %4082 = vtanh.f32 %v1398_v49  ;;  %v6093_v49 = vld [vmem:[#allocation9 + $0xb0] sm:$0xff] }
 0x319   :  { %8819 = vst [vmem:[#allocation75_spill] sm:$0xff] %v6093_v49 }
 0x325   :  { %v4083_v61 = vpop.eup %4082 }
 0x326   :  { %v1401_v11 = vmul.f32 %v4083_v61, %v1400_v57  ;;  %v6097_v57 = vld [vmem:[#allocation9 + $0x88] sm:$0xff] }
 0x327   :  { %8821 = vst [vmem:[#allocation76_spill] sm:$0xff] %v6097_v57  ;;  %v8822_v61 = vld [vmem:[#allocation91_spill] sm:$0xff] }
 0x328   :  { %v5987_v7 = vadd.f32 %v1402_v9, %v1401_v11  ;;  %v6101_v11 = vld [vmem:[#allocation9 + $0x80] sm:$0xff] }
 0x329   :  { %8823 = vst [vmem:[#allocation77_spill] sm:$0xff] %v6101_v11  ;;  %v8824_v9 = vld [vmem:[#allocation26_spill] sm:$0xff] }
 0x32a   :  { %1404 = vst [vmem:[#allocation3 + $0x1] sm:$0x1] %v5987_v7  ;;  %v1409_v40 = vrot.slane %v5987_v7, %v5539_v23  ;;  %v5994_v5 = vrot.slane %v5987_v7, %v5528_v16 }
 0x32c   :  { %1411 = vst [vmem:[#allocation3 + $0xe] sm:$0x1] %v1409_v40  ;;  %1481 = vmatprep.mubr.f32.mxu1 %v1409_v40  ;;  %1552 = vmatprep.mubr.f32.mxu0 %v1409_v40 }
 0x32d   :  { %1482 = vmatmul.mubr.f32.vlgmr.msra.gmra.mxu1 %v5994_v5  ;;  %1553 = vmatmul.mubr.f32.vlgmr.msra.gmra.mxu0 %v5994_v5 }
 0x32e   :  { %1560 = vmatpush1.msra.mxu1 %v5998_v32  ;;  %1623 = vmatprep.mubr.f32.mxu1 %v1409_v40  ;;  %v6105_v40 = vld [vmem:[#allocation9 + $0x58] sm:$0xff] }
 0x32f   :  { %1561 = vmatprep.subr.mxu1 %v6001_v39  ;;  %1730 = vmatpush1.msra.mxu0 %v5411_v15  ;;  %v6021_v15 = vld [vmem:[#allocation9 + $0x260] sm:$0xff]  ;;  %8825 = vst [vmem:[#allocation78_spill] sm:$0xff] %v6105_v40 }
 0x330   :  { %1562 = vmatpush1.msra.mxu1 %v6005_v48  ;;  %1731 = vmatprep.subr.mxu0 %v5415_v13  ;;  %v6025_v13 = vld [vmem:[#allocation9 + $0x238] sm:$0xff] }
 0x331   :  { %1563 = vmatprep.subr.mxu1 %v6009_v2  ;;  %1732 = vmatpush1.msra.mxu0 %v5419_v24  ;;  %v6029_v24 = vld [vmem:[#allocation9 + $0x230] sm:$0xff] }
 0x332   :  { %1564 = vmatpush1.msra.mxu1 %v6013_v17  ;;  %1733 = vmatprep.subr.mxu0 %v5423_v20  ;;  %v6033_v20 = vld [vmem:[#allocation9 + $0x208] sm:$0xff] }
 0x333   :  { %1565 = vmatprep.subr.mxu1 %v6017_v28  ;;  %1734 = vmatpush1.msra.mxu0 %v5427_v54  ;;  %v6037_v54 = vld [vmem:[#allocation9 + $0x200] sm:$0xff] }
 0x334   :  { %1566 = vmatpush1.msra.mxu1 %v6021_v15  ;;  %1735 = vmatprep.subr.mxu0 %v5431_v8  ;;  %v6041_v8 = vld [vmem:[#allocation9 + $0x1d8] sm:$0xff] }
 0x335   :  { %1567 = vmatprep.subr.mxu1 %v6025_v13  ;;  %1736 = vmatpush1.msra.mxu0 %v5613_v18 }
 0x336   :  { %1568 = vmatpush1.msra.mxu1 %v6029_v24  ;;  %1737 = vmatprep.subr.mxu0 %v5617_v58 }
 0x337   :  { %1569 = vmatprep.subr.mxu1 %v6033_v20  ;;  %1738 = vmatpush1.msra.mxu0 %v5621_v38 }
 0x338   :  { %1570 = vmatpush1.msra.mxu1 %v6037_v54  ;;  %1739 = vmatprep.subr.mxu0 %v5625_v46 }
 0x339   :  { %1571 = vmatprep.subr.mxu1 %v6041_v8  ;;  %1740 = vmatpush1.msra.mxu0 %v5629_v25 }
 0x33a   :  { %1572 = vmatpush1.msra.mxu1 %v6045_v60  ;;  %1741 = vmatprep.subr.mxu0 %v5633_v31 }
 0x33b   :  { %1573 = vmatprep.subr.mxu1 %v6049_v6  ;;  %1742 = vmatpush1.msra.mxu0 %v5637_v47 }
 0x33c   :  { %1574 = vmatpush1.msra.mxu1 %v6053_v14  ;;  %1743 = vmatprep.subr.mxu0 %v5641_v59 }
 0x33d   :  { %1575 = vmatprep.subr.mxu1 %v6057_v26  ;;  %1744 = vmatpush1.msra.mxu0 %v5645_v36 }
 0x33e   :  { %1576 = vmatpush1.msra.mxu1 %v6061_v50  ;;  %1745 = vmatprep.subr.mxu0 %v5649_v52 }
 0x33f   :  { %1577 = vmatprep.subr.mxu1 %v6065_v4  ;;  %1746 = vmatpush1.msra.mxu0 %v5653_v10 }
 0x340   :  { %1578 = vmatpush1.msra.mxu1 %v6069_v22  ;;  %1747 = vmatprep.subr.mxu0 %v5657_v12 }
 0x341   :  { %1579 = vmatprep.subr.mxu1 %v6073_v62  ;;  %1748 = vmatpush1.msra.mxu0 %v5661_v19 }
 0x342   :  { %1580 = vmatpush1.msra.mxu1 %v6077_v1  ;;  %1749 = vmatprep.subr.mxu0 %v8815_v21 }
 0x343   :  { %1581 = vmatprep.subr.mxu1 %v6081_v29  ;;  %1750 = vmatpush1.msra.mxu0 %v8816_v33 }
 0x344   :  { %1582 = vmatpush1.msra.mxu1 %v6085_v43  ;;  %1751 = vmatprep.subr.mxu0 %v8817_v51 }
 0x345   :  { %1583 = vmatprep.subr.mxu1 %v6089_v41  ;;  %1752 = vmatpush1.msra.mxu0 %v8818_v45  ;;  %v8826_v45 = vld [vmem:[#allocation93_spill] sm:$0xff] }
 0x346   :  { %1584 = vmatpush1.msra.mxu1 %v6093_v49  ;;  %1753 = vmatprep.subr.mxu0 %v8820_v53  ;;  %v6109_v49 = vld [vmem:[#allocation9 + $0x50] sm:$0xff]  ;;  %v8828_v53 = vld [vmem:[#allocation27_spill] sm:$0xff] }
 0x347   :  { %1585 = vmatprep.subr.mxu1 %v6097_v57  ;;  %1754 = vmatpush1.msra.mxu0 %v8822_v61  ;;  %8827 = vst [vmem:[#allocation79_spill] sm:$0xff] %v6109_v49  ;;  %v6113_v57 = vld [vmem:[#allocation9 + $0x28] sm:$0xff] }
 0x348   :  { %1586 = vmatpush1.msra.mxu1 %v6101_v11  ;;  %1755 = vmatprep.subr.mxu0 %v8824_v9  ;;  %8829 = vst [vmem:[#allocation80_spill] sm:$0xff] %v6113_v57  ;;  %v8830_v61 = vld [vmem:[#allocation95_spill] sm:$0xff]  ;;  %v8832_v9 = vld [vmem:[#allocation28_spill] sm:$0xff] }
 0x349   :  { %1587 = vmatprep.subr.mxu1 %v6105_v40  ;;  %1756 = vmatpush1.msra.mxu0 %v8826_v45  ;;  %v6117_v11 = vld [vmem:[#allocation9 + $0x20] sm:$0xff]  ;;  %v6121_v40 = vld [vmem:[#allocation9 + $0x5f8] sm:$0xff] }
 0x34a   :  { %1588 = vmatpush1.msra.mxu1 %v6109_v49  ;;  %1757 = vmatprep.subr.mxu0 %v8828_v53  ;;  %8831 = vst [vmem:[#allocation81_spill] sm:$0xff] %v6117_v11  ;;  %8833 = vst [vmem:[#allocation82_spill] sm:$0xff] %v6121_v40  ;;  %v8834_v45 = vld [vmem:[#allocation97_spill] sm:$0xff] }
 0x34b   :  { %1589 = vmatprep.subr.mxu1 %v6113_v57  ;;  %1758 = vmatpush1.msra.mxu0 %v8830_v61  ;;  %v6125_v49 = vld [vmem:[#allocation9 + $0x5f0] sm:$0xff]  ;;  %v6129_v57 = vld [vmem:[#allocation9 + $0x5c8] sm:$0xff] }
 0x34c   :  { %1590 = vmatpush1.msra.mxu1 %v6117_v11  ;;  %1759 = vmatprep.subr.mxu0 %v8832_v9  ;;  %8835 = vst [vmem:[#allocation83_spill] sm:$0xff] %v6125_v49  ;;  %v8836_v53 = vld [vmem:[#allocation29_spill] sm:$0xff]  ;;  %8837 = vst [vmem:[#allocation84_spill] sm:$0xff] %v6129_v57  ;;  %v8838_v61 = vld [vmem:[#allocation99_spill] sm:$0xff] }
 0x34d   :  { %1591 = vmatprep.subr.mxu1 %v6121_v40  ;;  %1760 = vmatpush1.msra.mxu0 %v8834_v45  ;;  %v6133_v11 = vld [vmem:[#allocation9 + $0x5c0] sm:$0xff]  ;;  %v6137_v40 = vld [vmem:[#allocation9 + $0x598] sm:$0xff] }
 0x34e   :  { %1592 = vmatpush2.msra.mxu1 %v6125_v49  ;;  %1761 = vmatprep.subr.mxu0 %v8836_v53  ;;  %8839 = vst [vmem:[#allocation85_spill] sm:$0xff] %v6133_v11  ;;  %v8840_v9 = vld [vmem:[#allocation30_spill] sm:$0xff]  ;;  %8841 = vst [vmem:[#allocation86_spill] sm:$0xff] %v6137_v40  ;;  %v8842_v45 = vld [vmem:[#allocation101_spill] sm:$0xff] }
 0x34f   :  { %1593 = vmatprep.subr.mxu1 %v6129_v57  ;;  %1762 = vmatpush2.msra.mxu0 %v8838_v61  ;;  %v6141_v49 = vld [vmem:[#allocation9 + $0x590] sm:$0xff]  ;;  %v8844_v53 = vld [vmem:[#allocation31_spill] sm:$0xff] }
 0x350   :  { %1594 = vmatpush2.msra.mxu1 %v6133_v11  ;;  %1763 = vmatprep.subr.mxu0 %v8840_v9  ;;  %8843 = vst [vmem:[#allocation88_spill] sm:$0xff] %v6141_v49  ;;  %v6145_v57 = vld [vmem:[#allocation9 + $0x568] sm:$0xff]  ;;  %v6149_v11 = vld [vmem:[#allocation9 + $0x560] sm:$0xff] }
 0x351   :  { %1595 = vmatprep.subr.mxu1 %v6137_v40  ;;  %1764 = vmatpush2.msra.mxu0 %v8842_v45  ;;  %8845 = vst [vmem:[#allocation90_spill] sm:$0xff] %v6145_v57  ;;  %v8846_v61 = vld [vmem:[#allocation103_spill] sm:$0xff]  ;;  %8847 = vst [vmem:[#allocation92_spill] sm:$0xff] %v6149_v11  ;;  %v8848_v9 = vld [vmem:[#allocation32_spill] sm:$0xff] }
 0x352   :  { %1596 = vmatpush2.msra.mxu1 %v6141_v49  ;;  %1765 = vmatprep.subr.mxu0 %v8844_v53  ;;  %v6153_v40 = vld [vmem:[#allocation9 + $0x538] sm:$0xff]  ;;  %v6157_v49 = vld [vmem:[#allocation9 + $0x530] sm:$0xff] }
 0x353   :  { %1597 = vmatprep.subr.mxu1 %v6145_v57  ;;  %1766 = vmatpush2.msra.mxu0 %v8846_v61  ;;  %8849 = vst [vmem:[#allocation94_spill] sm:$0xff] %v6153_v40  ;;  %v8850_v45 = vld [vmem:[#allocation105_spill] sm:$0xff]  ;;  %8851 = vst [vmem:[#allocation96_spill] sm:$0xff] %v6157_v49  ;;  %v6161_v57 = vld [vmem:[#allocation9 + $0x508] sm:$0xff] }
 0x354   :  { %1598 = vmatpush2.msra.mxu1 %v6149_v11  ;;  %1767 = vmatprep.subr.mxu0 %v8848_v9  ;;  %v8852_v53 = vld [vmem:[#allocation33_spill] sm:$0xff]  ;;  %8853 = vst [vmem:[#allocation98_spill] sm:$0xff] %v6161_v57  ;;  %v8854_v61 = vld [vmem:[#allocation107_spill] sm:$0xff]  ;;  %v8856_v9 = vld [vmem:[#allocation34_spill] sm:$0xff] }
 0x355   :  { %1599 = vmatprep.subr.mxu1 %v6153_v40  ;;  %1768 = vmatpush2.msra.mxu0 %v8850_v45  ;;  %v6165_v11 = vld [vmem:[#allocation9 + $0x500] sm:$0xff]  ;;  %v6169_v40 = vld [vmem:[#allocation9 + $0x4d8] sm:$0xff] }
 0x356   :  { %1600 = vmatpush2.msra.mxu1 %v6157_v49  ;;  %1769 = vmatprep.subr.mxu0 %v8852_v53  ;;  %8855 = vst [vmem:[#allocation100_spill] sm:$0xff] %v6165_v11  ;;  %8857 = vst [vmem:[#allocation102_spill] sm:$0xff] %v6169_v40  ;;  %v8858_v45 = vld [vmem:[#allocation109_spill] sm:$0xff]  ;;  %v8860_v53 = vld [vmem:[#allocation35_spill] sm:$0xff] }
 0x357   :  { %1601 = vmatprep.subr.mxu1 %v6161_v57  ;;  %1770 = vmatpush2.msra.mxu0 %v8854_v61  ;;  %v6173_v49 = vld [vmem:[#allocation9 + $0x4d0] sm:$0xff]  ;;  %v6177_v57 = vld [vmem:[#allocation9 + $0x4a8] sm:$0xff] }
 0x358   :  { %1602 = vmatpush2.msra.mxu1 %v6165_v11  ;;  %1771 = vmatprep.subr.mxu0 %v8856_v9  ;;  %8859 = vst [vmem:[#allocation104_spill] sm:$0xff] %v6173_v49  ;;  %8861 = vst [vmem:[#allocation106_spill] sm:$0xff] %v6177_v57  ;;  %v8862_v61 = vld [vmem:[#allocation111_spill] sm:$0xff]  ;;  %v8864_v9 = vld [vmem:[#allocation36_spill] sm:$0xff] }
 0x359   :  { %1603 = vmatprep.subr.mxu1 %v6169_v40  ;;  %1772 = vmatpush2.msra.mxu0 %v8858_v45  ;;  %v6181_v11 = vld [vmem:[#allocation9 + $0x4a0] sm:$0xff]  ;;  %v6185_v40 = vld [vmem:[#allocation9 + $0x478] sm:$0xff] }
 0x35a   :  { %1604 = vmatpush2.msra.mxu1 %v6173_v49  ;;  %1773 = vmatprep.subr.mxu0 %v8860_v53  ;;  %8863 = vst [vmem:[#allocation108_spill] sm:$0xff] %v6181_v11  ;;  %8865 = vst [vmem:[#allocation110_spill] sm:$0xff] %v6185_v40  ;;  %v8866_v45 = vld [vmem:[#allocation113_spill] sm:$0xff] }
 0x35b   :  { %1605 = vmatprep.subr.mxu1 %v6177_v57  ;;  %1774 = vmatpush2.msra.mxu0 %v8862_v61  ;;  %v6189_v49 = vld [vmem:[#allocation9 + $0x470] sm:$0xff]  ;;  %v6193_v57 = vld [vmem:[#allocation9 + $0x448] sm:$0xff] }
 0x35c   :  { %1606 = vmatpush2.msra.mxu1 %v6181_v11  ;;  %1775 = vmatprep.subr.mxu0 %v8864_v9  ;;  %8867 = vst [vmem:[#allocation112_spill] sm:$0xff] %v6189_v49  ;;  %v8868_v53 = vld [vmem:[#allocation37_spill] sm:$0xff]  ;;  %8869 = vst [vmem:[#allocation114_spill] sm:$0xff] %v6193_v57  ;;  %v8870_v61 = vld [vmem:[#allocation115_spill] sm:$0xff] }
 0x35d   :  { %1607 = vmatprep.subr.mxu1 %v6185_v40  ;;  %1776 = vmatpush2.msra.mxu0 %v8866_v45  ;;  %v6197_v11 = vld [vmem:[#allocation9 + $0x440] sm:$0xff]  ;;  %v6201_v40 = vld [vmem:[#allocation9 + $0x418] sm:$0xff] }
 0x35e   :  { %1608 = vmatpush2.msra.mxu1 %v6189_v49  ;;  %1777 = vmatprep.subr.mxu0 %v8868_v53  ;;  %8871 = vst [vmem:[#allocation116_spill] sm:$0xff] %v6197_v11  ;;  %v8872_v9 = vld [vmem:[#allocation38_spill] sm:$0xff]  ;;  %8873 = vst [vmem:[#allocation118_spill] sm:$0xff] %v6201_v40  ;;  %v8874_v45 = vld [vmem:[#allocation117_spill] sm:$0xff] }
 0x35f   :  { %1609 = vmatprep.subr.mxu1 %v6193_v57  ;;  %1778 = vmatpush2.msra.mxu0 %v8870_v61  ;;  %v6205_v49 = vld [vmem:[#allocation9 + $0x410] sm:$0xff]  ;;  %v8876_v53 = vld [vmem:[#allocation39_spill] sm:$0xff] }
 0x360   :  { %1610 = vmatpush2.msra.mxu1 %v6197_v11  ;;  %1779 = vmatprep.subr.mxu0 %v8872_v9  ;;  %8875 = vst [vmem:[#allocation120_spill] sm:$0xff] %v6205_v49  ;;  %v6209_v57 = vld [vmem:[#allocation9 + $0x3e8] sm:$0xff]  ;;  %v6213_v11 = vld [vmem:[#allocation9 + $0x3e0] sm:$0xff] }
 0x361   :  { %1611 = vmatprep.subr.mxu1 %v6201_v40  ;;  %1780 = vmatpush2.msra.mxu0 %v8874_v45  ;;  %8877 = vst [vmem:[#allocation122_spill] sm:$0xff] %v6209_v57  ;;  %v8878_v61 = vld [vmem:[#allocation119_spill] sm:$0xff]  ;;  %8879 = vst [vmem:[#allocation124_spill] sm:$0xff] %v6213_v11  ;;  %v8880_v9 = vld [vmem:[#allocation40_spill] sm:$0xff] }
 0x362   :  { %1612 = vmatpush2.msra.mxu1 %v6205_v49  ;;  %1781 = vmatprep.subr.mxu0 %v8876_v53  ;;  %v6217_v40 = vld [vmem:[#allocation9 + $0x3b8] sm:$0xff]  ;;  %v6221_v49 = vld [vmem:[#allocation9 + $0x3b0] sm:$0xff] }
 0x363   :  { %1613 = vmatprep.subr.mxu1 %v6209_v57  ;;  %1782 = vmatpush2.msra.mxu0 %v8878_v61  ;;  %8881 = vst [vmem:[#allocation126_spill] sm:$0xff] %v6217_v40  ;;  %v8882_v45 = vld [vmem:[#allocation121_spill] sm:$0xff]  ;;  %8883 = vst [vmem:[#allocation128_spill] sm:$0xff] %v6221_v49  ;;  %v6225_v57 = vld [vmem:[#allocation9 + $0x388] sm:$0xff] }
 0x364   :  { %1614 = vmatpush2.msra.mxu1 %v6213_v11  ;;  %1783 = vmatprep.subr.mxu0 %v8880_v9  ;;  %v8884_v53 = vld [vmem:[#allocation41_spill] sm:$0xff]  ;;  %8885 = vst [vmem:[#allocation130_spill] sm:$0xff] %v6225_v57  ;;  %v8886_v61 = vld [vmem:[#allocation123_spill] sm:$0xff]  ;;  %v8888_v9 = vld [vmem:[#allocation42_spill] sm:$0xff] }
 0x365   :  { %1615 = vmatprep.subr.mxu1 %v6217_v40  ;;  %1784 = vmatpush2.msra.mxu0 %v8882_v45  ;;  %v6229_v11 = vld [vmem:[#allocation9 + $0x380] sm:$0xff]  ;;  %v6233_v40 = vld [vmem:[#allocation9 + $0x358] sm:$0xff] }
 0x366   :  { %1616 = vmatpush2.msra.mxu1 %v6221_v49  ;;  %1785 = vmatprep.subr.mxu0 %v8884_v53  ;;  %8887 = vst [vmem:[#allocation132_spill] sm:$0xff] %v6229_v11  ;;  %8889 = vst [vmem:[#allocation134_spill] sm:$0xff] %v6233_v40  ;;  %v6237_v49 = vld [vmem:[#allocation9 + $0x350] sm:$0xff] }
 0x367   :  { %1617 = vmatprep.subr.mxu1 %v6225_v57  ;;  %1786 = vmatpush2.msra.mxu0 %v8886_v61  ;;  %8890 = vst [vmem:[#allocation136_spill] sm:$0xff] %v6237_v49  ;;  %v6241_v57 = vld [vmem:[#allocation9 + $0x328] sm:$0xff] }
 0x368   :  { %1618 = vmatpush2.msra.mxu1 %v6229_v11  ;;  %1787 = vmatprep.subr.mxu0 %v8888_v9  ;;  %8891 = vst [vmem:[#allocation138_spill] sm:$0xff] %v6241_v57  ;;  %v8892_v61 = vld [vmem:[#allocation127_spill] sm:$0xff]  ;;  %v8898_v9 = vld [vmem:[#allocation133_spill] sm:$0xff]  ;;  %v8901_v53 = vld [vmem:[#allocation48_spill] sm:$0xff] }
 0x369   :  { %1619 = vmatprep.subr.mxu1 %v6233_v40  ;;  %1788 = vmatpush2.msra.mxu0 %v5821_v30  ;;  %v6245_v11 = vld [vmem:[#allocation9 + $0x320] sm:$0xff]  ;;  %v8894_v30 = vld [vmem:[#allocation129_spill] sm:$0xff] }
 0x36a   :  { %1620 = vmatpush2.msra.mxu1 %v6237_v49  ;;  %1789 = vmatprep.subr.mxu0 %v5825_v37  ;;  %8893 = vst [vmem:[#allocation140_spill] sm:$0xff] %v6245_v11  ;;  %v8895_v40 = vld [vmem:[#allocation45_spill] sm:$0xff]  ;;  %v8896_v49 = vld [vmem:[#allocation131_spill] sm:$0xff]  ;;  %v8897_v37 = vld [vmem:[#allocation46_spill] sm:$0xff] }
 0x36b   :  { %1621 = vmatprep.subr.mxu1 %v6241_v57  ;;  %1790 = vmatpush2.msra.mxu0 %v8892_v61  ;;  %v8899_v57 = vld [vmem:[#allocation47_spill] sm:$0xff] }
 0x36c   :  { %1622 = vmatpush2.msra.mxu1 %v6245_v11  ;;  %1791 = vmatprep.subr.mxu0 %v5833_v0  ;;  %v8900_v61 = vld [vmem:[#allocation135_spill] sm:$0xff]  ;;  %v8902_v11 = vld [vmem:[#allocation137_spill] sm:$0xff] }
 0x36d   :  { %1624 = vmatmul.mubr.f32.vlgmr.msra.gmra.mxu1 %v5994_v5  ;;  %1800 = vmatprep.subr.mxu1 %v8894_v30  ;;  %v8903_v0 = vld [vmem:[#allocation49_spill] sm:$0xff]  ;;  %v8904_v5 = vld [vmem:[#allocation139_spill] sm:$0xff]  ;;  %v8905_v30 = vld [vmem:[#allocation50_spill] sm:$0xff] }
 0x36e   :  { %1801 = vmatpush1.msra.mxu1 %v8895_v40  ;;  %1792 = vmatpush2.msra.mxu0 %v8896_v49  ;;  %v8906_v40 = vld [vmem:[#allocation141_spill] sm:$0xff]  ;;  %v8907_v49 = vld [vmem:[#allocation51_spill] sm:$0xff] }
 0x36f   :  { %1802 = vmatprep.subr.mxu1 %v8897_v37  ;;  %1871 = vmatprep.subr.mxu0 %v8898_v9  ;;  %v8908_v37 = vld [vmem:[#allocation52_spill] sm:$0xff]  ;;  %v8909_v9 = vld [vmem:[#allocation53_spill] sm:$0xff] }
 0x370   :  { %1803 = vmatpush1.msra.mxu1 %v8899_v57  ;;  %v8910_v57 = vld [vmem:[#allocation54_spill] sm:$0xff] }
 0x371   :  { %1804 = vmatprep.subr.mxu1 %v8900_v61  ;;  %v8911_v61 = vld [vmem:[#allocation55_spill] sm:$0xff] }
 0x372   :  { %1805 = vmatpush1.msra.mxu1 %v8901_v53  ;;  %v8912_v53 = vld [vmem:[#allocation56_spill] sm:$0xff] }
 0x373   :  { %1806 = vmatprep.subr.mxu1 %v8902_v11  ;;  %v8913_v11 = vld [vmem:[#allocation57_spill] sm:$0xff] }
 0x374   :  { %1807 = vmatpush1.msra.mxu1 %v8903_v0  ;;  %v8914_v0 = vld [vmem:[#allocation58_spill] sm:$0xff] }
 0x375   :  { %1808 = vmatprep.subr.mxu1 %v8904_v5  ;;  %v8915_v5 = vld [vmem:[#allocation59_spill] sm:$0xff] }
 0x376   :  { %1809 = vmatpush1.msra.mxu1 %v8905_v30  ;;  %v8916_v30 = vld [vmem:[#allocation60_spill] sm:$0xff] }
 0x377   :  { %1810 = vmatprep.subr.mxu1 %v8906_v40  ;;  %v8917_v40 = vld [vmem:[#allocation61_spill] sm:$0xff] }
 0x378   :  { %1811 = vmatpush1.msra.mxu1 %v8907_v49  ;;  %v8918_v49 = vld [vmem:[#allocation62_spill] sm:$0xff] }
 0x379   :  { %1812 = vmatprep.subr.mxu1 %v8908_v37  ;;  %v8919_v37 = vld [vmem:[#allocation63_spill] sm:$0xff] }
 0x37a   :  { %1813 = vmatpush1.msra.mxu1 %v8909_v9  ;;  %v8920_v9 = vld [vmem:[#allocation64_spill] sm:$0xff] }
 0x37b   :  { %1814 = vmatprep.subr.mxu1 %v8910_v57  ;;  %v8921_v57 = vld [vmem:[#allocation65_spill] sm:$0xff] }
 0x37c   :  { %1815 = vmatpush1.msra.mxu1 %v8911_v61  ;;  %v8922_v61 = vld [vmem:[#allocation66_spill] sm:$0xff] }
 0x37d   :  { %1816 = vmatprep.subr.mxu1 %v8912_v53  ;;  %v8923_v53 = vld [vmem:[#allocation67_spill] sm:$0xff] }
 0x37e   :  { %1817 = vmatpush1.msra.mxu1 %v8913_v11  ;;  %v8924_v11 = vld [vmem:[#allocation68_spill] sm:$0xff] }
 0x37f   :  { %1818 = vmatprep.subr.mxu1 %v8914_v0 }
 0x380   :  { %1819 = vmatpush1.msra.mxu1 %v8915_v5 }
 0x381   :  { %1820 = vmatprep.subr.mxu1 %v8916_v30 }
 0x382   :  { %1821 = vmatpush1.msra.mxu1 %v8917_v40 }
 0x383   :  { %1822 = vmatprep.subr.mxu1 %v8918_v49 }
 0x384   :  { %1823 = vmatpush1.msra.mxu1 %v8919_v37 }
 0x385   :  { %1824 = vmatprep.subr.mxu1 %v8920_v9  ;;  %v6287_v9 = vld [vmem:[#allocation9 + $0x5b0] sm:$0xff] }
 0x386   :  { %1825 = vmatpush1.msra.mxu1 %v8921_v57  ;;  %8925 = vst [vmem:[#allocation142_spill] sm:$0xff] %v6287_v9  ;;  %v1631_v57 = vld [vmem:[#allocation2 + $0x2] ss:$8 sm:$0xf] }
 0x387   :  { %1826 = vmatprep.subr.mxu1 %v8922_v61  ;;  %v6290_v61 = vld [vmem:[#allocation9 + $0x588] sm:$0xff] }
 0x388   :  { %1827 = vmatpush1.msra.mxu1 %v8923_v53  ;;  %8926 = vst [vmem:[#allocation143_spill] sm:$0xff] %v6290_v61  ;;  %v1632_v53 = vld [vmem:[#allocation2 + $0x2] ss:$8 sm:$0x30] }
 0x389   :  { %1828 = vmatprep.subr.mxu1 %v8924_v11  ;;  %v6293_v11 = vld [vmem:[#allocation9 + $0x580] sm:$0xff]  ;;  %v1633_v37 = vor.u32 %v1632_v53, %v1631_v57 }
 0x38a   :  { %1829 = vmatpush1.msra.mxu1 %v5930_v34  ;;  %8927 = vst [vmem:[#allocation144_spill] sm:$0xff] %v6293_v11 }
 0x38b   :  { %1830 = vmatprep.subr.mxu1 %v5933_v55  ;;  %v6296_v55 = vld [vmem:[#allocation9 + $0x558] sm:$0xff]  ;;  %v1660_v5 = vrot.slane %v1633_v37, 2 }
 0x38c   :  { %1831 = vmatpush1.msra.mxu1 %v5936_v63  ;;  %8928 = vst [vmem:[#allocation145_spill] sm:$0xff] %v6296_v55 }
 0x38d   :  { %1832 = vmatprep.subr.mxu1 %v5939_v44  ;;  %v6299_v44 = vld [vmem:[#allocation9 + $0x550] sm:$0xff] }
 0x38e   :  { %1833 = vmatpush2.msra.mxu1 %v5942_v3  ;;  %8929 = vst [vmem:[#allocation146_spill] sm:$0xff] %v6299_v44 }
 0x38f   :  { %1834 = vmatprep.subr.mxu1 %v5945_v42  ;;  %v6302_v42 = vld [vmem:[#allocation9 + $0x528] sm:$0xff] }
 0x390   :  { %1835 = vmatpush2.msra.mxu1 %v6287_v9  ;;  %8930 = vst [vmem:[#allocation147_spill] sm:$0xff] %v6302_v42  ;;  %v6305_v9 = vld [vmem:[#allocation9 + $0x520] sm:$0xff] }
 0x391   :  { %1836 = vmatprep.subr.mxu1 %v6290_v61  ;;  %8931 = vst [vmem:[#allocation148_spill] sm:$0xff] %v6305_v9  ;;  %v6308_v61 = vld [vmem:[#allocation9 + $0x4f8] sm:$0xff] }
 0x392   :  { %1837 = vmatpush2.msra.mxu1 %v6293_v11  ;;  %8932 = vst [vmem:[#allocation23_spill] sm:$0xff] %v6308_v61  ;;  %v6311_v11 = vld [vmem:[#allocation9 + $0x4f0] sm:$0xff] }
 0x393   :  { %1838 = vmatprep.subr.mxu1 %v6296_v55  ;;  %8933 = vst [vmem:[#allocation87_spill] sm:$0xff] %v6311_v11  ;;  %v6314_v55 = vld [vmem:[#allocation9 + $0x4c8] sm:$0xff] }
 0x394   :  { %1839 = vmatpush2.msra.mxu1 %v6299_v44  ;;  %8934 = vst [vmem:[#allocation24_spill] sm:$0xff] %v6314_v55  ;;  %v6317_v44 = vld [vmem:[#allocation9 + $0x4c0] sm:$0xff] }
 0x395   :  { %1840 = vmatprep.subr.mxu1 %v6302_v42  ;;  %8935 = vst [vmem:[#allocation149_spill] sm:$0xff] %v6317_v44  ;;  %v6320_v42 = vld [vmem:[#allocation9 + $0x498] sm:$0xff] }
 0x396   :  { %1841 = vmatpush2.msra.mxu1 %v6305_v9  ;;  %8936 = vst [vmem:[#allocation150_spill] sm:$0xff] %v6320_v42  ;;  %v6323_v9 = vld [vmem:[#allocation9 + $0x490] sm:$0xff] }
 0x397   :  { %1842 = vmatprep.subr.mxu1 %v6308_v61  ;;  %8937 = vst [vmem:[#allocation151_spill] sm:$0xff] %v6323_v9  ;;  %v6326_v61 = vld [vmem:[#allocation9 + $0x468] sm:$0xff] }
 0x398   :  { %1843 = vmatpush2.msra.mxu1 %v6311_v11  ;;  %8938 = vst [vmem:[#allocation152_spill] sm:$0xff] %v6326_v61  ;;  %v6329_v11 = vld [vmem:[#allocation9 + $0x460] sm:$0xff] }
 0x399   :  { %1844 = vmatprep.subr.mxu1 %v6314_v55  ;;  %8939 = vst [vmem:[#allocation153_spill] sm:$0xff] %v6329_v11  ;;  %v6332_v55 = vld [vmem:[#allocation9 + $0x438] sm:$0xff] }
 0x39a   :  { %1845 = vmatpush2.msra.mxu1 %v6317_v44  ;;  %8940 = vst [vmem:[#allocation154_spill] sm:$0xff] %v6332_v55  ;;  %v6335_v44 = vld [vmem:[#allocation9 + $0x430] sm:$0xff] }
 0x39b   :  { %1846 = vmatprep.subr.mxu1 %v6320_v42  ;;  %8941 = vst [vmem:[#allocation155_spill] sm:$0xff] %v6335_v44  ;;  %v6338_v42 = vld [vmem:[#allocation9 + $0x408] sm:$0xff] }
 0x39c   :  { %1847 = vmatpush2.msra.mxu1 %v6323_v9  ;;  %8942 = vst [vmem:[#allocation156_spill] sm:$0xff] %v6338_v42  ;;  %v6341_v9 = vld [vmem:[#allocation9 + $0x400] sm:$0xff] }
 0x39d   :  { %1848 = vmatprep.subr.mxu1 %v6326_v61  ;;  %8943 = vst [vmem:[#allocation157_spill] sm:$0xff] %v6341_v9  ;;  %v6344_v61 = vld [vmem:[#allocation9 + $0x3d8] sm:$0xff] }
 0x39e   :  { %1849 = vmatpush2.msra.mxu1 %v6329_v11  ;;  %8944 = vst [vmem:[#allocation158_spill] sm:$0xff] %v6344_v61  ;;  %v6347_v11 = vld [vmem:[#allocation9 + $0x3d0] sm:$0xff] }
 0x39f   :  { %1850 = vmatprep.subr.mxu1 %v6332_v55  ;;  %8945 = vst [vmem:[#allocation159_spill] sm:$0xff] %v6347_v11  ;;  %v6350_v55 = vld [vmem:[#allocation9 + $0x3a8] sm:$0xff] }
 0x3a0   :  { %1851 = vmatpush2.msra.mxu1 %v6335_v44  ;;  %8946 = vst [vmem:[#allocation160_spill] sm:$0xff] %v6350_v55  ;;  %v6353_v44 = vld [vmem:[#allocation9 + $0x3a0] sm:$0xff] }
 0x3a1   :  { %1852 = vmatprep.subr.mxu1 %v6338_v42  ;;  %8947 = vst [vmem:[#allocation161_spill] sm:$0xff] %v6353_v44  ;;  %v6356_v42 = vld [vmem:[#allocation9 + $0x378] sm:$0xff] }
 0x3a2   :  { %1853 = vmatpush2.msra.mxu1 %v6341_v9  ;;  %8948 = vst [vmem:[#allocation162_spill] sm:$0xff] %v6356_v42  ;;  %v6359_v9 = vld [vmem:[#allocation9 + $0x370] sm:$0xff] }
 0x3a3   :  { %1854 = vmatprep.subr.mxu1 %v6344_v61  ;;  %8949 = vst [vmem:[#allocation163_spill] sm:$0xff] %v6359_v9  ;;  %v6362_v61 = vld [vmem:[#allocation9 + $0x348] sm:$0xff] }
 0x3a4   :  { %1855 = vmatpush2.msra.mxu1 %v6347_v11  ;;  %8950 = vst [vmem:[#allocation164_spill] sm:$0xff] %v6362_v61  ;;  %v6365_v11 = vld [vmem:[#allocation9 + $0x340] sm:$0xff] }
 0x3a5   :  { %1856 = vmatprep.subr.mxu1 %v6350_v55  ;;  %8951 = vst [vmem:[#allocation165_spill] sm:$0xff] %v6365_v11  ;;  %v6368_v55 = vld [vmem:[#allocation9 + $0x318] sm:$0xff] }
 0x3a6   :  { %1857 = vmatpush2.msra.mxu1 %v6353_v44  ;;  %8952 = vst [vmem:[#allocation166_spill] sm:$0xff] %v6368_v55  ;;  %v6371_v44 = vld [vmem:[#allocation9 + $0x310] sm:$0xff] }
 0x3a7   :  { %1858 = vmatprep.subr.mxu1 %v6356_v42  ;;  %8953 = vst [vmem:[#allocation167_spill] sm:$0xff] %v6371_v44  ;;  %v6374_v42 = vld [vmem:[#allocation9 + $0x2d8] sm:$0xff] }
 0x3a8   :  { %1859 = vmatpush2.msra.mxu1 %v6359_v9  ;;  %8954 = vst [vmem:[#allocation168_spill] sm:$0xff] %v6374_v42 }
 0x3a9   :  { %1860 = vmatprep.subr.mxu1 %v6362_v61 }
 0x3aa   :  { %1861 = vmatpush2.msra.mxu1 %v6365_v11 }
 0x3ab   :  { %1862 = vmatprep.subr.mxu1 %v6368_v55 }
 0x3ac   :  { %1863 = vmatpush2.msra.mxu1 %v6371_v44 }
 0x3ad   :  { %2041 = vmatprep.subr.mxu1 %v6374_v42 }
 0x3ed   :  { %v1483_v9 = vpop.f32.mrf.mxu1  ;;  %v1554_v34 = vpop.f32.mrf.mxu0 }
 0x3ef   :  { %v1485_v3 = vpop.f32.mrf.mxu1  ;;  %v1556_v55 = vpop.f32.mrf.mxu0 }
 0x3f0   :  { %v1636_v63 = vcombine.low %v1483_v9, %v1485_v3  ;;  %v1664_v40 = vcombine.low %v1554_v34, %v1556_v55 }
 0x3f2   :  { %v1643_v61 = vrot.slane %v1636_v63, %v5569_v56  ;;  %v1671_v44 = vrot.slane %v1664_v40, %v5569_v56 }
 0x3f4   :  { %v1650_v11 = vrot.slane %v1643_v61, %v5569_v56  ;;  %v1678_v42 = vrot.slane %v1671_v44, %v5569_v56 }
 0x3f6   :  { %v1652_v49 = vadd.f32 %v1650_v11, %v1633_v37  ;;  %v1680_v0 = vadd.f32 %v1678_v42, %v1660_v5  ;;  %v1708_v42 = vrot.slane %v1633_v37, 4  ;;  %v6399_v37 = vld [vmem:[#allocation9 + $0x2d0] sm:$0xff] }
 0x3f8   :  { %v3923_v30 = vmul.f32 -1.442695, %v1652_v49  ;;  %v3924_v3 = vmul.f32 -1.442695, %v1680_v0 }
 0x3fa   :  { %4084 = vpow2.f32 %v3923_v30 }
 0x3fb   :  { %4086 = vpow2.f32 %v3924_v3 }
 0x407   :  { %v4085_v9 = vpop.eup %4084 }
 0x408   :  { %v1656_v63 = vadd.f32 1.0, %v4085_v9  ;;  %v4087_v34 = vpop.eup %4086 }
 0x409   :  { %v1684_v49 = vadd.f32 1.0, %v4087_v34  ;;  %v6407_v34 = vld [vmem:[#allocation9 + $0x2a0] sm:$0xff] }
 0x40a   :  { %4088 = vrcp.f32 %v1656_v63 }
 0x40b   :  { %4090 = vrcp.f32 %v1684_v49  ;;  %v6415_v49 = vld [vmem:[#allocation9 + $0x270] sm:$0xff] }
 0x417   :  { %v4089_v11 = vpop.eup %4088 }
 0x418   :  { %v4091_v5 = vpop.eup %4090 }
 0x419   :  { %v1712_v3 = vsub.f32 1.0, %v4091_v5 }
 0x42d   :  { %v1625_v45 = vpop.f32.mrf.mxu1 }
 0x42e   :  { %v1687_v53 = vadd.f32 %v1625_v45, %v5577_v27  ;;  %v1714_v45 = vmul.f32 %v4091_v5, %v5987_v7  ;;  %v6403_v7 = vld [vmem:[#allocation9 + $0x2a8] sm:$0xff]  ;;  %v8976_v5 = vld [vmem:[#allocation85_spill] sm:$0xff] }
 0x42f   :  { %v1627_v61 = vpop.f32.mrf.mxu1 }
 0x430   :  { %v1688_v57 = vadd.f32 %v1627_v61, %v5580_v35 }
 0x432   :  { %v1691_v55 = vcombine.low %v1687_v53, %v1688_v57 }
 0x434   :  { %v1698_v30 = vrot.slane %v1691_v55, %v5569_v56  ;;  %v6411_v55 = vld [vmem:[#allocation9 + $0x278] sm:$0xff] }
 0x436   :  { %v1705_v44 = vrot.slane %v1698_v30, %v5569_v56  ;;  %v6419_v30 = vld [vmem:[#allocation9 + $0x248] sm:$0xff] }
 0x438   :  { %v1707_v0 = vmul.f32 %v4089_v11, %v1705_v44  ;;  %v8971_v44 = vld [vmem:[#allocation97_spill] sm:$0xff]  ;;  %v8972_v11 = vld [vmem:[#allocation83_spill] sm:$0xff] }
 0x43a   :  { %v1710_v40 = vadd.f32 %v1708_v42, %v1707_v0  ;;  %v8973_v0 = vld [vmem:[#allocation29_spill] sm:$0xff]  ;;  %v8974_v42 = vld [vmem:[#allocation84_spill] sm:$0xff] }
 0x43c   :  { %4092 = vtanh.f32 %v1710_v40  ;;  %v8975_v40 = vld [vmem:[#allocation99_spill] sm:$0xff] }
 0x449   :  { %v4093_v9 = vpop.eup %4092 }
 0x44a   :  { %v1713_v63 = vmul.f32 %v4093_v9, %v1712_v3  ;;  %v8977_v3 = vld [vmem:[#allocation30_spill] sm:$0xff] }
 0x44b   :  { %v8978_v9 = vld [vmem:[#allocation86_spill] sm:$0xff] }
 0x44c   :  { %v6386_v61 = vadd.f32 %v1714_v45, %v1713_v63  ;;  %v8979_v63 = vld [vmem:[#allocation101_spill] sm:$0xff]  ;;  %v8980_v45 = vld [vmem:[#allocation88_spill] sm:$0xff] }
 0x44e   :  { %1716 = vst [vmem:[#allocation3 + $0x2] sm:$0x1] %v6386_v61  ;;  %v1721_v53 = vrot.slane %v6386_v61, %v5539_v23  ;;  %v6393_v57 = vrot.slane %v6386_v61, %v5528_v16 }
 0x450   :  { %1723 = vst [vmem:[#allocation3 + $0xd] sm:$0x1] %v1721_v53  ;;  %1793 = vmatprep.mubr.f32.mxu0 %v1721_v53  ;;  %1864 = vmatprep.mubr.f32.mxu1 %v1721_v53 }
 0x451   :  { %1794 = vmatmul.mubr.f32.vlgmr.msra.gmra.mxu0 %v6393_v57  ;;  %1865 = vmatmul.mubr.f32.vlgmr.msra.gmra.mxu1 %v6393_v57 }
 0x452   :  { %1872 = vmatpush1.msra.mxu0 %v5998_v32  ;;  %1935 = vmatprep.mubr.f32.mxu0 %v1721_v53  ;;  %v8981_v53 = vld [vmem:[#allocation31_spill] sm:$0xff] }
 0x453   :  { %1873 = vmatprep.subr.mxu0 %v6001_v39  ;;  %2042 = vmatpush1.msra.mxu1 %v6399_v37 }
 0x454   :  { %1874 = vmatpush1.msra.mxu0 %v6005_v48  ;;  %2043 = vmatprep.subr.mxu1 %v6403_v7 }
 0x455   :  { %1875 = vmatprep.subr.mxu0 %v6009_v2  ;;  %2044 = vmatpush1.msra.mxu1 %v6407_v34 }
 0x456   :  { %1876 = vmatpush1.msra.mxu0 %v6013_v17  ;;  %2045 = vmatprep.subr.mxu1 %v6411_v55 }
 0x457   :  { %1877 = vmatprep.subr.mxu0 %v6017_v28  ;;  %2046 = vmatpush1.msra.mxu1 %v6415_v49 }
 0x458   :  { %1878 = vmatpush1.msra.mxu0 %v6021_v15  ;;  %2047 = vmatprep.subr.mxu1 %v6419_v30 }
 0x459   :  { %1879 = vmatprep.subr.mxu0 %v6025_v13  ;;  %2048 = vmatpush1.msra.mxu1 %v5613_v18  ;;  %v8955_v18 = vld [vmem:[#allocation89_spill] sm:$0xff] }
 0x45a   :  { %1880 = vmatpush1.msra.mxu0 %v6029_v24  ;;  %2049 = vmatprep.subr.mxu1 %v5617_v58  ;;  %v8956_v58 = vld [vmem:[#allocation75_spill] sm:$0xff] }
 0x45b   :  { %1881 = vmatprep.subr.mxu0 %v6033_v20  ;;  %2050 = vmatpush1.msra.mxu1 %v5621_v38  ;;  %v8957_v38 = vld [vmem:[#allocation25_spill] sm:$0xff] }
 0x45c   :  { %1882 = vmatpush1.msra.mxu0 %v6037_v54  ;;  %2051 = vmatprep.subr.mxu1 %v5625_v46  ;;  %v8958_v46 = vld [vmem:[#allocation76_spill] sm:$0xff] }
 0x45d   :  { %1883 = vmatprep.subr.mxu0 %v6041_v8  ;;  %2052 = vmatpush1.msra.mxu1 %v5629_v25  ;;  %v8959_v25 = vld [vmem:[#allocation91_spill] sm:$0xff] }
 0x45e   :  { %1884 = vmatpush1.msra.mxu0 %v6045_v60  ;;  %2053 = vmatprep.subr.mxu1 %v5633_v31  ;;  %v8960_v31 = vld [vmem:[#allocation77_spill] sm:$0xff] }
 0x45f   :  { %1885 = vmatprep.subr.mxu0 %v6049_v6  ;;  %2054 = vmatpush1.msra.mxu1 %v5637_v47  ;;  %v8961_v47 = vld [vmem:[#allocation26_spill] sm:$0xff] }
 0x460   :  { %1886 = vmatpush1.msra.mxu0 %v6053_v14  ;;  %2055 = vmatprep.subr.mxu1 %v5641_v59  ;;  %v8962_v59 = vld [vmem:[#allocation78_spill] sm:$0xff] }
 0x461   :  { %1887 = vmatprep.subr.mxu0 %v6057_v26  ;;  %2056 = vmatpush1.msra.mxu1 %v5645_v36  ;;  %v8963_v36 = vld [vmem:[#allocation93_spill] sm:$0xff] }
 0x462   :  { %1888 = vmatpush1.msra.mxu0 %v6061_v50  ;;  %2057 = vmatprep.subr.mxu1 %v5649_v52  ;;  %v8964_v52 = vld [vmem:[#allocation79_spill] sm:$0xff] }
 0x463   :  { %1889 = vmatprep.subr.mxu0 %v6065_v4  ;;  %2058 = vmatpush1.msra.mxu1 %v5653_v10  ;;  %v8965_v10 = vld [vmem:[#allocation27_spill] sm:$0xff] }
 0x464   :  { %1890 = vmatpush1.msra.mxu0 %v6069_v22  ;;  %2059 = vmatprep.subr.mxu1 %v5657_v12  ;;  %v8966_v12 = vld [vmem:[#allocation80_spill] sm:$0xff] }
 0x465   :  { %1891 = vmatprep.subr.mxu0 %v6073_v62  ;;  %2060 = vmatpush1.msra.mxu1 %v5661_v19  ;;  %v8967_v19 = vld [vmem:[#allocation95_spill] sm:$0xff] }
 0x466   :  { %1892 = vmatpush1.msra.mxu0 %v6077_v1  ;;  %2061 = vmatprep.subr.mxu1 %v8815_v21  ;;  %v8968_v21 = vld [vmem:[#allocation81_spill] sm:$0xff] }
 0x467   :  { %1893 = vmatprep.subr.mxu0 %v6081_v29  ;;  %2062 = vmatpush1.msra.mxu1 %v8816_v33  ;;  %v8969_v33 = vld [vmem:[#allocation28_spill] sm:$0xff] }
 0x468   :  { %1894 = vmatpush1.msra.mxu0 %v6085_v43  ;;  %2063 = vmatprep.subr.mxu1 %v8817_v51  ;;  %v8970_v51 = vld [vmem:[#allocation82_spill] sm:$0xff] }
 0x469   :  { %1895 = vmatprep.subr.mxu0 %v6089_v41  ;;  %2064 = vmatpush1.msra.mxu1 %v8955_v18  ;;  %v8982_v18 = vld [vmem:[#allocation90_spill] sm:$0xff] }
 0x46a   :  { %1896 = vmatpush1.msra.mxu0 %v8956_v58  ;;  %2065 = vmatprep.subr.mxu1 %v8957_v38  ;;  %v8983_v38 = vld [vmem:[#allocation103_spill] sm:$0xff] }
 0x46b   :  { %1897 = vmatprep.subr.mxu0 %v8958_v46  ;;  %2066 = vmatpush1.msra.mxu1 %v8959_v25  ;;  %v8984_v25 = vld [vmem:[#allocation92_spill] sm:$0xff] }
 0x46c   :  { %1898 = vmatpush1.msra.mxu0 %v8960_v31  ;;  %2067 = vmatprep.subr.mxu1 %v8961_v47  ;;  %v8985_v47 = vld [vmem:[#allocation32_spill] sm:$0xff] }
 0x46d   :  { %1899 = vmatprep.subr.mxu0 %v8962_v59  ;;  %2068 = vmatpush1.msra.mxu1 %v8963_v36  ;;  %v8986_v36 = vld [vmem:[#allocation94_spill] sm:$0xff] }
 0x46e   :  { %1900 = vmatpush1.msra.mxu0 %v8964_v52  ;;  %2069 = vmatprep.subr.mxu1 %v8965_v10  ;;  %v8987_v10 = vld [vmem:[#allocation105_spill] sm:$0xff] }
 0x46f   :  { %1901 = vmatprep.subr.mxu0 %v8966_v12  ;;  %2070 = vmatpush1.msra.mxu1 %v8967_v19  ;;  %v8988_v19 = vld [vmem:[#allocation96_spill] sm:$0xff] }
 0x470   :  { %1902 = vmatpush1.msra.mxu0 %v8968_v21  ;;  %2071 = vmatprep.subr.mxu1 %v8969_v33  ;;  %v8989_v33 = vld [vmem:[#allocation33_spill] sm:$0xff] }
 0x471   :  { %1903 = vmatprep.subr.mxu0 %v8970_v51  ;;  %2072 = vmatpush1.msra.mxu1 %v8971_v44  ;;  %v8990_v44 = vld [vmem:[#allocation98_spill] sm:$0xff] }
 0x472   :  { %1904 = vmatpush2.msra.mxu0 %v8972_v11  ;;  %2073 = vmatprep.subr.mxu1 %v8973_v0  ;;  %v8991_v0 = vld [vmem:[#allocation107_spill] sm:$0xff] }
 0x473   :  { %1905 = vmatprep.subr.mxu0 %v8974_v42  ;;  %2074 = vmatpush2.msra.mxu1 %v8975_v40  ;;  %v8992_v40 = vld [vmem:[#allocation100_spill] sm:$0xff] }
 0x474   :  { %1906 = vmatpush2.msra.mxu0 %v8976_v5  ;;  %2075 = vmatprep.subr.mxu1 %v8977_v3  ;;  %v8993_v3 = vld [vmem:[#allocation34_spill] sm:$0xff] }
 0x475   :  { %1907 = vmatprep.subr.mxu0 %v8978_v9  ;;  %2076 = vmatpush2.msra.mxu1 %v8979_v63  ;;  %v8994_v63 = vld [vmem:[#allocation102_spill] sm:$0xff] }
 0x476   :  { %1908 = vmatpush2.msra.mxu0 %v8980_v45  ;;  %2077 = vmatprep.subr.mxu1 %v8981_v53  ;;  %v8995_v53 = vld [vmem:[#allocation109_spill] sm:$0xff] }
 0x477   :  { %1909 = vmatprep.subr.mxu0 %v8982_v18  ;;  %2078 = vmatpush2.msra.mxu1 %v8983_v38  ;;  %v8996_v38 = vld [vmem:[#allocation104_spill] sm:$0xff] }
 0x478   :  { %1910 = vmatpush2.msra.mxu0 %v8984_v25  ;;  %2079 = vmatprep.subr.mxu1 %v8985_v47  ;;  %v8997_v47 = vld [vmem:[#allocation35_spill] sm:$0xff] }
 0x479   :  { %1911 = vmatprep.subr.mxu0 %v8986_v36  ;;  %2080 = vmatpush2.msra.mxu1 %v8987_v10  ;;  %v8998_v10 = vld [vmem:[#allocation106_spill] sm:$0xff] }
 0x47a   :  { %1912 = vmatpush2.msra.mxu0 %v8988_v19  ;;  %2081 = vmatprep.subr.mxu1 %v8989_v33  ;;  %v8999_v19 = vld [vmem:[#allocation111_spill] sm:$0xff]  ;;  %v9000_v33 = vld [vmem:[#allocation108_spill] sm:$0xff] }
 0x47b   :  { %1913 = vmatprep.subr.mxu0 %v8990_v44  ;;  %2082 = vmatpush2.msra.mxu1 %v8991_v0  ;;  %v9001_v44 = vld [vmem:[#allocation36_spill] sm:$0xff]  ;;  %v9002_v0 = vld [vmem:[#allocation110_spill] sm:$0xff] }
 0x47c   :  { %1914 = vmatpush2.msra.mxu0 %v8992_v40  ;;  %2083 = vmatprep.subr.mxu1 %v8993_v3  ;;  %v9003_v40 = vld [vmem:[#allocation113_spill] sm:$0xff]  ;;  %v9004_v3 = vld [vmem:[#allocation112_spill] sm:$0xff]  ;;  %v1944_v36 = vld [vmem:[#allocation2 + $0x3] ss:$8 sm:$0x30] }
 0x47d   :  { %1915 = vmatprep.subr.mxu0 %v8994_v63  ;;  %2084 = vmatpush2.msra.mxu1 %v8995_v53  ;;  %v9005_v63 = vld [vmem:[#allocation37_spill] sm:$0xff]  ;;  %v9006_v53 = vld [vmem:[#allocation114_spill] sm:$0xff] }
 0x47e   :  { %1916 = vmatpush2.msra.mxu0 %v8996_v38  ;;  %2085 = vmatprep.subr.mxu1 %v8997_v47  ;;  %v9007_v38 = vld [vmem:[#allocation115_spill] sm:$0xff]  ;;  %v9008_v47 = vld [vmem:[#allocation116_spill] sm:$0xff] }
 0x47f   :  { %1917 = vmatprep.subr.mxu0 %v8998_v10  ;;  %2086 = vmatpush2.msra.mxu1 %v8999_v19  ;;  %v9009_v10 = vld [vmem:[#allocation38_spill] sm:$0xff] }
 0x480   :  { %1918 = vmatpush2.msra.mxu0 %v9000_v33  ;;  %2087 = vmatprep.subr.mxu1 %v9001_v44  ;;  %v9010_v19 = vld [vmem:[#allocation118_spill] sm:$0xff]  ;;  %v9011_v33 = vld [vmem:[#allocation117_spill] sm:$0xff]  ;;  %v9012_v44 = vld [vmem:[#allocation120_spill] sm:$0xff] }
 0x481   :  { %1919 = vmatprep.subr.mxu0 %v9002_v0  ;;  %2088 = vmatpush2.msra.mxu1 %v9003_v40  ;;  %v9013_v0 = vld [vmem:[#allocation39_spill] sm:$0xff]  ;;  %v9014_v40 = vld [vmem:[#allocation122_spill] sm:$0xff] }
 0x482   :  { %1920 = vmatpush2.msra.mxu0 %v9004_v3  ;;  %2089 = vmatprep.subr.mxu1 %v9005_v63  ;;  %v9015_v3 = vld [vmem:[#allocation119_spill] sm:$0xff]  ;;  %v9016_v63 = vld [vmem:[#allocation124_spill] sm:$0xff] }
 0x483   :  { %1921 = vmatprep.subr.mxu0 %v9006_v53  ;;  %2090 = vmatpush2.msra.mxu1 %v9007_v38  ;;  %v9017_v53 = vld [vmem:[#allocation40_spill] sm:$0xff]  ;;  %v9018_v38 = vld [vmem:[#allocation126_spill] sm:$0xff] }
 0x484   :  { %1922 = vmatpush2.msra.mxu0 %v9008_v47  ;;  %2091 = vmatprep.subr.mxu1 %v9009_v10  ;;  %v9019_v47 = vld [vmem:[#allocation121_spill] sm:$0xff]  ;;  %v9020_v10 = vld [vmem:[#allocation128_spill] sm:$0xff] }
 0x485   :  { %1923 = vmatprep.subr.mxu0 %v9010_v19  ;;  %2092 = vmatpush2.msra.mxu1 %v9011_v33  ;;  %v9021_v19 = vld [vmem:[#allocation41_spill] sm:$0xff]  ;;  %v9022_v33 = vld [vmem:[#allocation130_spill] sm:$0xff] }
 0x486   :  { %1924 = vmatpush2.msra.mxu0 %v9012_v44  ;;  %2093 = vmatprep.subr.mxu1 %v9013_v0  ;;  %v9023_v44 = vld [vmem:[#allocation123_spill] sm:$0xff]  ;;  %v9024_v0 = vld [vmem:[#allocation132_spill] sm:$0xff] }
 0x487   :  { %1925 = vmatprep.subr.mxu0 %v9014_v40  ;;  %2094 = vmatpush2.msra.mxu1 %v9015_v3  ;;  %v9025_v40 = vld [vmem:[#allocation42_spill] sm:$0xff] }
 0x488   :  { %1926 = vmatpush2.msra.mxu0 %v9016_v63  ;;  %2095 = vmatprep.subr.mxu1 %v9017_v53  ;;  %v9026_v3 = vld [vmem:[#allocation134_spill] sm:$0xff]  ;;  %v9027_v63 = vld [vmem:[#allocation125_spill] sm:$0xff]  ;;  %v9028_v53 = vld [vmem:[#allocation136_spill] sm:$0xff] }
 0x489   :  { %1927 = vmatprep.subr.mxu0 %v9018_v38  ;;  %2096 = vmatpush2.msra.mxu1 %v9019_v47  ;;  %v9029_v38 = vld [vmem:[#allocation43_spill] sm:$0xff]  ;;  %v9030_v47 = vld [vmem:[#allocation138_spill] sm:$0xff] }
 0x48a   :  { %1928 = vmatpush2.msra.mxu0 %v9020_v10  ;;  %2097 = vmatprep.subr.mxu1 %v9021_v19  ;;  %v9031_v10 = vld [vmem:[#allocation127_spill] sm:$0xff]  ;;  %v9032_v19 = vld [vmem:[#allocation140_spill] sm:$0xff] }
 0x48b   :  { %1929 = vmatprep.subr.mxu0 %v9022_v33  ;;  %2098 = vmatpush2.msra.mxu1 %v9023_v44  ;;  %v9033_v33 = vld [vmem:[#allocation44_spill] sm:$0xff]  ;;  %v9034_v44 = vld [vmem:[#allocation129_spill] sm:$0xff] }
 0x48c   :  { %1930 = vmatpush2.msra.mxu0 %v9024_v0  ;;  %2099 = vmatprep.subr.mxu1 %v9025_v40  ;;  %v9035_v40 = vld [vmem:[#allocation45_spill] sm:$0xff] }
 0x48d   :  { %1931 = vmatprep.subr.mxu0 %v9026_v3  ;;  %2100 = vmatpush2.msra.mxu1 %v9027_v63  ;;  %v9036_v3 = vld [vmem:[#allocation131_spill] sm:$0xff]  ;;  %v9037_v63 = vld [vmem:[#allocation46_spill] sm:$0xff] }
 0x48e   :  { %1932 = vmatpush2.msra.mxu0 %v9028_v53  ;;  %2101 = vmatprep.subr.mxu1 %v9029_v38  ;;  %v9038_v53 = vld [vmem:[#allocation133_spill] sm:$0xff]  ;;  %v9039_v38 = vld [vmem:[#allocation47_spill] sm:$0xff] }
 0x48f   :  { %1933 = vmatprep.subr.mxu0 %v9030_v47  ;;  %2102 = vmatpush2.msra.mxu1 %v9031_v10  ;;  %v9040_v47 = vld [vmem:[#allocation135_spill] sm:$0xff]  ;;  %v9041_v10 = vld [vmem:[#allocation48_spill] sm:$0xff] }
 0x490   :  { %1934 = vmatpush2.msra.mxu0 %v9032_v19  ;;  %2103 = vmatprep.subr.mxu1 %v9033_v33  ;;  %v9042_v19 = vld [vmem:[#allocation137_spill] sm:$0xff] }
 0x491   :  { %1936 = vmatmul.mubr.f32.vlgmr.msra.gmra.mxu0 %v6393_v57  ;;  %2112 = vmatprep.subr.mxu0 %v9034_v44  ;;  %v9043_v33 = vld [vmem:[#allocation49_spill] sm:$0xff]  ;;  %v9044_v57 = vld [vmem:[#allocation139_spill] sm:$0xff]  ;;  %v9045_v44 = vld [vmem:[#allocation50_spill] sm:$0xff] }
 0x492   :  { %2113 = vmatpush1.msra.mxu0 %v9035_v40  ;;  %2104 = vmatpush2.msra.mxu1 %v9036_v3  ;;  %v9046_v40 = vld [vmem:[#allocation141_spill] sm:$0xff]  ;;  %v9047_v3 = vld [vmem:[#allocation51_spill] sm:$0xff] }
 0x493   :  { %2114 = vmatprep.subr.mxu0 %v9037_v63  ;;  %2183 = vmatprep.subr.mxu1 %v9038_v53  ;;  %v9048_v63 = vld [vmem:[#allocation52_spill] sm:$0xff]  ;;  %v9049_v53 = vld [vmem:[#allocation53_spill] sm:$0xff] }
 0x494   :  { %2115 = vmatpush1.msra.mxu0 %v9039_v38  ;;  %v9050_v38 = vld [vmem:[#allocation54_spill] sm:$0xff] }
 0x495   :  { %2116 = vmatprep.subr.mxu0 %v9040_v47  ;;  %v9051_v47 = vld [vmem:[#allocation55_spill] sm:$0xff] }
 0x496   :  { %2117 = vmatpush1.msra.mxu0 %v9041_v10  ;;  %v9052_v10 = vld [vmem:[#allocation56_spill] sm:$0xff] }
 0x497   :  { %2118 = vmatprep.subr.mxu0 %v9042_v19  ;;  %v9053_v19 = vld [vmem:[#allocation57_spill] sm:$0xff] }
 0x498   :  { %2119 = vmatpush1.msra.mxu0 %v9043_v33  ;;  %v9054_v33 = vld [vmem:[#allocation58_spill] sm:$0xff] }
 0x499   :  { %2120 = vmatprep.subr.mxu0 %v9044_v57  ;;  %v9055_v57 = vld [vmem:[#allocation59_spill] sm:$0xff] }
 0x49a   :  { %2121 = vmatpush1.msra.mxu0 %v9045_v44  ;;  %v9056_v44 = vld [vmem:[#allocation60_spill] sm:$0xff] }
 0x49b   :  { %2122 = vmatprep.subr.mxu0 %v9046_v40  ;;  %v9057_v40 = vld [vmem:[#allocation61_spill] sm:$0xff] }
 0x49c   :  { %2123 = vmatpush1.msra.mxu0 %v9047_v3  ;;  %v9058_v3 = vld [vmem:[#allocation62_spill] sm:$0xff] }
 0x49d   :  { %2124 = vmatprep.subr.mxu0 %v9048_v63  ;;  %v9059_v63 = vld [vmem:[#allocation63_spill] sm:$0xff] }
 0x49e   :  { %2125 = vmatpush1.msra.mxu0 %v9049_v53  ;;  %v9060_v53 = vld [vmem:[#allocation64_spill] sm:$0xff] }
 0x49f   :  { %2126 = vmatprep.subr.mxu0 %v9050_v38  ;;  %v9061_v38 = vld [vmem:[#allocation65_spill] sm:$0xff] }
 0x4a0   :  { %2127 = vmatpush1.msra.mxu0 %v9051_v47  ;;  %v9062_v47 = vld [vmem:[#allocation66_spill] sm:$0xff] }
 0x4a1   :  { %2128 = vmatprep.subr.mxu0 %v9052_v10  ;;  %v9063_v10 = vld [vmem:[#allocation67_spill] sm:$0xff] }
 0x4a2   :  { %2129 = vmatpush1.msra.mxu0 %v9053_v19  ;;  %v9064_v19 = vld [vmem:[#allocation68_spill] sm:$0xff] }
 0x4a3   :  { %2130 = vmatprep.subr.mxu0 %v9054_v33  ;;  %v9065_v33 = vld [vmem:[#allocation69_spill] sm:$0xff] }
 0x4a4   :  { %2131 = vmatpush1.msra.mxu0 %v9055_v57  ;;  %v9066_v57 = vld [vmem:[#allocation70_spill] sm:$0xff] }
 0x4a5   :  { %2132 = vmatprep.subr.mxu0 %v9056_v44  ;;  %v9067_v44 = vld [vmem:[#allocation71_spill] sm:$0xff] }
 0x4a6   :  { %2133 = vmatpush1.msra.mxu0 %v9057_v40  ;;  %v9068_v40 = vld [vmem:[#allocation72_spill] sm:$0xff] }
 0x4a7   :  { %2134 = vmatprep.subr.mxu0 %v9058_v3  ;;  %v9069_v3 = vld [vmem:[#allocation73_spill] sm:$0xff] }
 0x4a8   :  { %2135 = vmatpush1.msra.mxu0 %v9059_v63  ;;  %v9070_v63 = vld [vmem:[#allocation74_spill] sm:$0xff] }
 0x4a9   :  { %2136 = vmatprep.subr.mxu0 %v9060_v53  ;;  %v9071_v53 = vld [vmem:[#allocation142_spill] sm:$0xff] }
 0x4aa   :  { %2137 = vmatpush1.msra.mxu0 %v9061_v38  ;;  %v9072_v38 = vld [vmem:[#allocation143_spill] sm:$0xff] }
 0x4ab   :  { %2138 = vmatprep.subr.mxu0 %v9062_v47  ;;  %v9073_v47 = vld [vmem:[#allocation144_spill] sm:$0xff] }
 0x4ac   :  { %2139 = vmatpush1.msra.mxu0 %v9063_v10  ;;  %v9074_v10 = vld [vmem:[#allocation145_spill] sm:$0xff] }
 0x4ad   :  { %2140 = vmatprep.subr.mxu0 %v9064_v19  ;;  %v9075_v19 = vld [vmem:[#allocation146_spill] sm:$0xff] }
 0x4ae   :  { %2141 = vmatpush1.msra.mxu0 %v9065_v33  ;;  %v9076_v33 = vld [vmem:[#allocation147_spill] sm:$0xff] }
 0x4af   :  { %2142 = vmatprep.subr.mxu0 %v9066_v57  ;;  %v9077_v57 = vld [vmem:[#allocation148_spill] sm:$0xff] }
 0x4b0   :  { %2143 = vmatpush1.msra.mxu0 %v9067_v44  ;;  %v9078_v44 = vld [vmem:[#allocation23_spill] sm:$0xff] }
 0x4b1   :  { %2144 = vmatprep.subr.mxu0 %v9068_v40  ;;  %v9079_v40 = vld [vmem:[#allocation87_spill] sm:$0xff] }
 0x4b2   :  { %2145 = vmatpush2.msra.mxu0 %v9069_v3  ;;  %v9080_v3 = vld [vmem:[#allocation24_spill] sm:$0xff] }
 0x4b3   :  { %2146 = vmatprep.subr.mxu0 %v9070_v63  ;;  %v9081_v63 = vld [vmem:[#allocation149_spill] sm:$0xff] }
 0x4b4   :  { %2147 = vmatpush2.msra.mxu0 %v9071_v53  ;;  %v9082_v53 = vld [vmem:[#allocation150_spill] sm:$0xff] }
 0x4b5   :  { %2148 = vmatprep.subr.mxu0 %v9072_v38  ;;  %v9083_v38 = vld [vmem:[#allocation151_spill] sm:$0xff] }
 0x4b6   :  { %2149 = vmatpush2.msra.mxu0 %v9073_v47  ;;  %v9084_v47 = vld [vmem:[#allocation152_spill] sm:$0xff] }
 0x4b7   :  { %2150 = vmatprep.subr.mxu0 %v9074_v10  ;;  %v9085_v10 = vld [vmem:[#allocation153_spill] sm:$0xff] }
 0x4b8   :  { %2151 = vmatpush2.msra.mxu0 %v9075_v19  ;;  %v9086_v19 = vld [vmem:[#allocation154_spill] sm:$0xff] }
 0x4b9   :  { %2152 = vmatprep.subr.mxu0 %v9076_v33  ;;  %v9087_v33 = vld [vmem:[#allocation155_spill] sm:$0xff] }
 0x4ba   :  { %2153 = vmatpush2.msra.mxu0 %v9077_v57  ;;  %v9088_v57 = vld [vmem:[#allocation156_spill] sm:$0xff] }
 0x4bb   :  { %2154 = vmatprep.subr.mxu0 %v9078_v44  ;;  %v9089_v44 = vld [vmem:[#allocation157_spill] sm:$0xff] }
 0x4bc   :  { %2155 = vmatpush2.msra.mxu0 %v9079_v40  ;;  %v9090_v40 = vld [vmem:[#allocation158_spill] sm:$0xff] }
 0x4bd   :  { %2156 = vmatprep.subr.mxu0 %v9080_v3  ;;  %v9091_v3 = vld [vmem:[#allocation159_spill] sm:$0xff] }
 0x4be   :  { %2157 = vmatpush2.msra.mxu0 %v9081_v63  ;;  %v9092_v63 = vld [vmem:[#allocation160_spill] sm:$0xff] }
 0x4bf   :  { %2158 = vmatprep.subr.mxu0 %v9082_v53  ;;  %v9093_v53 = vld [vmem:[#allocation161_spill] sm:$0xff] }
 0x4c0   :  { %2159 = vmatpush2.msra.mxu0 %v9083_v38  ;;  %v9094_v38 = vld [vmem:[#allocation162_spill] sm:$0xff] }
 0x4c1   :  { %2160 = vmatprep.subr.mxu0 %v9084_v47  ;;  %v9095_v47 = vld [vmem:[#allocation163_spill] sm:$0xff] }
 0x4c2   :  { %2161 = vmatpush2.msra.mxu0 %v9085_v10  ;;  %v9096_v10 = vld [vmem:[#allocation164_spill] sm:$0xff] }
 0x4c3   :  { %2162 = vmatprep.subr.mxu0 %v9086_v19  ;;  %v9097_v19 = vld [vmem:[#allocation165_spill] sm:$0xff] }
 0x4c4   :  { %2163 = vmatpush2.msra.mxu0 %v9087_v33  ;;  %v9098_v33 = vld [vmem:[#allocation166_spill] sm:$0xff] }
 0x4c5   :  { %2164 = vmatprep.subr.mxu0 %v9088_v57  ;;  %v9099_v57 = vld [vmem:[#allocation167_spill] sm:$0xff] }
 0x4c6   :  { %2165 = vmatpush2.msra.mxu0 %v9089_v44  ;;  %v9100_v44 = vld [vmem:[#allocation168_spill] sm:$0xff] }
 0x4c7   :  { %2166 = vmatprep.subr.mxu0 %v9090_v40 }
 0x4c8   :  { %2167 = vmatpush2.msra.mxu0 %v9091_v3 }
 0x4c9   :  { %2168 = vmatprep.subr.mxu0 %v9092_v63 }
 0x4ca   :  { %2169 = vmatpush2.msra.mxu0 %v9093_v53 }
 0x4cb   :  { %2170 = vmatprep.subr.mxu0 %v9094_v38 }
 0x4cc   :  { %2171 = vmatpush2.msra.mxu0 %v9095_v47  ;;  %v1943_v47 = vld [vmem:[#allocation2 + $0x3] ss:$8 sm:$0xf] }
 0x4cd   :  { %2172 = vmatprep.subr.mxu0 %v9096_v10  ;;  %v1945_v25 = vor.u32 %v1944_v36, %v1943_v47 }
 0x4ce   :  { %2173 = vmatpush2.msra.mxu0 %v9097_v19 }
 0x4cf   :  { %2174 = vmatprep.subr.mxu0 %v9098_v33 }
 0x4d0   :  { %2175 = vmatpush2.msra.mxu0 %v9099_v57  ;;  %v1972_v57 = vrot.slane %v1945_v25, 2 }
 0x4d1   :  { %2353 = vmatprep.subr.mxu0 %v9100_v44 }
 0x511   :  { %v1795_v40 = vpop.f32.mrf.mxu0  ;;  %v1866_v53 = vpop.f32.mrf.mxu1 }
 0x513   :  { %v1797_v3 = vpop.f32.mrf.mxu0  ;;  %v1868_v10 = vpop.f32.mrf.mxu1 }
 0x514   :  { %v1948_v0 = vcombine.low %v1795_v40, %v1797_v3  ;;  %v1976_v19 = vcombine.low %v1866_v53, %v1868_v10 }
 0x516   :  { %v1955_v63 = vrot.slane %v1948_v0, %v5569_v56  ;;  %v1983_v33 = vrot.slane %v1976_v19, %v5569_v56 }
 0x518   :  { %v1962_v38 = vrot.slane %v1955_v63, %v5569_v56  ;;  %v1990_v44 = vrot.slane %v1983_v33, %v5569_v56  ;;  %v2020_v33 = vrot.slane %v1945_v25, 4 }
 0x51a   :  { %v1964_v18 = vadd.f32 %v1962_v38, %v1945_v25  ;;  %v1992_v9 = vadd.f32 %v1990_v44, %v1972_v57  ;;  %v9115_v25 = vld [vmem:[#allocation92_spill] sm:$0xff] }
 0x51c   :  { %v3925_v45 = vmul.f32 -1.442695, %v1964_v18  ;;  %v3926_v40 = vmul.f32 -1.442695, %v1992_v9 }
 0x51e   :  { %4094 = vpow2.f32 %v3925_v45 }
 0x51f   :  { %4096 = vpow2.f32 %v3926_v40 }
 0x52b   :  { %v4095_v3 = vpop.eup %4094 }
 0x52c   :  { %v1968_v0 = vadd.f32 1.0, %v4095_v3  ;;  %v4097_v53 = vpop.eup %4096 }
 0x52d   :  { %v1996_v47 = vadd.f32 1.0, %v4097_v53  ;;  %v6760_v53 = vld [vmem:[#allocation9 + $0x548] sm:$0xff] }
 0x52e   :  { %4098 = vrcp.f32 %v1968_v0  ;;  %9116 = vst [vmem:[#allocation27_spill] sm:$0xff] %v6760_v53 }
 0x52f   :  { %4100 = vrcp.f32 %v1996_v47  ;;  %v6764_v47 = vld [vmem:[#allocation9 + $0x540] sm:$0xff] }
 0x530   :  { %9118 = vst [vmem:[#allocation80_spill] sm:$0xff] %v6764_v47 }
 0x53b   :  { %v4099_v19 = vpop.eup %4098 }
 0x53c   :  { %v4101_v44 = vpop.eup %4100 }
 0x53d   :  { %v2024_v40 = vsub.f32 1.0, %v4101_v44 }
 0x551   :  { %v1937_v5 = vpop.f32.mrf.mxu0 }
 0x552   :  { %v1999_v36 = vadd.f32 %v1937_v5, %v5577_v27  ;;  %v2026_v5 = vmul.f32 %v4101_v44, %v6386_v61  ;;  %v6732_v61 = vld [vmem:[#allocation9] sm:$0xff] }
 0x553   :  { %v1939_v63 = vpop.f32.mrf.mxu0  ;;  %9104 = vst [vmem:[#allocation76_spill] sm:$0xff] %v6732_v61  ;;  %v9125_v44 = vld [vmem:[#allocation102_spill] sm:$0xff] }
 0x554   :  { %v2000_v38 = vadd.f32 %v1939_v63, %v5580_v35 }
 0x556   :  { %v2003_v18 = vcombine.low %v1999_v36, %v2000_v38 }
 0x558   :  { %v2010_v45 = vrot.slane %v2003_v18, %v5569_v56  ;;  %v9117_v18 = vld [vmem:[#allocation94_spill] sm:$0xff] }
 0x55a   :  { %v2017_v10 = vrot.slane %v2010_v45, %v5569_v56  ;;  %v9119_v45 = vld [vmem:[#allocation96_spill] sm:$0xff] }
 0x55c   :  { %v2019_v9 = vmul.f32 %v4099_v19, %v2017_v10  ;;  %v6768_v10 = vld [vmem:[#allocation9 + $0x518] sm:$0xff] }
 0x55d   :  { %9120 = vst [vmem:[#allocation95_spill] sm:$0xff] %v6768_v10  ;;  %v9121_v19 = vld [vmem:[#allocation98_spill] sm:$0xff] }
 0x55e   :  { %v2022_v57 = vadd.f32 %v2020_v33, %v2019_v9  ;;  %v6772_v9 = vld [vmem:[#allocation9 + $0x510] sm:$0xff] }
 0x55f   :  { %9122 = vst [vmem:[#allocation81_spill] sm:$0xff] %v6772_v9  ;;  %v9123_v33 = vld [vmem:[#allocation100_spill] sm:$0xff] }
 0x560   :  { %4102 = vtanh.f32 %v2022_v57  ;;  %v6776_v57 = vld [vmem:[#allocation9 + $0x4e8] sm:$0xff] }
 0x561   :  { %9124 = vst [vmem:[#allocation28_spill] sm:$0xff] %v6776_v57 }
 0x56d   :  { %v4103_v3 = vpop.eup %4102 }
 0x56e   :  { %v2025_v0 = vmul.f32 %v4103_v3, %v2024_v40  ;;  %v6780_v40 = vld [vmem:[#allocation9 + $0x4e0] sm:$0xff]  ;;  %v9127_v3 = vld [vmem:[#allocation104_spill] sm:$0xff] }
 0x56f   :  { %9126 = vst [vmem:[#allocation82_spill] sm:$0xff] %v6780_v40 }
 0x570   :  { %v6611_v63 = vadd.f32 %v2026_v5, %v2025_v0  ;;  %v6784_v0 = vld [vmem:[#allocation9 + $0x4b8] sm:$0xff] }
 0x571   :  { %9128 = vst [vmem:[#allocation97_spill] sm:$0xff] %v6784_v0  ;;  %v9129_v5 = vld [vmem:[#allocation106_spill] sm:$0xff] }
 0x572   :  { %2028 = vst [vmem:[#allocation3 + $0x3] sm:$0x1] %v6611_v63  ;;  %v2033_v36 = vrot.slane %v6611_v63, %v5539_v23  ;;  %v6618_v38 = vrot.slane %v6611_v63, %v5528_v16 }
 0x574   :  { %2035 = vst [vmem:[#allocation3 + $0xc] sm:$0x1] %v2033_v36  ;;  %2105 = vmatprep.mubr.f32.mxu1 %v2033_v36  ;;  %2176 = vmatprep.mubr.f32.mxu0 %v2033_v36 }
 0x575   :  { %2106 = vmatmul.mubr.f32.vlgmr.msra.gmra.mxu1 %v6618_v38  ;;  %2177 = vmatmul.mubr.f32.vlgmr.msra.gmra.mxu0 %v6618_v38 }
 0x576   :  { %2184 = vmatpush1.msra.mxu1 %v5998_v32  ;;  %2247 = vmatprep.mubr.f32.mxu1 %v2033_v36  ;;  %v6636_v32 = vld [vmem:[#allocation9 + $0x240] sm:$0xff]  ;;  %v6788_v36 = vld [vmem:[#allocation9 + $0x4b0] sm:$0xff] }
 0x577   :  { %2185 = vmatprep.subr.mxu1 %v6001_v39  ;;  %2354 = vmatpush1.msra.mxu0 %v6399_v37  ;;  %v6640_v39 = vld [vmem:[#allocation9 + $0x218] sm:$0xff]  ;;  %9130 = vst [vmem:[#allocation83_spill] sm:$0xff] %v6788_v36 }
 0x578   :  { %2186 = vmatpush1.msra.mxu1 %v6005_v48  ;;  %2355 = vmatprep.subr.mxu0 %v6403_v7  ;;  %v6644_v48 = vld [vmem:[#allocation9 + $0x210] sm:$0xff] }
 0x579   :  { %2187 = vmatprep.subr.mxu1 %v6009_v2  ;;  %2356 = vmatpush1.msra.mxu0 %v6407_v34  ;;  %v6648_v2 = vld [vmem:[#allocation9 + $0x1e8] sm:$0xff] }
 0x57a   :  { %2188 = vmatpush1.msra.mxu1 %v6013_v17  ;;  %2357 = vmatprep.subr.mxu0 %v6411_v55  ;;  %v6652_v17 = vld [vmem:[#allocation9 + $0x1e0] sm:$0xff] }
 0x57b   :  { %2189 = vmatprep.subr.mxu1 %v6017_v28  ;;  %2358 = vmatpush1.msra.mxu0 %v6415_v49  ;;  %v6656_v28 = vld [vmem:[#allocation9 + $0x1b8] sm:$0xff] }
 0x57c   :  { %2190 = vmatpush1.msra.mxu1 %v6021_v15  ;;  %2359 = vmatprep.subr.mxu0 %v6419_v30  ;;  %v6660_v15 = vld [vmem:[#allocation9 + $0x1b0] sm:$0xff] }
 0x57d   :  { %2191 = vmatprep.subr.mxu1 %v6025_v13  ;;  %2360 = vmatpush1.msra.mxu0 %v6636_v32  ;;  %v6664_v13 = vld [vmem:[#allocation9 + $0x188] sm:$0xff] }
 0x57e   :  { %2192 = vmatpush1.msra.mxu1 %v6029_v24  ;;  %2361 = vmatprep.subr.mxu0 %v6640_v39  ;;  %v6668_v24 = vld [vmem:[#allocation9 + $0x180] sm:$0xff] }
 0x57f   :  { %2193 = vmatprep.subr.mxu1 %v6033_v20  ;;  %2362 = vmatpush1.msra.mxu0 %v6644_v48  ;;  %v6672_v20 = vld [vmem:[#allocation9 + $0x158] sm:$0xff] }
 0x580   :  { %2194 = vmatpush1.msra.mxu1 %v6037_v54  ;;  %2363 = vmatprep.subr.mxu0 %v6648_v2  ;;  %v6676_v54 = vld [vmem:[#allocation9 + $0x150] sm:$0xff] }
 0x581   :  { %2195 = vmatprep.subr.mxu1 %v6041_v8  ;;  %2364 = vmatpush1.msra.mxu0 %v6652_v17  ;;  %v6680_v8 = vld [vmem:[#allocation9 + $0x128] sm:$0xff] }
 0x582   :  { %2196 = vmatpush1.msra.mxu1 %v6045_v60  ;;  %2365 = vmatprep.subr.mxu0 %v6656_v28  ;;  %v6684_v60 = vld [vmem:[#allocation9 + $0x120] sm:$0xff] }
 0x583   :  { %2197 = vmatprep.subr.mxu1 %v6049_v6  ;;  %2366 = vmatpush1.msra.mxu0 %v6660_v15  ;;  %v6688_v6 = vld [vmem:[#allocation9 + $0xf8] sm:$0xff] }
 0x584   :  { %2198 = vmatpush1.msra.mxu1 %v6053_v14  ;;  %2367 = vmatprep.subr.mxu0 %v6664_v13  ;;  %v6692_v14 = vld [vmem:[#allocation9 + $0xf0] sm:$0xff] }
 0x585   :  { %2199 = vmatprep.subr.mxu1 %v6057_v26  ;;  %2368 = vmatpush1.msra.mxu0 %v6668_v24  ;;  %v6696_v26 = vld [vmem:[#allocation9 + $0xc8] sm:$0xff] }
 0x586   :  { %2200 = vmatpush1.msra.mxu1 %v6061_v50  ;;  %2369 = vmatprep.subr.mxu0 %v6672_v20  ;;  %v6700_v50 = vld [vmem:[#allocation9 + $0xc0] sm:$0xff] }
 0x587   :  { %2201 = vmatprep.subr.mxu1 %v6065_v4  ;;  %2370 = vmatpush1.msra.mxu0 %v6676_v54  ;;  %v6704_v4 = vld [vmem:[#allocation9 + $0x98] sm:$0xff] }
 0x588   :  { %2202 = vmatpush1.msra.mxu1 %v6069_v22  ;;  %2371 = vmatprep.subr.mxu0 %v6680_v8  ;;  %v6708_v22 = vld [vmem:[#allocation9 + $0x90] sm:$0xff] }
 0x589   :  { %2203 = vmatprep.subr.mxu1 %v6073_v62  ;;  %2372 = vmatpush1.msra.mxu0 %v6684_v60  ;;  %v6712_v62 = vld [vmem:[#allocation9 + $0x68] sm:$0xff] }
 0x58a   :  { %2204 = vmatpush1.msra.mxu1 %v6077_v1  ;;  %2373 = vmatprep.subr.mxu0 %v6688_v6  ;;  %v6716_v1 = vld [vmem:[#allocation9 + $0x60] sm:$0xff] }
 0x58b   :  { %2205 = vmatprep.subr.mxu1 %v6081_v29  ;;  %2374 = vmatpush1.msra.mxu0 %v6692_v14  ;;  %v6720_v29 = vld [vmem:[#allocation9 + $0x38] sm:$0xff] }
 0x58c   :  { %2206 = vmatpush1.msra.mxu1 %v6085_v43  ;;  %2375 = vmatprep.subr.mxu0 %v6696_v26  ;;  %9101 = vst [vmem:[#allocation89_spill] sm:$0xff] %v6720_v29  ;;  %v6724_v43 = vld [vmem:[#allocation9 + $0x30] sm:$0xff] }
 0x58d   :  { %2207 = vmatprep.subr.mxu1 %v6089_v41  ;;  %2376 = vmatpush1.msra.mxu0 %v6700_v50  ;;  %9102 = vst [vmem:[#allocation75_spill] sm:$0xff] %v6724_v43  ;;  %v6728_v41 = vld [vmem:[#allocation9 + $0x8] sm:$0xff] }
 0x58e   :  { %2208 = vmatpush1.msra.mxu1 %v8956_v58  ;;  %2377 = vmatprep.subr.mxu0 %v6704_v4  ;;  %9103 = vst [vmem:[#allocation25_spill] sm:$0xff] %v6728_v41  ;;  %v6736_v58 = vld [vmem:[#allocation9 + $0x5d8] sm:$0xff] }
 0x58f   :  { %2209 = vmatprep.subr.mxu1 %v8958_v46  ;;  %2378 = vmatpush1.msra.mxu0 %v6708_v22  ;;  %9105 = vst [vmem:[#allocation91_spill] sm:$0xff] %v6736_v58  ;;  %v6740_v46 = vld [vmem:[#allocation9 + $0x5d0] sm:$0xff] }
 0x590   :  { %2210 = vmatpush1.msra.mxu1 %v8960_v31  ;;  %2379 = vmatprep.subr.mxu0 %v6712_v62  ;;  %9106 = vst [vmem:[#allocation77_spill] sm:$0xff] %v6740_v46  ;;  %v9107_v31 = vld [vmem:[#allocation85_spill] sm:$0xff] }
 0x591   :  { %2211 = vmatprep.subr.mxu1 %v8962_v59  ;;  %2380 = vmatpush1.msra.mxu0 %v6716_v1  ;;  %v6744_v59 = vld [vmem:[#allocation9 + $0x5a8] sm:$0xff] }
 0x592   :  { %2212 = vmatpush1.msra.mxu1 %v8964_v52  ;;  %2381 = vmatprep.subr.mxu0 %v6720_v29  ;;  %9108 = vst [vmem:[#allocation26_spill] sm:$0xff] %v6744_v59  ;;  %v9109_v52 = vld [vmem:[#allocation86_spill] sm:$0xff] }
 0x593   :  { %2213 = vmatprep.subr.mxu1 %v8966_v12  ;;  %2382 = vmatpush1.msra.mxu0 %v6724_v43  ;;  %v6748_v12 = vld [vmem:[#allocation9 + $0x5a0] sm:$0xff] }
 0x594   :  { %2214 = vmatpush1.msra.mxu1 %v8968_v21  ;;  %2383 = vmatprep.subr.mxu0 %v6728_v41  ;;  %9110 = vst [vmem:[#allocation78_spill] sm:$0xff] %v6748_v12  ;;  %v9111_v21 = vld [vmem:[#allocation88_spill] sm:$0xff] }
 0x595   :  { %2215 = vmatprep.subr.mxu1 %v8970_v51  ;;  %2384 = vmatpush1.msra.mxu0 %v6732_v61  ;;  %v6752_v51 = vld [vmem:[#allocation9 + $0x578] sm:$0xff] }
 0x596   :  { %2216 = vmatpush2.msra.mxu1 %v8972_v11  ;;  %2385 = vmatprep.subr.mxu0 %v6736_v58  ;;  %9112 = vst [vmem:[#allocation93_spill] sm:$0xff] %v6752_v51  ;;  %v9113_v11 = vld [vmem:[#allocation90_spill] sm:$0xff] }
 0x597   :  { %2217 = vmatprep.subr.mxu1 %v8974_v42  ;;  %2386 = vmatpush2.msra.mxu0 %v6740_v46  ;;  %v6756_v42 = vld [vmem:[#allocation9 + $0x570] sm:$0xff] }
 0x598   :  { %2218 = vmatpush2.msra.mxu1 %v9107_v31  ;;  %2387 = vmatprep.subr.mxu0 %v6744_v59  ;;  %9114 = vst [vmem:[#allocation79_spill] sm:$0xff] %v6756_v42  ;;  %v9131_v31 = vld [vmem:[#allocation108_spill] sm:$0xff] }
 0x599   :  { %2219 = vmatprep.subr.mxu1 %v9109_v52  ;;  %2388 = vmatpush2.msra.mxu0 %v6748_v12  ;;  %v6792_v52 = vld [vmem:[#allocation9 + $0x488] sm:$0xff] }
 0x59a   :  { %2220 = vmatpush2.msra.mxu1 %v9111_v21  ;;  %2389 = vmatprep.subr.mxu0 %v6752_v51  ;;  %9132 = vst [vmem:[#allocation29_spill] sm:$0xff] %v6792_v52  ;;  %v9133_v21 = vld [vmem:[#allocation110_spill] sm:$0xff] }
 0x59b   :  { %2221 = vmatprep.subr.mxu1 %v9113_v11  ;;  %2390 = vmatpush2.msra.mxu0 %v6756_v42  ;;  %v6796_v11 = vld [vmem:[#allocation9 + $0x480] sm:$0xff] }
 0x59c   :  { %2222 = vmatpush2.msra.mxu1 %v9115_v25  ;;  %2391 = vmatprep.subr.mxu0 %v6760_v53  ;;  %9134 = vst [vmem:[#allocation84_spill] sm:$0xff] %v6796_v11  ;;  %v9135_v25 = vld [vmem:[#allocation112_spill] sm:$0xff] }
 0x59d   :  { %2223 = vmatprep.subr.mxu1 %v9117_v18  ;;  %2392 = vmatpush2.msra.mxu0 %v6764_v47  ;;  %v6800_v18 = vld [vmem:[#allocation9 + $0x458] sm:$0xff] }
 0x59e   :  { %2224 = vmatpush2.msra.mxu1 %v9119_v45  ;;  %2393 = vmatprep.subr.mxu0 %v6768_v10  ;;  %9136 = vst [vmem:[#allocation99_spill] sm:$0xff] %v6800_v18  ;;  %v9137_v45 = vld [vmem:[#allocation114_spill] sm:$0xff] }
 0x59f   :  { %2225 = vmatprep.subr.mxu1 %v9121_v19  ;;  %2394 = vmatpush2.msra.mxu0 %v6772_v9  ;;  %v6804_v19 = vld [vmem:[#allocation9 + $0x450] sm:$0xff] }
 0x5a0   :  { %2226 = vmatpush2.msra.mxu1 %v9123_v33  ;;  %2395 = vmatprep.subr.mxu0 %v6776_v57  ;;  %9138 = vst [vmem:[#allocation30_spill] sm:$0xff] %v6804_v19  ;;  %v9139_v33 = vld [vmem:[#allocation116_spill] sm:$0xff] }
 0x5a1   :  { %2227 = vmatprep.subr.mxu1 %v9125_v44  ;;  %2396 = vmatpush2.msra.mxu0 %v6780_v40  ;;  %v6808_v44 = vld [vmem:[#allocation9 + $0x428] sm:$0xff] }
 0x5a2   :  { %2228 = vmatpush2.msra.mxu1 %v9127_v3  ;;  %2397 = vmatprep.subr.mxu0 %v6784_v0  ;;  %9140 = vst [vmem:[#allocation101_spill] sm:$0xff] %v6808_v44  ;;  %v9141_v3 = vld [vmem:[#allocation118_spill] sm:$0xff] }
 0x5a3   :  { %2229 = vmatprep.subr.mxu1 %v9129_v5  ;;  %2398 = vmatpush2.msra.mxu0 %v6788_v36  ;;  %v6812_v5 = vld [vmem:[#allocation9 + $0x420] sm:$0xff] }
 0x5a4   :  { %2230 = vmatpush2.msra.mxu1 %v9131_v31  ;;  %2399 = vmatprep.subr.mxu0 %v6792_v52  ;;  %9142 = vst [vmem:[#allocation31_spill] sm:$0xff] %v6812_v5  ;;  %v9143_v31 = vld [vmem:[#allocation120_spill] sm:$0xff] }
 0x5a5   :  { %2231 = vmatprep.subr.mxu1 %v9133_v21  ;;  %2400 = vmatpush2.msra.mxu0 %v6796_v11  ;;  %v6816_v21 = vld [vmem:[#allocation9 + $0x3f8] sm:$0xff]  ;;  %v2256_v52 = vld [vmem:[#allocation2 + $0x4] ss:$8 sm:$0x30] }
 0x5a6   :  { %2232 = vmatpush2.msra.mxu1 %v9135_v25  ;;  %2401 = vmatprep.subr.mxu0 %v6800_v18  ;;  %9144 = vst [vmem:[#allocation103_spill] sm:$0xff] %v6816_v21  ;;  %v9145_v25 = vld [vmem:[#allocation122_spill] sm:$0xff]  ;;  %v9211_v18 = vld [vmem:[#allocation24_spill] sm:$0xff] }
 0x5a7   :  { %2233 = vmatprep.subr.mxu1 %v9137_v45  ;;  %2402 = vmatpush2.msra.mxu0 %v6804_v19  ;;  %v6820_v45 = vld [vmem:[#allocation9 + $0x3f0] sm:$0xff]  ;;  %v9209_v19 = vld [vmem:[#allocation23_spill] sm:$0xff] }
 0x5a8   :  { %2234 = vmatpush2.msra.mxu1 %v9139_v33  ;;  %2403 = vmatprep.subr.mxu0 %v6808_v44  ;;  %9146 = vst [vmem:[#allocation32_spill] sm:$0xff] %v6820_v45  ;;  %v9147_v33 = vld [vmem:[#allocation124_spill] sm:$0xff] }
 0x5a9   :  { %2235 = vmatprep.subr.mxu1 %v9141_v3  ;;  %2404 = vmatpush2.msra.mxu0 %v6812_v5  ;;  %v6824_v44 = vld [vmem:[#allocation9 + $0x3c8] sm:$0xff]  ;;  %v9149_v3 = vld [vmem:[#allocation126_spill] sm:$0xff] }
 0x5aa   :  { %2236 = vmatpush2.msra.mxu1 %v9143_v31  ;;  %2405 = vmatprep.subr.mxu0 %v6816_v21  ;;  %9148 = vst [vmem:[#allocation105_spill] sm:$0xff] %v6824_v44  ;;  %v6828_v5 = vld [vmem:[#allocation9 + $0x3c0] sm:$0xff]  ;;  %v9151_v31 = vld [vmem:[#allocation128_spill] sm:$0xff]  ;;  %v6832_v21 = vld [vmem:[#allocation9 + $0x398] sm:$0xff] }
 0x5ab   :  { %2237 = vmatprep.subr.mxu1 %v9145_v25  ;;  %2406 = vmatpush2.msra.mxu0 %v6820_v45  ;;  %9150 = vst [vmem:[#allocation33_spill] sm:$0xff] %v6828_v5  ;;  %9152 = vst [vmem:[#allocation107_spill] sm:$0xff] %v6832_v21  ;;  %v9153_v25 = vld [vmem:[#allocation130_spill] sm:$0xff]  ;;  %v6836_v45 = vld [vmem:[#allocation9 + $0x390] sm:$0xff] }
 0x5ac   :  { %2238 = vmatpush2.msra.mxu1 %v9147_v33  ;;  %2407 = vmatprep.subr.mxu0 %v6824_v44  ;;  %9154 = vst [vmem:[#allocation34_spill] sm:$0xff] %v6836_v45  ;;  %v9155_v33 = vld [vmem:[#allocation132_spill] sm:$0xff] }
 0x5ad   :  { %2239 = vmatprep.subr.mxu1 %v9149_v3  ;;  %2408 = vmatpush2.msra.mxu0 %v6828_v5  ;;  %v6840_v44 = vld [vmem:[#allocation9 + $0x368] sm:$0xff]  ;;  %v9157_v3 = vld [vmem:[#allocation134_spill] sm:$0xff] }
 0x5ae   :  { %2240 = vmatpush2.msra.mxu1 %v9151_v31  ;;  %2409 = vmatprep.subr.mxu0 %v6832_v21  ;;  %9156 = vst [vmem:[#allocation109_spill] sm:$0xff] %v6840_v44  ;;  %v6844_v5 = vld [vmem:[#allocation9 + $0x360] sm:$0xff]  ;;  %v9159_v31 = vld [vmem:[#allocation136_spill] sm:$0xff]  ;;  %v6848_v21 = vld [vmem:[#allocation9 + $0x338] sm:$0xff] }
 0x5af   :  { %2241 = vmatprep.subr.mxu1 %v9153_v25  ;;  %2410 = vmatpush2.msra.mxu0 %v6836_v45  ;;  %9158 = vst [vmem:[#allocation35_spill] sm:$0xff] %v6844_v5  ;;  %9160 = vst [vmem:[#allocation111_spill] sm:$0xff] %v6848_v21  ;;  %v9161_v25 = vld [vmem:[#allocation138_spill] sm:$0xff]  ;;  %v6852_v45 = vld [vmem:[#allocation9 + $0x330] sm:$0xff] }
 0x5b0   :  { %2242 = vmatpush2.msra.mxu1 %v9155_v33  ;;  %2411 = vmatprep.subr.mxu0 %v6840_v44  ;;  %9162 = vst [vmem:[#allocation36_spill] sm:$0xff] %v6852_v45  ;;  %v9163_v33 = vld [vmem:[#allocation140_spill] sm:$0xff] }
 0x5b1   :  { %2243 = vmatprep.subr.mxu1 %v9157_v3  ;;  %2412 = vmatpush2.msra.mxu0 %v6844_v5  ;;  %v6856_v44 = vld [vmem:[#allocation9 + $0x308] sm:$0xff] }
 0x5b2   :  { %2244 = vmatpush2.msra.mxu1 %v9159_v31  ;;  %2413 = vmatprep.subr.mxu0 %v6848_v21  ;;  %9164 = vst [vmem:[#allocation113_spill] sm:$0xff] %v6856_v44  ;;  %v6860_v3 = vld [vmem:[#allocation9 + $0x2e8] sm:$0xff]  ;;  %v6863_v31 = vld [vmem:[#allocation9 + $0x2e0] sm:$0xff]  ;;  %v9205_v21 = vld [vmem:[#allocation145_spill] sm:$0xff] }
 0x5b3   :  { %2245 = vmatprep.subr.mxu1 %v9161_v25  ;;  %2414 = vmatpush2.msra.mxu0 %v6852_v45  ;;  %9165 = vst [vmem:[#allocation37_spill] sm:$0xff] %v6860_v3  ;;  %9166 = vst [vmem:[#allocation115_spill] sm:$0xff] %v6863_v31  ;;  %v6866_v25 = vld [vmem:[#allocation9 + $0x300] sm:$0xff]  ;;  %v6869_v45 = vld [vmem:[#allocation9 + $0x2b8] sm:$0xff] }
 0x5b4   :  { %2246 = vmatpush2.msra.mxu1 %v9163_v33  ;;  %2415 = vmatprep.subr.mxu0 %v6856_v44  ;;  %9167 = vst [vmem:[#allocation38_spill] sm:$0xff] %v6866_v25  ;;  %9168 = vst [vmem:[#allocation117_spill] sm:$0xff] %v6869_v45  ;;  %v6872_v33 = vld [vmem:[#allocation9 + $0x2f8] sm:$0xff]  ;;  %v9203_v44 = vld [vmem:[#allocation143_spill] sm:$0xff] }
 0x5b5   :  { %2248 = vmatmul.mubr.f32.vlgmr.msra.gmra.mxu1 %v6618_v38  ;;  %2424 = vmatprep.subr.mxu1 %v6860_v3  ;;  %9169 = vst [vmem:[#allocation39_spill] sm:$0xff] %v6872_v33  ;;  %v6875_v38 = vld [vmem:[#allocation9 + $0x2b0] sm:$0xff]  ;;  %v6878_v3 = vld [vmem:[#allocation9 + $0x288] sm:$0xff] }
 0x5b6   :  { %2425 = vmatpush1.msra.mxu1 %v6863_v31  ;;  %2416 = vmatpush2.msra.mxu0 %v6866_v25  ;;  %9170 = vst [vmem:[#allocation119_spill] sm:$0xff] %v6875_v38  ;;  %9171 = vst [vmem:[#allocation40_spill] sm:$0xff] %v6878_v3  ;;  %v6881_v31 = vld [vmem:[#allocation9 + $0x280] sm:$0xff]  ;;  %v6884_v25 = vld [vmem:[#allocation9 + $0x258] sm:$0xff] }
 0x5b7   :  { %2426 = vmatprep.subr.mxu1 %v6869_v45  ;;  %2495 = vmatprep.subr.mxu0 %v6872_v33  ;;  %9172 = vst [vmem:[#allocation121_spill] sm:$0xff] %v6881_v31  ;;  %9173 = vst [vmem:[#allocation41_spill] sm:$0xff] %v6884_v25  ;;  %v6887_v45 = vld [vmem:[#allocation9 + $0x250] sm:$0xff]  ;;  %v6890_v33 = vld [vmem:[#allocation9 + $0x228] sm:$0xff] }
 0x5b8   :  { %2427 = vmatpush1.msra.mxu1 %v6875_v38  ;;  %9174 = vst [vmem:[#allocation123_spill] sm:$0xff] %v6887_v45  ;;  %9175 = vst [vmem:[#allocation42_spill] sm:$0xff] %v6890_v33  ;;  %v6893_v38 = vld [vmem:[#allocation9 + $0x220] sm:$0xff] }
 0x5b9   :  { %2428 = vmatprep.subr.mxu1 %v6878_v3  ;;  %9176 = vst [vmem:[#allocation125_spill] sm:$0xff] %v6893_v38  ;;  %v6896_v3 = vld [vmem:[#allocation9 + $0x1f8] sm:$0xff]  ;;  %v9207_v5 = vld [vmem:[#allocation147_spill] sm:$0xff] }
 0x5ba   :  { %2429 = vmatpush1.msra.mxu1 %v6881_v31  ;;  %9177 = vst [vmem:[#allocation43_spill] sm:$0xff] %v6896_v3  ;;  %v6899_v31 = vld [vmem:[#allocation9 + $0x1f0] sm:$0xff] }
 0x5bb   :  { %2430 = vmatprep.subr.mxu1 %v6884_v25  ;;  %9178 = vst [vmem:[#allocation127_spill] sm:$0xff] %v6899_v31  ;;  %v6902_v25 = vld [vmem:[#allocation9 + $0x1c8] sm:$0xff] }
 0x5bc   :  { %2431 = vmatpush1.msra.mxu1 %v6887_v45  ;;  %9179 = vst [vmem:[#allocation44_spill] sm:$0xff] %v6902_v25  ;;  %v6905_v45 = vld [vmem:[#allocation9 + $0x1c0] sm:$0xff] }
 0x5bd   :  { %2432 = vmatprep.subr.mxu1 %v6890_v33  ;;  %9180 = vst [vmem:[#allocation129_spill] sm:$0xff] %v6905_v45  ;;  %v6908_v33 = vld [vmem:[#allocation9 + $0x198] sm:$0xff] }
 0x5be   :  { %2433 = vmatpush1.msra.mxu1 %v6893_v38  ;;  %9181 = vst [vmem:[#allocation45_spill] sm:$0xff] %v6908_v33  ;;  %v6911_v38 = vld [vmem:[#allocation9 + $0x190] sm:$0xff] }
 0x5bf   :  { %2434 = vmatprep.subr.mxu1 %v6896_v3  ;;  %9182 = vst [vmem:[#allocation131_spill] sm:$0xff] %v6911_v38  ;;  %v6914_v3 = vld [vmem:[#allocation9 + $0x168] sm:$0xff] }
 0x5c0   :  { %2435 = vmatpush1.msra.mxu1 %v6899_v31  ;;  %9183 = vst [vmem:[#allocation46_spill] sm:$0xff] %v6914_v3  ;;  %v6917_v31 = vld [vmem:[#allocation9 + $0x160] sm:$0xff] }
 0x5c1   :  { %2436 = vmatprep.subr.mxu1 %v6902_v25  ;;  %9184 = vst [vmem:[#allocation133_spill] sm:$0xff] %v6917_v31  ;;  %v6920_v25 = vld [vmem:[#allocation9 + $0x138] sm:$0xff] }
 0x5c2   :  { %2437 = vmatpush1.msra.mxu1 %v6905_v45  ;;  %9185 = vst [vmem:[#allocation47_spill] sm:$0xff] %v6920_v25  ;;  %v6923_v45 = vld [vmem:[#allocation9 + $0x130] sm:$0xff] }
 0x5c3   :  { %2438 = vmatprep.subr.mxu1 %v6908_v33  ;;  %9186 = vst [vmem:[#allocation135_spill] sm:$0xff] %v6923_v45  ;;  %v6926_v33 = vld [vmem:[#allocation9 + $0x108] sm:$0xff] }
 0x5c4   :  { %2439 = vmatpush1.msra.mxu1 %v6911_v38  ;;  %9187 = vst [vmem:[#allocation48_spill] sm:$0xff] %v6926_v33  ;;  %v6929_v38 = vld [vmem:[#allocation9 + $0x100] sm:$0xff] }
 0x5c5   :  { %2440 = vmatprep.subr.mxu1 %v6914_v3  ;;  %9188 = vst [vmem:[#allocation137_spill] sm:$0xff] %v6929_v38  ;;  %v6932_v3 = vld [vmem:[#allocation9 + $0xd8] sm:$0xff] }
 0x5c6   :  { %2441 = vmatpush1.msra.mxu1 %v6917_v31  ;;  %9189 = vst [vmem:[#allocation49_spill] sm:$0xff] %v6932_v3  ;;  %v6935_v31 = vld [vmem:[#allocation9 + $0xd0] sm:$0xff] }
 0x5c7   :  { %2442 = vmatprep.subr.mxu1 %v6920_v25  ;;  %9190 = vst [vmem:[#allocation139_spill] sm:$0xff] %v6935_v31  ;;  %v6938_v25 = vld [vmem:[#allocation9 + $0xa8] sm:$0xff] }
 0x5c8   :  { %2443 = vmatpush1.msra.mxu1 %v6923_v45  ;;  %9191 = vst [vmem:[#allocation50_spill] sm:$0xff] %v6938_v25  ;;  %v6941_v45 = vld [vmem:[#allocation9 + $0xa0] sm:$0xff] }
 0x5c9   :  { %2444 = vmatprep.subr.mxu1 %v6926_v33  ;;  %9192 = vst [vmem:[#allocation141_spill] sm:$0xff] %v6941_v45  ;;  %v6944_v33 = vld [vmem:[#allocation9 + $0x78] sm:$0xff] }
 0x5ca   :  { %2445 = vmatpush1.msra.mxu1 %v6929_v38  ;;  %9193 = vst [vmem:[#allocation51_spill] sm:$0xff] %v6944_v33  ;;  %v6947_v38 = vld [vmem:[#allocation9 + $0x70] sm:$0xff] }
 0x5cb   :  { %2446 = vmatprep.subr.mxu1 %v6932_v3  ;;  %9194 = vst [vmem:[#allocation52_spill] sm:$0xff] %v6947_v38  ;;  %v6950_v3 = vld [vmem:[#allocation9 + $0x48] sm:$0xff] }
 0x5cc   :  { %2447 = vmatpush1.msra.mxu1 %v6935_v31  ;;  %9195 = vst [vmem:[#allocation53_spill] sm:$0xff] %v6950_v3  ;;  %v6953_v31 = vld [vmem:[#allocation9 + $0x40] sm:$0xff] }
 0x5cd   :  { %2448 = vmatprep.subr.mxu1 %v6938_v25  ;;  %9196 = vst [vmem:[#allocation54_spill] sm:$0xff] %v6953_v31  ;;  %v6956_v25 = vld [vmem:[#allocation9 + $0x18] sm:$0xff] }
 0x5ce   :  { %2449 = vmatpush1.msra.mxu1 %v6941_v45  ;;  %9197 = vst [vmem:[#allocation55_spill] sm:$0xff] %v6956_v25  ;;  %v6959_v45 = vld [vmem:[#allocation9 + $0x10] sm:$0xff] }
 0x5cf   :  { %2450 = vmatprep.subr.mxu1 %v6944_v33  ;;  %9198 = vst [vmem:[#allocation56_spill] sm:$0xff] %v6959_v45  ;;  %v6962_v33 = vld [vmem:[#allocation9 + $0x5e8] sm:$0xff] }
 0x5d0   :  { %2451 = vmatpush1.msra.mxu1 %v6947_v38  ;;  %9199 = vst [vmem:[#allocation57_spill] sm:$0xff] %v6962_v33  ;;  %v6965_v38 = vld [vmem:[#allocation9 + $0x5e0] sm:$0xff] }
 0x5d1   :  { %2452 = vmatprep.subr.mxu1 %v6950_v3  ;;  %9200 = vst [vmem:[#allocation58_spill] sm:$0xff] %v6965_v38  ;;  %v6968_v3 = vld [vmem:[#allocation9 + $0x5b8] sm:$0xff] }
 0x5d2   :  { %2453 = vmatpush1.msra.mxu1 %v6953_v31  ;;  %9201 = vst [vmem:[#allocation59_spill] sm:$0xff] %v6968_v3  ;;  %v9202_v31 = vld [vmem:[#allocation142_spill] sm:$0xff] }
 0x5d3   :  { %2454 = vmatprep.subr.mxu1 %v6956_v25  ;;  %v9204_v25 = vld [vmem:[#allocation144_spill] sm:$0xff] }
 0x5d4   :  { %2455 = vmatpush1.msra.mxu1 %v6959_v45  ;;  %v9206_v45 = vld [vmem:[#allocation146_spill] sm:$0xff] }
 0x5d5   :  { %2456 = vmatprep.subr.mxu1 %v6962_v33  ;;  %v9208_v33 = vld [vmem:[#allocation148_spill] sm:$0xff] }
 0x5d6   :  { %2457 = vmatpush2.msra.mxu1 %v6965_v38  ;;  %v9210_v38 = vld [vmem:[#allocation87_spill] sm:$0xff] }
 0x5d7   :  { %2458 = vmatprep.subr.mxu1 %v6968_v3  ;;  %v9212_v3 = vld [vmem:[#allocation149_spill] sm:$0xff] }
 0x5d8   :  { %2459 = vmatpush2.msra.mxu1 %v9202_v31  ;;  %v9213_v31 = vld [vmem:[#allocation150_spill] sm:$0xff] }
 0x5d9   :  { %2460 = vmatprep.subr.mxu1 %v9203_v44  ;;  %v9214_v44 = vld [vmem:[#allocation151_spill] sm:$0xff] }
 0x5da   :  { %2461 = vmatpush2.msra.mxu1 %v9204_v25  ;;  %v9215_v25 = vld [vmem:[#allocation152_spill] sm:$0xff] }
 0x5db   :  { %2462 = vmatprep.subr.mxu1 %v9205_v21  ;;  %v9216_v21 = vld [vmem:[#allocation153_spill] sm:$0xff] }
 0x5dc   :  { %2463 = vmatpush2.msra.mxu1 %v9206_v45  ;;  %v9217_v45 = vld [vmem:[#allocation154_spill] sm:$0xff] }
 0x5dd   :  { %2464 = vmatprep.subr.mxu1 %v9207_v5  ;;  %v9218_v5 = vld [vmem:[#allocation155_spill] sm:$0xff] }
 0x5de   :  { %2465 = vmatpush2.msra.mxu1 %v9208_v33  ;;  %v9219_v33 = vld [vmem:[#allocation156_spill] sm:$0xff] }
 0x5df   :  { %2466 = vmatprep.subr.mxu1 %v9209_v19  ;;  %v9220_v19 = vld [vmem:[#allocation157_spill] sm:$0xff] }
 0x5e0   :  { %2467 = vmatpush2.msra.mxu1 %v9210_v38  ;;  %v9221_v38 = vld [vmem:[#allocation158_spill] sm:$0xff] }
 0x5e1   :  { %2468 = vmatprep.subr.mxu1 %v9211_v18  ;;  %v9222_v18 = vld [vmem:[#allocation159_spill] sm:$0xff] }
 0x5e2   :  { %2469 = vmatpush2.msra.mxu1 %v9212_v3  ;;  %v9223_v3 = vld [vmem:[#allocation160_spill] sm:$0xff] }
 0x5e3   :  { %2470 = vmatprep.subr.mxu1 %v9213_v31  ;;  %v9224_v31 = vld [vmem:[#allocation161_spill] sm:$0xff] }
 0x5e4   :  { %2471 = vmatpush2.msra.mxu1 %v9214_v44  ;;  %v9225_v44 = vld [vmem:[#allocation162_spill] sm:$0xff] }
 0x5e5   :  { %2472 = vmatprep.subr.mxu1 %v9215_v25  ;;  %v9226_v25 = vld [vmem:[#allocation163_spill] sm:$0xff] }
 0x5e6   :  { %2473 = vmatpush2.msra.mxu1 %v9216_v21  ;;  %v9227_v21 = vld [vmem:[#allocation164_spill] sm:$0xff] }
 0x5e7   :  { %2474 = vmatprep.subr.mxu1 %v9217_v45  ;;  %v9228_v45 = vld [vmem:[#allocation165_spill] sm:$0xff] }
 0x5e8   :  { %2475 = vmatpush2.msra.mxu1 %v9218_v5  ;;  %v9229_v5 = vld [vmem:[#allocation166_spill] sm:$0xff] }
 0x5e9   :  { %2476 = vmatprep.subr.mxu1 %v9219_v33  ;;  %v9230_v33 = vld [vmem:[#allocation167_spill] sm:$0xff] }
 0x5ea   :  { %2477 = vmatpush2.msra.mxu1 %v9220_v19  ;;  %v9231_v19 = vld [vmem:[#allocation168_spill] sm:$0xff] }
 0x5eb   :  { %2478 = vmatprep.subr.mxu1 %v9221_v38 }
 0x5ec   :  { %2479 = vmatpush2.msra.mxu1 %v9222_v18 }
 0x5ed   :  { %2480 = vmatprep.subr.mxu1 %v9223_v3 }
 0x5ee   :  { %2481 = vmatpush2.msra.mxu1 %v9224_v31 }
 0x5ef   :  { %2482 = vmatprep.subr.mxu1 %v9225_v44 }
 0x5f0   :  { %2483 = vmatpush2.msra.mxu1 %v9226_v25  ;;  %v2255_v25 = vld [vmem:[#allocation2 + $0x4] ss:$8 sm:$0xf] }
 0x5f1   :  { %2484 = vmatprep.subr.mxu1 %v9227_v21  ;;  %v2257_v36 = vor.u32 %v2256_v52, %v2255_v25 }
 0x5f2   :  { %2485 = vmatpush2.msra.mxu1 %v9228_v45 }
 0x5f3   :  { %2486 = vmatprep.subr.mxu1 %v9229_v5 }
 0x5f4   :  { %2487 = vmatpush2.msra.mxu1 %v9230_v33 }
 0x5f5   :  { %2665 = vmatprep.subr.mxu1 %v9231_v19  ;;  %v2284_v19 = vrot.slane %v2257_v36, 2 }
 0x635   :  { %v2107_v38 = vpop.f32.mrf.mxu1  ;;  %v2178_v31 = vpop.f32.mrf.mxu0 }
 0x637   :  { %v2109_v18 = vpop.f32.mrf.mxu1  ;;  %v2180_v21 = vpop.f32.mrf.mxu0 }
 0x638   :  { %v2260_v11 = vcombine.low %v2107_v38, %v2109_v18  ;;  %v2288_v45 = vcombine.low %v2178_v31, %v2180_v21 }
 0x63a   :  { %v2267_v3 = vrot.slane %v2260_v11, %v5569_v56  ;;  %v2295_v5 = vrot.slane %v2288_v45, %v5569_v56 }
 0x63c   :  { %v2274_v44 = vrot.slane %v2267_v3, %v5569_v56  ;;  %v2302_v33 = vrot.slane %v2295_v5, %v5569_v56  ;;  %v2332_v5 = vrot.slane %v2257_v36, 4 }
 0x63e   :  { %v2276_v0 = vadd.f32 %v2274_v44, %v2257_v36  ;;  %v2304_v57 = vadd.f32 %v2302_v33, %v2284_v19  ;;  %v7021_v36 = vld [vmem:[#allocation9 + $0x2f0] sm:$0xff] }
 0x640   :  { %v3927_v40 = vmul.f32 -1.442695, %v2276_v0  ;;  %v3928_v38 = vmul.f32 -1.442695, %v2304_v57 }
 0x642   :  { %4104 = vpow2.f32 %v3927_v40 }
 0x643   :  { %4106 = vpow2.f32 %v3928_v38 }
 0x64f   :  { %v4105_v18 = vpop.eup %4104 }
 0x650   :  { %v2280_v11 = vadd.f32 1.0, %v4105_v18  ;;  %v4107_v31 = vpop.eup %4106 }
 0x651   :  { %v2308_v25 = vadd.f32 1.0, %v4107_v31  ;;  %v7028_v31 = vld [vmem:[#allocation9 + $0x2c0] sm:$0xff] }
 0x652   :  { %4108 = vrcp.f32 %v2280_v11 }
 0x653   :  { %4110 = vrcp.f32 %v2308_v25  ;;  %v7036_v25 = vld [vmem:[#allocation9 + $0x290] sm:$0xff] }
 0x65f   :  { %v4109_v45 = vpop.eup %4108 }
 0x660   :  { %v4111_v19 = vpop.eup %4110 }
 0x661   :  { %v2336_v38 = vsub.f32 1.0, %v4111_v19 }
 0x675   :  { %v2249_v9 = vpop.f32.mrf.mxu1 }
 0x676   :  { %v2311_v52 = vadd.f32 %v2249_v9, %v5577_v27  ;;  %v2338_v9 = vmul.f32 %v4111_v19, %v6611_v63  ;;  %v7024_v63 = vld [vmem:[#allocation9 + $0x2c8] sm:$0xff] }
 0x677   :  { %v2251_v3 = vpop.f32.mrf.mxu1  ;;  %v7088_v19 = vld [vmem:[#allocation9 + $0x148] sm:$0xff] }
 0x678   :  { %v2312_v44 = vadd.f32 %v2251_v3, %v5580_v35 }
 0x67a   :  { %v2315_v0 = vcombine.low %v2311_v52, %v2312_v44 }
 0x67c   :  { %v2322_v40 = vrot.slane %v2315_v0, %v5569_v56  ;;  %v7032_v0 = vld [vmem:[#allocation9 + $0x298] sm:$0xff] }
 0x67e   :  { %v2329_v21 = vrot.slane %v2322_v40, %v5569_v56  ;;  %v7040_v40 = vld [vmem:[#allocation9 + $0x268] sm:$0xff] }
 0x680   :  { %v2331_v57 = vmul.f32 %v4109_v45, %v2329_v21  ;;  %v7068_v21 = vld [vmem:[#allocation9 + $0x1d0] sm:$0xff]  ;;  %v7072_v45 = vld [vmem:[#allocation9 + $0x1a8] sm:$0xff] }
 0x682   :  { %v2334_v33 = vadd.f32 %v2332_v5, %v2331_v57  ;;  %v7076_v57 = vld [vmem:[#allocation9 + $0x1a0] sm:$0xff]  ;;  %v7080_v5 = vld [vmem:[#allocation9 + $0x178] sm:$0xff] }
 0x684   :  { %4112 = vtanh.f32 %v2334_v33  ;;  %v7084_v33 = vld [vmem:[#allocation9 + $0x170] sm:$0xff] }
 0x691   :  { %v4113_v18 = vpop.eup %4112 }
 0x692   :  { %v2337_v11 = vmul.f32 %v4113_v18, %v2336_v38  ;;  %v7092_v38 = vld [vmem:[#allocation9 + $0x140] sm:$0xff]  ;;  %v7096_v18 = vld [vmem:[#allocation9 + $0x118] sm:$0xff] }
 0x693   :  { %9232 = vst [vmem:[#allocation60_spill] sm:$0xff] %v7096_v18 }
 0x694   :  { %v7010_v3 = vadd.f32 %v2338_v9, %v2337_v11  ;;  %v7100_v11 = vld [vmem:[#allocation9 + $0x110] sm:$0xff]  ;;  %v7104_v9 = vld [vmem:[#allocation9 + $0xe8] sm:$0xff] }
 0x695   :  { %9233 = vst [vmem:[#allocation61_spill] sm:$0xff] %v7100_v11  ;;  %9234 = vst [vmem:[#allocation62_spill] sm:$0xff] %v7104_v9 }
 0x696   :  { %2340 = vst [vmem:[#allocation3 + $0x4] sm:$0x1] %v7010_v3  ;;  %v2345_v52 = vrot.slane %v7010_v3, %v5539_v23  ;;  %v7017_v44 = vrot.slane %v7010_v3, %v5528_v16 }
 0x698   :  { %2347 = vst [vmem:[#allocation3 + $0xb] sm:$0x1] %v2345_v52  ;;  %2417 = vmatprep.mubr.f32.mxu0 %v2345_v52  ;;  %2488 = vmatprep.mubr.f32.mxu1 %v2345_v52 }
 0x699   :  { %2418 = vmatmul.mubr.f32.vlgmr.msra.gmra.mxu0 %v7017_v44  ;;  %2489 = vmatmul.mubr.f32.vlgmr.msra.gmra.mxu1 %v7017_v44 }
 0x69a   :  { %2496 = vmatpush1.msra.mxu0 %v7021_v36  ;;  %2559 = vmatprep.mubr.f32.mxu0 %v2345_v52  ;;  %v7108_v52 = vld [vmem:[#allocation9 + $0xe0] sm:$0xff] }
 0x69b   :  { %2497 = vmatprep.subr.mxu0 %v7024_v63  ;;  %2666 = vmatpush1.msra.mxu1 %v6399_v37  ;;  %v7044_v37 = vld [vmem:[#allocation9 + $0x260] sm:$0xff]  ;;  %9235 = vst [vmem:[#allocation63_spill] sm:$0xff] %v7108_v52 }
 0x69c   :  { %2498 = vmatpush1.msra.mxu0 %v7028_v31  ;;  %2667 = vmatprep.subr.mxu1 %v6403_v7  ;;  %v7048_v7 = vld [vmem:[#allocation9 + $0x238] sm:$0xff] }
 0x69d   :  { %2499 = vmatprep.subr.mxu0 %v7032_v0  ;;  %2668 = vmatpush1.msra.mxu1 %v6407_v34  ;;  %v7052_v34 = vld [vmem:[#allocation9 + $0x230] sm:$0xff] }
 0x69e   :  { %2500 = vmatpush1.msra.mxu0 %v7036_v25  ;;  %2669 = vmatprep.subr.mxu1 %v6411_v55  ;;  %v7056_v55 = vld [vmem:[#allocation9 + $0x208] sm:$0xff] }
 0x69f   :  { %2501 = vmatprep.subr.mxu0 %v7040_v40  ;;  %2670 = vmatpush1.msra.mxu1 %v6415_v49  ;;  %v7060_v49 = vld [vmem:[#allocation9 + $0x200] sm:$0xff] }
 0x6a0   :  { %2502 = vmatpush1.msra.mxu0 %v7044_v37  ;;  %2671 = vmatprep.subr.mxu1 %v6419_v30  ;;  %v7064_v30 = vld [vmem:[#allocation9 + $0x1d8] sm:$0xff] }
 0x6a1   :  { %2503 = vmatprep.subr.mxu0 %v7048_v7  ;;  %2672 = vmatpush1.msra.mxu1 %v6636_v32 }
 0x6a2   :  { %2504 = vmatpush1.msra.mxu0 %v7052_v34  ;;  %2673 = vmatprep.subr.mxu1 %v6640_v39 }
 0x6a3   :  { %2505 = vmatprep.subr.mxu0 %v7056_v55  ;;  %2674 = vmatpush1.msra.mxu1 %v6644_v48 }
 0x6a4   :  { %2506 = vmatpush1.msra.mxu0 %v7060_v49  ;;  %2675 = vmatprep.subr.mxu1 %v6648_v2 }
 0x6a5   :  { %2507 = vmatprep.subr.mxu0 %v7064_v30  ;;  %2676 = vmatpush1.msra.mxu1 %v6652_v17 }
 0x6a6   :  { %2508 = vmatpush1.msra.mxu0 %v7068_v21  ;;  %2677 = vmatprep.subr.mxu1 %v6656_v28 }
 0x6a7   :  { %2509 = vmatprep.subr.mxu0 %v7072_v45  ;;  %2678 = vmatpush1.msra.mxu1 %v6660_v15 }
 0x6a8   :  { %2510 = vmatpush1.msra.mxu0 %v7076_v57  ;;  %2679 = vmatprep.subr.mxu1 %v6664_v13 }
 0x6a9   :  { %2511 = vmatprep.subr.mxu0 %v7080_v5  ;;  %2680 = vmatpush1.msra.mxu1 %v6668_v24 }
 0x6aa   :  { %2512 = vmatpush1.msra.mxu0 %v7084_v33  ;;  %2681 = vmatprep.subr.mxu1 %v6672_v20 }
 0x6ab   :  { %2513 = vmatprep.subr.mxu0 %v7088_v19  ;;  %2682 = vmatpush1.msra.mxu1 %v6676_v54 }
 0x6ac   :  { %2514 = vmatpush1.msra.mxu0 %v7092_v38  ;;  %2683 = vmatprep.subr.mxu1 %v6680_v8 }
 0x6ad   :  { %2515 = vmatprep.subr.mxu0 %v7096_v18  ;;  %2684 = vmatpush1.msra.mxu1 %v6684_v60  ;;  %v7112_v18 = vld [vmem:[#allocation9 + $0xb8] sm:$0xff] }
 0x6ae   :  { %2516 = vmatpush1.msra.mxu0 %v7100_v11  ;;  %2685 = vmatprep.subr.mxu1 %v6688_v6  ;;  %9236 = vst [vmem:[#allocation64_spill] sm:$0xff] %v7112_v18  ;;  %v7116_v11 = vld [vmem:[#allocation9 + $0xb0] sm:$0xff] }
 0x6af   :  { %2517 = vmatprep.subr.mxu0 %v7104_v9  ;;  %2686 = vmatpush1.msra.mxu1 %v6692_v14  ;;  %9237 = vst [vmem:[#allocation65_spill] sm:$0xff] %v7116_v11  ;;  %v7120_v9 = vld [vmem:[#allocation9 + $0x88] sm:$0xff] }
 0x6b0   :  { %2518 = vmatpush1.msra.mxu0 %v7108_v52  ;;  %2687 = vmatprep.subr.mxu1 %v6696_v26  ;;  %9238 = vst [vmem:[#allocation66_spill] sm:$0xff] %v7120_v9  ;;  %v7124_v52 = vld [vmem:[#allocation9 + $0x80] sm:$0xff] }
 0x6b1   :  { %2519 = vmatprep.subr.mxu0 %v7112_v18  ;;  %2688 = vmatpush1.msra.mxu1 %v6700_v50  ;;  %9239 = vst [vmem:[#allocation67_spill] sm:$0xff] %v7124_v52  ;;  %v7128_v18 = vld [vmem:[#allocation9 + $0x58] sm:$0xff] }
 0x6b2   :  { %2520 = vmatpush1.msra.mxu0 %v7116_v11  ;;  %2689 = vmatprep.subr.mxu1 %v6704_v4  ;;  %9240 = vst [vmem:[#allocation68_spill] sm:$0xff] %v7128_v18  ;;  %v7132_v11 = vld [vmem:[#allocation9 + $0x50] sm:$0xff] }
 0x6b3   :  { %2521 = vmatprep.subr.mxu0 %v7120_v9  ;;  %2690 = vmatpush1.msra.mxu1 %v6708_v22  ;;  %9241 = vst [vmem:[#allocation69_spill] sm:$0xff] %v7132_v11  ;;  %v7136_v9 = vld [vmem:[#allocation9 + $0x28] sm:$0xff] }
 0x6b4   :  { %2522 = vmatpush1.msra.mxu0 %v7124_v52  ;;  %2691 = vmatprep.subr.mxu1 %v6712_v62  ;;  %9242 = vst [vmem:[#allocation70_spill] sm:$0xff] %v7136_v9  ;;  %v7140_v52 = vld [vmem:[#allocation9 + $0x20] sm:$0xff] }
 0x6b5   :  { %2523 = vmatprep.subr.mxu0 %v7128_v18  ;;  %2692 = vmatpush1.msra.mxu1 %v6716_v1  ;;  %9243 = vst [vmem:[#allocation71_spill] sm:$0xff] %v7140_v52  ;;  %v7144_v18 = vld [vmem:[#allocation9 + $0x5f8] sm:$0xff] }
 0x6b6   :  { %2524 = vmatpush1.msra.mxu0 %v7132_v11  ;;  %2693 = vmatprep.subr.mxu1 %v6720_v29  ;;  %9244 = vst [vmem:[#allocation72_spill] sm:$0xff] %v7144_v18  ;;  %v7148_v11 = vld [vmem:[#allocation9 + $0x5f0] sm:$0xff] }
 0x6b7   :  { %2525 = vmatprep.subr.mxu0 %v7136_v9  ;;  %2694 = vmatpush1.msra.mxu1 %v6724_v43  ;;  %9245 = vst [vmem:[#allocation73_spill] sm:$0xff] %v7148_v11  ;;  %v7152_v9 = vld [vmem:[#allocation9 + $0x5c8] sm:$0xff] }
 0x6b8   :  { %2526 = vmatpush1.msra.mxu0 %v7140_v52  ;;  %2695 = vmatprep.subr.mxu1 %v6728_v41  ;;  %9246 = vst [vmem:[#allocation74_spill] sm:$0xff] %v7152_v9  ;;  %v7156_v52 = vld [vmem:[#allocation9 + $0x5c0] sm:$0xff] }
 0x6b9   :  { %2527 = vmatprep.subr.mxu0 %v7144_v18  ;;  %2696 = vmatpush1.msra.mxu1 %v6732_v61  ;;  %9247 = vst [vmem:[#allocation85_spill] sm:$0xff] %v7156_v52  ;;  %v7160_v18 = vld [vmem:[#allocation9 + $0x598] sm:$0xff] }
 0x6ba   :  { %2528 = vmatpush2.msra.mxu0 %v7148_v11  ;;  %2697 = vmatprep.subr.mxu1 %v6736_v58  ;;  %9248 = vst [vmem:[#allocation86_spill] sm:$0xff] %v7160_v18  ;;  %v7164_v11 = vld [vmem:[#allocation9 + $0x590] sm:$0xff] }
 0x6bb   :  { %2529 = vmatprep.subr.mxu0 %v7152_v9  ;;  %2698 = vmatpush2.msra.mxu1 %v6740_v46  ;;  %9249 = vst [vmem:[#allocation88_spill] sm:$0xff] %v7164_v11  ;;  %v7168_v9 = vld [vmem:[#allocation9 + $0x568] sm:$0xff] }
 0x6bc   :  { %2530 = vmatpush2.msra.mxu0 %v7156_v52  ;;  %2699 = vmatprep.subr.mxu1 %v6744_v59  ;;  %9250 = vst [vmem:[#allocation90_spill] sm:$0xff] %v7168_v9  ;;  %v7172_v52 = vld [vmem:[#allocation9 + $0x560] sm:$0xff] }
 0x6bd   :  { %2531 = vmatprep.subr.mxu0 %v7160_v18  ;;  %2700 = vmatpush2.msra.mxu1 %v6748_v12  ;;  %9251 = vst [vmem:[#allocation92_spill] sm:$0xff] %v7172_v52  ;;  %v7176_v18 = vld [vmem:[#allocation9 + $0x538] sm:$0xff] }
 0x6be   :  { %2532 = vmatpush2.msra.mxu0 %v7164_v11  ;;  %2701 = vmatprep.subr.mxu1 %v6752_v51  ;;  %9252 = vst [vmem:[#allocation94_spill] sm:$0xff] %v7176_v18  ;;  %v7180_v11 = vld [vmem:[#allocation9 + $0x530] sm:$0xff]  ;;  %v9302_v51 = vld [vmem:[#allocation39_spill] sm:$0xff] }
 0x6bf   :  { %2533 = vmatprep.subr.mxu0 %v7168_v9  ;;  %2702 = vmatpush2.msra.mxu1 %v6756_v42  ;;  %9253 = vst [vmem:[#allocation96_spill] sm:$0xff] %v7180_v11  ;;  %v7184_v9 = vld [vmem:[#allocation9 + $0x508] sm:$0xff]  ;;  %v9255_v42 = vld [vmem:[#allocation81_spill] sm:$0xff] }
 0x6c0   :  { %2534 = vmatpush2.msra.mxu0 %v7172_v52  ;;  %2703 = vmatprep.subr.mxu1 %v6760_v53  ;;  %9254 = vst [vmem:[#allocation98_spill] sm:$0xff] %v7184_v9  ;;  %v7188_v52 = vld [vmem:[#allocation9 + $0x500] sm:$0xff]  ;;  %v9257_v53 = vld [vmem:[#allocation28_spill] sm:$0xff]  ;;  %v9305_v12 = vld [vmem:[#allocation121_spill] sm:$0xff] }
 0x6c1   :  { %2535 = vmatprep.subr.mxu0 %v7176_v18  ;;  %2704 = vmatpush2.msra.mxu1 %v6764_v47  ;;  %9256 = vst [vmem:[#allocation100_spill] sm:$0xff] %v7188_v52  ;;  %v7192_v18 = vld [vmem:[#allocation9 + $0x4d8] sm:$0xff] }
 0x6c2   :  { %2536 = vmatpush2.msra.mxu0 %v7180_v11  ;;  %2705 = vmatprep.subr.mxu1 %v6768_v10  ;;  %9258 = vst [vmem:[#allocation102_spill] sm:$0xff] %v7192_v18  ;;  %v9259_v47 = vld [vmem:[#allocation82_spill] sm:$0xff]  ;;  %v7196_v11 = vld [vmem:[#allocation9 + $0x4d0] sm:$0xff] }
 0x6c3   :  { %2537 = vmatprep.subr.mxu0 %v7184_v9  ;;  %2706 = vmatpush2.msra.mxu1 %v9255_v42  ;;  %9260 = vst [vmem:[#allocation104_spill] sm:$0xff] %v7196_v11  ;;  %v9261_v10 = vld [vmem:[#allocation97_spill] sm:$0xff]  ;;  %v7200_v9 = vld [vmem:[#allocation9 + $0x4a8] sm:$0xff] }
 0x6c4   :  { %2538 = vmatpush2.msra.mxu0 %v7188_v52  ;;  %2707 = vmatprep.subr.mxu1 %v9257_v53  ;;  %9262 = vst [vmem:[#allocation106_spill] sm:$0xff] %v7200_v9  ;;  %v9263_v42 = vld [vmem:[#allocation83_spill] sm:$0xff]  ;;  %v9265_v53 = vld [vmem:[#allocation29_spill] sm:$0xff] }
 0x6c5   :  { %2539 = vmatprep.subr.mxu0 %v7192_v18  ;;  %2708 = vmatpush2.msra.mxu1 %v9259_v47  ;;  %v7204_v52 = vld [vmem:[#allocation9 + $0x4a0] sm:$0xff]  ;;  %v7208_v18 = vld [vmem:[#allocation9 + $0x478] sm:$0xff]  ;;  %v9267_v47 = vld [vmem:[#allocation84_spill] sm:$0xff] }
 0x6c6   :  { %2540 = vmatpush2.msra.mxu0 %v7196_v11  ;;  %2709 = vmatprep.subr.mxu1 %v9261_v10  ;;  %9264 = vst [vmem:[#allocation108_spill] sm:$0xff] %v7204_v52  ;;  %9266 = vst [vmem:[#allocation110_spill] sm:$0xff] %v7208_v18  ;;  %v7212_v11 = vld [vmem:[#allocation9 + $0x470] sm:$0xff]  ;;  %v9269_v10 = vld [vmem:[#allocation99_spill] sm:$0xff] }
 0x6c7   :  { %2541 = vmatprep.subr.mxu0 %v7200_v9  ;;  %2710 = vmatpush2.msra.mxu1 %v9263_v42  ;;  %9268 = vst [vmem:[#allocation112_spill] sm:$0xff] %v7212_v11  ;;  %v7216_v9 = vld [vmem:[#allocation9 + $0x448] sm:$0xff]  ;;  %v9271_v42 = vld [vmem:[#allocation30_spill] sm:$0xff] }
 0x6c8   :  { %2542 = vmatpush2.msra.mxu0 %v7204_v52  ;;  %2711 = vmatprep.subr.mxu1 %v9265_v53  ;;  %9270 = vst [vmem:[#allocation114_spill] sm:$0xff] %v7216_v9  ;;  %v7220_v52 = vld [vmem:[#allocation9 + $0x440] sm:$0xff]  ;;  %v9273_v53 = vld [vmem:[#allocation101_spill] sm:$0xff] }
 0x6c9   :  { %2543 = vmatprep.subr.mxu0 %v7208_v18  ;;  %2712 = vmatpush2.msra.mxu1 %v9267_v47  ;;  %9272 = vst [vmem:[#allocation116_spill] sm:$0xff] %v7220_v52  ;;  %v7224_v18 = vld [vmem:[#allocation9 + $0x418] sm:$0xff]  ;;  %v9275_v47 = vld [vmem:[#allocation31_spill] sm:$0xff] }
 0x6ca   :  { %2544 = vmatpush2.msra.mxu0 %v7212_v11  ;;  %2713 = vmatprep.subr.mxu1 %v9269_v10  ;;  %9274 = vst [vmem:[#allocation118_spill] sm:$0xff] %v7224_v18  ;;  %v7228_v11 = vld [vmem:[#allocation9 + $0x410] sm:$0xff]  ;;  %v9277_v10 = vld [vmem:[#allocation103_spill] sm:$0xff] }
 0x6cb   :  { %2545 = vmatprep.subr.mxu0 %v7216_v9  ;;  %2714 = vmatpush2.msra.mxu1 %v9271_v42  ;;  %9276 = vst [vmem:[#allocation120_spill] sm:$0xff] %v7228_v11  ;;  %v7232_v9 = vld [vmem:[#allocation9 + $0x3e8] sm:$0xff] }
 0x6cc   :  { %2546 = vmatpush2.msra.mxu0 %v7220_v52  ;;  %2715 = vmatprep.subr.mxu1 %v9273_v53  ;;  %9278 = vst [vmem:[#allocation122_spill] sm:$0xff] %v7232_v9  ;;  %v9279_v42 = vld [vmem:[#allocation32_spill] sm:$0xff]  ;;  %v7236_v52 = vld [vmem:[#allocation9 + $0x3e0] sm:$0xff]  ;;  %v9281_v53 = vld [vmem:[#allocation105_spill] sm:$0xff] }
 0x6cd   :  { %2547 = vmatprep.subr.mxu0 %v7224_v18  ;;  %2716 = vmatpush2.msra.mxu1 %v9275_v47  ;;  %9280 = vst [vmem:[#allocation124_spill] sm:$0xff] %v7236_v52  ;;  %v7240_v18 = vld [vmem:[#allocation9 + $0x3b8] sm:$0xff] }
 0x6ce   :  { %2548 = vmatpush2.msra.mxu0 %v7228_v11  ;;  %2717 = vmatprep.subr.mxu1 %v9277_v10  ;;  %9282 = vst [vmem:[#allocation126_spill] sm:$0xff] %v7240_v18  ;;  %v9283_v47 = vld [vmem:[#allocation33_spill] sm:$0xff]  ;;  %v9285_v10 = vld [vmem:[#allocation107_spill] sm:$0xff] }
 0x6cf   :  { %2549 = vmatprep.subr.mxu0 %v7232_v9  ;;  %2718 = vmatpush2.msra.mxu1 %v9279_v42  ;;  %v7244_v11 = vld [vmem:[#allocation9 + $0x3b0] sm:$0xff]  ;;  %v7248_v9 = vld [vmem:[#allocation9 + $0x388] sm:$0xff]  ;;  %v9287_v42 = vld [vmem:[#allocation34_spill] sm:$0xff] }
 0x6d0   :  { %2550 = vmatpush2.msra.mxu0 %v7236_v52  ;;  %2719 = vmatprep.subr.mxu1 %v9281_v53  ;;  %9284 = vst [vmem:[#allocation128_spill] sm:$0xff] %v7244_v11  ;;  %9286 = vst [vmem:[#allocation130_spill] sm:$0xff] %v7248_v9  ;;  %v7252_v52 = vld [vmem:[#allocation9 + $0x380] sm:$0xff]  ;;  %v9289_v53 = vld [vmem:[#allocation109_spill] sm:$0xff] }
 0x6d1   :  { %2551 = vmatprep.subr.mxu0 %v7240_v18  ;;  %2720 = vmatpush2.msra.mxu1 %v9283_v47  ;;  %9288 = vst [vmem:[#allocation132_spill] sm:$0xff] %v7252_v52  ;;  %v7256_v18 = vld [vmem:[#allocation9 + $0x358] sm:$0xff]  ;;  %v9291_v47 = vld [vmem:[#allocation35_spill] sm:$0xff] }
 0x6d2   :  { %2552 = vmatpush2.msra.mxu0 %v7244_v11  ;;  %2721 = vmatprep.subr.mxu1 %v9285_v10  ;;  %9290 = vst [vmem:[#allocation134_spill] sm:$0xff] %v7256_v18  ;;  %v7260_v11 = vld [vmem:[#allocation9 + $0x350] sm:$0xff]  ;;  %v9293_v10 = vld [vmem:[#allocation111_spill] sm:$0xff] }
 0x6d3   :  { %2553 = vmatprep.subr.mxu0 %v7248_v9  ;;  %2722 = vmatpush2.msra.mxu1 %v9287_v42  ;;  %9292 = vst [vmem:[#allocation136_spill] sm:$0xff] %v7260_v11  ;;  %v7264_v9 = vld [vmem:[#allocation9 + $0x328] sm:$0xff] }
 0x6d4   :  { %2554 = vmatpush2.msra.mxu0 %v7252_v52  ;;  %2723 = vmatprep.subr.mxu1 %v9289_v53  ;;  %9294 = vst [vmem:[#allocation138_spill] sm:$0xff] %v7264_v9  ;;  %v9295_v42 = vld [vmem:[#allocation36_spill] sm:$0xff]  ;;  %v7268_v52 = vld [vmem:[#allocation9 + $0x320] sm:$0xff]  ;;  %v9297_v53 = vld [vmem:[#allocation113_spill] sm:$0xff] }
 0x6d5   :  { %2555 = vmatprep.subr.mxu0 %v7256_v18  ;;  %2724 = vmatpush2.msra.mxu1 %v9291_v47  ;;  %9296 = vst [vmem:[#allocation140_spill] sm:$0xff] %v7268_v52  ;;  %v9298_v47 = vld [vmem:[#allocation37_spill] sm:$0xff]  ;;  %v9299_v18 = vld [vmem:[#allocation115_spill] sm:$0xff] }
 0x6d6   :  { %2556 = vmatpush2.msra.mxu0 %v7260_v11  ;;  %2725 = vmatprep.subr.mxu1 %v9293_v10  ;;  %v9300_v11 = vld [vmem:[#allocation38_spill] sm:$0xff]  ;;  %v9301_v10 = vld [vmem:[#allocation117_spill] sm:$0xff] }
 0x6d7   :  { %2557 = vmatprep.subr.mxu0 %v7264_v9  ;;  %2726 = vmatpush2.msra.mxu1 %v9295_v42  ;;  %v9303_v9 = vld [vmem:[#allocation119_spill] sm:$0xff]  ;;  %v9304_v42 = vld [vmem:[#allocation40_spill] sm:$0xff] }
 0x6d8   :  { %2558 = vmatpush2.msra.mxu0 %v7268_v52  ;;  %2727 = vmatprep.subr.mxu1 %v9297_v53  ;;  %v9306_v52 = vld [vmem:[#allocation41_spill] sm:$0xff]  ;;  %v9307_v53 = vld [vmem:[#allocation123_spill] sm:$0xff] }
 0x6d9   :  { %2560 = vmatmul.mubr.f32.vlgmr.msra.gmra.mxu0 %v7017_v44  ;;  %2736 = vmatprep.subr.mxu0 %v9298_v47  ;;  %v9308_v44 = vld [vmem:[#allocation42_spill] sm:$0xff]  ;;  %v9309_v47 = vld [vmem:[#allocation125_spill] sm:$0xff] }
 0x6da   :  { %2737 = vmatpush1.msra.mxu0 %v9299_v18  ;;  %2728 = vmatpush2.msra.mxu1 %v9300_v11  ;;  %v9310_v18 = vld [vmem:[#allocation43_spill] sm:$0xff] }
 0x6db   :  { %2738 = vmatprep.subr.mxu0 %v9301_v10  ;;  %2807 = vmatprep.subr.mxu1 %v9302_v51  ;;  %v9311_v11 = vld [vmem:[#allocation127_spill] sm:$0xff]  ;;  %v9312_v10 = vld [vmem:[#allocation44_spill] sm:$0xff]  ;;  %v9313_v51 = vld [vmem:[#allocation129_spill] sm:$0xff] }
 0x6dc   :  { %2739 = vmatpush1.msra.mxu0 %v9303_v9  ;;  %v9314_v9 = vld [vmem:[#allocation45_spill] sm:$0xff] }
 0x6dd   :  { %2740 = vmatprep.subr.mxu0 %v9304_v42  ;;  %v9315_v42 = vld [vmem:[#allocation131_spill] sm:$0xff] }
 0x6de   :  { %2741 = vmatpush1.msra.mxu0 %v9305_v12  ;;  %v9316_v12 = vld [vmem:[#allocation46_spill] sm:$0xff] }
 0x6df   :  { %2742 = vmatprep.subr.mxu0 %v9306_v52  ;;  %v9317_v52 = vld [vmem:[#allocation133_spill] sm:$0xff] }
 0x6e0   :  { %2743 = vmatpush1.msra.mxu0 %v9307_v53  ;;  %v9318_v53 = vld [vmem:[#allocation47_spill] sm:$0xff] }
 0x6e1   :  { %2744 = vmatprep.subr.mxu0 %v9308_v44  ;;  %v9319_v44 = vld [vmem:[#allocation135_spill] sm:$0xff] }
 0x6e2   :  { %2745 = vmatpush1.msra.mxu0 %v9309_v47  ;;  %v9320_v47 = vld [vmem:[#allocation48_spill] sm:$0xff] }
 0x6e3   :  { %2746 = vmatprep.subr.mxu0 %v9310_v18  ;;  %v9321_v18 = vld [vmem:[#allocation137_spill] sm:$0xff] }
 0x6e4   :  { %2747 = vmatpush1.msra.mxu0 %v9311_v11  ;;  %v9322_v11 = vld [vmem:[#allocation49_spill] sm:$0xff] }
 0x6e5   :  { %2748 = vmatprep.subr.mxu0 %v9312_v10  ;;  %v9323_v10 = vld [vmem:[#allocation139_spill] sm:$0xff] }
 0x6e6   :  { %2749 = vmatpush1.msra.mxu0 %v9313_v51  ;;  %v9324_v51 = vld [vmem:[#allocation50_spill] sm:$0xff] }
 0x6e7   :  { %2750 = vmatprep.subr.mxu0 %v9314_v9  ;;  %v9325_v9 = vld [vmem:[#allocation141_spill] sm:$0xff] }
 0x6e8   :  { %2751 = vmatpush1.msra.mxu0 %v9315_v42  ;;  %v9326_v42 = vld [vmem:[#allocation51_spill] sm:$0xff] }
 0x6e9   :  { %2752 = vmatprep.subr.mxu0 %v9316_v12  ;;  %v9327_v12 = vld [vmem:[#allocation52_spill] sm:$0xff] }
 0x6ea   :  { %2753 = vmatpush1.msra.mxu0 %v9317_v52  ;;  %v9328_v52 = vld [vmem:[#allocation53_spill] sm:$0xff] }
 0x6eb   :  { %2754 = vmatprep.subr.mxu0 %v9318_v53  ;;  %v9329_v53 = vld [vmem:[#allocation54_spill] sm:$0xff] }
 0x6ec   :  { %2755 = vmatpush1.msra.mxu0 %v9319_v44  ;;  %v9330_v44 = vld [vmem:[#allocation55_spill] sm:$0xff] }
 0x6ed   :  { %2756 = vmatprep.subr.mxu0 %v9320_v47  ;;  %v9331_v47 = vld [vmem:[#allocation56_spill] sm:$0xff] }
 0x6ee   :  { %2757 = vmatpush1.msra.mxu0 %v9321_v18  ;;  %v9332_v18 = vld [vmem:[#allocation57_spill] sm:$0xff] }
 0x6ef   :  { %2758 = vmatprep.subr.mxu0 %v9322_v11  ;;  %v9333_v11 = vld [vmem:[#allocation58_spill] sm:$0xff] }
 0x6f0   :  { %2759 = vmatpush1.msra.mxu0 %v9323_v10  ;;  %v9334_v10 = vld [vmem:[#allocation59_spill] sm:$0xff] }
 0x6f1   :  { %2760 = vmatprep.subr.mxu0 %v9324_v51  ;;  %v7310_v51 = vld [vmem:[#allocation9 + $0x5b0] sm:$0xff] }
 0x6f2   :  { %2761 = vmatpush1.msra.mxu0 %v9325_v9  ;;  %9335 = vst [vmem:[#allocation142_spill] sm:$0xff] %v7310_v51 }
 0x6f3   :  { %2762 = vmatprep.subr.mxu0 %v9326_v42  ;;  %v7313_v42 = vld [vmem:[#allocation9 + $0x588] sm:$0xff] }
 0x6f4   :  { %2763 = vmatpush1.msra.mxu0 %v9327_v12  ;;  %9336 = vst [vmem:[#allocation143_spill] sm:$0xff] %v7313_v42  ;;  %v2568_v12 = vld [vmem:[#allocation2 + $0x5] ss:$8 sm:$0x30] }
 0x6f5   :  { %2764 = vmatprep.subr.mxu0 %v9328_v52  ;;  %v7316_v52 = vld [vmem:[#allocation9 + $0x580] sm:$0xff] }
 0x6f6   :  { %2765 = vmatpush1.msra.mxu0 %v9329_v53  ;;  %9337 = vst [vmem:[#allocation144_spill] sm:$0xff] %v7316_v52 }
 0x6f7   :  { %2766 = vmatprep.subr.mxu0 %v9330_v44  ;;  %v7319_v44 = vld [vmem:[#allocation9 + $0x558] sm:$0xff] }
 0x6f8   :  { %2767 = vmatpush1.msra.mxu0 %v9331_v47  ;;  %9338 = vst [vmem:[#allocation145_spill] sm:$0xff] %v7319_v44 }
 0x6f9   :  { %2768 = vmatprep.subr.mxu0 %v9332_v18  ;;  %v7322_v18 = vld [vmem:[#allocation9 + $0x550] sm:$0xff] }
 0x6fa   :  { %2769 = vmatpush2.msra.mxu0 %v9333_v11  ;;  %9339 = vst [vmem:[#allocation146_spill] sm:$0xff] %v7322_v18 }
 0x6fb   :  { %2770 = vmatprep.subr.mxu0 %v9334_v10  ;;  %v7325_v10 = vld [vmem:[#allocation9 + $0x528] sm:$0xff] }
 0x6fc   :  { %2771 = vmatpush2.msra.mxu0 %v7310_v51  ;;  %9340 = vst [vmem:[#allocation147_spill] sm:$0xff] %v7325_v10  ;;  %v7328_v51 = vld [vmem:[#allocation9 + $0x520] sm:$0xff] }
 0x6fd   :  { %2772 = vmatprep.subr.mxu0 %v7313_v42  ;;  %9341 = vst [vmem:[#allocation148_spill] sm:$0xff] %v7328_v51  ;;  %v7331_v42 = vld [vmem:[#allocation9 + $0x4f8] sm:$0xff] }
 0x6fe   :  { %2773 = vmatpush2.msra.mxu0 %v7316_v52  ;;  %9342 = vst [vmem:[#allocation23_spill] sm:$0xff] %v7331_v42  ;;  %v7334_v52 = vld [vmem:[#allocation9 + $0x4f0] sm:$0xff] }
 0x6ff   :  { %2774 = vmatprep.subr.mxu0 %v7319_v44  ;;  %9343 = vst [vmem:[#allocation87_spill] sm:$0xff] %v7334_v52  ;;  %v7337_v44 = vld [vmem:[#allocation9 + $0x4c8] sm:$0xff] }
 0x700   :  { %2775 = vmatpush2.msra.mxu0 %v7322_v18  ;;  %9344 = vst [vmem:[#allocation24_spill] sm:$0xff] %v7337_v44  ;;  %v7340_v18 = vld [vmem:[#allocation9 + $0x4c0] sm:$0xff] }
 0x701   :  { %2776 = vmatprep.subr.mxu0 %v7325_v10  ;;  %9345 = vst [vmem:[#allocation149_spill] sm:$0xff] %v7340_v18  ;;  %v7343_v10 = vld [vmem:[#allocation9 + $0x498] sm:$0xff] }
 0x702   :  { %2777 = vmatpush2.msra.mxu0 %v7328_v51  ;;  %9346 = vst [vmem:[#allocation150_spill] sm:$0xff] %v7343_v10  ;;  %v7346_v51 = vld [vmem:[#allocation9 + $0x490] sm:$0xff] }
 0x703   :  { %2778 = vmatprep.subr.mxu0 %v7331_v42  ;;  %9347 = vst [vmem:[#allocation151_spill] sm:$0xff] %v7346_v51  ;;  %v7349_v42 = vld [vmem:[#allocation9 + $0x468] sm:$0xff] }
 0x704   :  { %2779 = vmatpush2.msra.mxu0 %v7334_v52  ;;  %9348 = vst [vmem:[#allocation152_spill] sm:$0xff] %v7349_v42  ;;  %v7352_v52 = vld [vmem:[#allocation9 + $0x460] sm:$0xff] }
 0x705   :  { %2780 = vmatprep.subr.mxu0 %v7337_v44  ;;  %9349 = vst [vmem:[#allocation153_spill] sm:$0xff] %v7352_v52  ;;  %v7355_v44 = vld [vmem:[#allocation9 + $0x438] sm:$0xff] }
 0x706   :  { %2781 = vmatpush2.msra.mxu0 %v7340_v18  ;;  %9350 = vst [vmem:[#allocation154_spill] sm:$0xff] %v7355_v44  ;;  %v7358_v18 = vld [vmem:[#allocation9 + $0x430] sm:$0xff] }
 0x707   :  { %2782 = vmatprep.subr.mxu0 %v7343_v10  ;;  %9351 = vst [vmem:[#allocation155_spill] sm:$0xff] %v7358_v18  ;;  %v7361_v10 = vld [vmem:[#allocation9 + $0x408] sm:$0xff] }
 0x708   :  { %2783 = vmatpush2.msra.mxu0 %v7346_v51  ;;  %9352 = vst [vmem:[#allocation156_spill] sm:$0xff] %v7361_v10  ;;  %v7364_v51 = vld [vmem:[#allocation9 + $0x400] sm:$0xff] }
 0x709   :  { %2784 = vmatprep.subr.mxu0 %v7349_v42  ;;  %9353 = vst [vmem:[#allocation157_spill] sm:$0xff] %v7364_v51  ;;  %v7367_v42 = vld [vmem:[#allocation9 + $0x3d8] sm:$0xff] }
 0x70a   :  { %2785 = vmatpush2.msra.mxu0 %v7352_v52  ;;  %9354 = vst [vmem:[#allocation158_spill] sm:$0xff] %v7367_v42  ;;  %v7370_v52 = vld [vmem:[#allocation9 + $0x3d0] sm:$0xff] }
 0x70b   :  { %2786 = vmatprep.subr.mxu0 %v7355_v44  ;;  %9355 = vst [vmem:[#allocation159_spill] sm:$0xff] %v7370_v52  ;;  %v7373_v44 = vld [vmem:[#allocation9 + $0x3a8] sm:$0xff] }
 0x70c   :  { %2787 = vmatpush2.msra.mxu0 %v7358_v18  ;;  %9356 = vst [vmem:[#allocation160_spill] sm:$0xff] %v7373_v44  ;;  %v7376_v18 = vld [vmem:[#allocation9 + $0x3a0] sm:$0xff] }
 0x70d   :  { %2788 = vmatprep.subr.mxu0 %v7361_v10  ;;  %9357 = vst [vmem:[#allocation161_spill] sm:$0xff] %v7376_v18  ;;  %v7379_v10 = vld [vmem:[#allocation9 + $0x378] sm:$0xff] }
 0x70e   :  { %2789 = vmatpush2.msra.mxu0 %v7364_v51  ;;  %9358 = vst [vmem:[#allocation162_spill] sm:$0xff] %v7379_v10  ;;  %v7382_v51 = vld [vmem:[#allocation9 + $0x370] sm:$0xff] }
 0x70f   :  { %2790 = vmatprep.subr.mxu0 %v7367_v42  ;;  %9359 = vst [vmem:[#allocation163_spill] sm:$0xff] %v7382_v51  ;;  %v7385_v42 = vld [vmem:[#allocation9 + $0x348] sm:$0xff] }
 0x710   :  { %2791 = vmatpush2.msra.mxu0 %v7370_v52  ;;  %9360 = vst [vmem:[#allocation164_spill] sm:$0xff] %v7385_v42  ;;  %v7388_v52 = vld [vmem:[#allocation9 + $0x340] sm:$0xff] }
 0x711   :  { %2792 = vmatprep.subr.mxu0 %v7373_v44  ;;  %9361 = vst [vmem:[#allocation165_spill] sm:$0xff] %v7388_v52  ;;  %v7391_v44 = vld [vmem:[#allocation9 + $0x318] sm:$0xff] }
 0x712   :  { %2793 = vmatpush2.msra.mxu0 %v7376_v18  ;;  %9362 = vst [vmem:[#allocation166_spill] sm:$0xff] %v7391_v44  ;;  %v7394_v18 = vld [vmem:[#allocation9 + $0x310] sm:$0xff] }
 0x713   :  { %2794 = vmatprep.subr.mxu0 %v7379_v10  ;;  %9363 = vst [vmem:[#allocation167_spill] sm:$0xff] %v7394_v18  ;;  %v4538_v10 = vld [vmem:[#allocation9 + $0x2d8] sm:$0xff] }
 0x714   :  { %2795 = vmatpush2.msra.mxu0 %v7382_v51 }
 0x715   :  { %2796 = vmatprep.subr.mxu0 %v7385_v42 }
 0x716   :  { %2797 = vmatpush2.msra.mxu0 %v7388_v52  ;;  %v2567_v52 = vld [vmem:[#allocation2 + $0x5] ss:$8 sm:$0xf] }
 0x717   :  { %2798 = vmatprep.subr.mxu0 %v7391_v44  ;;  %v2569_v59 = vor.u32 %v2568_v12, %v2567_v52 }
 0x718   :  { %2799 = vmatpush2.msra.mxu0 %v7394_v18 }
 0x719   :  { %2977 = vmatprep.subr.mxu0 %v4538_v10  ;;  %v2596_v18 = vrot.slane %v2569_v59, 2 }
 0x759   :  { %v2419_v11 = vpop.f32.mrf.mxu0  ;;  %v2490_v42 = vpop.f32.mrf.mxu1 }
 0x75b   :  { %v2421_v51 = vpop.f32.mrf.mxu0  ;;  %v2492_v46 = vpop.f32.mrf.mxu1 }
 0x75c   :  { %v2572_v47 = vcombine.low %v2419_v11, %v2421_v51  ;;  %v2600_v44 = vcombine.low %v2490_v42, %v2492_v46 }
 0x75e   :  { %v2579_v53 = vrot.slane %v2572_v47, %v5569_v56  ;;  %v2607_v41 = vrot.slane %v2600_v44, %v5569_v56 }
 0x760   :  { %v2586_v9 = vrot.slane %v2579_v53, %v5569_v56  ;;  %v2614_v10 = vrot.slane %v2607_v41, %v5569_v56 }
 0x762   :  { %v2588_v58 = vadd.f32 %v2586_v9, %v2569_v59  ;;  %v2616_v43 = vadd.f32 %v2614_v10, %v2596_v18  ;;  %v2644_v18 = vrot.slane %v2569_v59, 4  ;;  %v4539_v59 = vld [vmem:[#allocation9 + $0x2d0] sm:$0xff] }
 0x764   :  { %v3929_v61 = vmul.f32 -1.442695, %v2588_v58  ;;  %v3930_v51 = vmul.f32 -1.442695, %v2616_v43 }
 0x766   :  { %4114 = vpow2.f32 %v3929_v61 }
 0x767   :  { %4116 = vpow2.f32 %v3930_v51 }
 0x773   :  { %v4115_v11 = vpop.eup %4114 }
 0x774   :  { %v2592_v47 = vadd.f32 1.0, %v4115_v11  ;;  %v4117_v46 = vpop.eup %4116 }
 0x775   :  { %v2620_v42 = vadd.f32 1.0, %v4117_v46  ;;  %v4541_v46 = vld [vmem:[#allocation9 + $0x2a0] sm:$0xff] }
 0x776   :  { %4118 = vrcp.f32 %v2592_v47 }
 0x777   :  { %4120 = vrcp.f32 %v2620_v42  ;;  %v4543_v42 = vld [vmem:[#allocation9 + $0x270] sm:$0xff] }
 0x783   :  { %v4119_v52 = vpop.eup %4118 }
 0x784   :  { %v4121_v10 = vpop.eup %4120 }
 0x785   :  { %v2648_v51 = vsub.f32 1.0, %v4121_v10 }
 0x799   :  { %v2561_v29 = vpop.f32.mrf.mxu0 }
 0x79a   :  { %v2623_v12 = vadd.f32 %v2561_v29, %v5577_v27  ;;  %v2650_v29 = vmul.f32 %v4121_v10, %v7010_v3  ;;  %v4540_v3 = vld [vmem:[#allocation9 + $0x2a8] sm:$0xff]  ;;  %v9390_v10 = vld [vmem:[#allocation93_spill] sm:$0xff] }
 0x79b   :  { %v2563_v53 = vpop.f32.mrf.mxu0 }
 0x79c   :  { %v2624_v9 = vadd.f32 %v2563_v53, %v5580_v35 }
 0x79e   :  { %v2627_v58 = vcombine.low %v2623_v12, %v2624_v9 }
 0x7a0   :  { %v2634_v61 = vrot.slane %v2627_v58, %v5569_v56  ;;  %v4542_v58 = vld [vmem:[#allocation9 + $0x278] sm:$0xff] }
 0x7a2   :  { %v2641_v41 = vrot.slane %v2634_v61, %v5569_v56  ;;  %v4544_v61 = vld [vmem:[#allocation9 + $0x248] sm:$0xff] }
 0x7a4   :  { %v2643_v43 = vmul.f32 %v4119_v52, %v2641_v41  ;;  %v9385_v41 = vld [vmem:[#allocation85_spill] sm:$0xff]  ;;  %v9386_v52 = vld [vmem:[#allocation26_spill] sm:$0xff] }
 0x7a6   :  { %v2646_v44 = vadd.f32 %v2644_v18, %v2643_v43  ;;  %v9387_v43 = vld [vmem:[#allocation86_spill] sm:$0xff] }
 0x7a7   :  { %v9388_v18 = vld [vmem:[#allocation78_spill] sm:$0xff] }
 0x7a8   :  { %4122 = vtanh.f32 %v2646_v44  ;;  %v9389_v44 = vld [vmem:[#allocation88_spill] sm:$0xff] }
 0x7b5   :  { %v4123_v11 = vpop.eup %4122 }
 0x7b6   :  { %v2649_v47 = vmul.f32 %v4123_v11, %v2648_v51  ;;  %v9391_v51 = vld [vmem:[#allocation90_spill] sm:$0xff]  ;;  %v9392_v11 = vld [vmem:[#allocation79_spill] sm:$0xff] }
 0x7b8   :  { %v7406_v53 = vadd.f32 %v2650_v29, %v2649_v47  ;;  %v9393_v47 = vld [vmem:[#allocation92_spill] sm:$0xff]  ;;  %v9394_v29 = vld [vmem:[#allocation27_spill] sm:$0xff] }
 0x7ba   :  { %2652 = vst [vmem:[#allocation3 + $0x5] sm:$0x1] %v7406_v53  ;;  %v2657_v12 = vrot.slane %v7406_v53, %v5539_v23  ;;  %v7413_v9 = vrot.slane %v7406_v53, %v5528_v16 }
 0x7bc   :  { %2659 = vst [vmem:[#allocation3 + $0xa] sm:$0x1] %v2657_v12  ;;  %2729 = vmatprep.mubr.f32.mxu1 %v2657_v12  ;;  %2800 = vmatprep.mubr.f32.mxu0 %v2657_v12 }
 0x7bd   :  { %2730 = vmatmul.mubr.f32.vlgmr.msra.gmra.mxu1 %v7413_v9  ;;  %2801 = vmatmul.mubr.f32.vlgmr.msra.gmra.mxu0 %v7413_v9 }
 0x7be   :  { %2808 = vmatpush1.msra.mxu1 %v7021_v36  ;;  %2871 = vmatprep.mubr.f32.mxu1 %v2657_v12  ;;  %v9395_v12 = vld [vmem:[#allocation94_spill] sm:$0xff] }
 0x7bf   :  { %2809 = vmatprep.subr.mxu1 %v7024_v63  ;;  %2978 = vmatpush1.msra.mxu0 %v4539_v59  ;;  %v9396_v59 = vld [vmem:[#allocation80_spill] sm:$0xff] }
 0x7c0   :  { %2810 = vmatpush1.msra.mxu1 %v7028_v31  ;;  %2979 = vmatprep.subr.mxu0 %v4540_v3  ;;  %v9397_v3 = vld [vmem:[#allocation96_spill] sm:$0xff] }
 0x7c1   :  { %2811 = vmatprep.subr.mxu1 %v7032_v0  ;;  %2980 = vmatpush1.msra.mxu0 %v4541_v46  ;;  %v9398_v46 = vld [vmem:[#allocation95_spill] sm:$0xff] }
 0x7c2   :  { %2812 = vmatpush1.msra.mxu1 %v7036_v25  ;;  %2981 = vmatprep.subr.mxu0 %v4542_v58  ;;  %v9399_v58 = vld [vmem:[#allocation98_spill] sm:$0xff] }
 0x7c3   :  { %2813 = vmatprep.subr.mxu1 %v7040_v40  ;;  %2982 = vmatpush1.msra.mxu0 %v4543_v42  ;;  %v9400_v42 = vld [vmem:[#allocation81_spill] sm:$0xff] }
 0x7c4   :  { %2814 = vmatpush1.msra.mxu1 %v7044_v37  ;;  %2983 = vmatprep.subr.mxu0 %v4544_v61  ;;  %v9401_v61 = vld [vmem:[#allocation100_spill] sm:$0xff] }
 0x7c5   :  { %2815 = vmatprep.subr.mxu1 %v7048_v7  ;;  %2984 = vmatpush1.msra.mxu0 %v6636_v32  ;;  %v9364_v32 = vld [vmem:[#allocation60_spill] sm:$0xff] }
 0x7c6   :  { %2816 = vmatpush1.msra.mxu1 %v7052_v34  ;;  %2985 = vmatprep.subr.mxu0 %v6640_v39  ;;  %v9365_v39 = vld [vmem:[#allocation61_spill] sm:$0xff] }
 0x7c7   :  { %2817 = vmatprep.subr.mxu1 %v7056_v55  ;;  %2986 = vmatpush1.msra.mxu0 %v6644_v48  ;;  %v9366_v48 = vld [vmem:[#allocation62_spill] sm:$0xff] }
 0x7c8   :  { %2818 = vmatpush1.msra.mxu1 %v7060_v49  ;;  %2987 = vmatprep.subr.mxu0 %v6648_v2  ;;  %v9367_v2 = vld [vmem:[#allocation63_spill] sm:$0xff] }
 0x7c9   :  { %2819 = vmatprep.subr.mxu1 %v7064_v30  ;;  %2988 = vmatpush1.msra.mxu0 %v6652_v17  ;;  %v9368_v17 = vld [vmem:[#allocation64_spill] sm:$0xff] }
 0x7ca   :  { %2820 = vmatpush1.msra.mxu1 %v7068_v21  ;;  %2989 = vmatprep.subr.mxu0 %v6656_v28  ;;  %v9369_v28 = vld [vmem:[#allocation65_spill] sm:$0xff] }
 0x7cb   :  { %2821 = vmatprep.subr.mxu1 %v7072_v45  ;;  %2990 = vmatpush1.msra.mxu0 %v6660_v15  ;;  %v9370_v15 = vld [vmem:[#allocation66_spill] sm:$0xff] }
 0x7cc   :  { %2822 = vmatpush1.msra.mxu1 %v7076_v57  ;;  %2991 = vmatprep.subr.mxu0 %v6664_v13  ;;  %v9371_v13 = vld [vmem:[#allocation67_spill] sm:$0xff] }
 0x7cd   :  { %2823 = vmatprep.subr.mxu1 %v7080_v5  ;;  %2992 = vmatpush1.msra.mxu0 %v6668_v24  ;;  %v9372_v24 = vld [vmem:[#allocation68_spill] sm:$0xff] }
 0x7ce   :  { %2824 = vmatpush1.msra.mxu1 %v7084_v33  ;;  %2993 = vmatprep.subr.mxu0 %v6672_v20  ;;  %v9373_v20 = vld [vmem:[#allocation69_spill] sm:$0xff] }
 0x7cf   :  { %2825 = vmatprep.subr.mxu1 %v7088_v19  ;;  %2994 = vmatpush1.msra.mxu0 %v6676_v54  ;;  %v9374_v54 = vld [vmem:[#allocation89_spill] sm:$0xff] }
 0x7d0   :  { %2826 = vmatpush1.msra.mxu1 %v7092_v38  ;;  %2995 = vmatprep.subr.mxu0 %v6680_v8  ;;  %v9375_v8 = vld [vmem:[#allocation70_spill] sm:$0xff] }
 0x7d1   :  { %2827 = vmatprep.subr.mxu1 %v9364_v32  ;;  %2996 = vmatpush1.msra.mxu0 %v6684_v60  ;;  %v9376_v60 = vld [vmem:[#allocation75_spill] sm:$0xff] }
 0x7d2   :  { %2828 = vmatpush1.msra.mxu1 %v9365_v39  ;;  %2997 = vmatprep.subr.mxu0 %v6688_v6  ;;  %v9377_v6 = vld [vmem:[#allocation71_spill] sm:$0xff] }
 0x7d3   :  { %2829 = vmatprep.subr.mxu1 %v9366_v48  ;;  %2998 = vmatpush1.msra.mxu0 %v6692_v14  ;;  %v9378_v14 = vld [vmem:[#allocation25_spill] sm:$0xff] }
 0x7d4   :  { %2830 = vmatpush1.msra.mxu1 %v9367_v2  ;;  %2999 = vmatprep.subr.mxu0 %v6696_v26  ;;  %v9379_v26 = vld [vmem:[#allocation72_spill] sm:$0xff] }
 0x7d5   :  { %2831 = vmatprep.subr.mxu1 %v9368_v17  ;;  %3000 = vmatpush1.msra.mxu0 %v6700_v50  ;;  %v9380_v50 = vld [vmem:[#allocation76_spill] sm:$0xff] }
 0x7d6   :  { %2832 = vmatpush1.msra.mxu1 %v9369_v28  ;;  %3001 = vmatprep.subr.mxu0 %v6704_v4  ;;  %v9381_v4 = vld [vmem:[#allocation73_spill] sm:$0xff] }
 0x7d7   :  { %2833 = vmatprep.subr.mxu1 %v9370_v15  ;;  %3002 = vmatpush1.msra.mxu0 %v6708_v22  ;;  %v9382_v22 = vld [vmem:[#allocation91_spill] sm:$0xff] }
 0x7d8   :  { %2834 = vmatpush1.msra.mxu1 %v9371_v13  ;;  %3003 = vmatprep.subr.mxu0 %v6712_v62  ;;  %v9383_v62 = vld [vmem:[#allocation74_spill] sm:$0xff] }
 0x7d9   :  { %2835 = vmatprep.subr.mxu1 %v9372_v24  ;;  %3004 = vmatpush1.msra.mxu0 %v6716_v1  ;;  %v9384_v1 = vld [vmem:[#allocation77_spill] sm:$0xff] }
 0x7da   :  { %2836 = vmatpush1.msra.mxu1 %v9373_v20  ;;  %3005 = vmatprep.subr.mxu0 %v9374_v54  ;;  %v9402_v54 = vld [vmem:[#allocation28_spill] sm:$0xff] }
 0x7db   :  { %2837 = vmatprep.subr.mxu1 %v9375_v8  ;;  %3006 = vmatpush1.msra.mxu0 %v9376_v60  ;;  %v9403_v60 = vld [vmem:[#allocation102_spill] sm:$0xff] }
 0x7dc   :  { %2838 = vmatpush1.msra.mxu1 %v9377_v6  ;;  %3007 = vmatprep.subr.mxu0 %v9378_v14  ;;  %v9404_v14 = vld [vmem:[#allocation82_spill] sm:$0xff] }
 0x7dd   :  { %2839 = vmatprep.subr.mxu1 %v9379_v26  ;;  %3008 = vmatpush1.msra.mxu0 %v9380_v50  ;;  %v9405_v50 = vld [vmem:[#allocation104_spill] sm:$0xff] }
 0x7de   :  { %2840 = vmatpush2.msra.mxu1 %v9381_v4  ;;  %3009 = vmatprep.subr.mxu0 %v9382_v22  ;;  %v9406_v22 = vld [vmem:[#allocation97_spill] sm:$0xff] }
 0x7df   :  { %2841 = vmatprep.subr.mxu1 %v9383_v62  ;;  %3010 = vmatpush2.msra.mxu0 %v9384_v1  ;;  %v9407_v1 = vld [vmem:[#allocation106_spill] sm:$0xff] }
 0x7e0   :  { %2842 = vmatpush2.msra.mxu1 %v9385_v41  ;;  %3011 = vmatprep.subr.mxu0 %v9386_v52  ;;  %v9408_v52 = vld [vmem:[#allocation83_spill] sm:$0xff] }
 0x7e1   :  { %2843 = vmatprep.subr.mxu1 %v9387_v43  ;;  %3012 = vmatpush2.msra.mxu0 %v9388_v18  ;;  %v9409_v18 = vld [vmem:[#allocation108_spill] sm:$0xff] }
 0x7e2   :  { %2844 = vmatpush2.msra.mxu1 %v9389_v44  ;;  %3013 = vmatprep.subr.mxu0 %v9390_v10  ;;  %v9410_v10 = vld [vmem:[#allocation29_spill] sm:$0xff] }
 0x7e3   :  { %2845 = vmatprep.subr.mxu1 %v9391_v51  ;;  %3014 = vmatpush2.msra.mxu0 %v9392_v11  ;;  %v9411_v11 = vld [vmem:[#allocation110_spill] sm:$0xff] }
 0x7e4   :  { %2846 = vmatpush2.msra.mxu1 %v9393_v47  ;;  %3015 = vmatprep.subr.mxu0 %v9394_v29  ;;  %v9412_v29 = vld [vmem:[#allocation84_spill] sm:$0xff] }
 0x7e5   :  { %2847 = vmatprep.subr.mxu1 %v9395_v12  ;;  %3016 = vmatpush2.msra.mxu0 %v9396_v59  ;;  %v9413_v59 = vld [vmem:[#allocation112_spill] sm:$0xff] }
 0x7e6   :  { %2848 = vmatpush2.msra.mxu1 %v9397_v3  ;;  %3017 = vmatprep.subr.mxu0 %v9398_v46  ;;  %v9414_v46 = vld [vmem:[#allocation99_spill] sm:$0xff] }
 0x7e7   :  { %2849 = vmatprep.subr.mxu1 %v9399_v58  ;;  %3018 = vmatpush2.msra.mxu0 %v9400_v42  ;;  %v9415_v42 = vld [vmem:[#allocation114_spill] sm:$0xff] }
 0x7e8   :  { %2850 = vmatpush2.msra.mxu1 %v9401_v61  ;;  %3019 = vmatprep.subr.mxu0 %v9402_v54  ;;  %v9416_v54 = vld [vmem:[#allocation30_spill] sm:$0xff] }
 0x7e9   :  { %2851 = vmatprep.subr.mxu1 %v9403_v60  ;;  %3020 = vmatpush2.msra.mxu0 %v9404_v14  ;;  %v9417_v14 = vld [vmem:[#allocation116_spill] sm:$0xff] }
 0x7ea   :  { %2852 = vmatpush2.msra.mxu1 %v9405_v50  ;;  %3021 = vmatprep.subr.mxu0 %v9406_v22  ;;  %v9418_v22 = vld [vmem:[#allocation101_spill] sm:$0xff] }
 0x7eb   :  { %2853 = vmatprep.subr.mxu1 %v9407_v1  ;;  %3022 = vmatpush2.msra.mxu0 %v9408_v52  ;;  %v9419_v52 = vld [vmem:[#allocation118_spill] sm:$0xff]  ;;  %v2880_v1 = vld [vmem:[#allocation2 + $0x6] ss:$8 sm:$0x30] }
 0x7ec   :  { %2854 = vmatpush2.msra.mxu1 %v9409_v18  ;;  %3023 = vmatprep.subr.mxu0 %v9410_v10  ;;  %v9420_v18 = vld [vmem:[#allocation31_spill] sm:$0xff]  ;;  %v9421_v10 = vld [vmem:[#allocation120_spill] sm:$0xff] }
 0x7ed   :  { %2855 = vmatprep.subr.mxu1 %v9411_v11  ;;  %3024 = vmatpush2.msra.mxu0 %v9412_v29  ;;  %v9422_v11 = vld [vmem:[#allocation103_spill] sm:$0xff]  ;;  %v9423_v29 = vld [vmem:[#allocation122_spill] sm:$0xff] }
 0x7ee   :  { %2856 = vmatpush2.msra.mxu1 %v9413_v59  ;;  %3025 = vmatprep.subr.mxu0 %v9414_v46  ;;  %v9424_v59 = vld [vmem:[#allocation32_spill] sm:$0xff] }
 0x7ef   :  { %2857 = vmatprep.subr.mxu1 %v9415_v42  ;;  %3026 = vmatpush2.msra.mxu0 %v9416_v54  ;;  %v9425_v46 = vld [vmem:[#allocation124_spill] sm:$0xff]  ;;  %v9426_v42 = vld [vmem:[#allocation105_spill] sm:$0xff]  ;;  %v9427_v54 = vld [vmem:[#allocation126_spill] sm:$0xff] }
 0x7f0   :  { %2858 = vmatpush2.msra.mxu1 %v9417_v14  ;;  %3027 = vmatprep.subr.mxu0 %v9418_v22  ;;  %v9428_v14 = vld [vmem:[#allocation33_spill] sm:$0xff]  ;;  %v9429_v22 = vld [vmem:[#allocation128_spill] sm:$0xff] }
 0x7f1   :  { %2859 = vmatprep.subr.mxu1 %v9419_v52  ;;  %3028 = vmatpush2.msra.mxu0 %v9420_v18  ;;  %v9430_v52 = vld [vmem:[#allocation107_spill] sm:$0xff]  ;;  %v9431_v18 = vld [vmem:[#allocation130_spill] sm:$0xff] }
 0x7f2   :  { %2860 = vmatpush2.msra.mxu1 %v9421_v10  ;;  %3029 = vmatprep.subr.mxu0 %v9422_v11  ;;  %v9432_v10 = vld [vmem:[#allocation34_spill] sm:$0xff]  ;;  %v9433_v11 = vld [vmem:[#allocation132_spill] sm:$0xff] }
 0x7f3   :  { %2861 = vmatprep.subr.mxu1 %v9423_v29  ;;  %3030 = vmatpush2.msra.mxu0 %v9424_v59  ;;  %v9434_v29 = vld [vmem:[#allocation109_spill] sm:$0xff]  ;;  %v9435_v59 = vld [vmem:[#allocation134_spill] sm:$0xff] }
 0x7f4   :  { %2862 = vmatpush2.msra.mxu1 %v9425_v46  ;;  %3031 = vmatprep.subr.mxu0 %v9426_v42  ;;  %v9436_v46 = vld [vmem:[#allocation35_spill] sm:$0xff]  ;;  %v9437_v42 = vld [vmem:[#allocation136_spill] sm:$0xff] }
 0x7f5   :  { %2863 = vmatprep.subr.mxu1 %v9427_v54  ;;  %3032 = vmatpush2.msra.mxu0 %v9428_v14  ;;  %v9438_v54 = vld [vmem:[#allocation111_spill] sm:$0xff]  ;;  %v9439_v14 = vld [vmem:[#allocation138_spill] sm:$0xff] }
 0x7f6   :  { %2864 = vmatpush2.msra.mxu1 %v9429_v22  ;;  %3033 = vmatprep.subr.mxu0 %v9430_v52  ;;  %v9440_v22 = vld [vmem:[#allocation36_spill] sm:$0xff] }
 0x7f7   :  { %2865 = vmatprep.subr.mxu1 %v9431_v18  ;;  %3034 = vmatpush2.msra.mxu0 %v9432_v10  ;;  %v9441_v52 = vld [vmem:[#allocation140_spill] sm:$0xff]  ;;  %v9442_v18 = vld [vmem:[#allocation113_spill] sm:$0xff] }
 0x7f8   :  { %2866 = vmatpush2.msra.mxu1 %v9433_v11  ;;  %3035 = vmatprep.subr.mxu0 %v9434_v29  ;;  %v9443_v10 = vld [vmem:[#allocation37_spill] sm:$0xff]  ;;  %v9444_v29 = vld [vmem:[#allocation115_spill] sm:$0xff] }
 0x7f9   :  { %2867 = vmatprep.subr.mxu1 %v9435_v59  ;;  %3036 = vmatpush2.msra.mxu0 %v9436_v46  ;;  %v9445_v59 = vld [vmem:[#allocation38_spill] sm:$0xff]  ;;  %v9446_v46 = vld [vmem:[#allocation117_spill] sm:$0xff] }
 0x7fa   :  { %2868 = vmatpush2.msra.mxu1 %v9437_v42  ;;  %3037 = vmatprep.subr.mxu0 %v9438_v54  ;;  %v9447_v42 = vld [vmem:[#allocation39_spill] sm:$0xff] }
 0x7fb   :  { %2869 = vmatprep.subr.mxu1 %v9439_v14  ;;  %3038 = vmatpush2.msra.mxu0 %v9440_v22  ;;  %v9448_v54 = vld [vmem:[#allocation119_spill] sm:$0xff]  ;;  %v9449_v14 = vld [vmem:[#allocation40_spill] sm:$0xff]  ;;  %v9450_v22 = vld [vmem:[#allocation121_spill] sm:$0xff] }
 0x7fc   :  { %2870 = vmatpush2.msra.mxu1 %v9441_v52  ;;  %3039 = vmatprep.subr.mxu0 %v9442_v18  ;;  %v9451_v52 = vld [vmem:[#allocation41_spill] sm:$0xff]  ;;  %v9452_v18 = vld [vmem:[#allocation123_spill] sm:$0xff] }
 0x7fd   :  { %2872 = vmatmul.mubr.f32.vlgmr.msra.gmra.mxu1 %v7413_v9  ;;  %3048 = vmatprep.subr.mxu1 %v9443_v10  ;;  %v9453_v9 = vld [vmem:[#allocation42_spill] sm:$0xff]  ;;  %v9454_v10 = vld [vmem:[#allocation125_spill] sm:$0xff] }
 0x7fe   :  { %3049 = vmatpush1.msra.mxu1 %v9444_v29  ;;  %3040 = vmatpush2.msra.mxu0 %v9445_v59  ;;  %v9455_v29 = vld [vmem:[#allocation43_spill] sm:$0xff] }
 0x7ff   :  { %3050 = vmatprep.subr.mxu1 %v9446_v46  ;;  %3119 = vmatprep.subr.mxu0 %v9447_v42  ;;  %v9456_v59 = vld [vmem:[#allocation127_spill] sm:$0xff]  ;;  %v9457_v46 = vld [vmem:[#allocation44_spill] sm:$0xff]  ;;  %v9458_v42 = vld [vmem:[#allocation129_spill] sm:$0xff] }
 0x800   :  { %3051 = vmatpush1.msra.mxu1 %v9448_v54  ;;  %v9459_v54 = vld [vmem:[#allocation45_spill] sm:$0xff] }
 0x801   :  { %3052 = vmatprep.subr.mxu1 %v9449_v14  ;;  %v9460_v14 = vld [vmem:[#allocation131_spill] sm:$0xff] }
 0x802   :  { %3053 = vmatpush1.msra.mxu1 %v9450_v22  ;;  %v9461_v22 = vld [vmem:[#allocation46_spill] sm:$0xff] }
 0x803   :  { %3054 = vmatprep.subr.mxu1 %v9451_v52  ;;  %v9462_v52 = vld [vmem:[#allocation133_spill] sm:$0xff] }
 0x804   :  { %3055 = vmatpush1.msra.mxu1 %v9452_v18  ;;  %v9463_v18 = vld [vmem:[#allocation47_spill] sm:$0xff] }
 0x805   :  { %3056 = vmatprep.subr.mxu1 %v9453_v9  ;;  %v9464_v9 = vld [vmem:[#allocation135_spill] sm:$0xff] }
 0x806   :  { %3057 = vmatpush1.msra.mxu1 %v9454_v10  ;;  %v9465_v10 = vld [vmem:[#allocation48_spill] sm:$0xff] }
 0x807   :  { %3058 = vmatprep.subr.mxu1 %v9455_v29  ;;  %v9466_v29 = vld [vmem:[#allocation137_spill] sm:$0xff] }
 0x808   :  { %3059 = vmatpush1.msra.mxu1 %v9456_v59  ;;  %v9467_v59 = vld [vmem:[#allocation49_spill] sm:$0xff] }
 0x809   :  { %3060 = vmatprep.subr.mxu1 %v9457_v46  ;;  %v9468_v46 = vld [vmem:[#allocation139_spill] sm:$0xff] }
 0x80a   :  { %3061 = vmatpush1.msra.mxu1 %v9458_v42  ;;  %v9469_v42 = vld [vmem:[#allocation50_spill] sm:$0xff] }
 0x80b   :  { %3062 = vmatprep.subr.mxu1 %v9459_v54  ;;  %v9470_v54 = vld [vmem:[#allocation141_spill] sm:$0xff] }
 0x80c   :  { %3063 = vmatpush1.msra.mxu1 %v9460_v14  ;;  %v9471_v14 = vld [vmem:[#allocation51_spill] sm:$0xff] }
 0x80d   :  { %3064 = vmatprep.subr.mxu1 %v9461_v22  ;;  %v9472_v22 = vld [vmem:[#allocation52_spill] sm:$0xff] }
 0x80e   :  { %3065 = vmatpush1.msra.mxu1 %v9462_v52  ;;  %v9473_v52 = vld [vmem:[#allocation53_spill] sm:$0xff] }
 0x80f   :  { %3066 = vmatprep.subr.mxu1 %v9463_v18  ;;  %v9474_v18 = vld [vmem:[#allocation54_spill] sm:$0xff] }
 0x810   :  { %3067 = vmatpush1.msra.mxu1 %v9464_v9  ;;  %v9475_v9 = vld [vmem:[#allocation55_spill] sm:$0xff] }
 0x811   :  { %3068 = vmatprep.subr.mxu1 %v9465_v10  ;;  %v9476_v10 = vld [vmem:[#allocation56_spill] sm:$0xff] }
 0x812   :  { %3069 = vmatpush1.msra.mxu1 %v9466_v29  ;;  %v9477_v29 = vld [vmem:[#allocation57_spill] sm:$0xff] }
 0x813   :  { %3070 = vmatprep.subr.mxu1 %v9467_v59  ;;  %v9478_v59 = vld [vmem:[#allocation58_spill] sm:$0xff] }
 0x814   :  { %3071 = vmatpush1.msra.mxu1 %v9468_v46  ;;  %v9479_v46 = vld [vmem:[#allocation59_spill] sm:$0xff] }
 0x815   :  { %3072 = vmatprep.subr.mxu1 %v9469_v42  ;;  %v9480_v42 = vld [vmem:[#allocation142_spill] sm:$0xff] }
 0x816   :  { %3073 = vmatpush1.msra.mxu1 %v9470_v54  ;;  %v9481_v54 = vld [vmem:[#allocation143_spill] sm:$0xff] }
 0x817   :  { %3074 = vmatprep.subr.mxu1 %v9471_v14  ;;  %v9482_v14 = vld [vmem:[#allocation144_spill] sm:$0xff] }
 0x818   :  { %3075 = vmatpush1.msra.mxu1 %v9472_v22  ;;  %v9483_v22 = vld [vmem:[#allocation145_spill] sm:$0xff] }
 0x819   :  { %3076 = vmatprep.subr.mxu1 %v9473_v52  ;;  %v9484_v52 = vld [vmem:[#allocation146_spill] sm:$0xff] }
 0x81a   :  { %3077 = vmatpush1.msra.mxu1 %v9474_v18  ;;  %v9485_v18 = vld [vmem:[#allocation147_spill] sm:$0xff] }
 0x81b   :  { %3078 = vmatprep.subr.mxu1 %v9475_v9  ;;  %v9486_v9 = vld [vmem:[#allocation148_spill] sm:$0xff] }
 0x81c   :  { %3079 = vmatpush1.msra.mxu1 %v9476_v10  ;;  %v9487_v10 = vld [vmem:[#allocation23_spill] sm:$0xff] }
 0x81d   :  { %3080 = vmatprep.subr.mxu1 %v9477_v29  ;;  %v9488_v29 = vld [vmem:[#allocation87_spill] sm:$0xff] }
 0x81e   :  { %3081 = vmatpush2.msra.mxu1 %v9478_v59  ;;  %v9489_v59 = vld [vmem:[#allocation24_spill] sm:$0xff] }
 0x81f   :  { %3082 = vmatprep.subr.mxu1 %v9479_v46  ;;  %v9490_v46 = vld [vmem:[#allocation149_spill] sm:$0xff] }
 0x820   :  { %3083 = vmatpush2.msra.mxu1 %v9480_v42  ;;  %v9491_v42 = vld [vmem:[#allocation150_spill] sm:$0xff] }
 0x821   :  { %3084 = vmatprep.subr.mxu1 %v9481_v54  ;;  %v9492_v54 = vld [vmem:[#allocation151_spill] sm:$0xff] }
 0x822   :  { %3085 = vmatpush2.msra.mxu1 %v9482_v14  ;;  %v9493_v14 = vld [vmem:[#allocation152_spill] sm:$0xff] }
 0x823   :  { %3086 = vmatprep.subr.mxu1 %v9483_v22  ;;  %v9494_v22 = vld [vmem:[#allocation153_spill] sm:$0xff] }
 0x824   :  { %3087 = vmatpush2.msra.mxu1 %v9484_v52  ;;  %v9495_v52 = vld [vmem:[#allocation154_spill] sm:$0xff] }
 0x825   :  { %3088 = vmatprep.subr.mxu1 %v9485_v18  ;;  %v9496_v18 = vld [vmem:[#allocation155_spill] sm:$0xff] }
 0x826   :  { %3089 = vmatpush2.msra.mxu1 %v9486_v9  ;;  %v9497_v9 = vld [vmem:[#allocation156_spill] sm:$0xff] }
 0x827   :  { %3090 = vmatprep.subr.mxu1 %v9487_v10  ;;  %v9498_v10 = vld [vmem:[#allocation157_spill] sm:$0xff] }
 0x828   :  { %3091 = vmatpush2.msra.mxu1 %v9488_v29  ;;  %v9499_v29 = vld [vmem:[#allocation158_spill] sm:$0xff] }
 0x829   :  { %3092 = vmatprep.subr.mxu1 %v9489_v59  ;;  %v9500_v59 = vld [vmem:[#allocation159_spill] sm:$0xff] }
 0x82a   :  { %3093 = vmatpush2.msra.mxu1 %v9490_v46  ;;  %v9501_v46 = vld [vmem:[#allocation160_spill] sm:$0xff] }
 0x82b   :  { %3094 = vmatprep.subr.mxu1 %v9491_v42  ;;  %v9502_v42 = vld [vmem:[#allocation161_spill] sm:$0xff] }
 0x82c   :  { %3095 = vmatpush2.msra.mxu1 %v9492_v54  ;;  %v9503_v54 = vld [vmem:[#allocation162_spill] sm:$0xff] }
 0x82d   :  { %3096 = vmatprep.subr.mxu1 %v9493_v14  ;;  %v9504_v14 = vld [vmem:[#allocation163_spill] sm:$0xff] }
 0x82e   :  { %3097 = vmatpush2.msra.mxu1 %v9494_v22  ;;  %v9505_v22 = vld [vmem:[#allocation164_spill] sm:$0xff] }
 0x82f   :  { %3098 = vmatprep.subr.mxu1 %v9495_v52  ;;  %v9506_v52 = vld [vmem:[#allocation165_spill] sm:$0xff] }
 0x830   :  { %3099 = vmatpush2.msra.mxu1 %v9496_v18  ;;  %v9507_v18 = vld [vmem:[#allocation166_spill] sm:$0xff] }
 0x831   :  { %3100 = vmatprep.subr.mxu1 %v9497_v9  ;;  %v9508_v9 = vld [vmem:[#allocation167_spill] sm:$0xff] }
 0x832   :  { %3101 = vmatpush2.msra.mxu1 %v9498_v10 }
 0x833   :  { %3102 = vmatprep.subr.mxu1 %v9499_v29 }
 0x834   :  { %3103 = vmatpush2.msra.mxu1 %v9500_v59 }
 0x835   :  { %3104 = vmatprep.subr.mxu1 %v9501_v46 }
 0x836   :  { %3105 = vmatpush2.msra.mxu1 %v9502_v42 }
 0x837   :  { %3106 = vmatprep.subr.mxu1 %v9503_v54  ;;  %v2879_v54 = vld [vmem:[#allocation2 + $0x6] ss:$8 sm:$0xf] }
 0x838   :  { %3107 = vmatpush2.msra.mxu1 %v9504_v14  ;;  %v2881_v50 = vor.u32 %v2880_v1, %v2879_v54 }
 0x839   :  { %3108 = vmatprep.subr.mxu1 %v9505_v22 }
 0x83a   :  { %3109 = vmatpush2.msra.mxu1 %v9506_v52 }
 0x83b   :  { %3110 = vmatprep.subr.mxu1 %v9507_v18 }
 0x83c   :  { %3111 = vmatpush2.msra.mxu1 %v9508_v9  ;;  %v2908_v9 = vrot.slane %v2881_v50, 2 }
 0x87d   :  { %v2731_v10 = vpop.f32.mrf.mxu1  ;;  %v2802_v46 = vpop.f32.mrf.mxu0 }
 0x87f   :  { %v2733_v29 = vpop.f32.mrf.mxu1  ;;  %v2804_v14 = vpop.f32.mrf.mxu0 }
 0x880   :  { %v2884_v11 = vcombine.low %v2731_v10, %v2733_v29  ;;  %v2912_v22 = vcombine.low %v2802_v46, %v2804_v14 }
 0x882   :  { %v2891_v59 = vrot.slane %v2884_v11, %v5569_v56  ;;  %v2919_v52 = vrot.slane %v2912_v22, %v5569_v56 }
 0x884   :  { %v2898_v42 = vrot.slane %v2891_v59, %v5569_v56  ;;  %v2926_v18 = vrot.slane %v2919_v52, %v5569_v56  ;;  %v2956_v52 = vrot.slane %v2881_v50, 4 }
 0x886   :  { %v2900_v60 = vadd.f32 %v2898_v42, %v2881_v50  ;;  %v2928_v58 = vadd.f32 %v2926_v18, %v2908_v9  ;;  %v3308_v50 = vld [vmem:[#allocation11 + $0xb0] sm:$0xff] }
 0x888   :  { %v3931_v61 = vmul.f32 -1.442695, %v2900_v60  ;;  %v3932_v10 = vmul.f32 -1.442695, %v2928_v58 }
 0x88a   :  { %4124 = vpow2.f32 %v3931_v61 }
 0x88b   :  { %4126 = vpow2.f32 %v3932_v10 }
 0x897   :  { %v4125_v29 = vpop.eup %4124 }
 0x898   :  { %v2904_v11 = vadd.f32 1.0, %v4125_v29  ;;  %v4127_v46 = vpop.eup %4126 }
 0x899   :  { %v2932_v54 = vadd.f32 1.0, %v4127_v46  ;;  %v3292_v46 = vld [vmem:[#allocation11 + $0x30] sm:$0xff] }
 0x89a   :  { %4128 = vrcp.f32 %v2904_v11 }
 0x89b   :  { %4130 = vrcp.f32 %v2932_v54  ;;  %v3291_v54 = vld [vmem:[#allocation11 + $0x28] sm:$0xff] }
 0x8a7   :  { %v4129_v22 = vpop.eup %4128 }
 0x8a8   :  { %v4131_v9 = vpop.eup %4130 }
 0x8a9   :  { %v2960_v10 = vsub.f32 1.0, %v4131_v9 }
 0x8bd   :  { %v2873_v3 = vpop.f32.mrf.mxu1 }
 0x8be   :  { %v2935_v1 = vadd.f32 %v2873_v3, %v5577_v27  ;;  %v2962_v3 = vmul.f32 %v4131_v9, %v7406_v53  ;;  %v9528_v53 = vld [vmem:[#allocation134_spill] sm:$0xff]  ;;  %v3303_v9 = vld [vmem:[#allocation11 + $0x88] sm:$0xff] }
 0x8bf   :  { %v2875_v59 = vpop.f32.mrf.mxu1 }
 0x8c0   :  { %v2936_v42 = vadd.f32 %v2875_v59, %v5580_v35 }
 0x8c2   :  { %v2939_v60 = vcombine.low %v2935_v1, %v2936_v42 }
 0x8c4   :  { %v2946_v61 = vrot.slane %v2939_v60, %v5569_v56  ;;  %v3307_v60 = vld [vmem:[#allocation11 + $0xa8] sm:$0xff] }
 0x8c6   :  { %v2953_v14 = vrot.slane %v2946_v61, %v5569_v56  ;;  %v3306_v61 = vld [vmem:[#allocation11 + $0xa0] sm:$0xff] }
 0x8c8   :  { %v2955_v58 = vmul.f32 %v4129_v22, %v2953_v14  ;;  %v3290_v14 = vld [vmem:[#allocation11 + $0x20] sm:$0xff]  ;;  %v3305_v22 = vld [vmem:[#allocation11 + $0x98] sm:$0xff] }
 0x8ca   :  { %v2958_v18 = vadd.f32 %v2956_v52, %v2955_v58  ;;  %v3289_v58 = vld [vmem:[#allocation11 + $0x18] sm:$0xff]  ;;  %v3304_v52 = vld [vmem:[#allocation11 + $0x90] sm:$0xff] }
 0x8cc   :  { %4132 = vtanh.f32 %v2958_v18  ;;  %v3288_v18 = vld [vmem:[#allocation11 + $0x10] sm:$0xff] }
 0x8d9   :  { %v4133_v29 = vpop.eup %4132 }
 0x8da   :  { %v2961_v11 = vmul.f32 %v4133_v29, %v2960_v10  ;;  %v3287_v10 = vld [vmem:[#allocation11 + $0x8] sm:$0xff]  ;;  %v3302_v29 = vld [vmem:[#allocation11 + $0x80] sm:$0xff] }
 0x8dc   :  { %v7612_v59 = vadd.f32 %v2962_v3, %v2961_v11  ;;  %v3286_v11 = vld [vmem:[#allocation11] sm:$0xff] }
 0x8de   :  { %2964 = vst [vmem:[#allocation3 + $0x6] sm:$0x1] %v7612_v59  ;;  %v2969_v1 = vrot.slane %v7612_v59, %v5539_v23  ;;  %v7619_v42 = vrot.slane %v7612_v59, %v5528_v16 }
 0x8e0   :  { %2971 = vst [vmem:[#allocation3 + $0x9] sm:$0x1] %v2969_v1  ;;  %3041 = vmatprep.mubr.f32.mxu0 %v2969_v1  ;;  %3112 = vmatprep.mubr.f32.mxu1 %v2969_v1 }
 0x8e1   :  { %3042 = vmatmul.mubr.f32.vlgmr.msra.gmra.mxu0 %v7619_v42  ;;  %3113 = vmatmul.mubr.f32.vlgmr.msra.gmra.mxu1 %v7619_v42 }
 0x8e2   :  { %3120 = vmatpush1.msra.mxu0 %v7021_v36  ;;  %3183 = vmatprep.mubr.f32.mxu0 %v2969_v1  ;;  %v9509_v36 = vld [vmem:[#allocation96_spill] sm:$0xff] }
 0x8e3   :  { %3121 = vmatprep.subr.mxu0 %v7024_v63  ;;  %v9510_v63 = vld [vmem:[#allocation98_spill] sm:$0xff] }
 0x8e4   :  { %3122 = vmatpush1.msra.mxu0 %v7028_v31  ;;  %v9511_v31 = vld [vmem:[#allocation100_spill] sm:$0xff] }
 0x8e5   :  { %3123 = vmatprep.subr.mxu0 %v7032_v0  ;;  %v9512_v0 = vld [vmem:[#allocation102_spill] sm:$0xff] }
 0x8e6   :  { %3124 = vmatpush1.msra.mxu0 %v7036_v25  ;;  %v9513_v25 = vld [vmem:[#allocation104_spill] sm:$0xff] }
 0x8e7   :  { %3125 = vmatprep.subr.mxu0 %v7040_v40  ;;  %v9514_v40 = vld [vmem:[#allocation106_spill] sm:$0xff] }
 0x8e8   :  { %3126 = vmatpush1.msra.mxu0 %v7044_v37  ;;  %v9515_v37 = vld [vmem:[#allocation108_spill] sm:$0xff] }
 0x8e9   :  { %3127 = vmatprep.subr.mxu0 %v7048_v7  ;;  %v9516_v7 = vld [vmem:[#allocation110_spill] sm:$0xff] }
 0x8ea   :  { %3128 = vmatpush1.msra.mxu0 %v7052_v34  ;;  %v9517_v34 = vld [vmem:[#allocation112_spill] sm:$0xff] }
 0x8eb   :  { %3129 = vmatprep.subr.mxu0 %v7056_v55  ;;  %v9518_v55 = vld [vmem:[#allocation114_spill] sm:$0xff] }
 0x8ec   :  { %3130 = vmatpush1.msra.mxu0 %v7060_v49  ;;  %v9519_v49 = vld [vmem:[#allocation116_spill] sm:$0xff] }
 0x8ed   :  { %3131 = vmatprep.subr.mxu0 %v7064_v30  ;;  %v9520_v30 = vld [vmem:[#allocation118_spill] sm:$0xff] }
 0x8ee   :  { %3132 = vmatpush1.msra.mxu0 %v7068_v21  ;;  %v9521_v21 = vld [vmem:[#allocation120_spill] sm:$0xff] }
 0x8ef   :  { %3133 = vmatprep.subr.mxu0 %v7072_v45  ;;  %v9522_v45 = vld [vmem:[#allocation122_spill] sm:$0xff] }
 0x8f0   :  { %3134 = vmatpush1.msra.mxu0 %v7076_v57  ;;  %v9523_v57 = vld [vmem:[#allocation124_spill] sm:$0xff] }
 0x8f1   :  { %3135 = vmatprep.subr.mxu0 %v7080_v5  ;;  %v9524_v5 = vld [vmem:[#allocation126_spill] sm:$0xff] }
 0x8f2   :  { %3136 = vmatpush1.msra.mxu0 %v7084_v33  ;;  %v9525_v33 = vld [vmem:[#allocation128_spill] sm:$0xff] }
 0x8f3   :  { %3137 = vmatprep.subr.mxu0 %v7088_v19  ;;  %v9526_v19 = vld [vmem:[#allocation130_spill] sm:$0xff] }
 0x8f4   :  { %3138 = vmatpush1.msra.mxu0 %v7092_v38  ;;  %v9527_v38 = vld [vmem:[#allocation132_spill] sm:$0xff] }
 0x8f5   :  { %3139 = vmatprep.subr.mxu0 %v9364_v32  ;;  %v9529_v32 = vld [vmem:[#allocation136_spill] sm:$0xff] }
 0x8f6   :  { %3140 = vmatpush1.msra.mxu0 %v9365_v39  ;;  %v9530_v39 = vld [vmem:[#allocation138_spill] sm:$0xff] }
 0x8f7   :  { %3141 = vmatprep.subr.mxu0 %v9366_v48  ;;  %v9531_v48 = vld [vmem:[#allocation140_spill] sm:$0xff] }
 0x8f8   :  { %3142 = vmatpush1.msra.mxu0 %v9367_v2  ;;  %v3317_v2 = vld [vmem:[#allocation11 + $0xf8] sm:$0xff] }
 0x8f9   :  { %3143 = vmatprep.subr.mxu0 %v9368_v17  ;;  %3940 = vmatprep.subr.mxu1 %v3317_v2  ;;  %v3301_v17 = vld [vmem:[#allocation11 + $0x78] sm:$0xff] }
 0x8fa   :  { %3144 = vmatpush1.msra.mxu0 %v9369_v28  ;;  %3941 = vmatpush3.msra.mxu1 %v3301_v17  ;;  %v3316_v28 = vld [vmem:[#allocation11 + $0xf0] sm:$0xff] }
 0x8fb   :  { %3145 = vmatprep.subr.mxu0 %v9370_v15  ;;  %3942 = vmatprep.subr.mxu1 %v3316_v28  ;;  %v3300_v15 = vld [vmem:[#allocation11 + $0x70] sm:$0xff] }
 0x8fc   :  { %3146 = vmatpush1.msra.mxu0 %v9371_v13  ;;  %3943 = vmatpush3.msra.mxu1 %v3300_v15  ;;  %v3315_v13 = vld [vmem:[#allocation11 + $0xe8] sm:$0xff] }
 0x8fd   :  { %3147 = vmatprep.subr.mxu0 %v9372_v24  ;;  %3944 = vmatprep.subr.mxu1 %v3315_v13  ;;  %v3299_v24 = vld [vmem:[#allocation11 + $0x68] sm:$0xff] }
 0x8fe   :  { %3148 = vmatpush1.msra.mxu0 %v9373_v20  ;;  %3945 = vmatpush3.msra.mxu1 %v3299_v24  ;;  %v3314_v20 = vld [vmem:[#allocation11 + $0xe0] sm:$0xff] }
 0x8ff   :  { %3149 = vmatprep.subr.mxu0 %v9375_v8  ;;  %3946 = vmatprep.subr.mxu1 %v3314_v20  ;;  %v3298_v8 = vld [vmem:[#allocation11 + $0x60] sm:$0xff] }
 0x900   :  { %3150 = vmatpush1.msra.mxu0 %v9377_v6  ;;  %3947 = vmatpush3.msra.mxu1 %v3298_v8  ;;  %v3313_v6 = vld [vmem:[#allocation11 + $0xd8] sm:$0xff] }
 0x901   :  { %3151 = vmatprep.subr.mxu0 %v9379_v26  ;;  %3948 = vmatprep.subr.mxu1 %v3313_v6  ;;  %v3297_v26 = vld [vmem:[#allocation11 + $0x58] sm:$0xff] }
 0x902   :  { %3152 = vmatpush2.msra.mxu0 %v9381_v4  ;;  %3949 = vmatpush3.msra.mxu1 %v3297_v26  ;;  %v3312_v4 = vld [vmem:[#allocation11 + $0xd0] sm:$0xff] }
 0x903   :  { %3153 = vmatprep.subr.mxu0 %v9383_v62  ;;  %3950 = vmatprep.subr.mxu1 %v3312_v4  ;;  %v3296_v62 = vld [vmem:[#allocation11 + $0x50] sm:$0xff] }
 0x904   :  { %3154 = vmatpush2.msra.mxu0 %v9385_v41  ;;  %3951 = vmatpush3.msra.mxu1 %v3296_v62  ;;  %v3311_v41 = vld [vmem:[#allocation11 + $0xc8] sm:$0xff] }
 0x905   :  { %3155 = vmatprep.subr.mxu0 %v9387_v43  ;;  %3952 = vmatprep.subr.mxu1 %v3311_v41  ;;  %v3295_v43 = vld [vmem:[#allocation11 + $0x48] sm:$0xff] }
 0x906   :  { %3156 = vmatpush2.msra.mxu0 %v9389_v44  ;;  %3953 = vmatpush3.msra.mxu1 %v3295_v43  ;;  %v3310_v44 = vld [vmem:[#allocation11 + $0xc0] sm:$0xff] }
 0x907   :  { %3157 = vmatprep.subr.mxu0 %v9391_v51  ;;  %3954 = vmatprep.subr.mxu1 %v3310_v44  ;;  %v3294_v51 = vld [vmem:[#allocation11 + $0x40] sm:$0xff] }
 0x908   :  { %3158 = vmatpush2.msra.mxu0 %v9393_v47  ;;  %3955 = vmatpush3.msra.mxu1 %v3294_v51  ;;  %v3309_v47 = vld [vmem:[#allocation11 + $0xb8] sm:$0xff] }
 0x909   :  { %3159 = vmatprep.subr.mxu0 %v9395_v12  ;;  %3956 = vmatprep.subr.mxu1 %v3309_v47  ;;  %v3293_v12 = vld [vmem:[#allocation11 + $0x38] sm:$0xff] }
 0x90a   :  { %3160 = vmatpush2.msra.mxu0 %v9509_v36  ;;  %3957 = vmatpush3.msra.mxu1 %v3293_v12 }
 0x90b   :  { %3161 = vmatprep.subr.mxu0 %v9510_v63  ;;  %3958 = vmatprep.subr.mxu1 %v3308_v50  ;;  %v3936_v50 = vld [vmem:[%s7775_s7] ss:$0 sm:$0xff] }
 0x90c   :  { %3162 = vmatpush2.msra.mxu0 %v9511_v31  ;;  %3959 = vmatpush3.msra.mxu1 %v3292_v46  ;;  %v3192_v31 = vld [vmem:[#allocation2 + $0x7] ss:$8 sm:$0x30] }
 0x90d   :  { %3163 = vmatprep.subr.mxu0 %v9512_v0  ;;  %3960 = vmatprep.subr.mxu1 %v3307_v60 }
 0x90e   :  { %3164 = vmatpush2.msra.mxu0 %v9513_v25  ;;  %3961 = vmatpush3.msra.mxu1 %v3291_v54  ;;  %v3191_v25 = vld [vmem:[#allocation2 + $0x7] ss:$8 sm:$0xf]  ;;  %v4709_v54 = vmov 0  }
 0x90f   :  { %3165 = vmatprep.subr.mxu0 %v9514_v40  ;;  %3962 = vmatprep.subr.mxu1 %v3306_v61  ;;  %v3193_v40 = vor.u32 %v3192_v31, %v3191_v25  ;;  %v3484_v61 = vld [vmem:[#allocation12 + $0xf8] sm:$0xff]  ;;  %v3469_v31 = vld [vmem:[#allocation12 + $0x80] sm:$0xff]  ;;  %v3467_v25 = vld [vmem:[#allocation12 + $0x70] sm:$0xff] }
 0x910   :  { %3166 = vmatpush2.msra.mxu0 %v9515_v37  ;;  %3963 = vmatpush3.msra.mxu1 %v3290_v14  ;;  %v3483_v14 = vld [vmem:[#allocation12 + $0xf0] sm:$0xff] }
 0x911   :  { %3167 = vmatprep.subr.mxu0 %v9516_v7  ;;  %3964 = vmatprep.subr.mxu1 %v3305_v22  ;;  %v3268_v24 = vrot.slane %v3193_v40, 4  ;;  %v3482_v22 = vld [vmem:[#allocation12 + $0xe8] sm:$0xff] }
 0x912   :  { %3168 = vmatpush2.msra.mxu0 %v9517_v34  ;;  %3965 = vmatpush3.msra.mxu1 %v3289_v58  ;;  %v3481_v58 = vld [vmem:[#allocation12 + $0xe0] sm:$0xff] }
 0x913   :  { %3169 = vmatprep.subr.mxu0 %v9518_v55  ;;  %3966 = vmatprep.subr.mxu1 %v3304_v52  ;;  %v3480_v52 = vld [vmem:[#allocation12 + $0xd8] sm:$0xff] }
 0x914   :  { %3170 = vmatpush2.msra.mxu0 %v9519_v49  ;;  %3967 = vmatpush3.msra.mxu1 %v3288_v18  ;;  %v3479_v18 = vld [vmem:[#allocation12 + $0xd0] sm:$0xff] }
 0x915   :  { %3171 = vmatprep.subr.mxu0 %v9520_v30  ;;  %3968 = vmatprep.subr.mxu1 %v3303_v9  ;;  %v3478_v9 = vld [vmem:[#allocation12 + $0xc8] sm:$0xff] }
 0x916   :  { %3172 = vmatpush2.msra.mxu0 %v9521_v21  ;;  %3969 = vmatpush3.msra.mxu1 %v3287_v10  ;;  %v3220_v21 = vrot.slane %v3193_v40, 2  ;;  %v3477_v10 = vld [vmem:[#allocation12 + $0xc0] sm:$0xff] }
 0x917   :  { %3173 = vmatprep.subr.mxu0 %v9522_v45  ;;  %3970 = vmatprep.subr.mxu1 %v3302_v29  ;;  %v3476_v29 = vld [vmem:[#allocation12 + $0xb8] sm:$0xff] }
 0x918   :  { %3174 = vmatpush2.msra.mxu0 %v9523_v57  ;;  %3971 = vmatpush3.msra.mxu1 %v3286_v11  ;;  %v3475_v11 = vld [vmem:[#allocation12 + $0xb0] sm:$0xff] }
 0x919   :  { %3175 = vmatprep.subr.mxu0 %v9524_v5  ;;  %4063 = vset.pattern.permute.xlu0 %v4709_v54 }
 0x91a   :  { %3176 = vmatpush2.msra.mxu0 %v9525_v33  ;;  %3529 = vmatprep.subr.mxu1 %v3484_v61 }
 0x91b   :  { %3177 = vmatprep.subr.mxu0 %v9526_v19 }
 0x91c   :  { %3178 = vmatpush2.msra.mxu0 %v9527_v38 }
 0x91d   :  { %3179 = vmatprep.subr.mxu0 %v9528_v53 }
 0x91e   :  { %3180 = vmatpush2.msra.mxu0 %v9529_v32 }
 0x91f   :  { %3181 = vmatprep.subr.mxu0 %v9530_v39 }
 0x920   :  { %3182 = vmatpush2.msra.mxu0 %v9531_v48 }
 0x921   :  { %3184 = vmatmul.mubr.f32.vlgmr.msra.gmra.mxu0 %v7619_v42 }
 0x9a1   :  { %v3043_v3 = vpop.f32.mrf.mxu0  ;;  %v3114_v63 = vpop.f32.mrf.mxu1 }
 0x9a3   :  { %v3045_v1 = vpop.f32.mrf.mxu0  ;;  %v3116_v37 = vpop.f32.mrf.mxu1 }
 0x9a4   :  { %v3196_v42 = vcombine.low %v3043_v3, %v3045_v1  ;;  %v3224_v34 = vcombine.low %v3114_v63, %v3116_v37  ;;  %v3474_v3 = vld [vmem:[#allocation12 + $0xa8] sm:$0xff]  ;;  %v3473_v1 = vld [vmem:[#allocation12 + $0xa0] sm:$0xff] }
 0x9a5   :  { %v3470_v63 = vld [vmem:[#allocation12 + $0x88] sm:$0xff]  ;;  %v3465_v37 = vld [vmem:[#allocation12 + $0x60] sm:$0xff] }
 0x9a6   :  { %v3203_v36 = vrot.slane %v3196_v42, %v5569_v56  ;;  %v3231_v49 = vrot.slane %v3224_v34, %v5569_v56  ;;  %v3472_v42 = vld [vmem:[#allocation12 + $0x98] sm:$0xff]  ;;  %v3463_v34 = vld [vmem:[#allocation12 + $0x50] sm:$0xff] }
 0x9a8   :  { %v3210_v0 = vrot.slane %v3203_v36, %v5569_v56  ;;  %v3238_v30 = vrot.slane %v3231_v49, %v5569_v56  ;;  %v3471_v36 = vld [vmem:[#allocation12 + $0x90] sm:$0xff]  ;;  %v3461_v49 = vld [vmem:[#allocation12 + $0x40] sm:$0xff] }
 0x9aa   :  { %v3212_v7 = vadd.f32 %v3210_v0, %v3193_v40  ;;  %v3240_v45 = vadd.f32 %v3238_v30, %v3220_v21  ;;  %v3468_v0 = vld [vmem:[#allocation12 + $0x78] sm:$0xff]  ;;  %v3466_v40 = vld [vmem:[#allocation12 + $0x68] sm:$0xff]  ;;  %v3459_v21 = vld [vmem:[#allocation12 + $0x30] sm:$0xff] }
 0x9ab   :  { %v3460_v30 = vld [vmem:[#allocation12 + $0x38] sm:$0xff] }
 0x9ac   :  { %v3933_v55 = vmul.f32 -1.442695, %v3212_v7  ;;  %v3934_v57 = vmul.f32 -1.442695, %v3240_v45  ;;  %v3464_v7 = vld [vmem:[#allocation12 + $0x58] sm:$0xff]  ;;  %v3458_v45 = vld [vmem:[#allocation12 + $0x28] sm:$0xff] }
 0x9ae   :  { %4134 = vpow2.f32 %v3933_v55  ;;  %v3462_v55 = vld [vmem:[#allocation12 + $0x48] sm:$0xff] }
 0x9af   :  { %4136 = vpow2.f32 %v3934_v57  ;;  %v3457_v57 = vld [vmem:[#allocation12 + $0x20] sm:$0xff] }
 0x9bb   :  { %v4135_v5 = vpop.eup %4134 }
 0x9bc   :  { %v3216_v33 = vadd.f32 1.0, %v4135_v5  ;;  %v4137_v39 = vpop.eup %4136  ;;  %v3456_v5 = vld [vmem:[#allocation12 + $0x18] sm:$0xff] }
 0x9bd   :  { %v3244_v2 = vadd.f32 1.0, %v4137_v39  ;;  %v3514_v39 = vld [vmem:[#allocation12 + $0x1e8] sm:$0xff] }
 0x9be   :  { %4138 = vrcp.f32 %v3216_v33  ;;  %v3455_v33 = vld [vmem:[#allocation12 + $0x10] sm:$0xff] }
 0x9bf   :  { %4140 = vrcp.f32 %v3244_v2  ;;  %v3512_v2 = vld [vmem:[#allocation12 + $0x1d8] sm:$0xff] }
 0x9cb   :  { %v4139_v15 = vpop.eup %4138 }
 0x9cc   :  { %v4141_v8 = vpop.eup %4140 }
 0x9cd   :  { %v3272_v6 = vsub.f32 1.0, %v4141_v8 }
 0x9e1   :  { %v3185_v19 = vpop.f32.mrf.mxu0 }
 0x9e2   :  { %v3247_v53 = vadd.f32 %v3185_v19, %v5577_v27  ;;  %v3274_v27 = vmul.f32 %v4141_v8, %v7612_v59  ;;  %v3935_v59 = vld [vmem:[%s7774_s6] ss:$0 sm:$0xff]  ;;  %v3454_v19 = vld [vmem:[#allocation12 + $0x8] sm:$0xff]  ;;  %v3505_v8 = vld [vmem:[#allocation12 + $0x1a0] sm:$0xff] }
 0x9e3   :  { %v3187_v38 = vpop.f32.mrf.mxu0 }
 0x9e4   :  { %v3248_v32 = vadd.f32 %v3187_v38, %v5580_v35  ;;  %v3453_v38 = vld [vmem:[#allocation12] sm:$0xff] }
 0x9e6   :  { %v3251_v48 = vcombine.low %v3247_v53, %v3248_v32  ;;  %v3516_v53 = vld [vmem:[#allocation12 + $0x1f8] sm:$0xff]  ;;  %v3515_v32 = vld [vmem:[#allocation12 + $0x1f0] sm:$0xff] }
 0x9e8   :  { %v3258_v17 = vrot.slane %v3251_v48, %v5569_v56  ;;  %v3513_v48 = vld [vmem:[#allocation12 + $0x1e0] sm:$0xff] }
 0x9ea   :  { %v3265_v28 = vrot.slane %v3258_v17, %v5569_v56  ;;  %v3511_v17 = vld [vmem:[#allocation12 + $0x1d0] sm:$0xff] }
 0x9ec   :  { %v3267_v13 = vmul.f32 %v4139_v15, %v3265_v28  ;;  %v3510_v28 = vld [vmem:[#allocation12 + $0x1c8] sm:$0xff]  ;;  %v3509_v15 = vld [vmem:[#allocation12 + $0x1c0] sm:$0xff] }
 0x9ee   :  { %v3270_v20 = vadd.f32 %v3268_v24, %v3267_v13  ;;  %v3508_v13 = vld [vmem:[#allocation12 + $0x1b8] sm:$0xff]  ;;  %v3507_v24 = vld [vmem:[#allocation12 + $0x1b0] sm:$0xff] }
 0x9f0   :  { %4142 = vtanh.f32 %v3270_v20  ;;  %v3506_v20 = vld [vmem:[#allocation12 + $0x1a8] sm:$0xff] }
 0x9fd   :  { %v4143_v26 = vpop.eup %4142 }
 0x9fe   :  { %v3273_v4 = vmul.f32 %v4143_v26, %v3272_v6  ;;  %v3504_v6 = vld [vmem:[#allocation12 + $0x198] sm:$0xff]  ;;  %v3503_v26 = vld [vmem:[#allocation12 + $0x190] sm:$0xff] }
 0xa00   :  { %v7696_v35 = vadd.f32 %v3274_v27, %v3273_v4  ;;  %v3502_v27 = vld [vmem:[#allocation12 + $0x188] sm:$0xff]  ;;  %v3501_v4 = vld [vmem:[#allocation12 + $0x180] sm:$0xff] }
 0xa02   :  { %3276 = vst [vmem:[#allocation3 + $0x7] sm:$0x1] %v7696_v35  ;;  %v3281_v62 = vrot.slane %v7696_v35, %v5539_v23 }
 0xa04   :  { %3283 = vst [vmem:[#allocation3 + $0x8] sm:$0x1] %v3281_v62  ;;  %v3500_v62 = vld [vmem:[#allocation12 + $0x178] sm:$0xff] }
 0xa09   :  { %v7704_v43 = vld [vmem:[#allocation3] sm:$0xff] }
 0xa0b   :  { %v7701_v41 = vld [vmem:[#allocation3 + $0x8] sm:$0xff] }
 0xa0c   :  { %3389 = vmatprep.mubr.f32.mxu1 %v7701_v41 }
 0xa0d   :  { %3390 = vmatmul.mubr.f32.vlgmr.msra.gmra.mxu1 %v7704_v43 }
 0xa0e   :  { %3530 = vmatpush1.msra.mxu1 %v3483_v14 }
 0xa0f   :  { %3531 = vmatprep.subr.mxu1 %v3482_v22 }
 0xa10   :  { %3532 = vmatpush1.msra.mxu1 %v3481_v58 }
 0xa11   :  { %3533 = vmatprep.subr.mxu1 %v3480_v52 }
 0xa12   :  { %3534 = vmatpush1.msra.mxu1 %v3479_v18 }
 0xa13   :  { %3535 = vmatprep.subr.mxu1 %v3478_v9 }
 0xa14   :  { %3536 = vmatpush1.msra.mxu1 %v3477_v10 }
 0xa15   :  { %3537 = vmatprep.subr.mxu1 %v3476_v29 }
 0xa16   :  { %3538 = vmatpush1.msra.mxu1 %v3475_v11 }
 0xa17   :  { %3539 = vmatprep.subr.mxu1 %v3474_v3 }
 0xa18   :  { %3540 = vmatpush1.msra.mxu1 %v3473_v1  ;;  %v3499_v1 = vld [vmem:[#allocation12 + $0x170] sm:$0xff] }
 0xa19   :  { %3541 = vmatprep.subr.mxu1 %v3472_v42  ;;  %v3498_v42 = vld [vmem:[#allocation12 + $0x168] sm:$0xff] }
 0xa1a   :  { %3542 = vmatpush1.msra.mxu1 %v3471_v36 }
 0xa1b   :  { %3543 = vmatprep.subr.mxu1 %v3470_v63  ;;  %v3497_v63 = vld [vmem:[#allocation12 + $0x160] sm:$0xff] }
 0xa1c   :  { %3544 = vmatpush1.msra.mxu1 %v3469_v31 }
 0xa1d   :  { %3545 = vmatprep.subr.mxu1 %v3468_v0  ;;  %v3496_v0 = vld [vmem:[#allocation12 + $0x158] sm:$0xff] }
 0xa1e   :  { %3546 = vmatpush1.msra.mxu1 %v3467_v25  ;;  %v3495_v25 = vld [vmem:[#allocation12 + $0x150] sm:$0xff] }
 0xa1f   :  { %3547 = vmatprep.subr.mxu1 %v3466_v40  ;;  %v3494_v40 = vld [vmem:[#allocation12 + $0x148] sm:$0xff] }
 0xa20   :  { %3548 = vmatpush1.msra.mxu1 %v3465_v37  ;;  %v3493_v37 = vld [vmem:[#allocation12 + $0x140] sm:$0xff] }
 0xa21   :  { %3549 = vmatprep.subr.mxu1 %v3464_v7  ;;  %v3492_v7 = vld [vmem:[#allocation12 + $0x138] sm:$0xff] }
 0xa22   :  { %3550 = vmatpush1.msra.mxu1 %v3463_v34  ;;  %v3491_v34 = vld [vmem:[#allocation12 + $0x130] sm:$0xff] }
 0xa23   :  { %3551 = vmatprep.subr.mxu1 %v3462_v55  ;;  %v3490_v55 = vld [vmem:[#allocation12 + $0x128] sm:$0xff] }
 0xa24   :  { %3552 = vmatpush1.msra.mxu1 %v3461_v49  ;;  %v3489_v49 = vld [vmem:[#allocation12 + $0x120] sm:$0xff] }
 0xa25   :  { %3553 = vmatprep.subr.mxu1 %v3460_v30  ;;  %v3488_v30 = vld [vmem:[#allocation12 + $0x118] sm:$0xff] }
 0xa26   :  { %3554 = vmatpush1.msra.mxu1 %v3459_v21  ;;  %v3487_v21 = vld [vmem:[#allocation12 + $0x110] sm:$0xff] }
 0xa27   :  { %3555 = vmatprep.subr.mxu1 %v3458_v45  ;;  %v3486_v45 = vld [vmem:[#allocation12 + $0x108] sm:$0xff] }
 0xa28   :  { %3556 = vmatpush1.msra.mxu1 %v3457_v57  ;;  %v3485_v57 = vld [vmem:[#allocation12 + $0x100] sm:$0xff] }
 0xa29   :  { %3557 = vmatprep.subr.mxu1 %v3456_v5 }
 0xa2a   :  { %3558 = vmatpush1.msra.mxu1 %v3455_v33 }
 0xa2b   :  { %3559 = vmatprep.subr.mxu1 %v3454_v19 }
 0xa2c   :  { %3560 = vmatpush1.msra.mxu1 %v3453_v38 }
 0xa2d   :  { %3561 = vmatprep.subr.mxu1 %v3516_v53 }
 0xa2e   :  { %3562 = vmatpush2.msra.mxu1 %v3515_v32 }
 0xa2f   :  { %3563 = vmatprep.subr.mxu1 %v3514_v39 }
 0xa30   :  { %3564 = vmatpush2.msra.mxu1 %v3513_v48 }
 0xa31   :  { %3565 = vmatprep.subr.mxu1 %v3512_v2 }
 0xa32   :  { %3566 = vmatpush2.msra.mxu1 %v3511_v17 }
 0xa33   :  { %3567 = vmatprep.subr.mxu1 %v3510_v28 }
 0xa34   :  { %3568 = vmatpush2.msra.mxu1 %v3509_v15 }
 0xa35   :  { %3569 = vmatprep.subr.mxu1 %v3508_v13 }
 0xa36   :  { %3570 = vmatpush2.msra.mxu1 %v3507_v24 }
 0xa37   :  { %3571 = vmatprep.subr.mxu1 %v3506_v20 }
 0xa38   :  { %3572 = vmatpush2.msra.mxu1 %v3505_v8 }
 0xa39   :  { %3573 = vmatprep.subr.mxu1 %v3504_v6  ;;  %v3517_v6 = vld [vmem:[%s7778_s10] sm:$0x3] }
 0xa3a   :  { %3574 = vmatpush2.msra.mxu1 %v3503_v26  ;;  %v3522_v26 = vrot.slane %v3517_v6, %v5528_v16 }
 0xa3b   :  { %3575 = vmatprep.subr.mxu1 %v3502_v27  ;;  %v3526_v27 = vrot.slane %v3517_v6, %v5539_v23  ;;  %v3813_v6 = vld [vmem:[#allocation15 + $0xf8] sm:$0xff] }
 0xa3c   :  { %3576 = vmatpush2.msra.mxu1 %v3501_v4 }
 0xa3d   :  { %3577 = vmatprep.subr.mxu1 %v3500_v62 }
 0xa3e   :  { %3578 = vmatpush2.msra.mxu1 %v3499_v1  ;;  %v3683_v1 = vld [vmem:[#allocation14 + $0xf0] sm:$0xff] }
 0xa3f   :  { %3579 = vmatprep.subr.mxu1 %v3498_v42  ;;  %v3667_v42 = vld [vmem:[#allocation14 + $0x70] sm:$0xff] }
 0xa40   :  { %3580 = vmatpush2.msra.mxu1 %v3497_v63  ;;  %v3666_v63 = vld [vmem:[#allocation14 + $0x68] sm:$0xff] }
 0xa41   :  { %3581 = vmatprep.subr.mxu1 %v3496_v0  ;;  %v3665_v0 = vld [vmem:[#allocation14 + $0x60] sm:$0xff] }
 0xa42   :  { %3582 = vmatpush2.msra.mxu1 %v3495_v25  ;;  %v3680_v25 = vld [vmem:[#allocation14 + $0xd8] sm:$0xff] }
 0xa43   :  { %3583 = vmatprep.subr.mxu1 %v3494_v40  ;;  %v3664_v40 = vld [vmem:[#allocation14 + $0x58] sm:$0xff] }
 0xa44   :  { %3584 = vmatpush2.msra.mxu1 %v3493_v37  ;;  %v3679_v37 = vld [vmem:[#allocation14 + $0xd0] sm:$0xff] }
 0xa45   :  { %3585 = vmatprep.subr.mxu1 %v3492_v7  ;;  %v3663_v7 = vld [vmem:[#allocation14 + $0x50] sm:$0xff] }
 0xa46   :  { %3586 = vmatpush2.msra.mxu1 %v3491_v34  ;;  %v3678_v34 = vld [vmem:[#allocation14 + $0xc8] sm:$0xff] }
 0xa47   :  { %3587 = vmatprep.subr.mxu1 %v3490_v55  ;;  %v3662_v55 = vld [vmem:[#allocation14 + $0x48] sm:$0xff] }
 0xa48   :  { %3588 = vmatpush2.msra.mxu1 %v3489_v49  ;;  %v3677_v49 = vld [vmem:[#allocation14 + $0xc0] sm:$0xff] }
 0xa49   :  { %3589 = vmatprep.subr.mxu1 %v3488_v30  ;;  %v3661_v30 = vld [vmem:[#allocation14 + $0x40] sm:$0xff] }
 0xa4a   :  { %3590 = vmatpush2.msra.mxu1 %v3487_v21  ;;  %v3676_v21 = vld [vmem:[#allocation14 + $0xb8] sm:$0xff] }
 0xa4b   :  { %3591 = vmatprep.subr.mxu1 %v3486_v45  ;;  %v3660_v45 = vld [vmem:[#allocation14 + $0x38] sm:$0xff] }
 0xa4c   :  { %3592 = vmatpush2.msra.mxu1 %v3485_v57  ;;  %v3675_v57 = vld [vmem:[#allocation14 + $0xb0] sm:$0xff] }
 0xacd   :  { %v3972_v44 = vpop.f32.mrf.mxu1 }
 0xacf   :  { %v3973_v51 = vpop.f32.mrf.mxu1 }
 0xad0   :  { %v3974_v47 = vadd.f32 %v3973_v51, %v3972_v44  ;;  %v3937_v44 = vld [vmem:[#allocation4] ss:$0 sm:$0xff] }
 0xad2   :  { %v3392_v12 = vadd.f32 %v3974_v47, %v3935_v59 }
 0xad4   :  { %v3395_v46 = vmax.f32 %v3392_v12, 0.0 }
 0xad6   :  { %v3403_v60 = vmul.f32 %v3936_v50, %v3395_v46 }
 0xad8   :  { %3404 = vadd.xlane.f32.xlu0 %v3403_v60 }
 0xb61   :  { %v3405_v51 = vpop.xlane.xlu0 %3404 }
 0xb62   :  { %v3413_v59 = vadd.f32 %v3937_v44, %v3405_v51 }
 0xb64   :  { %v3415_v47 = vsel %vm3414_vm0, %v3413_v59, -inf }
 0xb65   :  { %v3416_v12 = vrot.slane %v3415_v47, 4 }
 0xb67   :  { %v3417_v50 = vmax.f32 %v3415_v47, %v3416_v12 }
 0xb69   :  { %v3418_v46 = vrot.slane %v3417_v50, 2 }
 0xb6b   :  { %v3419_v60 = vmax.f32 %v3417_v50, %v3418_v46  ;;  %v3612_v46 = vld [vmem:[%s7779_s11] sm:$0x3] }
 0xb6d   :  { %v3420_v54 = vrot.slane %v3419_v60, 1 }
 0xb6f   :  { %v3421_v61 = vmax.f32 %v3419_v60, %v3420_v54  ;;  %v3617_v60 = vrot.slane %v3612_v46, %v5528_v16  ;;  %v3621_v54 = vrot.slane %v3612_v46, %v5539_v23 }
 0xb71   :  { %v3422_v14 = vsub.f32 %v3413_v59, %v3421_v61 }
 0xb73   :  { %v3423_v22 = vmul.f32 1.442695, %v3422_v14 }
 0xb75   :  { %4144 = vpow2.f32 %v3423_v22 }
 0xb82   :  { %v4145_v58 = vpop.eup %4144 }
 0xb83   :  { %v3425_v52 = vsel %vm3414_vm0, %v4145_v58, 0.0 }
 0xb84   :  { %v3426_v18 = vrot.slane %v3425_v52, 4 }
 0xb86   :  { %v3427_v9 = vadd.f32 %v3426_v18, %v3425_v52  ;;  %v3938_v18 = vld [vmem:[#allocation5] ss:$0 sm:$0xff] }
 0xb88   :  { %v3428_v10 = vrot.slane %v3427_v9, 2 }
 0xb8a   :  { %v3429_v29 = vadd.f32 %v3428_v10, %v3427_v9 }
 0xb8c   :  { %v3430_v11 = vrot.slane %v3429_v29, 1 }
 0xb8e   :  { %v3431_v3 = vadd.f32 %v3430_v11, %v3429_v29  ;;  %v3684_v11 = vld [vmem:[#allocation14 + $0xf8] sm:$0xff] }
 0xb8f   :  { %3975 = vmatprep.subr.mxu0 %v3684_v11  ;;  %v3806_v11 = vld [vmem:[#allocation15 + $0xc0] sm:$0xff] }
 0xb90   :  { %4146 = vrcp.f32 %v3431_v3  ;;  %v3668_v3 = vld [vmem:[#allocation14 + $0x78] sm:$0xff] }
 0xb91   :  { %3976 = vmatpush3.msra.mxu0 %v3668_v3  ;;  %v3790_v3 = vld [vmem:[#allocation15 + $0x40] sm:$0xff] }
 0xb92   :  { %3977 = vmatprep.subr.mxu0 %v3683_v1  ;;  %v3805_v1 = vld [vmem:[#allocation15 + $0xb8] sm:$0xff] }
 0xb93   :  { %3978 = vmatpush3.msra.mxu0 %v3667_v42  ;;  %v3789_v42 = vld [vmem:[#allocation15 + $0x38] sm:$0xff] }
 0xb9d   :  { %v4147_v36 = vpop.eup %4146 }
 0xb9e   :  { %v3433_v31 = vmul.f32 %v4147_v36, %v4145_v58  ;;  %v3682_v36 = vld [vmem:[#allocation14 + $0xe8] sm:$0xff] }
 0xb9f   :  { %3979 = vmatprep.subr.mxu0 %v3682_v36  ;;  %v3804_v36 = vld [vmem:[#allocation15 + $0xb0] sm:$0xff] }
 0xba0   :  { %3436 = vperm.xlu0 %4063, %v3433_v31   ;;  %v3681_v31 = vld [vmem:[#allocation14 + $0xe0] sm:$0xff]  ;;  %3980 = vmatpush3.msra.mxu0 %v3666_v63  ;;  %v3788_v63 = vld [vmem:[#allocation15 + $0x30] sm:$0xff] }
 0xba1   :  { %3981 = vmatprep.subr.mxu0 %v3681_v31  ;;  %v3803_v31 = vld [vmem:[#allocation15 + $0xa8] sm:$0xff] }
 0xba2   :  { %3982 = vmatpush3.msra.mxu0 %v3665_v0  ;;  %v3787_v0 = vld [vmem:[#allocation15 + $0x28] sm:$0xff] }
 0xba3   :  { %3983 = vmatprep.subr.mxu0 %v3680_v25  ;;  %v3802_v25 = vld [vmem:[#allocation15 + $0xa0] sm:$0xff] }
 0xba4   :  { %3984 = vmatpush3.msra.mxu0 %v3664_v40  ;;  %v3786_v40 = vld [vmem:[#allocation15 + $0x20] sm:$0xff] }
 0xba5   :  { %3985 = vmatprep.subr.mxu0 %v3679_v37  ;;  %v3801_v37 = vld [vmem:[#allocation15 + $0x98] sm:$0xff] }
 0xba6   :  { %3986 = vmatpush3.msra.mxu0 %v3663_v7  ;;  %v3785_v7 = vld [vmem:[#allocation15 + $0x18] sm:$0xff] }
 0xba7   :  { %3987 = vmatprep.subr.mxu0 %v3678_v34  ;;  %v3800_v34 = vld [vmem:[#allocation15 + $0x90] sm:$0xff] }
 0xba8   :  { %3988 = vmatpush3.msra.mxu0 %v3662_v55  ;;  %v3784_v55 = vld [vmem:[#allocation15 + $0x10] sm:$0xff] }
 0xba9   :  { %3989 = vmatprep.subr.mxu0 %v3677_v49  ;;  %v3799_v49 = vld [vmem:[#allocation15 + $0x88] sm:$0xff] }
 0xbaa   :  { %3990 = vmatpush3.msra.mxu0 %v3661_v30  ;;  %v3783_v30 = vld [vmem:[#allocation15 + $0x8] sm:$0xff] }
 0xbab   :  { %3991 = vmatprep.subr.mxu0 %v3676_v21  ;;  %v3798_v21 = vld [vmem:[#allocation15 + $0x80] sm:$0xff] }
 0xbac   :  { %3992 = vmatpush3.msra.mxu0 %v3660_v45  ;;  %v3782_v45 = vld [vmem:[#allocation15] sm:$0xff] }
 0xbad   :  { %3993 = vmatprep.subr.mxu0 %v3675_v57 }
 0xc1b   :  { %v3437_v5 = vpop.permute.xlu0 %3436 }
 0xc1c   :  { %v3439_v33 = vmul.f32 %v3437_v5, %v7704_v43  ;;  %v3440_v19 = vmul.f32 %v3437_v5, %v7701_v41  ;;  %v3659_v5 = vld [vmem:[#allocation14 + $0x30] sm:$0xff] }
 0xc1d   :  { %3994 = vmatpush3.msra.mxu0 %v3659_v5 }
 0xc1e   :  { %v3441_v38 = vrot.slane %v3439_v33, 4  ;;  %v3447_v53 = vrot.slane %v3440_v19, 4 }
 0xc20   :  { %v3442_v32 = vadd.f32 %v3441_v38, %v3439_v33  ;;  %v3448_v39 = vadd.f32 %v3447_v53, %v3440_v19  ;;  %v3674_v33 = vld [vmem:[#allocation14 + $0xa8] sm:$0xff]  ;;  %v3673_v38 = vld [vmem:[#allocation14 + $0xa0] sm:$0xff] }
 0xc21   :  { %v3658_v19 = vld [vmem:[#allocation14 + $0x28] sm:$0xff]  ;;  %3995 = vmatprep.subr.mxu0 %v3674_v33  ;;  %v3657_v53 = vld [vmem:[#allocation14 + $0x20] sm:$0xff]  ;;  %v3939_v33 = vld [vmem:[%s7781_s14] ss:$0 sm:$0xff]  ;;  %s4665_s14 = scalar_lea.vmem %s3906_s30, 16 }
 0xc22   :  { %v3443_v48 = vrot.slane %v3442_v32, 2  ;;  %v3449_v2 = vrot.slane %v3448_v39, 2  ;;  %3996 = vmatpush3.msra.mxu0 %v3658_v19  ;;  %p4666_p2 = scmp.ne.s32.totalorder %s3906_s30, %s4665_s14  ;;  %p4671_p4 = scmp.lt.s32.totalorder %s4669_s13, %s4665_s14 }
 0xc23   :  { %3997 = vmatprep.subr.mxu0 %v3673_v38 }
 0xc24   :  { %v3444_v17 = vadd.f32 %v3443_v48, %v3442_v32  ;;  %v3450_v28 = vadd.f32 %v3449_v2, %v3448_v39  ;;  %v3672_v32 = vld [vmem:[#allocation14 + $0x98] sm:$0xff]  ;;  %3998 = vmatpush3.msra.mxu0 %v3657_v53  ;;  %v3671_v48 = vld [vmem:[#allocation14 + $0x90] sm:$0xff]  ;;  %p4672_p5 = por %p4671_p4, %p4670_p3 }
 0xc25   :  { %v3656_v39 = vld [vmem:[#allocation14 + $0x18] sm:$0xff]  ;;  %3999 = vmatprep.subr.mxu0 %v3672_v32  ;;  %v3655_v2 = vld [vmem:[#allocation14 + $0x10] sm:$0xff] }
 0xc26   :  { %v3445_v15 = vrot.slane %v3444_v17, 1  ;;  %v3451_v13 = vrot.slane %v3450_v28, 1  ;;  %4000 = vmatpush3.msra.mxu0 %v3656_v39  ;;  %v3814_v39 = vld [vmem:[%s7783_s16] sm:$0x1]  ;;  %p4673_p6 = pnand %p4672_p5, %p4666_p2 }
 0xc27   :  { %4001 = vmatprep.subr.mxu0 %v3671_v48 }
 0xc28   :  { %v7717_v24 = vadd.f32 %v3445_v15, %v3444_v17  ;;  %v7719_v20 = vadd.f32 %v3451_v13, %v3450_v28  ;;  %v3670_v17 = vld [vmem:[#allocation14 + $0x88] sm:$0xff]  ;;  %4002 = vmatpush3.msra.mxu0 %v3655_v2  ;;  %v3669_v15 = vld [vmem:[#allocation14 + $0x80] sm:$0xff] }
 0xc29   :  { %v3654_v28 = vld [vmem:[#allocation14 + $0x8] sm:$0xff]  ;;  %4003 = vmatprep.subr.mxu0 %v3670_v17  ;;  %v3653_v13 = vld [vmem:[#allocation14] sm:$0xff] }
 0xc2a   :  { %3593 = vmatprep.mubr.f32.mxu1 %v7719_v20  ;;  %v3765_v8 = vcombine.low %v7717_v24, %v7719_v20  ;;  %4004 = vmatpush3.msra.mxu0 %v3654_v28  ;;  %v3811_v20 = vld [vmem:[#allocation15 + $0xe8] sm:$0xff] }
 0xc2b   :  { %3594 = vmatmul.mubr.f32.vlgmr.msra.gmra.mxu1 %v7717_v24  ;;  %4005 = vmatprep.subr.mxu0 %v3669_v15 }
 0xc2c   :  { %4006 = vmatpush3.msra.mxu0 %v3653_v13 }
 0xc2d   :  { %4010 = vmatprep.subr.mxu0 %v3813_v6 }
 0xceb   :  { %v3595_v4 = vpop.f32.mrf.mxu1 }
 0xcec   :  { %v3596_v62 = vadd.f32 %v3595_v4, %v3522_v26 }
 0xced   :  { %v3597_v44 = vpop.f32.mrf.mxu1 }
 0xcee   :  { %v3603_v51 = vrot.slane %v3596_v62, %v5528_v16  ;;  %v3598_v59 = vadd.f32 %v3597_v44, %v3526_v27 }
 0xcf0   :  { %v3608_v47 = vadd.f32 %v3603_v51, %v7704_v43  ;;  %v3607_v12 = vrot.slane %v3598_v59, %v5528_v16 }
 0xcf2   :  { %4148 = vtanh.f32 %v3608_v47  ;;  %v3609_v50 = vadd.f32 %v3607_v12, %v7701_v41  ;;  %v3772_v12 = vrot.slane %v3765_v8, %v5569_v56  ;;  %v3795_v8 = vld [vmem:[#allocation15 + $0x68] sm:$0xff] }
 0xcf4   :  { %4150 = vtanh.f32 %v3609_v50  ;;  %v3779_v50 = vrot.slane %v3772_v12, %v5569_v56  ;;  %v3796_v56 = vld [vmem:[#allocation15 + $0x70] sm:$0xff] }
 0xcff   :  { %v4149_v61 = vpop.eup %4148 }
 0xd00   :  { %v3624_v22 = vmul.f32 %v4149_v61, %v3617_v60  ;;  %v7748_v61 = vadd.f32 %v3779_v50, %v7696_v35  ;;  %v3810_v35 = vld [vmem:[#allocation15 + $0xe0] sm:$0xff] }
 0xd01   :  { %v4151_v14 = vpop.eup %4150 }
 0xd02   :  { %v3625_v58 = vmul.f32 %v4151_v14, %v3621_v54  ;;  %v3823_v24 = vrot.slane %v7748_v61, %v5539_v23  ;;  %v3807_v23 = vld [vmem:[#allocation15 + $0xc8] sm:$0xff]  ;;  %v3819_v57 = vrot.slane %v7748_v61, %v5528_v16 }
 0xd04   :  { %v3626_v52 = vadd.f32 %v3625_v58, %v3624_v22  ;;  %v3797_v58 = vld [vmem:[#allocation15 + $0x78] sm:$0xff] }
 0xd06   :  { %3627 = vadd.xlane.f32.xlu1 %v3626_v52  ;;  %v3812_v52 = vld [vmem:[#allocation15 + $0xf0] sm:$0xff] }
 0xd8f   :  { %v3628_v9 = vpop.xlane.xlu1 %3627 }
 0xd90   :  { %v3636_v10 = vadd.f32 %v3938_v18, %v3628_v9  ;;  %v3794_v18 = vld [vmem:[#allocation15 + $0x60] sm:$0xff]  ;;  %v3808_v9 = vld [vmem:[#allocation15 + $0xd0] sm:$0xff] }
 0xd92   :  { %v3637_v29 = vsel %vm3414_vm0, %v3636_v10, 0.0  ;;  %v3792_v10 = vld [vmem:[#allocation15 + $0x50] sm:$0xff] }
 0xd93   :  { %3638 = vadd.xlane.f32.xlu1 %v3637_v29  ;;  %v3791_v29 = vld [vmem:[#allocation15 + $0x48] sm:$0xff] }
 0xe1c   :  { %v3639_v26 = vpop.xlane.xlu1 %3638 }
 0xe1d   :  { %v3640_v27 = vrot.slane %v3639_v26, 4 }
 0xe1f   :  { %v3641_v4 = vadd.f32 %v3640_v27, %v3639_v26 }
 0xe21   :  { %v3642_v62 = vrot.slane %v3641_v4, 2 }
 0xe23   :  { %v3643_v44 = vadd.f32 %v3642_v62, %v3641_v4 }
 0xe25   :  { %v3644_v51 = vrot.slane %v3643_v44, 1 }
 0xe27   :  { %v3645_v59 = vadd.f32 %v3644_v51, %v3643_v44 }
 0xe29   :  { %4045 = vpush %v3645_v59 }
 0xe5a   :  { %s4046_s11 = spop %4045 }
 0xe5b   :  { %v3647_v47 = vstv %s4046_s11 }
 0xe5c   :  { %4152 = vtanh.f32 %v3647_v47 }
 0xe69   :  { %v4153_v46 = vpop.eup %4152 }
 0xe6a   :  { %v3650_v60 = vmul.f32 %v4153_v46, %v7701_v41  ;;  %v3649_v54 = vmul.f32 %v4153_v46, %v7704_v43 }
 0xe6c   :  { %v3652_v14 = vadd.f32 %v3650_v60, %v7701_v41  ;;  %v3651_v22 = vadd.f32 %v3649_v54, %v7704_v43  ;;  %v3809_v41 = vld [vmem:[#allocation15 + $0xd8] sm:$0xff] }
 0xe6d   :  { %v3793_v43 = vld [vmem:[#allocation15 + $0x58] sm:$0xff] }
 0xe6e   :  { %3756 = vmatprep.mubr.f32.mxu0 %v3652_v14 }
 0xe6f   :  { %3757 = vmatmul.mubr.f32.vlgmr.msra.gmra.mxu0 %v3651_v22 }
 0xe70   :  { %4011 = vmatpush3.msra.mxu0 %v3797_v58  ;;  %3890 = vmatprep.mubr.f32.mxu0 %v3823_v24 }
 0xe71   :  { %4012 = vmatprep.subr.mxu0 %v3812_v52 }
 0xe72   :  { %4013 = vmatpush3.msra.mxu0 %v3796_v56 }
 0xe73   :  { %4014 = vmatprep.subr.mxu0 %v3811_v20 }
 0xe74   :  { %4015 = vmatpush3.msra.mxu0 %v3795_v8 }
 0xe75   :  { %4016 = vmatprep.subr.mxu0 %v3810_v35 }
 0xe76   :  { %4017 = vmatpush3.msra.mxu0 %v3794_v18 }
 0xe77   :  { %4018 = vmatprep.subr.mxu0 %v3809_v41 }
 0xe78   :  { %4019 = vmatpush3.msra.mxu0 %v3793_v43 }
 0xe79   :  { %4020 = vmatprep.subr.mxu0 %v3808_v9 }
 0xe7a   :  { %4021 = vmatpush3.msra.mxu0 %v3792_v10 }
 0xe7b   :  { %4022 = vmatprep.subr.mxu0 %v3807_v23 }
 0xe7c   :  { %4023 = vmatpush3.msra.mxu0 %v3791_v29 }
 0xe7d   :  { %4024 = vmatprep.subr.mxu0 %v3806_v11 }
 0xe7e   :  { %4025 = vmatpush3.msra.mxu0 %v3790_v3 }
 0xe7f   :  { %4026 = vmatprep.subr.mxu0 %v3805_v1 }
 0xe80   :  { %4027 = vmatpush3.msra.mxu0 %v3789_v42 }
 0xe81   :  { %4028 = vmatprep.subr.mxu0 %v3804_v36 }
 0xe82   :  { %4029 = vmatpush3.msra.mxu0 %v3788_v63 }
 0xe83   :  { %4030 = vmatprep.subr.mxu0 %v3803_v31 }
 0xe84   :  { %4031 = vmatpush3.msra.mxu0 %v3787_v0 }
 0xe85   :  { %4032 = vmatprep.subr.mxu0 %v3802_v25 }
 0xe86   :  { %4033 = vmatpush3.msra.mxu0 %v3786_v40 }
 0xe87   :  { %4034 = vmatprep.subr.mxu0 %v3801_v37 }
 0xe88   :  { %4035 = vmatpush3.msra.mxu0 %v3785_v7 }
 0xe89   :  { %4036 = vmatprep.subr.mxu0 %v3800_v34 }
 0xe8a   :  { %4037 = vmatpush3.msra.mxu0 %v3784_v55 }
 0xe8b   :  { %4038 = vmatprep.subr.mxu0 %v3799_v49 }
 0xe8c   :  { %4039 = vmatpush3.msra.mxu0 %v3783_v30 }
 0xe8d   :  { %4040 = vmatprep.subr.mxu0 %v3798_v21 }
 0xe8e   :  { %4041 = vmatpush3.msra.mxu0 %v3782_v45 }
 0xe8f   :  { %3891 = vmatmul.mubr.f32.vlgmr.msra.gmra.mxu0 %v3819_v57 }
 0xf2f   :  { %v4007_v5 = vpop.f32.mrf.mxu0 }
 0xf31   :  { %v4008_v19 = vpop.f32.mrf.mxu0 }
 0xf32   :  { %v4009_v38 = vadd.f32 %v4008_v19, %v4007_v5 }
 0xf34   :  { %v3759_v53 = vadd.f32 %v4009_v38, %v3939_v33 }
 0xf36   :  { %3762 = vst [vmem:[%s7784_s17] sm:$0xff] %v3759_v53 }
 0xf4f   :  { %v4042_v32 = vpop.f32.mrf.mxu0 }
 0xf51   :  { %v4043_v16 = vpop.f32.mrf.mxu0 }
 0xf52   :  { %v4044_v48 = vadd.f32 %v4043_v16, %v4042_v32 }
 0xf54   :  { %v3893_v2 = vadd.f32 %v4044_v48, %v3814_v39 }
 0xf56   :  { %3896 = vst [vmem:[#allocation17] sm:$0x1] %v3893_v2 }
 0xf57   :  { %4676 = shalt.err (!%p4673_p6)
}
 0xf58   :  { %3908 = dma.vmem_to_hbm [thread:$0]  %s3906_s30, 16, %s7785_s18, [#allocation8]  }
 0xf59   :  { %4693 = dma.done.wait [#allocation8], 16  }
 0xf5a   :  { %4694 = vsyncadd [#allocation8], 4294967280 }
 0xf5b   :  { %3914 = vsyncpa [#allocation7], 1 }
 0xf5c   :  { %3915 = vsyncpa [#allocation10], 1 }
 0xf5d   :  { %3916 = vsyncpa [#allocation13], 1 }
 0xf5e   :  { %3917 = vsyncpa [#allocation16], 1 }
 0xf5f   :  { %3918 = vsyncpa [#allocation8], 1 }

</bundles_post_ra>
